<compile_context>
chip_gen: v5e
topology: v5e:2x2
jax: 0.10.0
libtpu: 0.0.40
codegen_flags: <defaults>
</compile_context>

<pallas_src>
import functools

import jax
import jax.numpy as jnp
from jax.experimental import pallas as pl
from jax.experimental.pallas import tpu as pltpu


# ---------------------------------------------------------------------------
# VMEM budget: stay inside the smallest physical VMEM (v7x: 64 MiB / TC).
# ---------------------------------------------------------------------------
def _vmem_limit_bytes():
    cap = 64 * 1024 * 1024
    try:
        cap = int(pltpu.get_tpu_info().vmem_capacity_bytes)
    except Exception:
        pass
    return min(48 * 1024 * 1024, (3 * cap) // 4)


# ---------------------------------------------------------------------------
# Conv2d(3x3, valid) + bias + ReLU + MaxPool2d(2) for one batch element.
# ---------------------------------------------------------------------------
def _conv_relu_pool_kernel(x_ref, w_ref, b_ref, o_ref, row_scr,
                           *, Ho, Wo, Hp, Wp, Cin, Cout):
    x = x_ref[0]                                   # (H, W, Cin)   float32
    w = w_ref[...]                                 # (3, 3, Cin, Cout) float32
    acc = jnp.zeros((Ho, Wo, Cout), jnp.float32)
    for kh in range(3):
        for kw in range(3):
            patch = x[kh:kh + Ho, kw:kw + Wo, :]                     # (Ho, Wo, Cin)
            wk = jnp.broadcast_to(w[kh, kw][None], (Ho, Cin, Cout))  # (Ho, Cin, Cout)
            # Batched-over-rows matmul on the MXU, f32 accumulation.
            acc = acc + jnp.einsum('hwc,hcd->hwd', patch, wk,
                                   preferred_element_type=jnp.float32)
    y = jnp.maximum(acc + b_ref[...], 0.0)         # bias + ReLU on the VPU

    # 2x2 / stride-2 max pool.
    # H: reshape splits only a leading (untiled) dim -> layout free.
    y = jnp.max(y[:2 * Hp].reshape(Hp, 2, Wo, Cout), axis=1)         # (Hp, Wo, Cout)
    row_scr[...] = y
    # W: even / odd columns via sublane-strided reads from the VMEM scratch.
    even = row_scr[:, pl.ds(0, Wp, stride=2), :]
    odd = row_scr[:, pl.ds(1, Wp, stride=2), :]
    o_ref[0] = jnp.maximum(even, odd)


def conv_relu_pool(x, w, b):
    """x: (B, H, W, Cin) f32; w: (3, 3, Cin, Cout) f32; b: (1, Cout) f32."""
    B, H, W, Cin = x.shape
    Cout = w.shape[-1]
    Ho, Wo = H - 2, W - 2
    Hp, Wp = Ho // 2, Wo // 2
    kernel = functools.partial(_conv_relu_pool_kernel,
                               Ho=Ho, Wo=Wo, Hp=Hp, Wp=Wp, Cin=Cin, Cout=Cout)
    return pl.pallas_call(
        kernel,
        out_shape=jax.ShapeDtypeStruct((B, Hp, Wp, Cout), jnp.float32),
        grid=(B,),
        in_specs=[
            pl.BlockSpec((1, H, W, Cin), lambda i: (i, 0, 0, 0)),
            pl.BlockSpec((3, 3, Cin, Cout), lambda i: (0, 0, 0, 0)),
            pl.BlockSpec((1, Cout), lambda i: (0, 0)),
        ],
        out_specs=pl.BlockSpec((1, Hp, Wp, Cout), lambda i: (i, 0, 0, 0)),
        scratch_shapes=[pltpu.VMEM((Hp, Wo, Cout), jnp.float32)],
        compiler_params=pltpu.CompilerParams(
            dimension_semantics=("parallel",),           # batch -> megacore on v7x
            vmem_limit_bytes=_vmem_limit_bytes(),
        ),
    )(x, w, b)


# ---------------------------------------------------------------------------
# FC head: Linear+BN(folded)+ReLU -> Linear+BN(folded)+ReLU -> Linear (padded).
# The fc1 contraction axis is streamed via the grid with a f32 accumulator.
# ---------------------------------------------------------------------------
def _fc_head_kernel(x_ref, w1_ref, b1_ref, w2_ref, b2_ref, w3_ref, b3_ref,
                    o_ref, acc_ref):
    k = pl.program_id(0)

    @pl.when(k == 0)
    def _():
        acc_ref[...] = jnp.zeros_like(acc_ref)

    # bf16 operands on the MXU, float32 accumulation.
    acc_ref[...] += jnp.dot(x_ref[...].astype(jnp.bfloat16), w1_ref[...],
                            preferred_element_type=jnp.float32)

    @pl.when(k == pl.num_programs(0) - 1)
    def _():
        # fc1 bias (BN folded) + ReLU.  Dropout = identity in eval mode.
        h1 = jnp.maximum(acc_ref[...] + b1_ref[...], 0.0)
        # fc2 (BN folded) + ReLU.
        h2 = jnp.dot(h1.astype(jnp.bfloat16), w2_ref[...],
                     preferred_element_type=jnp.float32) + b2_ref[...]
        h2 = jnp.maximum(h2, 0.0)
        # fc3 -> lane-dense padded output (sliced back to n_classes in wrapper).
        out = jnp.dot(h2.astype(jnp.bfloat16), w3_ref[...],
                      preferred_element_type=jnp.float32) + b3_ref[...]
        o_ref[...] = out.astype(o_ref.dtype)


def _pick_k_tile(k_dim, max_tile=4096):
    if k_dim <= max_tile:
        return k_dim
    for t in range(max_tile, 127, -128):
        if k_dim % t == 0:
            return t
    return k_dim


def fc_head(x, w1, b1, w2, b2, w3, b3):
    """x: (B, K1) f32.  w*: bf16 (in, out); b*: (1, out) f32.  Returns (B, Npad) f32."""
    B, K1 = x.shape
    H1, H2, N3 = w1.shape[1], w2.shape[1], w3.shape[1]
    tk = _pick_k_tile(K1)
    nk = K1 // tk
    return pl.pallas_call(
        _fc_head_kernel,
        out_shape=jax.ShapeDtypeStruct((B, N3), jnp.float32),
        grid=(nk,),
        in_specs=[
            pl.BlockSpec((B, tk), lambda k: (0, k)),
            pl.BlockSpec((tk, H1), lambda k: (k, 0)),
            pl.BlockSpec((1, H1), lambda k: (0, 0)),
            pl.BlockSpec((H1, H2), lambda k: (0, 0)),    # resident across k
            pl.BlockSpec((1, H2), lambda k: (0, 0)),
            pl.BlockSpec((H2, N3), lambda k: (0, 0)),
            pl.BlockSpec((1, N3), lambda k: (0, 0)),
        ],
        out_specs=pl.BlockSpec((B, N3), lambda k: (0, 0)),
        scratch_shapes=[pltpu.VMEM((B, H1), jnp.float32)],
        compiler_params=pltpu.CompilerParams(
            dimension_semantics=("arbitrary",),          # reduction axis
            vmem_limit_bytes=_vmem_limit_bytes(),
        ),
    )(x, w1, b1, w2, b2, w3, b3)


# ---------------------------------------------------------------------------
# Full forward, parameters, and a pure-JAX reference.
# ---------------------------------------------------------------------------
def scnn_forward(x_nchw, params, n_classes):
    (cw1, cb1, cw2, cb2, cw3, cb3, w1, b1, w2, b2, w3, b3) = params
    x = jnp.transpose(x_nchw, (0, 2, 3, 1)).astype(jnp.float32)    # NCHW -> NHWC
    h = conv_relu_pool(x, cw1, cb1)
    h = conv_relu_pool(h, cw2, cb2)
    h = conv_relu_pool(h, cw3, cb3)
    h = h.reshape(h.shape[0], -1)               # flatten (HWC order; weights match)
    out = fc_head(h, w1, b1, w2, b2, w3, b3)
    return out[:, :n_classes]


def make_params(key, in_channels, n_classes, flat_dim, eps=1e-5):
    ks = jax.random.split(key, 6)

    def conv_w(k, cin, cout):
        std = (2.0 / (9 * cin)) ** 0.5
        return std * jax.random.normal(k, (3, 3, cin, cout), jnp.float32)

    def lin_w(k, fin, fout):
        std = (2.0 / (fin + fout)) ** 0.5
        return std * jax.random.normal(k, (fin, fout), jnp.float32)

    cw1, cb1 = conv_w(ks[0], in_channels, 16), jnp.zeros((1, 16), jnp.float32)
    cw2, cb2 = conv_w(ks[1], 16, 32), jnp.zeros((1, 32), jnp.float32)
    cw3, cb3 = conv_w(ks[2], 32, 64), jnp.zeros((1, 64), jnp.float32)

    w1, b1 = lin_w(ks[3], flat_dim, 4096), jnp.zeros((4096,), jnp.float32)
    w2, b2 = lin_w(ks[4], 4096, 512), jnp.zeros((512,), jnp.float32)
    w3, b3 = lin_w(ks[5], 512, n_classes), jnp.zeros((n_classes,), jnp.float32)

    # Fold inference-mode BatchNorm1d into the preceding Linear.
    def fold_bn(w, b, gamma, beta, mean, var):
        scale = gamma / jnp.sqrt(var + eps)
        return w * scale[None, :], (b - mean) * scale + beta

    g1, be1, m1, v1 = (jnp.ones((4096,)), jnp.zeros((4096,)),
                       jnp.zeros((4096,)), jnp.ones((4096,)))
    g2, be2, m2, v2 = (jnp.ones((512,)), jnp.zeros((512,)),
                       jnp.zeros((512,)), jnp.ones((512,)))
    w1f, b1f = fold_bn(w1, b1, g1, be1, m1, v1)
    w2f, b2f = fold_bn(w2, b2, g2, be2, m2, v2)

    # Pad the final projection to a lane-dense 128-wide output.
    n_pad = ((n_classes + 127) // 128) * 128
    w3p = jnp.zeros((512, n_pad), jnp.float32).at[:, :n_classes].set(w3)
    b3p = jnp.zeros((n_pad,), jnp.float32).at[:n_classes].set(b3)

    return (cw1, cb1, cw2, cb2, cw3, cb3,
            w1f.astype(jnp.bfloat16), b1f.reshape(1, -1),
            w2f.astype(jnp.bfloat16), b2f.reshape(1, -1),
            w3p.astype(jnp.bfloat16), b3p.reshape(1, -1))


def reference_forward(x_nchw, params, n_classes):
    (cw1, cb1, cw2, cb2, cw3, cb3, w1, b1, w2, b2, w3, b3) = params
    x = jnp.transpose(x_nchw, (0, 2, 3, 1)).astype(jnp.float32)

    def conv_block(x, w, b):
        Bn, H, W, Cin = x.shape
        Cout = w.shape[-1]
        Ho, Wo = H - 2, W - 2
        acc = jnp.zeros((Bn, Ho, Wo, Cout), jnp.float32)
        for kh in range(3):
            for kw in range(3):
                acc = acc + jnp.einsum('bhwc,cd->bhwd',
                                       x[:, kh:kh + Ho, kw:kw + Wo, :], w[kh, kw],
                                       preferred_element_type=jnp.float32)
        y = jnp.maximum(acc + b.reshape(1, 1, 1, Cout), 0.0)
        Hp, Wp = Ho // 2, Wo // 2
        return y[:, :2 * Hp, :2 * Wp, :].reshape(Bn, Hp, 2, Wp, 2, Cout).max(axis=(2, 4))

    h = conv_block(x, cw1, cb1)
    h = conv_block(h, cw2, cb2)
    h = conv_block(h, cw3, cb3)
    h = h.reshape(h.shape[0], -1)
    h1 = jnp.maximum(jnp.dot(h.astype(jnp.bfloat16), w1,
                             preferred_element_type=jnp.float32) + b1, 0.0)
    h2 = jnp.maximum(jnp.dot(h1.astype(jnp.bfloat16), w2,
                             preferred_element_type=jnp.float32) + b2, 0.0)
    out = jnp.dot(h2.astype(jnp.bfloat16), w3,
                  preferred_element_type=jnp.float32) + b3
    return out[:, :n_classes]


if __name__ == "__main__":
    B, Cin, S = 2, 3, 30          # small input; conv stack: 30 -> 14 -> 6 -> 2
    n_classes = 10

    key = jax.random.PRNGKey(0)
    kx, kp = jax.random.split(key)
    x = jax.random.normal(kx, (B, Cin, S, S), dtype=jnp.float32)   # NCHW like PyTorch

    def after(s):
        return (s - 2) // 2
    s3 = after(after(after(S)))
    flat_dim = 64 * s3 * s3        # 256 for S=30 (43264 for the 224x224 original)

    params = make_params(kp, Cin, n_classes, flat_dim)

    out = scnn_forward(x, params, n_classes)
    out = jax.block_until_ready(out)

    ref = reference_forward(x, params, n_classes)
    assert out.shape == (B, n_classes)
    max_err = float(jnp.max(jnp.abs(out - ref)))
    assert jnp.allclose(out, ref, atol=2e-2, rtol=2e-2), f"mismatch vs reference: {max_err}"

    print("KERNEL_OK")
</pallas_src>

<mosaic_0001>
module attributes {stable_mosaic.version = 11 : i64} {
  func.func @_conv_relu_pool_kernel(%arg0: i32, %arg1: memref<1x30x30x3xf32, #tpu.memory_space<vmem>>, %arg2: memref<3x3x3x16xf32, #tpu.memory_space<vmem>>, %arg3: memref<1x16xf32, #tpu.memory_space<vmem>>, %arg4: memref<1x14x14x16xf32, #tpu.memory_space<vmem>>, %arg5: memref<14x28x16xf32, #tpu.memory_space<vmem>>) attributes {dimension_semantics = [#tpu.dimension_semantics<parallel>], iteration_bounds = array<i64: 2>, scalar_prefetch = 0 : i64, scratch_operands = 1 : i64, tpu.core_type = #tpu.core_type<tc>, window_params = [{transform_indices = @transform_0, window_bounds = array<i64: 1, 30, 30, 3>}, {pipeline_mode = #tpu.pipeline_mode<synchronous>, transform_indices = @transform_1, window_bounds = array<i64: 3, 3, 3, 16>}, {pipeline_mode = #tpu.pipeline_mode<synchronous>, transform_indices = @transform_2, window_bounds = array<i64: 1, 16>}, {transform_indices = @transform_3, window_bounds = array<i64: 1, 14, 14, 16>}]} {
    %c0 = arith.constant 0 : index
    %c0_0 = arith.constant 0 : index
    %c0_1 = arith.constant 0 : index
    %c0_2 = arith.constant 0 : index
    %0 = vector.load %arg1[%c0, %c0_0, %c0_1, %c0_2] : memref<1x30x30x3xf32, #tpu.memory_space<vmem>>, vector<1x30x30x3xf32>
    %1 = vector.shape_cast %0 : vector<1x30x30x3xf32> to vector<30x30x3xf32>
    %c0_3 = arith.constant 0 : index
    %c0_4 = arith.constant 0 : index
    %c0_5 = arith.constant 0 : index
    %c0_6 = arith.constant 0 : index
    %2 = vector.load %arg2[%c0_3, %c0_4, %c0_5, %c0_6] : memref<3x3x3x16xf32, #tpu.memory_space<vmem>>, vector<3x3x3x16xf32>
    %cst = arith.constant 0.000000e+00 : f32
    %3 = vector.broadcast %cst : f32 to vector<28x28x16xf32>
    %4 = vector.extract_strided_slice %1 {offsets = [0, 0, 0], sizes = [28, 28, 3], strides = [1, 1, 1]} : vector<30x30x3xf32> to vector<28x28x3xf32>
    %5 = vector.extract_strided_slice %2 {offsets = [0, 0, 0, 0], sizes = [1, 1, 3, 16], strides = [1, 1, 1, 1]} : vector<3x3x3x16xf32> to vector<1x1x3x16xf32>
    %6 = vector.shape_cast %5 : vector<1x1x3x16xf32> to vector<3x16xf32>
    %7 = vector.shape_cast %6 : vector<3x16xf32> to vector<1x3x16xf32>
    %8 = vector.shape_cast %7 : vector<1x3x16xf32> to vector<1x3x16xf32>
    %9 = vector.broadcast %8 : vector<1x3x16xf32> to vector<28x3x16xf32>
    "tpu.trace_start"() <{level = 10 : i32, message = "hwc,hcd->hwd"}> : () -> ()
    %cst_7 = arith.constant dense<0.000000e+00> : vector<28x28x16xf32>
    %10 = tpu.matmul %4, %9, %cst_7 {dimension_numbers = #tpu.dot_dimension_numbers<[2], [1], [1], [2], [0, 0, 0, 1, 1, 2], [0], [0]>} : vector<28x28x3xf32>, vector<28x3x16xf32>, vector<28x28x16xf32> -> vector<28x28x16xf32>
    "tpu.trace_stop"() : () -> ()
    %11 = arith.addf %3, %10 : vector<28x28x16xf32>
    %12 = vector.extract_strided_slice %1 {offsets = [0, 1, 0], sizes = [28, 28, 3], strides = [1, 1, 1]} : vector<30x30x3xf32> to vector<28x28x3xf32>
    %13 = vector.extract_strided_slice %2 {offsets = [0, 1, 0, 0], sizes = [1, 1, 3, 16], strides = [1, 1, 1, 1]} : vector<3x3x3x16xf32> to vector<1x1x3x16xf32>
    %14 = vector.shape_cast %13 : vector<1x1x3x16xf32> to vector<3x16xf32>
    %15 = vector.shape_cast %14 : vector<3x16xf32> to vector<1x3x16xf32>
    %16 = vector.shape_cast %15 : vector<1x3x16xf32> to vector<1x3x16xf32>
    %17 = vector.broadcast %16 : vector<1x3x16xf32> to vector<28x3x16xf32>
    "tpu.trace_start"() <{level = 10 : i32, message = "hwc,hcd->hwd"}> : () -> ()
    %cst_8 = arith.constant dense<0.000000e+00> : vector<28x28x16xf32>
    %18 = tpu.matmul %12, %17, %cst_8 {dimension_numbers = #tpu.dot_dimension_numbers<[2], [1], [1], [2], [0, 0, 0, 1, 1, 2], [0], [0]>} : vector<28x28x3xf32>, vector<28x3x16xf32>, vector<28x28x16xf32> -> vector<28x28x16xf32>
    "tpu.trace_stop"() : () -> ()
    %19 = arith.addf %11, %18 : vector<28x28x16xf32>
    %20 = vector.extract_strided_slice %1 {offsets = [0, 2, 0], sizes = [28, 28, 3], strides = [1, 1, 1]} : vector<30x30x3xf32> to vector<28x28x3xf32>
    %21 = vector.extract_strided_slice %2 {offsets = [0, 2, 0, 0], sizes = [1, 1, 3, 16], strides = [1, 1, 1, 1]} : vector<3x3x3x16xf32> to vector<1x1x3x16xf32>
    %22 = vector.shape_cast %21 : vector<1x1x3x16xf32> to vector<3x16xf32>
    %23 = vector.shape_cast %22 : vector<3x16xf32> to vector<1x3x16xf32>
    %24 = vector.shape_cast %23 : vector<1x3x16xf32> to vector<1x3x16xf32>
    %25 = vector.broadcast %24 : vector<1x3x16xf32> to vector<28x3x16xf32>
    "tpu.trace_start"() <{level = 10 : i32, message = "hwc,hcd->hwd"}> : () -> ()
    %cst_9 = arith.constant dense<0.000000e+00> : vector<28x28x16xf32>
    %26 = tpu.matmul %20, %25, %cst_9 {dimension_numbers = #tpu.dot_dimension_numbers<[2], [1], [1], [2], [0, 0, 0, 1, 1, 2], [0], [0]>} : vector<28x28x3xf32>, vector<28x3x16xf32>, vector<28x28x16xf32> -> vector<28x28x16xf32>
    "tpu.trace_stop"() : () -> ()
    %27 = arith.addf %19, %26 : vector<28x28x16xf32>
    %28 = vector.extract_strided_slice %1 {offsets = [1, 0, 0], sizes = [28, 28, 3], strides = [1, 1, 1]} : vector<30x30x3xf32> to vector<28x28x3xf32>
    %29 = vector.extract_strided_slice %2 {offsets = [1, 0, 0, 0], sizes = [1, 1, 3, 16], strides = [1, 1, 1, 1]} : vector<3x3x3x16xf32> to vector<1x1x3x16xf32>
    %30 = vector.shape_cast %29 : vector<1x1x3x16xf32> to vector<3x16xf32>
    %31 = vector.shape_cast %30 : vector<3x16xf32> to vector<1x3x16xf32>
    %32 = vector.shape_cast %31 : vector<1x3x16xf32> to vector<1x3x16xf32>
    %33 = vector.broadcast %32 : vector<1x3x16xf32> to vector<28x3x16xf32>
    "tpu.trace_start"() <{level = 10 : i32, message = "hwc,hcd->hwd"}> : () -> ()
    %cst_10 = arith.constant dense<0.000000e+00> : vector<28x28x16xf32>
    %34 = tpu.matmul %28, %33, %cst_10 {dimension_numbers = #tpu.dot_dimension_numbers<[2], [1], [1], [2], [0, 0, 0, 1, 1, 2], [0], [0]>} : vector<28x28x3xf32>, vector<28x3x16xf32>, vector<28x28x16xf32> -> vector<28x28x16xf32>
    "tpu.trace_stop"() : () -> ()
    %35 = arith.addf %27, %34 : vector<28x28x16xf32>
    %36 = vector.extract_strided_slice %1 {offsets = [1, 1, 0], sizes = [28, 28, 3], strides = [1, 1, 1]} : vector<30x30x3xf32> to vector<28x28x3xf32>
    %37 = vector.extract_strided_slice %2 {offsets = [1, 1, 0, 0], sizes = [1, 1, 3, 16], strides = [1, 1, 1, 1]} : vector<3x3x3x16xf32> to vector<1x1x3x16xf32>
    %38 = vector.shape_cast %37 : vector<1x1x3x16xf32> to vector<3x16xf32>
    %39 = vector.shape_cast %38 : vector<3x16xf32> to vector<1x3x16xf32>
    %40 = vector.shape_cast %39 : vector<1x3x16xf32> to vector<1x3x16xf32>
    %41 = vector.broadcast %40 : vector<1x3x16xf32> to vector<28x3x16xf32>
    "tpu.trace_start"() <{level = 10 : i32, message = "hwc,hcd->hwd"}> : () -> ()
    %cst_11 = arith.constant dense<0.000000e+00> : vector<28x28x16xf32>
    %42 = tpu.matmul %36, %41, %cst_11 {dimension_numbers = #tpu.dot_dimension_numbers<[2], [1], [1], [2], [0, 0, 0, 1, 1, 2], [0], [0]>} : vector<28x28x3xf32>, vector<28x3x16xf32>, vector<28x28x16xf32> -> vector<28x28x16xf32>
    "tpu.trace_stop"() : () -> ()
    %43 = arith.addf %35, %42 : vector<28x28x16xf32>
    %44 = vector.extract_strided_slice %1 {offsets = [1, 2, 0], sizes = [28, 28, 3], strides = [1, 1, 1]} : vector<30x30x3xf32> to vector<28x28x3xf32>
    %45 = vector.extract_strided_slice %2 {offsets = [1, 2, 0, 0], sizes = [1, 1, 3, 16], strides = [1, 1, 1, 1]} : vector<3x3x3x16xf32> to vector<1x1x3x16xf32>
    %46 = vector.shape_cast %45 : vector<1x1x3x16xf32> to vector<3x16xf32>
    %47 = vector.shape_cast %46 : vector<3x16xf32> to vector<1x3x16xf32>
    %48 = vector.shape_cast %47 : vector<1x3x16xf32> to vector<1x3x16xf32>
    %49 = vector.broadcast %48 : vector<1x3x16xf32> to vector<28x3x16xf32>
    "tpu.trace_start"() <{level = 10 : i32, message = "hwc,hcd->hwd"}> : () -> ()
    %cst_12 = arith.constant dense<0.000000e+00> : vector<28x28x16xf32>
    %50 = tpu.matmul %44, %49, %cst_12 {dimension_numbers = #tpu.dot_dimension_numbers<[2], [1], [1], [2], [0, 0, 0, 1, 1, 2], [0], [0]>} : vector<28x28x3xf32>, vector<28x3x16xf32>, vector<28x28x16xf32> -> vector<28x28x16xf32>
    "tpu.trace_stop"() : () -> ()
    %51 = arith.addf %43, %50 : vector<28x28x16xf32>
    %52 = vector.extract_strided_slice %1 {offsets = [2, 0, 0], sizes = [28, 28, 3], strides = [1, 1, 1]} : vector<30x30x3xf32> to vector<28x28x3xf32>
    %53 = vector.extract_strided_slice %2 {offsets = [2, 0, 0, 0], sizes = [1, 1, 3, 16], strides = [1, 1, 1, 1]} : vector<3x3x3x16xf32> to vector<1x1x3x16xf32>
    %54 = vector.shape_cast %53 : vector<1x1x3x16xf32> to vector<3x16xf32>
    %55 = vector.shape_cast %54 : vector<3x16xf32> to vector<1x3x16xf32>
    %56 = vector.shape_cast %55 : vector<1x3x16xf32> to vector<1x3x16xf32>
    %57 = vector.broadcast %56 : vector<1x3x16xf32> to vector<28x3x16xf32>
    "tpu.trace_start"() <{level = 10 : i32, message = "hwc,hcd->hwd"}> : () -> ()
    %cst_13 = arith.constant dense<0.000000e+00> : vector<28x28x16xf32>
    %58 = tpu.matmul %52, %57, %cst_13 {dimension_numbers = #tpu.dot_dimension_numbers<[2], [1], [1], [2], [0, 0, 0, 1, 1, 2], [0], [0]>} : vector<28x28x3xf32>, vector<28x3x16xf32>, vector<28x28x16xf32> -> vector<28x28x16xf32>
    "tpu.trace_stop"() : () -> ()
    %59 = arith.addf %51, %58 : vector<28x28x16xf32>
    %60 = vector.extract_strided_slice %1 {offsets = [2, 1, 0], sizes = [28, 28, 3], strides = [1, 1, 1]} : vector<30x30x3xf32> to vector<28x28x3xf32>
    %61 = vector.extract_strided_slice %2 {offsets = [2, 1, 0, 0], sizes = [1, 1, 3, 16], strides = [1, 1, 1, 1]} : vector<3x3x3x16xf32> to vector<1x1x3x16xf32>
    %62 = vector.shape_cast %61 : vector<1x1x3x16xf32> to vector<3x16xf32>
    %63 = vector.shape_cast %62 : vector<3x16xf32> to vector<1x3x16xf32>
    %64 = vector.shape_cast %63 : vector<1x3x16xf32> to vector<1x3x16xf32>
    %65 = vector.broadcast %64 : vector<1x3x16xf32> to vector<28x3x16xf32>
    "tpu.trace_start"() <{level = 10 : i32, message = "hwc,hcd->hwd"}> : () -> ()
    %cst_14 = arith.constant dense<0.000000e+00> : vector<28x28x16xf32>
    %66 = tpu.matmul %60, %65, %cst_14 {dimension_numbers = #tpu.dot_dimension_numbers<[2], [1], [1], [2], [0, 0, 0, 1, 1, 2], [0], [0]>} : vector<28x28x3xf32>, vector<28x3x16xf32>, vector<28x28x16xf32> -> vector<28x28x16xf32>
    "tpu.trace_stop"() : () -> ()
    %67 = arith.addf %59, %66 : vector<28x28x16xf32>
    %68 = vector.extract_strided_slice %1 {offsets = [2, 2, 0], sizes = [28, 28, 3], strides = [1, 1, 1]} : vector<30x30x3xf32> to vector<28x28x3xf32>
    %69 = vector.extract_strided_slice %2 {offsets = [2, 2, 0, 0], sizes = [1, 1, 3, 16], strides = [1, 1, 1, 1]} : vector<3x3x3x16xf32> to vector<1x1x3x16xf32>
    %70 = vector.shape_cast %69 : vector<1x1x3x16xf32> to vector<3x16xf32>
    %71 = vector.shape_cast %70 : vector<3x16xf32> to vector<1x3x16xf32>
    %72 = vector.shape_cast %71 : vector<1x3x16xf32> to vector<1x3x16xf32>
    %73 = vector.broadcast %72 : vector<1x3x16xf32> to vector<28x3x16xf32>
    "tpu.trace_start"() <{level = 10 : i32, message = "hwc,hcd->hwd"}> : () -> ()
    %cst_15 = arith.constant dense<0.000000e+00> : vector<28x28x16xf32>
    %74 = tpu.matmul %68, %73, %cst_15 {dimension_numbers = #tpu.dot_dimension_numbers<[2], [1], [1], [2], [0, 0, 0, 1, 1, 2], [0], [0]>} : vector<28x28x3xf32>, vector<28x3x16xf32>, vector<28x28x16xf32> -> vector<28x28x16xf32>
    "tpu.trace_stop"() : () -> ()
    %75 = arith.addf %67, %74 : vector<28x28x16xf32>
    %c0_16 = arith.constant 0 : index
    %c0_17 = arith.constant 0 : index
    %76 = vector.load %arg3[%c0_16, %c0_17] : memref<1x16xf32, #tpu.memory_space<vmem>>, vector<1x16xf32>
    %77 = vector.shape_cast %76 : vector<1x16xf32> to vector<1x1x16xf32>
    %78 = vector.broadcast %77 : vector<1x1x16xf32> to vector<28x28x16xf32>
    %79 = arith.addf %75, %78 : vector<28x28x16xf32>
    %cst_18 = arith.constant 0.000000e+00 : f32
    %80 = vector.broadcast %cst_18 : f32 to vector<28x28x16xf32>
    %81 = arith.maximumf %79, %80 : vector<28x28x16xf32>
    %82 = vector.shape_cast %81 : vector<28x28x16xf32> to vector<14x2x28x16xf32>
    %cst_19 = arith.constant dense<0xFF800000> : vector<14x28x16xf32>
    %83 = vector.multi_reduction <maximumf>, %82, %cst_19 [1] : vector<14x2x28x16xf32> to vector<14x28x16xf32>
    %c0_20 = arith.constant 0 : index
    %c0_21 = arith.constant 0 : index
    %c0_22 = arith.constant 0 : index
    %84 = vector.load %arg5[%c0_20, %c0_21, %c0_22] : memref<14x28x16xf32, #tpu.memory_space<vmem>>, vector<14x28x16xf32>
    tpu.vector_store %arg5[%c0_20, %c0_21, %c0_22], %83 {strides = array<i32>} : memref<14x28x16xf32, #tpu.memory_space<vmem>>, vector<14x28x16xf32>,
    %c0_23 = arith.constant 0 : index
    %c0_24 = arith.constant 0 : index
    %c0_25 = arith.constant 0 : index
    %85 = tpu.strided_load %arg5[%c0_23, %c0_24, %c0_25] {strides = array<i32: 1, 2, 1>} : memref<14x28x16xf32, #tpu.memory_space<vmem>>, vector<14x14x16xf32>
    %c0_26 = arith.constant 0 : index
    %c1 = arith.constant 1 : index
    %c0_27 = arith.constant 0 : index
    %86 = tpu.strided_load %arg5[%c0_26, %c1, %c0_27] {strides = array<i32: 1, 2, 1>} : memref<14x28x16xf32, #tpu.memory_space<vmem>>, vector<14x14x16xf32>
    %87 = arith.maximumf %85, %86 : vector<14x14x16xf32>
    %c0_28 = arith.constant 0 : index
    %c0_29 = arith.constant 0 : index
    %c0_30 = arith.constant 0 : index
    %c0_31 = arith.constant 0 : index
    %88 = vector.load %arg4[%c0_28, %c0_29, %c0_30, %c0_31] : memref<1x14x14x16xf32, #tpu.memory_space<vmem>>, vector<1x14x14x16xf32>
    %89 = vector.shape_cast %88 : vector<1x14x14x16xf32> to vector<14x14x16xf32>
    %90 = vector.shape_cast %87 : vector<14x14x16xf32> to vector<1x14x14x16xf32>
    tpu.vector_store %arg4[%c0_28, %c0_29, %c0_30, %c0_31], %90 {strides = array<i32>} : memref<1x14x14x16xf32, #tpu.memory_space<vmem>>, vector<1x14x14x16xf32>,
    return
  }
  func.func @transform_0(%arg0: i32) -> (i32, i32, i32, i32) {
    %c0_i32 = arith.constant 0 : i32
    %c0_i32_0 = arith.constant 0 : i32
    %c0_i32_1 = arith.constant 0 : i32
    %c0_i32_2 = arith.constant 0 : i32
    return %arg0, %c0_i32, %c0_i32_0, %c0_i32_1 : i32, i32, i32, i32
  }
  func.func @transform_1(%arg0: i32) -> (i32, i32, i32, i32) {
    %c0_i32 = arith.constant 0 : i32
    %c0_i32_0 = arith.constant 0 : i32
    %c0_i32_1 = arith.constant 0 : i32
    %c0_i32_2 = arith.constant 0 : i32
    %c0_i32_3 = arith.constant 0 : i32
    return %c0_i32, %c0_i32_0, %c0_i32_1, %c0_i32_2 : i32, i32, i32, i32
  }
  func.func @transform_2(%arg0: i32) -> (i32, i32) {
    %c0_i32 = arith.constant 0 : i32
    %c0_i32_0 = arith.constant 0 : i32
    %c0_i32_1 = arith.constant 0 : i32
    return %c0_i32, %c0_i32_0 : i32, i32
  }
  func.func @transform_3(%arg0: i32) -> (i32, i32, i32, i32) {
    %c0_i32 = arith.constant 0 : i32
    %c0_i32_0 = arith.constant 0 : i32
    %c0_i32_1 = arith.constant 0 : i32
    %c0_i32_2 = arith.constant 0 : i32
    return %arg0, %c0_i32, %c0_i32_0, %c0_i32_1 : i32, i32, i32, i32
  }
}

</mosaic_0001>

<bundles_post_ra>
// kernel: tpu_custom_call.1
= control target key start
LH: loop header
LB: loop body
LE: loop exit
PB: predicated region body
PF: predicated region fallthrough
CT: control target
= control target key end

     0   :  { %s11897_s12 = smov 0   ;;  %s19371_s0 = inlined_call_operand.vmem [shape: f32[2,30,30,3], index: 0, kind: input, shape index: {}]   ;;  %s19372_s1 = inlined_call_operand.vmem [shape: f32[3,3,3,16], index: 1, kind: input, shape index: {}]   ;;  %s19373_s2 = inlined_call_operand.vmem [shape: f32[1,16], index: 2, kind: input, shape index: {}]   ;;  %s19374_s3 = inlined_call_operand.vmem [shape: f32[2,14,14,16], index: 3, kind: output, shape index: {}]  }
   0x1 LB: > { %s10360_s13 = sadd.s32 4294967295, %s11875_s12   ;;  %p10364_p0 = scmp.ge.s32.totalorder %s11875_s12, 1  ;;  %s11875_s12 = sphi %s11897_s12, %s13_s12  }
   0x2   : > { %p137_p1 = scmp.lt.s32.totalorder %s11875_s12, 3 }
   0x4   : > { %p138_p2 = pnand %p10364_p0, %p137_p1 }
   0x6   : > { %141 = sbr.rel (%p138_p2) target bundleno = 2287 (0x8ef), region = 32 }
   0xb   : > { %v11908_v0 = vld [vmem:[%s19372_s1 + $0x4] sm:$0x7]  ;;  %vm321_vm0 = vcmask 1042432   ;;  %p161_p3 = scmp.lt.s32.totalorder %s10360_s13, 1  ;;  %vm304_vm1 = vcmask 1046528   ;;  %vm312_vm2 = vcmask 23552  }
   0xc   : > { %10367 = vmatpush.msk.msra.mxu0 %vm321_vm0, %v11908_v0  ;;  %10372 = vmatpush.msk.msra.mxu1 %vm321_vm0, %v11908_v0  ;;  %vm2689_vm3 = vcmask 1045504   ;;  %vm9911_vm4 = vcmask 130048   ;;  %vm9921_vm5 = vcmask 125952   ;;  %vm10277_vm6 = vcmask 128000  }
   0xd   : > { %10377 = vmatpush.msk.msra.mxu2 %vm321_vm0, %v11908_v0  ;;  %10382 = vmatpush.msk.msra.mxu3 %vm321_vm0, %v11908_v0  ;;  %s22143_s13 = smov (!%p161_p3, %s10360_s13), 1 }
   0xe   : > { %s11629_s16 = smul.u32 960, %s22143_s13  ;;  %10387 = vmatpush.msk.msrb.mxu0 %vm321_vm0, %v11908_v0  ;;  %10392 = vmatpush.msk.msrb.mxu1 %vm321_vm0, %v11908_v0 }
   0xf   : > { %10397 = vmatpush.msk.msrb.mxu2 %vm321_vm0, %v11908_v0  ;;  %10402 = vmatpush.msk.msrb.mxu3 %vm321_vm0, %v11908_v0  ;;  %s11630_s11 = smul.u32 224, %s22143_s13 }
  0x10   : > { %s11932_s19 = scalar_lea.vmem %s19371_s0, %s11629_s16 }
  0x11   : > { %v11935_v1 = vld [vmem:[%s11932_s19] sm:$0xff]  ;;  %v172_v2 = vld [vmem:[%s11932_s19 + $0x8] sm:$0xff]  ;;  %v11965_v18 = vld [vmem:[%s11932_s19 + $0x10] sm:$0xff]  ;;  %s18521_s15 = scalar_lea.vmem %s19374_s3, %s11630_s11 }
  0x12   : > { %v11939_v3 = vld [vmem:[%s11932_s19 + $0x20] sm:$0xff]  ;;  %v305_v4 = vrot.slane %v11935_v1, 1  ;;  %v306_v5 = vrot.slane %v172_v2, 1  ;;  %v11943_v6 = vld [vmem:[%s11932_s19 + $0x28] sm:$0xff]  ;;  %v11968_v19 = vld [vmem:[%s11932_s19 + $0x30] sm:$0xff]  ;;  %v308_v25 = vrot.slane %v11965_v18, 1 }
  0x13   : > { %v11946_v7 = vld [vmem:[%s11932_s19 + $0x40] sm:$0xff]  ;;  %v358_v8 = vrot.slane %v11939_v3, 1  ;;  %v359_v9 = vrot.slane %v11943_v6, 1  ;;  %v11951_v10 = vld [vmem:[%s11932_s19 + $0x48] sm:$0xff]  ;;  %v11975_v21 = vld [vmem:[%s11932_s19 + $0x50] sm:$0xff]  ;;  %v361_v26 = vrot.slane %v11968_v19, 1 }
  0x14   : > { %v406_v11 = vrot.slane %v11946_v7, 1  ;;  %v11955_v12 = vld [vmem:[%s11932_s19 + $0x60] sm:$0xff]  ;;  %v11958_v13 = vld [vmem:[%s11932_s19 + $0x68] sm:$0xff]  ;;  %v307_v14 = vsel %vm304_vm1, %v305_v4, %v306_v5  ;;  %v407_v15 = vrot.slane %v11951_v10, 1  ;;  %v11978_v22 = vld [vmem:[%s11932_s19 + $0x70] sm:$0xff]  ;;  %v409_v27 = vrot.slane %v11975_v21, 1 }
  0x15   : > { %v454_v16 = vrot.slane %v11955_v12, 1  ;;  %v455_v17 = vrot.slane %v11958_v13, 1  ;;  %10368 = vmatmul.msk.f32.vlgmr.msra.gmra.mxu0 %vm312_vm2, %v307_v14  ;;  %v11972_v20 = vsel %vm304_vm1, %v358_v8, %v359_v9  ;;  %v457_v28 = vrot.slane %v11978_v22, 1  ;;  %v12009_v31 = vld [vmem:[%s11932_s19 + $0x18] sm:$0x3f]  ;;  %v12064_v45 = vld [vmem:[%s11932_s19 + $0x80] sm:$0xff] }
  0x16   : > { %19963 = vst [vmem:[#allocation3_spill] sm:$0xff] %v11972_v20  ;;  %10373 = vmatmul.msk.f32.vlgmr.msra.gmra.mxu1 %vm312_vm2, %v11972_v20  ;;  %v11983_v23 = vsel %vm304_vm1, %v406_v11, %v407_v15  ;;  %10407 = vmatpush.msk.msra.mxu0 %vm321_vm0, %v11908_v0  ;;  %v309_v29 = vsel %vm304_vm1, %v306_v5, %v308_v25  ;;  %v12018_v34 = vld [vmem:[%s11932_s19 + $0x38] sm:$0x3f]  ;;  %v310_v37 = vrot.slane %v12009_v31, 1  ;;  %v12067_v46 = vld [vmem:[%s11932_s19 + $0x88] sm:$0xff]  ;;  %v12070_v47 = vld [vmem:[%s11932_s19 + $0xa0] sm:$0xff] }
  0x17   : > { %19964 = vst [vmem:[#allocation4_spill] sm:$0xff] %v11983_v23  ;;  %v11986_v24 = vsel %vm304_vm1, %v454_v16, %v455_v17  ;;  %10378 = vmatmul.msk.f32.vlgmr.msra.gmra.mxu2 %vm312_vm2, %v11983_v23  ;;  %10412 = vmatpush.msk.msra.mxu1 %vm321_vm0, %v11908_v0  ;;  %v12006_v30 = vsel %vm304_vm1, %v359_v9, %v361_v26  ;;  %v12022_v35 = vld [vmem:[%s11932_s19 + $0x58] sm:$0x3f]  ;;  %v12035_v38 = vrot.slane %v12018_v34, 1  ;;  %v12073_v48 = vld [vmem:[%s11932_s19 + $0xa8] sm:$0xff]  ;;  %v12076_v49 = vld [vmem:[%s11932_s19 + $0xc0] sm:$0xff] }
  0x18   : > { %19965 = vst [vmem:[#allocation5_spill] sm:$0xff] %v11986_v24  ;;  %10383 = vmatmul.msk.f32.vlgmr.msra.gmra.mxu3 %vm312_vm2, %v11986_v24  ;;  %10417 = vmatpush.msk.msra.mxu2 %vm321_vm0, %v11908_v0  ;;  %v12012_v32 = vsel %vm304_vm1, %v407_v15, %v409_v27  ;;  %v12015_v33 = vsel %vm304_vm1, %v455_v17, %v457_v28  ;;  %v12025_v36 = vld [vmem:[%s11932_s19 + $0x78] sm:$0x3f]  ;;  %v12038_v39 = vrot.slane %v12022_v35, 1  ;;  %v12080_v50 = vld [vmem:[%s11932_s19 + $0xc8] sm:$0xff]  ;;  %v12083_v51 = vld [vmem:[%s11932_s19 + $0xe0] sm:$0xff] }
  0x19   : > { %10422 = vmatpush.msk.msra.mxu3 %vm321_vm0, %v11908_v0  ;;  %19966 = vst [vmem:[#allocation6_spill] sm:$0xff] %v12006_v30  ;;  %v12041_v40 = vrot.slane %v12025_v36, 1  ;;  %v311_v41 = vsel %vm304_vm1, %v308_v25, %v310_v37  ;;  %v12046_v42 = vsel %vm304_vm1, %v361_v26, %v12035_v38  ;;  %v12086_v52 = vld [vmem:[%s11932_s19 + $0xe8] sm:$0xff]  ;;  %v502_v53 = vrot.slane %v12064_v45, 1  ;;  %v12109_v63 = vld [vmem:[%s11932_s19 + $0x90] sm:$0xff] }
  0x1a   : > { %19967 = vst [vmem:[#allocation7_spill] sm:$0xff] %v12012_v32  ;;  %v12050_v43 = vsel %vm304_vm1, %v409_v27, %v12038_v39  ;;  %v503_v54 = vrot.slane %v12067_v46, 1  ;;  %v550_v55 = vrot.slane %v12070_v47, 1  ;;  %v551_v56 = vrot.slane %v12073_v48, 1  ;;  %v12118_v5 = vld [vmem:[%s11932_s19 + $0xb0] sm:$0xff] }
  0x1b   : > { %19968 = vst [vmem:[#allocation8_spill] sm:$0xff] %v12015_v33  ;;  %v12054_v44 = vsel %vm304_vm1, %v457_v28, %v12041_v40  ;;  %v598_v57 = vrot.slane %v12076_v49, 1  ;;  %v599_v58 = vrot.slane %v12080_v50, 1  ;;  %v646_v59 = vrot.slane %v12083_v51, 1  ;;  %v12123_v8 = vld [vmem:[%s11932_s19 + $0xd0] sm:$0xff] }
  0x1c   : > { %19969 = vst [vmem:[#allocation9_spill] sm:$0xff] %v12035_v38  ;;  %v647_v60 = vrot.slane %v12086_v52, 1  ;;  %v12103_v61 = vsel %vm304_vm1, %v502_v53, %v503_v54  ;;  %v12106_v62 = vsel %vm304_vm1, %v550_v55, %v551_v56  ;;  %v12126_v9 = vld [vmem:[%s11932_s19 + $0xf0] sm:$0xff]  ;;  %v505_v11 = vrot.slane %v12109_v63, 1  ;;  %v12153_v26 = vld [vmem:[%s11932_s19 + $0x98] sm:$0x3f] }
  0x1d   : > { %10369 = vmatmul.msk.f32.gmra.mxu0 %vm312_vm2, %v309_v29  ;;  %19970 = vst [vmem:[#allocation10_spill] sm:$0xff] %v12038_v39  ;;  %v12112_v2 = vsel %vm304_vm1, %v598_v57, %v599_v58  ;;  %v553_v14 = vrot.slane %v12118_v5, 1  ;;  %v601_v15 = vrot.slane %v12123_v8, 1  ;;  %v649_v16 = vrot.slane %v12126_v9, 1  ;;  %v12162_v29 = vld [vmem:[%s11932_s19 + $0xb8] sm:$0x3f] }
  0x1e   : > { %10374 = vmatmul.msk.f32.gmra.mxu1 %vm312_vm2, %v12006_v30  ;;  %19971 = vst [vmem:[#allocation11_spill] sm:$0xff] %v12041_v40  ;;  %v12115_v4 = vsel %vm304_vm1, %v646_v59, %v647_v60  ;;  %v12147_v17 = vsel %vm304_vm1, %v503_v54, %v505_v11  ;;  %v12175_v53 = vrot.slane %v12153_v26, 1  ;;  %v12182_v54 = vrot.slane %v12162_v29, 1 }
  0x1f   : > { %10379 = vmatmul.msk.f32.gmra.mxu2 %vm312_vm2, %v12012_v32  ;;  %19972 = vst [vmem:[#allocation12_spill] sm:$0xff] %v12046_v42  ;;  %v12150_v25 = vsel %vm304_vm1, %v551_v56, %v553_v14  ;;  %v12156_v27 = vsel %vm304_vm1, %v599_v58, %v601_v15  ;;  %v12159_v28 = vsel %vm304_vm1, %v647_v60, %v649_v16  ;;  %v12319_v32 = vld [vmem:[%s11932_s19 + $0x158] sm:$0x3f] }
  0x20   : > { %10384 = vmatmul.msk.f32.gmra.mxu3 %vm312_vm2, %v12015_v33  ;;  %19973 = vst [vmem:[#allocation13_spill] sm:$0xff] %v12050_v43  ;;  %v12192_v57 = vsel %vm304_vm1, %v505_v11, %v12175_v53  ;;  %v12196_v58 = vsel %vm304_vm1, %v553_v14, %v12182_v54  ;;  %v12215_v11 = vld [vmem:[%s11932_s19 + $0x100] sm:$0xff]  ;;  %v12218_v14 = vld [vmem:[%s11932_s19 + $0x108] sm:$0xff]  ;;  %v12314_v33 = vld [vmem:[%s11932_s19 + $0x138] sm:$0x3f] }
  0x21   : > { %19974 = vst [vmem:[#allocation14_spill] sm:$0xff] %v12054_v44 }
  0x22   : > { %19975 = vst [vmem:[#allocation15_spill] sm:$0xff] %v12103_v61 }
  0x23   : > { %19976 = vst [vmem:[#allocation16_spill] sm:$0xff] %v12106_v62 }
  0x24   : > { %19977 = vst [vmem:[#allocation17_spill] sm:$0xff] %v12112_v2 }
  0x25   : > { %10370 = vmatmul.msk.f32.gmra.mxu0 %vm312_vm2, %v311_v41  ;;  %19978 = vst [vmem:[#allocation18_spill] sm:$0xff] %v12115_v4  ;;  %v12170_v41 = vld [vmem:[%s11932_s19 + $0xf8] sm:$0x3f] }
  0x26   : > { %10375 = vmatmul.msk.f32.gmra.mxu1 %vm312_vm2, %v12046_v42  ;;  %19979 = vst [vmem:[#allocation19_spill] sm:$0xff] %v12147_v17  ;;  %v12188_v56 = vrot.slane %v12170_v41, 1 }
  0x27   : > { %10380 = vmatmul.msk.f32.gmra.mxu2 %vm312_vm2, %v12050_v43  ;;  %19980 = vst [vmem:[#allocation20_spill] sm:$0xff] %v12150_v25  ;;  %v12275_v43 = vld [vmem:[%s11932_s19 + $0x150] sm:$0xff] }
  0x28   : > { %10385 = vmatmul.msk.f32.gmra.mxu3 %vm312_vm2, %v12054_v44  ;;  %19981 = vst [vmem:[#allocation21_spill] sm:$0xff] %v12156_v27  ;;  %v12204_v60 = vsel %vm304_vm1, %v649_v16, %v12188_v56  ;;  %v12224_v16 = vld [vmem:[%s11932_s19 + $0x128] sm:$0xff]  ;;  %v12270_v44 = vld [vmem:[%s11932_s19 + $0x130] sm:$0xff] }
  0x29   : > { %19982 = vst [vmem:[#allocation22_spill] sm:$0xff] %v12159_v28 }
  0x2a   : > { %19983 = vst [vmem:[#allocation23_spill] sm:$0xff] %v12175_v53 }
  0x2b   : > { %19984 = vst [vmem:[#allocation24_spill] sm:$0xff] %v12182_v54 }
  0x2c   : > { %19986 = vst [vmem:[#allocation26_spill] sm:$0xff] %v12188_v56 }
  0x2d   : > { %10371 = vmatmul.msk.f32.gmra.mxu0 %vm312_vm2, %v310_v37  ;;  %v12167_v37 = vld [vmem:[%s11932_s19 + $0xd8] sm:$0x3f]  ;;  %19987 = vst [vmem:[#allocation27_spill] sm:$0xff] %v12192_v57 }
  0x2e   : > { %10376 = vmatmul.msk.f32.gmra.mxu1 %vm312_vm2, %v12035_v38  ;;  %v12185_v55 = vrot.slane %v12167_v37, 1  ;;  %19988 = vst [vmem:[#allocation28_spill] sm:$0xff] %v12196_v58  ;;  %v12261_v38 = vld [vmem:[%s11932_s19 + $0x110] sm:$0xff] }
  0x2f   : > { %10381 = vmatmul.msk.f32.gmra.mxu2 %vm312_vm2, %v12038_v39  ;;  %19990 = vst [vmem:[#allocation30_spill] sm:$0xff] %v12204_v60 }
  0x30   : > { %10386 = vmatmul.msk.f32.gmra.mxu3 %vm312_vm2, %v12041_v40  ;;  %19985 = vst [vmem:[#allocation25_spill] sm:$0xff] %v12185_v55  ;;  %v12200_v59 = vsel %vm304_vm1, %v601_v15, %v12185_v55  ;;  %v12221_v15 = vld [vmem:[%s11932_s19 + $0x120] sm:$0xff] }
  0x31   : > { %19989 = vst [vmem:[#allocation29_spill] sm:$0xff] %v12200_v59 }
  0x32   : > { %19999 = vst [vmem:[#allocation39_spill] sm:$0xff] %v12319_v32 }
  0x35   : > { %10388 = vmatmul.msk.f32.vlgmr.msrb.gmra.mxu0 %vm312_vm2, %v12103_v61  ;;  %v12379_v61 = vld [vmem:[%s11932_s19 + $0x1c0] sm:$0xff] }
  0x36   : > { %10393 = vmatmul.msk.f32.vlgmr.msrb.gmra.mxu1 %vm312_vm2, %v12106_v62  ;;  %10427 = vmatpush.msk.msrb.mxu0 %vm321_vm0, %v11908_v0  ;;  %20013 = vst [vmem:[#allocation53_spill] sm:$0xff] %v12379_v61  ;;  %v982_v20 = vrot.slane %v12379_v61, 1  ;;  %v12422_v61 = vld [vmem:[%s11932_s19 + $0x1b0] sm:$0xff] }
  0x37   : > { %10398 = vmatmul.msk.f32.vlgmr.msrb.gmra.mxu2 %vm312_vm2, %v12112_v2  ;;  %10432 = vmatpush.msk.msrb.mxu1 %vm321_vm0, %v11908_v0  ;;  %v743_v2 = vrot.slane %v12224_v16, 1  ;;  %20022 = vst [vmem:[#allocation62_spill] sm:$0xff] %v12422_v61 }
  0x38   : > { %10403 = vmatmul.msk.f32.vlgmr.msrb.gmra.mxu3 %vm312_vm2, %v12115_v4  ;;  %10437 = vmatpush.msk.msrb.mxu2 %vm321_vm0, %v11908_v0  ;;  %v742_v4 = vrot.slane %v12221_v15, 1 }
  0x39   : > { %10442 = vmatpush.msk.msrb.mxu3 %vm321_vm0, %v11908_v0 }
  0x3d   : > { %10389 = vmatmul.msk.f32.gmra.mxu0 %vm312_vm2, %v12147_v17 }
  0x3e   : > { %10394 = vmatmul.msk.f32.gmra.mxu1 %vm312_vm2, %v12150_v25  ;;  %v695_v25 = vrot.slane %v12218_v14, 1 }
  0x3f   : > { %10399 = vmatmul.msk.f32.gmra.mxu2 %vm312_vm2, %v12156_v27  ;;  %v12238_v27 = vld [vmem:[%s11932_s19 + $0x168] sm:$0xff] }
  0x40   : > { %10404 = vmatmul.msk.f32.gmra.mxu3 %vm312_vm2, %v12159_v28  ;;  %v12227_v28 = vld [vmem:[%s11932_s19 + $0x140] sm:$0xff]  ;;  %v839_v40 = vrot.slane %v12238_v27, 1 }
  0x41   : > { %v790_v62 = vrot.slane %v12227_v28, 1 }
  0x45   : > { %10390 = vmatmul.msk.f32.gmra.mxu0 %vm312_vm2, %v12192_v57 }
  0x46   : > { %10395 = vmatmul.msk.f32.gmra.mxu1 %vm312_vm2, %v12196_v58  ;;  %v12232_v58 = vld [vmem:[%s11932_s19 + $0x148] sm:$0xff] }
  0x47   : > { %10400 = vmatmul.msk.f32.gmra.mxu2 %vm312_vm2, %v12200_v59  ;;  %v12235_v59 = vld [vmem:[%s11932_s19 + $0x160] sm:$0xff] }
  0x48   : > { %10405 = vmatmul.msk.f32.gmra.mxu3 %vm312_vm2, %v12204_v60  ;;  %v694_v60 = vrot.slane %v12215_v11, 1 }
  0x4a   : > { %v12255_v39 = vsel %vm304_vm1, %v694_v60, %v695_v25  ;;  %v12278_v60 = vld [vmem:[%s11932_s19 + $0x170] sm:$0xff] }
  0x4b   : > { %19991 = vst [vmem:[#allocation31_spill] sm:$0xff] %v12255_v39 }
  0x4d   : > { %10391 = vmatmul.msk.f32.gmra.mxu0 %vm312_vm2, %v12175_v53  ;;  %v838_v53 = vrot.slane %v12235_v59, 1 }
  0x4e   : > { %10396 = vmatmul.msk.f32.gmra.mxu1 %vm312_vm2, %v12182_v54  ;;  %v791_v54 = vrot.slane %v12232_v58, 1 }
  0x4f   : > { %10401 = vmatmul.msk.f32.gmra.mxu2 %vm312_vm2, %v12185_v55  ;;  %v12258_v55 = vsel %vm304_vm1, %v742_v4, %v743_v2  ;;  %v12267_v57 = vsel %vm304_vm1, %v838_v53, %v839_v40  ;;  %v745_v4 = vrot.slane %v12270_v44, 1  ;;  %v793_v53 = vrot.slane %v12275_v43, 1 }
  0x50   : > { %10406 = vmatmul.msk.f32.gmra.mxu3 %vm312_vm2, %v12188_v56  ;;  %19992 = vst [vmem:[#allocation32_spill] sm:$0xff] %v12258_v55  ;;  %v12264_v56 = vsel %vm304_vm1, %v790_v62, %v791_v54  ;;  %v697_v62 = vrot.slane %v12261_v38, 1 }
  0x51   : > { %19993 = vst [vmem:[#allocation33_spill] sm:$0xff] %v12264_v56  ;;  %v12308_v42 = vsel %vm304_vm1, %v791_v54, %v793_v53  ;;  %v12337_v54 = vrot.slane %v12319_v32, 1  ;;  %v12413_v32 = vld [vmem:[%s11932_s19 + $0x190] sm:$0xff] }
  0x52   : > { %19994 = vst [vmem:[#allocation34_spill] sm:$0xff] %v12267_v57 }
  0x53   : > { %19997 = vst [vmem:[#allocation37_spill] sm:$0xff] %v12308_v42 }
  0x54   : > { %20003 = vst [vmem:[#allocation43_spill] sm:$0xff] %v12337_v54 }
  0x55   : > { %10408 = vmatmul.msk.f32.vlgmr.msra.gmra.mxu0 %vm312_vm2, %v12255_v39  ;;  %v12305_v39 = vld [vmem:[%s11932_s19 + $0x118] sm:$0x3f]  ;;  %20019 = vst [vmem:[#allocation59_spill] sm:$0xff] %v12413_v32 }
  0x56   : > { %10413 = vmatmul.msk.f32.vlgmr.msra.gmra.mxu1 %vm312_vm2, %v12258_v55  ;;  %10447 = vmatpush.msk.msra.mxu0 %vm321_vm0, %v11908_v0  ;;  %v841_v55 = vrot.slane %v12278_v60, 1 }
  0x57   : > { %10418 = vmatmul.msk.f32.vlgmr.msra.gmra.mxu2 %vm312_vm2, %v12264_v56  ;;  %10452 = vmatpush.msk.msra.mxu1 %vm321_vm0, %v11908_v0  ;;  %v12299_v56 = vsel %vm304_vm1, %v695_v25, %v697_v62  ;;  %v12322_v25 = vld [vmem:[%s11932_s19 + $0x178] sm:$0x3f] }
  0x58   : > { %10423 = vmatmul.msk.f32.vlgmr.msra.gmra.mxu3 %vm312_vm2, %v12267_v57  ;;  %10457 = vmatpush.msk.msra.mxu2 %vm321_vm0, %v11908_v0  ;;  %19995 = vst [vmem:[#allocation35_spill] sm:$0xff] %v12299_v56  ;;  %v12302_v57 = vsel %vm304_vm1, %v743_v2, %v745_v4  ;;  %v12311_v17 = vsel %vm304_vm1, %v839_v40, %v841_v55  ;;  %v12327_v2 = vrot.slane %v12305_v39, 1  ;;  %v12334_v40 = vrot.slane %v12314_v33, 1 }
  0x59   : > { %10462 = vmatpush.msk.msra.mxu3 %vm321_vm0, %v11908_v0  ;;  %19996 = vst [vmem:[#allocation36_spill] sm:$0xff] %v12302_v57 }
  0x5a   : > { %19998 = vst [vmem:[#allocation38_spill] sm:$0xff] %v12311_v17 }
  0x5b   : > { %20000 = vst [vmem:[#allocation40_spill] sm:$0xff] %v12322_v25 }
  0x5c   : > { %20001 = vst [vmem:[#allocation41_spill] sm:$0xff] %v12327_v2 }
  0x5d   : > { %10409 = vmatmul.msk.f32.gmra.mxu0 %vm312_vm2, %v12299_v56  ;;  %20002 = vst [vmem:[#allocation42_spill] sm:$0xff] %v12334_v40  ;;  %v12344_v56 = vsel %vm304_vm1, %v697_v62, %v12327_v2  ;;  %v12367_v62 = vld [vmem:[%s11932_s19 + $0x180] sm:$0xff] }
  0x5e   : > { %10414 = vmatmul.msk.f32.gmra.mxu1 %vm312_vm2, %v12302_v57  ;;  %v12340_v57 = vrot.slane %v12322_v25, 1  ;;  %20005 = vst [vmem:[#allocation45_spill] sm:$0xff] %v12344_v56 }
  0x5f   : > { %10419 = vmatmul.msk.f32.gmra.mxu2 %vm312_vm2, %v12308_v42  ;;  %v12352_v42 = vsel %vm304_vm1, %v793_v53, %v12337_v54  ;;  %20009 = vst [vmem:[#allocation49_spill] sm:$0xff] %v12367_v62  ;;  %v12373_v53 = vld [vmem:[%s11932_s19 + $0x1a0] sm:$0xff] }
  0x60   : > { %10424 = vmatmul.msk.f32.gmra.mxu3 %vm312_vm2, %v12311_v17  ;;  %20004 = vst [vmem:[#allocation44_spill] sm:$0xff] %v12340_v57  ;;  %v12348_v17 = vsel %vm304_vm1, %v745_v4, %v12334_v40  ;;  %v12356_v30 = vsel %vm304_vm1, %v841_v55, %v12340_v57  ;;  %v12370_v4 = vld [vmem:[%s11932_s19 + $0x188] sm:$0xff] }
  0x61   : > { %20006 = vst [vmem:[#allocation46_spill] sm:$0xff] %v12348_v17  ;;  %v12376_v55 = vld [vmem:[%s11932_s19 + $0x1a8] sm:$0xff]  ;;  %v887_v24 = vrot.slane %v12370_v4, 1 }
  0x62   : > { %20007 = vst [vmem:[#allocation47_spill] sm:$0xff] %v12352_v42  ;;  %v935_v23 = vrot.slane %v12376_v55, 1 }
  0x63   : > { %20008 = vst [vmem:[#allocation48_spill] sm:$0xff] %v12356_v30 }
  0x64   : > { %20010 = vst [vmem:[#allocation50_spill] sm:$0xff] %v12370_v4 }
  0x65   : > { %10410 = vmatmul.msk.f32.gmra.mxu0 %vm312_vm2, %v12344_v56  ;;  %20011 = vst [vmem:[#allocation51_spill] sm:$0xff] %v12373_v53  ;;  %v12390_v56 = vld [vmem:[%s11932_s19 + $0x1e8] sm:$0xff] }
  0x66   : > { %10415 = vmatmul.msk.f32.gmra.mxu1 %vm312_vm2, %v12348_v17  ;;  %20012 = vst [vmem:[#allocation52_spill] sm:$0xff] %v12376_v55  ;;  %v12384_v17 = vld [vmem:[%s11932_s19 + $0x1c8] sm:$0xff]  ;;  %v1031_v4 = vrot.slane %v12390_v56, 1 }
  0x67   : > { %10420 = vmatmul.msk.f32.gmra.mxu2 %vm312_vm2, %v12352_v42  ;;  %20014 = vst [vmem:[#allocation54_spill] sm:$0xff] %v12384_v17  ;;  %v12387_v42 = vld [vmem:[%s11932_s19 + $0x1e0] sm:$0xff] }
  0x68   : > { %10425 = vmatmul.msk.f32.gmra.mxu3 %vm312_vm2, %v12356_v30  ;;  %20015 = vst [vmem:[#allocation55_spill] sm:$0xff] %v12387_v42  ;;  %v886_v30 = vrot.slane %v12367_v62, 1  ;;  %v1030_v62 = vrot.slane %v12387_v42, 1 }
  0x69   : > { %20016 = vst [vmem:[#allocation56_spill] sm:$0xff] %v12390_v56  ;;  %v12427_v56 = vld [vmem:[%s11932_s19 + $0x1d0] sm:$0xff] }
  0x6a   : > { %v12407_v25 = vsel %vm304_vm1, %v886_v30, %v887_v24  ;;  %v12419_v55 = vsel %vm304_vm1, %v1030_v62, %v1031_v4  ;;  %20023 = vst [vmem:[#allocation63_spill] sm:$0xff] %v12427_v56  ;;  %v12430_v30 = vld [vmem:[%s11932_s19 + $0x1f0] sm:$0xff]  ;;  %v985_v62 = vrot.slane %v12427_v56, 1 }
  0x6b   : > { %20017 = vst [vmem:[#allocation57_spill] sm:$0xff] %v12407_v25 }
  0x6c   : > { %20021 = vst [vmem:[#allocation61_spill] sm:$0xff] %v12419_v55 }
  0x6d   : > { %10411 = vmatmul.msk.f32.gmra.mxu0 %vm312_vm2, %v12327_v2  ;;  %v934_v2 = vrot.slane %v12373_v53, 1  ;;  %20024 = vst [vmem:[#allocation64_spill] sm:$0xff] %v12430_v30  ;;  %v12569_v53 = vld [vmem:[%s11932_s19 + $0x210] sm:$0xff] }
  0x6e   : > { %10416 = vmatmul.msk.f32.gmra.mxu1 %vm312_vm2, %v12334_v40  ;;  %v983_v40 = vrot.slane %v12384_v17, 1  ;;  %20053 = vst [vmem:[#allocation93_spill] sm:$0xff] %v12569_v53 }
  0x6f   : > { %10421 = vmatmul.msk.f32.gmra.mxu2 %vm312_vm2, %v12337_v54  ;;  %v12410_v54 = vsel %vm304_vm1, %v934_v2, %v935_v23  ;;  %v937_v2 = vrot.slane %v12422_v61, 1  ;;  %v12466_v61 = vld [vmem:[%s11932_s19 + $0x1b8] sm:$0x3f] }
  0x70   : > { %10426 = vmatmul.msk.f32.gmra.mxu3 %vm312_vm2, %v12340_v57  ;;  %20018 = vst [vmem:[#allocation58_spill] sm:$0xff] %v12410_v54  ;;  %v12416_v57 = vsel %vm304_vm1, %v982_v20, %v983_v40  ;;  %v889_v20 = vrot.slane %v12413_v32, 1  ;;  %v12460_v56 = vsel %vm304_vm1, %v983_v40, %v985_v62  ;;  %v12471_v32 = vld [vmem:[%s11932_s19 + $0x1d8] sm:$0x3f]  ;;  %v12486_v40 = vrot.slane %v12466_v61, 1 }
  0x71   : > { %20020 = vst [vmem:[#allocation60_spill] sm:$0xff] %v12416_v57 }
  0x72   : > { %20028 = vst [vmem:[#allocation68_spill] sm:$0xff] %v12460_v56 }
  0x73   : > { %20030 = vst [vmem:[#allocation70_spill] sm:$0xff] %v12466_v61 }
  0x74   : > { %20031 = vst [vmem:[#allocation71_spill] sm:$0xff] %v12471_v32 }
  0x75   : > { %10428 = vmatmul.msk.f32.vlgmr.msrb.gmra.mxu0 %vm312_vm2, %v12407_v25  ;;  %v12457_v25 = vld [vmem:[%s11932_s19 + $0x198] sm:$0x3f]  ;;  %20034 = vst [vmem:[#allocation74_spill] sm:$0xff] %v12486_v40 }
  0x76   : > { %10433 = vmatmul.msk.f32.vlgmr.msrb.gmra.mxu1 %vm312_vm2, %v12410_v54  ;;  %10467 = vmatpush.msk.msrb.mxu0 %vm321_vm0, %v11908_v0  ;;  %v1033_v54 = vrot.slane %v12430_v30, 1  ;;  %20027 = vst [vmem:[#allocation67_spill] sm:$0xff] %v12457_v25 }
  0x77   : > { %10438 = vmatmul.msk.f32.vlgmr.msrb.gmra.mxu2 %vm312_vm2, %v12416_v57  ;;  %10472 = vmatpush.msk.msrb.mxu1 %vm321_vm0, %v11908_v0  ;;  %v12451_v57 = vsel %vm304_vm1, %v887_v24, %v889_v20  ;;  %v12474_v24 = vld [vmem:[%s11932_s19 + $0x1f8] sm:$0x3f] }
  0x78   : > { %10443 = vmatmul.msk.f32.vlgmr.msrb.gmra.mxu3 %vm312_vm2, %v12419_v55  ;;  %10477 = vmatpush.msk.msrb.mxu2 %vm321_vm0, %v11908_v0  ;;  %20025 = vst [vmem:[#allocation65_spill] sm:$0xff] %v12451_v57  ;;  %v12454_v55 = vsel %vm304_vm1, %v935_v23, %v937_v2  ;;  %v12463_v30 = vsel %vm304_vm1, %v1031_v4, %v1033_v54  ;;  %v12479_v23 = vrot.slane %v12457_v25, 1  ;;  %v12489_v4 = vrot.slane %v12471_v32, 1 }
  0x79   : > { %10482 = vmatpush.msk.msrb.mxu3 %vm321_vm0, %v11908_v0  ;;  %20026 = vst [vmem:[#allocation66_spill] sm:$0xff] %v12454_v55 }
  0x7a   : > { %20029 = vst [vmem:[#allocation69_spill] sm:$0xff] %v12463_v30 }
  0x7b   : > { %20032 = vst [vmem:[#allocation72_spill] sm:$0xff] %v12474_v24 }
  0x7c   : > { %20033 = vst [vmem:[#allocation73_spill] sm:$0xff] %v12479_v23 }
  0x7d   : > { %10429 = vmatmul.msk.f32.gmra.mxu0 %vm312_vm2, %v12451_v57  ;;  %20035 = vst [vmem:[#allocation75_spill] sm:$0xff] %v12489_v4  ;;  %v12496_v57 = vsel %vm304_vm1, %v889_v20, %v12479_v23  ;;  %v12519_v20 = vld [vmem:[%s11932_s19 + $0x200] sm:$0xff] }
  0x7e   : > { %10434 = vmatmul.msk.f32.gmra.mxu1 %vm312_vm2, %v12454_v55  ;;  %v12492_v55 = vrot.slane %v12474_v24, 1  ;;  %20037 = vst [vmem:[#allocation77_spill] sm:$0xff] %v12496_v57  ;;  %v12531_v24 = vld [vmem:[%s11932_s19 + $0x240] sm:$0xff] }
  0x7f   : > { %10439 = vmatmul.msk.f32.gmra.mxu2 %vm312_vm2, %v12460_v56  ;;  %v12504_v56 = vsel %vm304_vm1, %v985_v62, %v12489_v4  ;;  %20041 = vst [vmem:[#allocation81_spill] sm:$0xff] %v12519_v20  ;;  %v12525_v62 = vld [vmem:[%s11932_s19 + $0x220] sm:$0xff]  ;;  %v1174_v17 = vrot.slane %v12531_v24, 1 }
  0x80   : > { %10444 = vmatmul.msk.f32.gmra.mxu3 %vm312_vm2, %v12463_v30  ;;  %20036 = vst [vmem:[#allocation76_spill] sm:$0xff] %v12492_v55  ;;  %v12500_v30 = vsel %vm304_vm1, %v937_v2, %v12486_v40  ;;  %v12508_v32 = vsel %vm304_vm1, %v1033_v54, %v12492_v55  ;;  %v12522_v2 = vld [vmem:[%s11932_s19 + $0x208] sm:$0xff] }
  0x81   : > { %20038 = vst [vmem:[#allocation78_spill] sm:$0xff] %v12500_v30  ;;  %v12528_v54 = vld [vmem:[%s11932_s19 + $0x228] sm:$0xff]  ;;  %v1079_v61 = vrot.slane %v12522_v2, 1 }
  0x82   : > { %20039 = vst [vmem:[#allocation79_spill] sm:$0xff] %v12504_v56  ;;  %v1127_v25 = vrot.slane %v12528_v54, 1 }
  0x83   : > { %20040 = vst [vmem:[#allocation80_spill] sm:$0xff] %v12508_v32 }
  0x84   : > { %20042 = vst [vmem:[#allocation82_spill] sm:$0xff] %v12522_v2 }
  0x85   : > { %10430 = vmatmul.msk.f32.gmra.mxu0 %vm312_vm2, %v12496_v57  ;;  %20043 = vst [vmem:[#allocation83_spill] sm:$0xff] %v12525_v62  ;;  %v12539_v57 = vld [vmem:[%s11932_s19 + $0x260] sm:$0xff] }
  0x86   : > { %10435 = vmatmul.msk.f32.gmra.mxu1 %vm312_vm2, %v12500_v30  ;;  %20044 = vst [vmem:[#allocation84_spill] sm:$0xff] %v12528_v54  ;;  %v12536_v30 = vld [vmem:[%s11932_s19 + $0x248] sm:$0xff] }
  0x87   : > { %10440 = vmatmul.msk.f32.gmra.mxu2 %vm312_vm2, %v12504_v56  ;;  %20045 = vst [vmem:[#allocation85_spill] sm:$0xff] %v12531_v24  ;;  %v12542_v56 = vld [vmem:[%s11932_s19 + $0x268] sm:$0xff]  ;;  %v12942_v24 = vld [vmem:[%s11932_s19 + $0x310] sm:$0xff] }
  0x88   : > { %10445 = vmatmul.msk.f32.gmra.mxu3 %vm312_vm2, %v12508_v32  ;;  %20046 = vst [vmem:[#allocation86_spill] sm:$0xff] %v12536_v30  ;;  %v1078_v32 = vrot.slane %v12519_v20, 1  ;;  %v1222_v20 = vrot.slane %v12539_v57, 1  ;;  %v1223_v2 = vrot.slane %v12542_v56, 1 }
  0x89   : > { %20047 = vst [vmem:[#allocation87_spill] sm:$0xff] %v12539_v57  ;;  %v12578_v57 = vld [vmem:[%s11932_s19 + $0x230] sm:$0xff] }
  0x8a   : > { %20048 = vst [vmem:[#allocation88_spill] sm:$0xff] %v12542_v56  ;;  %v12753_v56 = vld [vmem:[%s11932_s19 + $0x290] sm:$0xff] }
  0x8b   : > { %20056 = vst [vmem:[#allocation96_spill] sm:$0xff] %v12578_v57 }
  0x8c   : > { %20101 = vst [vmem:[#allocation141_spill] sm:$0xff] %v12753_v56 }
  0x8d   : > { %10431 = vmatmul.msk.f32.gmra.mxu0 %vm312_vm2, %v12479_v23  ;;  %v1126_v23 = vrot.slane %v12525_v62, 1  ;;  %20148 = vst [vmem:[#allocation188_spill] sm:$0xff] %v12942_v24 }
  0x8e   : > { %10436 = vmatmul.msk.f32.gmra.mxu1 %vm312_vm2, %v12486_v40  ;;  %v1175_v40 = vrot.slane %v12536_v30, 1  ;;  %v12575_v30 = vsel %vm304_vm1, %v1222_v20, %v1223_v2 }
  0x8f   : > { %10441 = vmatmul.msk.f32.gmra.mxu2 %vm312_vm2, %v12489_v4  ;;  %v12561_v4 = vsel %vm304_vm1, %v1078_v32, %v1079_v61  ;;  %v12566_v62 = vsel %vm304_vm1, %v1126_v23, %v1127_v25  ;;  %20055 = vst [vmem:[#allocation95_spill] sm:$0xff] %v12575_v30  ;;  %v12583_v32 = vld [vmem:[%s11932_s19 + $0x250] sm:$0xff]  ;;  %v1081_v23 = vrot.slane %v12569_v53, 1 }
  0x90   : > { %10446 = vmatmul.msk.f32.gmra.mxu3 %vm312_vm2, %v12492_v55  ;;  %20050 = vst [vmem:[#allocation90_spill] sm:$0xff] %v12561_v4  ;;  %v12572_v54 = vsel %vm304_vm1, %v1174_v17, %v1175_v40  ;;  %v1129_v17 = vrot.slane %v12578_v57, 1  ;;  %v1177_v20 = vrot.slane %v12583_v32, 1  ;;  %v12621_v57 = vld [vmem:[%s11932_s19 + $0x218] sm:$0x3f] }
  0x91   : > { %20052 = vst [vmem:[#allocation92_spill] sm:$0xff] %v12566_v62 }
  0x92   : > { %v12558_v42 = vpop.f32.mrf.mxu0  ;;  %20054 = vst [vmem:[#allocation94_spill] sm:$0xff] %v12572_v54  ;;  %v12624_v53 = vsel %vm304_vm1, %v1175_v40, %v1177_v20 }
  0x93   : > { %20049 = vst [vmem:[#allocation89_spill] sm:$0xff] %v12558_v42  ;;  %v12563_v55 = vpop.f32.mrf.mxu1  ;;  %v12586_v42 = vld [vmem:[%s11932_s19 + $0x270] sm:$0xff] }
  0x94   : > { %20051 = vst [vmem:[#allocation91_spill] sm:$0xff] %v12563_v55  ;;  %v1225_v55 = vrot.slane %v12586_v42, 1 }
  0x95   : > { %10448 = vmatmul.msk.f32.vlgmr.msra.gmra.mxu0 %vm312_vm2, %v12561_v4  ;;  %20057 = vst [vmem:[#allocation97_spill] sm:$0xff] %v12583_v32  ;;  %v12618_v32 = vsel %vm304_vm1, %v1127_v25, %v1129_v17  ;;  %v12643_v25 = vrot.slane %v12621_v57, 1 }
  0x96   : > { %20058 = vst [vmem:[#allocation98_spill] sm:$0xff] %v12586_v42  ;;  %10453 = vmatmul.msk.f32.vlgmr.msra.gmra.mxu1 %vm312_vm2, %v12566_v62  ;;  %10487 = vmatpush.msk.msra.mxu0 %vm321_vm0, %v11908_v0  ;;  %v12611_v62 = vsel %vm304_vm1, %v1079_v61, %v1081_v23  ;;  %v12635_v61 = vld [vmem:[%s11932_s19 + $0x258] sm:$0x3f] }
  0x97   : > { %10458 = vmatmul.msk.f32.vlgmr.msra.gmra.mxu2 %vm312_vm2, %v12572_v54  ;;  %10492 = vmatpush.msk.msra.mxu1 %vm321_vm0, %v11908_v0  ;;  %20061 = vst [vmem:[#allocation101_spill] sm:$0xff] %v12611_v62 }
  0x98   : > { %10463 = vmatmul.msk.f32.vlgmr.msra.gmra.mxu3 %vm312_vm2, %v12575_v30  ;;  %10497 = vmatpush.msk.msra.mxu2 %vm321_vm0, %v11908_v0  ;;  %20064 = vst [vmem:[#allocation104_spill] sm:$0xff] %v12618_v32 }
  0x99   : > { %10502 = vmatpush.msk.msra.mxu3 %vm321_vm0, %v11908_v0  ;;  %20065 = vst [vmem:[#allocation105_spill] sm:$0xff] %v12621_v57  ;;  %v12627_v0 = vsel %vm304_vm1, %v1223_v2, %v1225_v55  ;;  %v12653_v2 = vrot.slane %v12635_v61, 1 }
  0x9a   : > { %v12606_v54 = vpop.f32.mrf.mxu2  ;;  %v12613_v4 = vpop.f32.mrf.mxu0  ;;  %20066 = vst [vmem:[#allocation106_spill] sm:$0xff] %v12624_v53 }
  0x9b   : > { %20059 = vst [vmem:[#allocation99_spill] sm:$0xff] %v12606_v54  ;;  %v12608_v30 = vpop.f32.mrf.mxu3  ;;  %v12615_v42 = vpop.f32.mrf.mxu1  ;;  %v12630_v54 = vld [vmem:[%s11932_s19 + $0x238] sm:$0x3f] }
  0x9c   : > { %20060 = vst [vmem:[#allocation100_spill] sm:$0xff] %v12608_v30  ;;  %v12650_v40 = vrot.slane %v12630_v54, 1 }
  0x9d   : > { %20062 = vst [vmem:[#allocation102_spill] sm:$0xff] %v12613_v4  ;;  %10449 = vmatmul.msk.f32.gmra.mxu0 %vm312_vm2, %v12611_v62  ;;  %v12638_v4 = vld [vmem:[%s11932_s19 + $0x278] sm:$0x3f] }
  0x9e   : > { %20063 = vst [vmem:[#allocation103_spill] sm:$0xff] %v12615_v42  ;;  %10454 = vmatmul.msk.f32.gmra.mxu1 %vm312_vm2, %v12618_v32  ;;  %v12656_v42 = vrot.slane %v12638_v4, 1 }
  0x9f   : > { %20067 = vst [vmem:[#allocation107_spill] sm:$0xff] %v12627_v0  ;;  %10459 = vmatmul.msk.f32.gmra.mxu2 %vm312_vm2, %v12624_v53  ;;  %v12664_v53 = vsel %vm304_vm1, %v1081_v23, %v12643_v25 }
  0xa0   : > { %20068 = vst [vmem:[#allocation108_spill] sm:$0xff] %v12630_v54  ;;  %10464 = vmatmul.msk.f32.gmra.mxu3 %vm312_vm2, %v12627_v0  ;;  %v12680_v23 = vsel %vm304_vm1, %v1225_v55, %v12656_v42 }
  0xa1   : > { %20069 = vst [vmem:[#allocation109_spill] sm:$0xff] %v12635_v61 }
  0xa2   : > { %20070 = vst [vmem:[#allocation110_spill] sm:$0xff] %v12638_v4  ;;  %v12658_v62 = vpop.f32.mrf.mxu2  ;;  %v12666_v0 = vpop.f32.mrf.mxu0  ;;  %v12672_v4 = vsel %vm304_vm1, %v1129_v17, %v12650_v40 }
  0xa3   : > { %20071 = vst [vmem:[#allocation111_spill] sm:$0xff] %v12643_v25  ;;  %v12660_v32 = vpop.f32.mrf.mxu3  ;;  %v12668_v30 = vpop.f32.mrf.mxu1 }
  0xa4   : > { %20072 = vst [vmem:[#allocation112_spill] sm:$0xff] %v12650_v40 }
  0xa5   : > { %20073 = vst [vmem:[#allocation113_spill] sm:$0xff] %v12653_v2  ;;  %10450 = vmatmul.msk.f32.gmra.mxu0 %vm312_vm2, %v12664_v53 }
  0xa6   : > { %20074 = vst [vmem:[#allocation114_spill] sm:$0xff] %v12656_v42  ;;  %10455 = vmatmul.msk.f32.gmra.mxu1 %vm312_vm2, %v12672_v4 }
  0xa7   : > { %20075 = vst [vmem:[#allocation115_spill] sm:$0xff] %v12658_v62  ;;  %v12676_v62 = vsel %vm304_vm1, %v1177_v20, %v12653_v2 }
  0xa8   : > { %20076 = vst [vmem:[#allocation116_spill] sm:$0xff] %v12660_v32  ;;  %10460 = vmatmul.msk.f32.gmra.mxu2 %vm312_vm2, %v12676_v62  ;;  %10465 = vmatmul.msk.f32.gmra.mxu3 %vm312_vm2, %v12680_v23  ;;  %v12705_v32 = vld [vmem:[%s11932_s19 + $0x2a0] sm:$0xff] }
  0xa9   : > { %20077 = vst [vmem:[#allocation117_spill] sm:$0xff] %v12664_v53  ;;  %v12702_v53 = vld [vmem:[%s11932_s19 + $0x288] sm:$0xff] }
  0xaa   : > { %20078 = vst [vmem:[#allocation118_spill] sm:$0xff] %v12666_v0  ;;  %v12690_v17 = vpop.f32.mrf.mxu2  ;;  %v12694_v55 = vpop.f32.mrf.mxu0  ;;  %v12699_v0 = vld [vmem:[%s11932_s19 + $0x280] sm:$0xff] }
  0xab   : > { %20079 = vst [vmem:[#allocation119_spill] sm:$0xff] %v12668_v30  ;;  %v12692_v20 = vpop.f32.mrf.mxu3  ;;  %v12696_v30 = vpop.f32.mrf.mxu1 }
  0xac   : > { %20080 = vst [vmem:[#allocation120_spill] sm:$0xff] %v12672_v4  ;;  %v12708_v4 = vld [vmem:[%s11932_s19 + $0x2a8] sm:$0xff] }
  0xad   : > { %20081 = vst [vmem:[#allocation121_spill] sm:$0xff] %v12676_v62  ;;  %v12711_v62 = vld [vmem:[%s11932_s19 + $0x2c0] sm:$0xff]  ;;  %10451 = vmatmul.msk.f32.gmra.mxu0 %vm312_vm2, %v12643_v25  ;;  %v1318_v25 = vrot.slane %v12705_v32, 1  ;;  %v1319_v61 = vrot.slane %v12708_v4, 1 }
  0xae   : > { %20082 = vst [vmem:[#allocation122_spill] sm:$0xff] %v12680_v23  ;;  %v12716_v23 = vld [vmem:[%s11932_s19 + $0x2c8] sm:$0xff]  ;;  %10456 = vmatmul.msk.f32.gmra.mxu1 %vm312_vm2, %v12650_v40  ;;  %v1366_v54 = vrot.slane %v12711_v62, 1 }
  0xaf   : > { %20083 = vst [vmem:[#allocation123_spill] sm:$0xff] %v12690_v17  ;;  %v1271_v17 = vrot.slane %v12702_v53, 1  ;;  %v1367_v40 = vrot.slane %v12716_v23, 1 }
  0xb0   : > { %20084 = vst [vmem:[#allocation124_spill] sm:$0xff] %v12692_v20  ;;  %v12719_v20 = vld [vmem:[%s11932_s19 + $0x2e0] sm:$0xff]  ;;  %10461 = vmatmul.msk.f32.gmra.mxu2 %vm312_vm2, %v12653_v2  ;;  %10466 = vmatmul.msk.f32.gmra.mxu3 %vm312_vm2, %v12656_v42 }
  0xb1   : > { %20085 = vst [vmem:[#allocation125_spill] sm:$0xff] %v12694_v55  ;;  %v12722_v55 = vld [vmem:[%s11932_s19 + $0x2e8] sm:$0xff] }
  0xb2   : > { %20086 = vst [vmem:[#allocation126_spill] sm:$0xff] %v12696_v30  ;;  %v1270_v30 = vrot.slane %v12699_v0, 1  ;;  %v12738_v57 = vpop.f32.mrf.mxu2 }
  0xb3   : > { %20087 = vst [vmem:[#allocation127_spill] sm:$0xff] %v12699_v0  ;;  %v1414_v0 = vrot.slane %v12719_v20, 1  ;;  %v12740_v2 = vpop.f32.mrf.mxu3 }
  0xb4   : > { %20088 = vst [vmem:[#allocation128_spill] sm:$0xff] %v12702_v53  ;;  %v1415_v53 = vrot.slane %v12722_v55, 1  ;;  %v12743_v42 = vsel %vm304_vm1, %v1270_v30, %v1271_v17  ;;  %v12767_v30 = vld [vmem:[%s11932_s19 + $0x2d0] sm:$0xff] }
  0xb5   : > { %20089 = vst [vmem:[#allocation129_spill] sm:$0xff] %v12705_v32  ;;  %v12745_v32 = vpop.f32.mrf.mxu0  ;;  %10468 = vmatmul.msk.f32.vlgmr.msrb.gmra.mxu0 %vm312_vm2, %v12743_v42 }
  0xb6   : > { %20090 = vst [vmem:[#allocation130_spill] sm:$0xff] %v12708_v4  ;;  %v12747_v4 = vpop.f32.mrf.mxu1 }
  0xb7   : > { %20091 = vst [vmem:[#allocation131_spill] sm:$0xff] %v12711_v62  ;;  %v12750_v62 = vsel %vm304_vm1, %v1318_v25, %v1319_v61  ;;  %v1273_v25 = vrot.slane %v12753_v56, 1 }
  0xb8   : > { %20092 = vst [vmem:[#allocation132_spill] sm:$0xff] %v12716_v23  ;;  %v12756_v23 = vsel %vm304_vm1, %v1366_v54, %v1367_v40  ;;  %10473 = vmatmul.msk.f32.vlgmr.msrb.gmra.mxu1 %vm312_vm2, %v12750_v62 }
  0xb9   : > { %20093 = vst [vmem:[#allocation133_spill] sm:$0xff] %v12719_v20  ;;  %10478 = vmatmul.msk.f32.vlgmr.msrb.gmra.mxu2 %vm312_vm2, %v12756_v23 }
  0xba   : > { %20094 = vst [vmem:[#allocation134_spill] sm:$0xff] %v12722_v55  ;;  %v12759_v55 = vsel %vm304_vm1, %v1414_v0, %v1415_v53  ;;  %v12783_v0 = vld [vmem:[%s19372_s1] sm:$0x7] }
  0xbb   : > { %20095 = vst [vmem:[#allocation135_spill] sm:$0xff] %v12738_v57  ;;  %v12762_v57 = vld [vmem:[%s11932_s19 + $0x2b0] sm:$0xff]  ;;  %10483 = vmatmul.msk.f32.vlgmr.msrb.gmra.mxu3 %vm312_vm2, %v12759_v55  ;;  %10517 = vmatpush.msk.msrb.mxu2 %vm321_vm0, %v12783_v0 }
  0xbc   : > { %20096 = vst [vmem:[#allocation136_spill] sm:$0xff] %v12740_v2  ;;  %v1321_v54 = vrot.slane %v12762_v57, 1  ;;  %10522 = vmatpush.msk.msrb.mxu3 %vm321_vm0, %v12783_v0  ;;  %10507 = vmatpush.msk.msrb.mxu0 %vm321_vm0, %v12783_v0 }
  0xbd   : > { %20097 = vst [vmem:[#allocation137_spill] sm:$0xff] %v12743_v42  ;;  %10512 = vmatpush.msk.msrb.mxu1 %vm321_vm0, %v12783_v0  ;;  %v12800_v42 = vsel %vm304_vm1, %v1271_v17, %v1273_v25  ;;  %v12802_v2 = vpop.f32.mrf.mxu0  ;;  %v12824_v17 = vld [vmem:[%s11932_s19 + $0x2d8] sm:$0x3f] }
  0xbe   : > { %20098 = vst [vmem:[#allocation138_spill] sm:$0xff] %v12745_v32  ;;  %v12770_v32 = vld [vmem:[%s11932_s19 + $0x2f0] sm:$0xff]  ;;  %10469 = vmatmul.msk.f32.gmra.mxu0 %vm312_vm2, %v12800_v42 }
  0xbf   : > { %20099 = vst [vmem:[#allocation139_spill] sm:$0xff] %v12747_v4  ;;  %v1369_v4 = vrot.slane %v12767_v30, 1 }
  0xc0   : > { %20100 = vst [vmem:[#allocation140_spill] sm:$0xff] %v12750_v62  ;;  %v1417_v62 = vrot.slane %v12770_v32, 1 }
  0xc1   : > { %20102 = vst [vmem:[#allocation142_spill] sm:$0xff] %v12756_v23  ;;  %v12797_v23 = vpop.f32.mrf.mxu3  ;;  %v12813_v56 = vsel %vm304_vm1, %v1367_v40, %v1369_v4  ;;  %v12842_v40 = vrot.slane %v12824_v17, 1 }
  0xc2   : > { %20103 = vst [vmem:[#allocation143_spill] sm:$0xff] %v12759_v55  ;;  %v12795_v55 = vpop.f32.mrf.mxu2  ;;  %v12816_v20 = vsel %vm304_vm1, %v1415_v53, %v1417_v62  ;;  %10479 = vmatmul.msk.f32.gmra.mxu2 %vm312_vm2, %v12813_v56 }
  0xc3   : > { %20104 = vst [vmem:[#allocation144_spill] sm:$0xff] %v12762_v57  ;;  %v12810_v57 = vld [vmem:[%s11932_s19 + $0x298] sm:$0x3f]  ;;  %10484 = vmatmul.msk.f32.gmra.mxu3 %vm312_vm2, %v12816_v20 }
  0xc4   : > { %20105 = vst [vmem:[#allocation145_spill] sm:$0xff] %v12767_v30  ;;  %v12807_v30 = vsel %vm304_vm1, %v1319_v61, %v1321_v54  ;;  %v12832_v61 = vrot.slane %v12810_v57, 1 }
  0xc5   : > { %20106 = vst [vmem:[#allocation146_spill] sm:$0xff] %v12770_v32  ;;  %v12804_v32 = vpop.f32.mrf.mxu1  ;;  %10474 = vmatmul.msk.f32.gmra.mxu1 %vm312_vm2, %v12807_v30 }
  0xc6   : > { %20107 = vst [vmem:[#allocation147_spill] sm:$0xff] %v12795_v55  ;;  %v12819_v55 = vld [vmem:[%s11932_s19 + $0x2b8] sm:$0x3f] }
  0xc7   : > { %20108 = vst [vmem:[#allocation148_spill] sm:$0xff] %v12797_v23  ;;  %v12839_v53 = vrot.slane %v12819_v55, 1 }
  0xc8   : > { %20109 = vst [vmem:[#allocation149_spill] sm:$0xff] %v12800_v42 }
  0xc9   : > { %20110 = vst [vmem:[#allocation150_spill] sm:$0xff] %v12802_v2  ;;  %v12827_v2 = vld [vmem:[%s11932_s19 + $0x2f8] sm:$0x3f] }
  0xca   : > { %20111 = vst [vmem:[#allocation151_spill] sm:$0xff] %v12804_v32  ;;  %v12845_v32 = vrot.slane %v12827_v2, 1  ;;  %v12847_v42 = vpop.f32.mrf.mxu2 }
  0xcb   : > { %20112 = vst [vmem:[#allocation152_spill] sm:$0xff] %v12807_v30  ;;  %v12849_v30 = vpop.f32.mrf.mxu3 }
  0xcc   : > { %20113 = vst [vmem:[#allocation153_spill] sm:$0xff] %v12810_v57 }
  0xcd   : > { %20114 = vst [vmem:[#allocation154_spill] sm:$0xff] %v12813_v56  ;;  %v12853_v56 = vsel %vm304_vm1, %v1273_v25, %v12832_v61  ;;  %v12857_v23 = vpop.f32.mrf.mxu1  ;;  %v12869_v25 = vsel %vm304_vm1, %v1417_v62, %v12845_v32 }
  0xce   : > { %20115 = vst [vmem:[#allocation155_spill] sm:$0xff] %v12816_v20  ;;  %v12855_v20 = vpop.f32.mrf.mxu0  ;;  %10470 = vmatmul.msk.f32.gmra.mxu0 %vm312_vm2, %v12853_v56  ;;  %10485 = vmatmul.msk.f32.gmra.mxu3 %vm312_vm2, %v12869_v25 }
  0xcf   : > { %20116 = vst [vmem:[#allocation156_spill] sm:$0xff] %v12819_v55 }
  0xd0   : > { %20117 = vst [vmem:[#allocation157_spill] sm:$0xff] %v12824_v17 }
  0xd1   : > { %20118 = vst [vmem:[#allocation158_spill] sm:$0xff] %v12827_v2  ;;  %v12861_v2 = vsel %vm304_vm1, %v1321_v54, %v12839_v53 }
  0xd2   : > { %20119 = vst [vmem:[#allocation159_spill] sm:$0xff] %v12832_v61  ;;  %10475 = vmatmul.msk.f32.gmra.mxu1 %vm312_vm2, %v12861_v2 }
  0xd3   : > { %20120 = vst [vmem:[#allocation160_spill] sm:$0xff] %v12839_v53  ;;  %v12881_v54 = vpop.f32.mrf.mxu3 }
  0xd4   : > { %20121 = vst [vmem:[#allocation161_spill] sm:$0xff] %v12842_v40 }
  0xd5   : > { %20122 = vst [vmem:[#allocation162_spill] sm:$0xff] %v12845_v32 }
  0xd6   : > { %20123 = vst [vmem:[#allocation163_spill] sm:$0xff] %v12847_v42  ;;  %v12865_v42 = vsel %vm304_vm1, %v1369_v4, %v12842_v40  ;;  %v12879_v4 = vpop.f32.mrf.mxu2  ;;  %v12883_v62 = vpop.f32.mrf.mxu0  ;;  %10471 = vmatmul.msk.f32.gmra.mxu0 %vm312_vm2, %v12832_v61  ;;  %10486 = vmatmul.msk.f32.gmra.mxu3 %vm312_vm2, %v12845_v32 }
  0xd7   : > { %20124 = vst [vmem:[#allocation164_spill] sm:$0xff] %v12849_v30  ;;  %10480 = vmatmul.msk.f32.gmra.mxu2 %vm312_vm2, %v12865_v42  ;;  %v12894_v30 = vld [vmem:[%s11932_s19 + $0x320] sm:$0xff] }
  0xd8   : > { %20125 = vst [vmem:[#allocation165_spill] sm:$0xff] %v12853_v56  ;;  %v12891_v56 = vld [vmem:[%s11932_s19 + $0x308] sm:$0xff]  ;;  %v1510_v61 = vrot.slane %v12894_v30, 1 }
  0xd9   : > { %20126 = vst [vmem:[#allocation166_spill] sm:$0xff] %v12855_v20  ;;  %v12888_v20 = vld [vmem:[%s11932_s19 + $0x300] sm:$0xff] }
  0xda   : > { %20127 = vst [vmem:[#allocation167_spill] sm:$0xff] %v12857_v23  ;;  %v12885_v23 = vpop.f32.mrf.mxu1  ;;  %10476 = vmatmul.msk.f32.gmra.mxu1 %vm312_vm2, %v12839_v53 }
  0xdb   : > { %20128 = vst [vmem:[#allocation168_spill] sm:$0xff] %v12861_v2  ;;  %v12897_v2 = vld [vmem:[%s11932_s19 + $0x328] sm:$0xff] }
  0xdc   : > { %20129 = vst [vmem:[#allocation169_spill] sm:$0xff] %v12865_v42  ;;  %v12900_v42 = vld [vmem:[%s11932_s19 + $0x340] sm:$0xff]  ;;  %v1511_v17 = vrot.slane %v12897_v2, 1 }
  0xdd   : > { %20130 = vst [vmem:[#allocation170_spill] sm:$0xff] %v12869_v25  ;;  %v12905_v25 = vld [vmem:[%s11932_s19 + $0x348] sm:$0xff]  ;;  %v1558_v55 = vrot.slane %v12900_v42, 1 }
  0xde   : > { %20131 = vst [vmem:[#allocation171_spill] sm:$0xff] %v12879_v4  ;;  %v1463_v4 = vrot.slane %v12891_v56, 1  ;;  %v1559_v53 = vrot.slane %v12905_v25, 1  ;;  %v12927_v57 = vpop.f32.mrf.mxu2 }
  0xdf   : > { %20132 = vst [vmem:[#allocation172_spill] sm:$0xff] %v12881_v54  ;;  %v12908_v54 = vld [vmem:[%s11932_s19 + $0x360] sm:$0xff]  ;;  %10481 = vmatmul.msk.f32.gmra.mxu2 %vm312_vm2, %v12842_v40  ;;  %v12929_v40 = vpop.f32.mrf.mxu3 }
  0xe0   : > { %20133 = vst [vmem:[#allocation173_spill] sm:$0xff] %v12883_v62  ;;  %v12911_v62 = vld [vmem:[%s11932_s19 + $0x368] sm:$0xff] }
  0xe1   : > { %20134 = vst [vmem:[#allocation174_spill] sm:$0xff] %v12885_v23  ;;  %v1462_v23 = vrot.slane %v12888_v20, 1 }
  0xe2   : > { %20135 = vst [vmem:[#allocation175_spill] sm:$0xff] %v12888_v20  ;;  %v1606_v20 = vrot.slane %v12908_v54, 1 }
  0xe3   : > { %20136 = vst [vmem:[#allocation176_spill] sm:$0xff] %v12891_v56  ;;  %v1607_v56 = vrot.slane %v12911_v62, 1  ;;  %v12932_v32 = vsel %vm304_vm1, %v1462_v23, %v1463_v4  ;;  %v12956_v23 = vld [vmem:[%s11932_s19 + $0x350] sm:$0xff] }
  0xe4   : > { %20137 = vst [vmem:[#allocation177_spill] sm:$0xff] %v12894_v30  ;;  %v12934_v30 = vpop.f32.mrf.mxu0  ;;  %10488 = vmatmul.msk.f32.vlgmr.msra.gmra.mxu0 %vm312_vm2, %v12932_v32 }
  0xe5   : > { %20138 = vst [vmem:[#allocation178_spill] sm:$0xff] %v12897_v2  ;;  %v12936_v2 = vpop.f32.mrf.mxu1  ;;  %10527 = vmatpush.msk.msra.mxu0 %vm321_vm0, %v12783_v0 }
  0xe6   : > { %20139 = vst [vmem:[#allocation179_spill] sm:$0xff] %v12900_v42  ;;  %v12939_v42 = vsel %vm304_vm1, %v1510_v61, %v1511_v17  ;;  %v1465_v61 = vrot.slane %v12942_v24, 1 }
  0xe7   : > { %20140 = vst [vmem:[#allocation180_spill] sm:$0xff] %v12905_v25  ;;  %v12945_v25 = vsel %vm304_vm1, %v1558_v55, %v1559_v53  ;;  %10493 = vmatmul.msk.f32.vlgmr.msra.gmra.mxu1 %vm312_vm2, %v12939_v42  ;;  %v1561_v55 = vrot.slane %v12956_v23, 1 }
  0xe8   : > { %20141 = vst [vmem:[#allocation181_spill] sm:$0xff] %v12911_v62  ;;  %v12948_v62 = vsel %vm304_vm1, %v1606_v20, %v1607_v56  ;;  %10498 = vmatmul.msk.f32.vlgmr.msra.gmra.mxu2 %vm312_vm2, %v12945_v25  ;;  %10532 = vmatpush.msk.msra.mxu1 %vm321_vm0, %v12783_v0 }
  0xe9   : > { %20142 = vst [vmem:[#allocation182_spill] sm:$0xff] %v12927_v57  ;;  %v12951_v57 = vld [vmem:[%s11932_s19 + $0x330] sm:$0xff]  ;;  %10503 = vmatmul.msk.f32.vlgmr.msra.gmra.mxu3 %vm312_vm2, %v12948_v62  ;;  %10537 = vmatpush.msk.msra.mxu2 %vm321_vm0, %v12783_v0 }
  0xea   : > { %20143 = vst [vmem:[#allocation183_spill] sm:$0xff] %v12929_v40  ;;  %v1513_v20 = vrot.slane %v12951_v57, 1  ;;  %10542 = vmatpush.msk.msra.mxu3 %vm321_vm0, %v12783_v0 }
  0xeb   : > { %20144 = vst [vmem:[#allocation184_spill] sm:$0xff] %v12932_v32 }
  0xec   : > { %20145 = vst [vmem:[#allocation185_spill] sm:$0xff] %v12934_v30  ;;  %v12959_v30 = vld [vmem:[%s11932_s19 + $0x370] sm:$0xff]  ;;  %v12986_v32 = vpop.f32.mrf.mxu0 }
  0xed   : > { %20146 = vst [vmem:[#allocation186_spill] sm:$0xff] %v12936_v2  ;;  %v1609_v2 = vrot.slane %v12959_v30, 1  ;;  %v12988_v40 = vpop.f32.mrf.mxu1 }
  0xee   : > { %20147 = vst [vmem:[#allocation187_spill] sm:$0xff] %v12939_v42  ;;  %v12984_v42 = vsel %vm304_vm1, %v1463_v4, %v1465_v61  ;;  %v13008_v4 = vld [vmem:[%s11932_s19 + $0x358] sm:$0x3f] }
  0xef   : > { %20149 = vst [vmem:[#allocation189_spill] sm:$0xff] %v12945_v25  ;;  %v12979_v25 = vpop.f32.mrf.mxu2  ;;  %v13000_v24 = vsel %vm304_vm1, %v1607_v56, %v1609_v2  ;;  %10489 = vmatmul.msk.f32.gmra.mxu0 %vm312_vm2, %v12984_v42 }
  0xf0   : > { %20150 = vst [vmem:[#allocation190_spill] sm:$0xff] %v12948_v62  ;;  %v12981_v62 = vpop.f32.mrf.mxu3 }
  0xf1   : > { %20151 = vst [vmem:[#allocation191_spill] sm:$0xff] %v12951_v57  ;;  %v12997_v57 = vsel %vm304_vm1, %v1559_v53, %v1561_v55  ;;  %10504 = vmatmul.msk.f32.gmra.mxu3 %vm312_vm2, %v13000_v24  ;;  %v13026_v53 = vrot.slane %v13008_v4, 1 }
  0xf2   : > { %20152 = vst [vmem:[#allocation192_spill] sm:$0xff] %v12956_v23  ;;  %v12994_v23 = vld [vmem:[%s11932_s19 + $0x318] sm:$0x3f]  ;;  %10499 = vmatmul.msk.f32.gmra.mxu2 %vm312_vm2, %v12997_v57 }
  0xf3   : > { %20153 = vst [vmem:[#allocation193_spill] sm:$0xff] %v12959_v30  ;;  %v12991_v30 = vsel %vm304_vm1, %v1511_v17, %v1513_v20  ;;  %v13016_v17 = vrot.slane %v12994_v23, 1 }
  0xf4   : > { %20154 = vst [vmem:[#allocation194_spill] sm:$0xff] %v12979_v25  ;;  %v13003_v25 = vld [vmem:[%s11932_s19 + $0x338] sm:$0x3f]  ;;  %10494 = vmatmul.msk.f32.gmra.mxu1 %vm312_vm2, %v12991_v30 }
  0xf5   : > { %20155 = vst [vmem:[#allocation195_spill] sm:$0xff] %v12981_v62  ;;  %v13023_v56 = vrot.slane %v13003_v25, 1  ;;  %v13037_v62 = vsel %vm304_vm1, %v1465_v61, %v13016_v17 }
  0xf6   : > { %20156 = vst [vmem:[#allocation196_spill] sm:$0xff] %v12984_v42 }
  0xf7   : > { %20157 = vst [vmem:[#allocation197_spill] sm:$0xff] %v12986_v32  ;;  %v13011_v32 = vld [vmem:[%s11932_s19 + $0x378] sm:$0x3f]  ;;  %v13031_v42 = vpop.f32.mrf.mxu2  ;;  %10490 = vmatmul.msk.f32.gmra.mxu0 %vm312_vm2, %v13037_v62 }
  0xf8   : > { %20158 = vst [vmem:[#allocation198_spill] sm:$0xff] %v12988_v40  ;;  %v13029_v40 = vrot.slane %v13011_v32, 1 }
  0xf9   : > { %20159 = vst [vmem:[#allocation199_spill] sm:$0xff] %v12991_v30  ;;  %v13033_v30 = vpop.f32.mrf.mxu3 }
  0xfa   : > { %20160 = vst [vmem:[#allocation200_spill] sm:$0xff] %v12997_v57  ;;  %v13039_v57 = vpop.f32.mrf.mxu0 }
  0xfb   : > { %20161 = vst [vmem:[#allocation201_spill] sm:$0xff] %v13000_v24  ;;  %v13041_v24 = vpop.f32.mrf.mxu1 }
  0xfc   : > { %20162 = vst [vmem:[#allocation202_spill] sm:$0xff] %v13003_v25  ;;  %v13045_v25 = vsel %vm304_vm1, %v1513_v20, %v13023_v56 }
  0xfd   : > { %20163 = vst [vmem:[#allocation203_spill] sm:$0xff] %v13011_v32  ;;  %v13049_v32 = vsel %vm304_vm1, %v1561_v55, %v13026_v53  ;;  %10495 = vmatmul.msk.f32.gmra.mxu1 %vm312_vm2, %v13045_v25 }
  0xfe   : > { %20164 = vst [vmem:[#allocation204_spill] sm:$0xff] %v13016_v17  ;;  %10500 = vmatmul.msk.f32.gmra.mxu2 %vm312_vm2, %v13049_v32 }
  0xff   : > { %20165 = vst [vmem:[#allocation205_spill] sm:$0xff] %v13023_v56  ;;  %v13063_v61 = vpop.f32.mrf.mxu2  ;;  %10491 = vmatmul.msk.f32.gmra.mxu0 %vm312_vm2, %v13016_v17 }
 0x100   : > { %20166 = vst [vmem:[#allocation206_spill] sm:$0xff] %v13026_v53 }
 0x101   : > { %20167 = vst [vmem:[#allocation207_spill] sm:$0xff] %v13029_v40  ;;  %v13065_v20 = vpop.f32.mrf.mxu3 }
 0x102   : > { %20168 = vst [vmem:[#allocation208_spill] sm:$0xff] %v13031_v42  ;;  %v13053_v42 = vsel %vm304_vm1, %v1609_v2, %v13029_v40  ;;  %v13067_v55 = vpop.f32.mrf.mxu0 }
 0x103   : > { %20169 = vst [vmem:[#allocation209_spill] sm:$0xff] %v13037_v62  ;;  %10505 = vmatmul.msk.f32.gmra.mxu3 %vm312_vm2, %v13053_v42  ;;  %v13069_v2 = vpop.f32.mrf.mxu1 }
 0x104   : > { %20170 = vst [vmem:[#allocation210_spill] sm:$0xff] %v13039_v57 }
 0x105   : > { %20171 = vst [vmem:[#allocation211_spill] sm:$0xff] %v13041_v24  ;;  %10496 = vmatmul.msk.f32.gmra.mxu1 %vm312_vm2, %v13023_v56 }
 0x106   : > { %20172 = vst [vmem:[#allocation212_spill] sm:$0xff] %v13045_v25  ;;  %10501 = vmatmul.msk.f32.gmra.mxu2 %vm312_vm2, %v13026_v53  ;;  %v20290_v53 = vld [vmem:[#allocation134_spill] sm:$0xff] }
 0x107   : > { %20173 = vst [vmem:[#allocation213_spill] sm:$0xff] %v13049_v32  ;;  %v13079_v24 = vpop.f32.mrf.mxu2  ;;  %10508 = vmatmul.msk.f32.vlgmr.msrb.gmra.mxu0 %vm312_vm2, %v11935_v1 }
 0x108   : > { %20174 = vst [vmem:[#allocation214_spill] sm:$0xff] %v13053_v42  ;;  %10547 = vmatpush.msk.msrb.mxu0 %vm321_vm0, %v12783_v0 }
 0x109   : > { %20175 = vst [vmem:[#allocation215_spill] sm:$0xff] %v13067_v55  ;;  %v13081_v57 = vpop.f32.mrf.mxu3 }
 0x10a   : > { %20176 = vst [vmem:[#allocation216_spill] sm:$0xff] %v13069_v2  ;;  %v13083_v55 = vpop.f32.mrf.mxu0 }
 0x10b   : > { %10506 = vmatmul.msk.f32.gmra.mxu3 %vm312_vm2, %v13029_v40  ;;  %20177 = vst [vmem:[#allocation217_spill] sm:$0xff] %v13083_v55  ;;  %v13085_v2 = vpop.f32.mrf.mxu1 }
 0x10c   : > { %20178 = vst [vmem:[#allocation218_spill] sm:$0xff] %v13085_v2 }
 0x10d   : > { %10513 = vmatmul.msk.f32.vlgmr.msrb.gmra.mxu1 %vm312_vm2, %v11939_v3 }
 0x10e   : > { %10518 = vmatmul.msk.f32.vlgmr.msrb.gmra.mxu2 %vm312_vm2, %v11946_v7  ;;  %10552 = vmatpush.msk.msrb.mxu1 %vm321_vm0, %v12783_v0  ;;  %v13112_v7 = vld [vmem:[%s11932_s19 + $0x8] sm:$0xff] }
 0x10f   : > { %10557 = vmatpush.msk.msrb.mxu2 %vm321_vm0, %v12783_v0  ;;  %v13103_v1 = vpop.f32.mrf.mxu2  ;;  %10509 = vmatmul.msk.f32.gmra.mxu0 %vm312_vm2, %v13112_v7 }
 0x111   : > { %v13105_v3 = vpop.f32.mrf.mxu3 }
 0x112   : > { %v13107_v2 = vpop.f32.mrf.mxu0 }
 0x113   : > { %10523 = vmatmul.msk.f32.vlgmr.msrb.gmra.mxu3 %vm312_vm2, %v11955_v12  ;;  %20179 = vst [vmem:[#allocation219_spill] sm:$0xff] %v13107_v2  ;;  %v13109_v55 = vpop.f32.mrf.mxu1 }
 0x114   : > { %10562 = vmatpush.msk.msrb.mxu3 %vm321_vm0, %v12783_v0  ;;  %20180 = vst [vmem:[#allocation220_spill] sm:$0xff] %v13109_v55 }
 0x115   : > { %10514 = vmatmul.msk.f32.gmra.mxu1 %vm312_vm2, %v11943_v6 }
 0x116   : > { %10519 = vmatmul.msk.f32.gmra.mxu2 %vm312_vm2, %v11951_v10 }
 0x117   : > { %v13122_v12 = vpop.f32.mrf.mxu2  ;;  %10510 = vmatmul.msk.f32.gmra.mxu0 %vm312_vm2, %v11965_v18 }
 0x119   : > { %v13124_v40 = vpop.f32.mrf.mxu3 }
 0x11a   : > { %v13126_v2 = vpop.f32.mrf.mxu0 }
 0x11b   : > { %10524 = vmatmul.msk.f32.gmra.mxu3 %vm312_vm2, %v11958_v13  ;;  %20181 = vst [vmem:[#allocation221_spill] sm:$0xff] %v13126_v2  ;;  %v13128_v55 = vpop.f32.mrf.mxu1 }
 0x11c   : > { %20182 = vst [vmem:[#allocation222_spill] sm:$0xff] %v13128_v55 }
 0x11d   : > { %10515 = vmatmul.msk.f32.gmra.mxu1 %vm312_vm2, %v11968_v19 }
 0x11e   : > { %10520 = vmatmul.msk.f32.gmra.mxu2 %vm312_vm2, %v11975_v21 }
 0x11f   : > { %v13138_v6 = vpop.f32.mrf.mxu2  ;;  %10511 = vmatmul.msk.f32.gmra.mxu0 %vm312_vm2, %v12009_v31 }
 0x120   : > { %20183 = vst [vmem:[#allocation223_spill] sm:$0xff] %v13138_v6 }
 0x121   : > { %v13140_v10 = vpop.f32.mrf.mxu3 }
 0x122   : > { %20184 = vst [vmem:[#allocation224_spill] sm:$0xff] %v13140_v10  ;;  %v13142_v13 = vpop.f32.mrf.mxu0 }
 0x123   : > { %10525 = vmatmul.msk.f32.gmra.mxu3 %vm312_vm2, %v11978_v22  ;;  %20185 = vst [vmem:[#allocation225_spill] sm:$0xff] %v13142_v13  ;;  %v13144_v2 = vpop.f32.mrf.mxu1  ;;  %v20269_v13 = vld [vmem:[#allocation93_spill] sm:$0xff] }
 0x124   : > { %20186 = vst [vmem:[#allocation226_spill] sm:$0xff] %v13144_v2 }
 0x125   : > { %10516 = vmatmul.msk.f32.gmra.mxu1 %vm312_vm2, %v12018_v34 }
 0x126   : > { %10521 = vmatmul.msk.f32.gmra.mxu2 %vm312_vm2, %v12022_v35 }
 0x127   : > { %v13154_v18 = vpop.f32.mrf.mxu2  ;;  %10528 = vmatmul.msk.f32.vlgmr.msra.gmra.mxu0 %vm312_vm2, %v12064_v45 }
 0x128   : > { %20187 = vst [vmem:[#allocation227_spill] sm:$0xff] %v13154_v18  ;;  %10567 = vmatpush.msk.msra.mxu0 %vm321_vm0, %v12783_v0  ;;  %v13762_v18 = vld [vmem:[%s11932_s19 + $0xc8] sm:$0xff] }
 0x129   : > { %v13156_v19 = vpop.f32.mrf.mxu3  ;;  %20352 = vst [vmem:[#allocation266_spill] sm:$0xff] %v13762_v18 }
 0x12a   : > { %20188 = vst [vmem:[#allocation228_spill] sm:$0xff] %v13156_v19  ;;  %v13158_v21 = vpop.f32.mrf.mxu0 }
 0x12b   : > { %10526 = vmatmul.msk.f32.gmra.mxu3 %vm312_vm2, %v12025_v36  ;;  %20189 = vst [vmem:[#allocation229_spill] sm:$0xff] %v13158_v21  ;;  %v13160_v22 = vpop.f32.mrf.mxu1 }
 0x12c   : > { %20190 = vst [vmem:[#allocation230_spill] sm:$0xff] %v13160_v22 }
 0x12d   : > { %10533 = vmatmul.msk.f32.vlgmr.msra.gmra.mxu1 %vm312_vm2, %v12070_v47 }
 0x12e   : > { %10538 = vmatmul.msk.f32.vlgmr.msra.gmra.mxu2 %vm312_vm2, %v12076_v49  ;;  %10572 = vmatpush.msk.msra.mxu1 %vm321_vm0, %v12783_v0 }
 0x12f   : > { %10577 = vmatpush.msk.msra.mxu2 %vm321_vm0, %v12783_v0  ;;  %v13178_v31 = vpop.f32.mrf.mxu2  ;;  %10529 = vmatmul.msk.f32.gmra.mxu0 %vm312_vm2, %v12067_v46 }
 0x130   : > { %20191 = vst [vmem:[#allocation231_spill] sm:$0xff] %v13178_v31 }
 0x131   : > { %v13180_v34 = vpop.f32.mrf.mxu3 }
 0x132   : > { %20192 = vst [vmem:[#allocation232_spill] sm:$0xff] %v13180_v34  ;;  %v13182_v35 = vpop.f32.mrf.mxu0 }
 0x133   : > { %10543 = vmatmul.msk.f32.vlgmr.msra.gmra.mxu3 %vm312_vm2, %v12083_v51  ;;  %20193 = vst [vmem:[#allocation233_spill] sm:$0xff] %v13182_v35  ;;  %v13184_v36 = vpop.f32.mrf.mxu1  ;;  %v20266_v35 = vld [vmem:[#allocation88_spill] sm:$0xff] }
 0x134   : > { %10582 = vmatpush.msk.msra.mxu3 %vm321_vm0, %v12783_v0  ;;  %20194 = vst [vmem:[#allocation234_spill] sm:$0xff] %v13184_v36  ;;  %v20265_v36 = vld [vmem:[#allocation86_spill] sm:$0xff] }
 0x135   : > { %10534 = vmatmul.msk.f32.gmra.mxu1 %vm312_vm2, %v12073_v48 }
 0x136   : > { %10539 = vmatmul.msk.f32.gmra.mxu2 %vm312_vm2, %v12080_v50 }
 0x137   : > { %v13194_v45 = vpop.f32.mrf.mxu2  ;;  %10530 = vmatmul.msk.f32.gmra.mxu0 %vm312_vm2, %v12109_v63 }
 0x138   : > { %20195 = vst [vmem:[#allocation235_spill] sm:$0xff] %v13194_v45 }
 0x139   : > { %v13196_v47 = vpop.f32.mrf.mxu3 }
 0x13a   : > { %20196 = vst [vmem:[#allocation236_spill] sm:$0xff] %v13196_v47  ;;  %v13198_v49 = vpop.f32.mrf.mxu0 }
 0x13b   : > { %10544 = vmatmul.msk.f32.gmra.mxu3 %vm312_vm2, %v12086_v52  ;;  %20197 = vst [vmem:[#allocation237_spill] sm:$0xff] %v13198_v49  ;;  %v13200_v51 = vpop.f32.mrf.mxu1 }
 0x13c   : > { %20198 = vst [vmem:[#allocation238_spill] sm:$0xff] %v13200_v51 }
 0x13d   : > { %10535 = vmatmul.msk.f32.gmra.mxu1 %vm312_vm2, %v12118_v5 }
 0x13e   : > { %10540 = vmatmul.msk.f32.gmra.mxu2 %vm312_vm2, %v12123_v8 }
 0x13f   : > { %v13210_v46 = vpop.f32.mrf.mxu2  ;;  %10531 = vmatmul.msk.f32.gmra.mxu0 %vm312_vm2, %v12153_v26 }
 0x140   : > { %20199 = vst [vmem:[#allocation239_spill] sm:$0xff] %v13210_v46 }
 0x141   : > { %v13212_v48 = vpop.f32.mrf.mxu3 }
 0x142   : > { %20200 = vst [vmem:[#allocation240_spill] sm:$0xff] %v13212_v48  ;;  %v13214_v50 = vpop.f32.mrf.mxu0 }
 0x143   : > { %10545 = vmatmul.msk.f32.gmra.mxu3 %vm312_vm2, %v12126_v9  ;;  %20201 = vst [vmem:[#allocation241_spill] sm:$0xff] %v13214_v50  ;;  %v13216_v52 = vpop.f32.mrf.mxu1 }
 0x144   : > { %20202 = vst [vmem:[#allocation242_spill] sm:$0xff] %v13216_v52 }
 0x145   : > { %10536 = vmatmul.msk.f32.gmra.mxu1 %vm312_vm2, %v12162_v29 }
 0x146   : > { %10541 = vmatmul.msk.f32.gmra.mxu2 %vm312_vm2, %v12167_v37 }
 0x147   : > { %v13226_v63 = vpop.f32.mrf.mxu2  ;;  %10548 = vmatmul.msk.f32.vlgmr.msrb.gmra.mxu0 %vm312_vm2, %v12215_v11 }
 0x148   : > { %20203 = vst [vmem:[#allocation243_spill] sm:$0xff] %v13226_v63  ;;  %10587 = vmatpush.msk.msrb.mxu0 %vm321_vm0, %v12783_v0 }
 0x149   : > { %v13228_v5 = vpop.f32.mrf.mxu3 }
 0x14a   : > { %20204 = vst [vmem:[#allocation244_spill] sm:$0xff] %v13228_v5  ;;  %v13230_v8 = vpop.f32.mrf.mxu0 }
 0x14b   : > { %10546 = vmatmul.msk.f32.gmra.mxu3 %vm312_vm2, %v12170_v41  ;;  %20205 = vst [vmem:[#allocation245_spill] sm:$0xff] %v13230_v8  ;;  %v13232_v9 = vpop.f32.mrf.mxu1 }
 0x14c   : > { %20206 = vst [vmem:[#allocation246_spill] sm:$0xff] %v13232_v9 }
 0x14d   : > { %10553 = vmatmul.msk.f32.vlgmr.msrb.gmra.mxu1 %vm312_vm2, %v12221_v15 }
 0x14e   : > { %10558 = vmatmul.msk.f32.vlgmr.msrb.gmra.mxu2 %vm312_vm2, %v12227_v28  ;;  %10592 = vmatpush.msk.msrb.mxu1 %vm321_vm0, %v12783_v0 }
 0x14f   : > { %10597 = vmatpush.msk.msrb.mxu2 %vm321_vm0, %v12783_v0  ;;  %v13250_v26 = vpop.f32.mrf.mxu2  ;;  %10549 = vmatmul.msk.f32.gmra.mxu0 %vm312_vm2, %v12218_v14 }
 0x150   : > { %20207 = vst [vmem:[#allocation247_spill] sm:$0xff] %v13250_v26 }
 0x151   : > { %v13252_v29 = vpop.f32.mrf.mxu3 }
 0x152   : > { %20208 = vst [vmem:[#allocation248_spill] sm:$0xff] %v13252_v29  ;;  %v13254_v37 = vpop.f32.mrf.mxu0 }
 0x153   : > { %10563 = vmatmul.msk.f32.vlgmr.msrb.gmra.mxu3 %vm312_vm2, %v12235_v59  ;;  %20209 = vst [vmem:[#allocation249_spill] sm:$0xff] %v13254_v37  ;;  %v13256_v41 = vpop.f32.mrf.mxu1 }
 0x154   : > { %10602 = vmatpush.msk.msrb.mxu3 %vm321_vm0, %v12783_v0  ;;  %20210 = vst [vmem:[#allocation250_spill] sm:$0xff] %v13256_v41 }
 0x155   : > { %10554 = vmatmul.msk.f32.gmra.mxu1 %vm312_vm2, %v12224_v16 }
 0x156   : > { %10559 = vmatmul.msk.f32.gmra.mxu2 %vm312_vm2, %v12232_v58 }
 0x157   : > { %v13266_v28 = vpop.f32.mrf.mxu2  ;;  %10550 = vmatmul.msk.f32.gmra.mxu0 %vm312_vm2, %v12261_v38  ;;  %v20219_v38 = vld [vmem:[#allocation39_spill] sm:$0xff] }
 0x158   : > { %20211 = vst [vmem:[#allocation251_spill] sm:$0xff] %v13266_v28 }
 0x159   : > { %v13268_v59 = vpop.f32.mrf.mxu3 }
 0x15a   : > { %20212 = vst [vmem:[#allocation252_spill] sm:$0xff] %v13268_v59  ;;  %v13270_v11 = vpop.f32.mrf.mxu0 }
 0x15b   : > { %10564 = vmatmul.msk.f32.gmra.mxu3 %vm312_vm2, %v12238_v27  ;;  %20213 = vst [vmem:[#allocation253_spill] sm:$0xff] %v13270_v11  ;;  %v13272_v15 = vpop.f32.mrf.mxu1  ;;  %v20236_v11 = vld [vmem:[#allocation56_spill] sm:$0xff] }
 0x15c   : > { %20214 = vst [vmem:[#allocation254_spill] sm:$0xff] %v13272_v15 }
 0x15d   : > { %10555 = vmatmul.msk.f32.gmra.mxu1 %vm312_vm2, %v12270_v44 }
 0x15e   : > { %10560 = vmatmul.msk.f32.gmra.mxu2 %vm312_vm2, %v12275_v43  ;;  %v20220_v43 = vld [vmem:[#allocation40_spill] sm:$0xff] }
 0x15f   : > { %v13282_v27 = vpop.f32.mrf.mxu2  ;;  %10551 = vmatmul.msk.f32.gmra.mxu0 %vm312_vm2, %v12305_v39  ;;  %v20226_v39 = vld [vmem:[#allocation51_spill] sm:$0xff] }
 0x160   : > { %20215 = vst [vmem:[#allocation255_spill] sm:$0xff] %v13282_v27 }
 0x161   : > { %v13284_v58 = vpop.f32.mrf.mxu3 }
 0x162   : > { %20216 = vst [vmem:[#allocation256_spill] sm:$0xff] %v13284_v58  ;;  %v13286_v14 = vpop.f32.mrf.mxu0 }
 0x163   : > { %10565 = vmatmul.msk.f32.gmra.mxu3 %vm312_vm2, %v12278_v60  ;;  %20217 = vst [vmem:[#allocation257_spill] sm:$0xff] %v13286_v14  ;;  %v13288_v16 = vpop.f32.mrf.mxu1 }
 0x164   : > { %20218 = vst [vmem:[#allocation258_spill] sm:$0xff] %v13288_v16  ;;  %v20225_v16 = vld [vmem:[#allocation49_spill] sm:$0xff] }
 0x165   : > { %10556 = vmatmul.msk.f32.gmra.mxu1 %vm312_vm2, %v12314_v33  ;;  %v20227_v33 = vld [vmem:[#allocation53_spill] sm:$0xff] }
 0x166   : > { %10561 = vmatmul.msk.f32.gmra.mxu2 %vm312_vm2, %v20219_v38  ;;  %v20228_v38 = vld [vmem:[#allocation55_spill] sm:$0xff] }
 0x167   : > { %v13298_v44 = vpop.f32.mrf.mxu2  ;;  %10568 = vmatmul.msk.f32.vlgmr.msra.gmra.mxu0 %vm312_vm2, %v20225_v16 }
 0x168   : > { %20221 = vst [vmem:[#allocation39_spill] sm:$0xff] %v13298_v44  ;;  %10607 = vmatpush.msk.msra.mxu0 %vm321_vm0, %v12783_v0  ;;  %v11647_v44 = vld [vmem:[%s11932_s19 + $0x68] sm:$0xff] }
 0x169   : > { %v13300_v60 = vpop.f32.mrf.mxu3 }
 0x16a   : > { %20222 = vst [vmem:[#allocation40_spill] sm:$0xff] %v13300_v60  ;;  %v13302_v15 = vpop.f32.mrf.mxu0  ;;  %v13604_v60 = vld [vmem:[%s11932_s19 + $0x60] sm:$0xff] }
 0x16b   : > { %10566 = vmatmul.msk.f32.gmra.mxu3 %vm312_vm2, %v20220_v43  ;;  %20223 = vst [vmem:[#allocation259_spill] sm:$0xff] %v13302_v15  ;;  %v13304_v14 = vpop.f32.mrf.mxu1  ;;  %v20235_v15 = vld [vmem:[#allocation54_spill] sm:$0xff] }
 0x16c   : > { %20224 = vst [vmem:[#allocation260_spill] sm:$0xff] %v13304_v14 }
 0x16d   : > { %10573 = vmatmul.msk.f32.vlgmr.msra.gmra.mxu1 %vm312_vm2, %v20226_v39 }
 0x16e   : > { %10578 = vmatmul.msk.f32.vlgmr.msra.gmra.mxu2 %vm312_vm2, %v20227_v33  ;;  %10612 = vmatpush.msk.msra.mxu1 %vm321_vm0, %v12783_v0  ;;  %v20233_v33 = vld [vmem:[#allocation50_spill] sm:$0xff] }
 0x16f   : > { %10617 = vmatpush.msk.msra.mxu2 %vm321_vm0, %v12783_v0  ;;  %v13322_v16 = vpop.f32.mrf.mxu2  ;;  %10569 = vmatmul.msk.f32.gmra.mxu0 %vm312_vm2, %v20233_v33  ;;  %v20242_v33 = vld [vmem:[#allocation62_spill] sm:$0xff] }
 0x170   : > { %20229 = vst [vmem:[#allocation49_spill] sm:$0xff] %v13322_v16  ;;  %v11645_v16 = vld [vmem:[%s11932_s19 + $0x48] sm:$0xff] }
 0x171   : > { %v13324_v43 = vpop.f32.mrf.mxu3 }
 0x172   : > { %20230 = vst [vmem:[#allocation51_spill] sm:$0xff] %v13324_v43  ;;  %v13326_v39 = vpop.f32.mrf.mxu0 }
 0x173   : > { %10583 = vmatmul.msk.f32.vlgmr.msra.gmra.mxu3 %vm312_vm2, %v20228_v38  ;;  %20231 = vst [vmem:[#allocation53_spill] sm:$0xff] %v13326_v39  ;;  %v13328_v14 = vpop.f32.mrf.mxu1  ;;  %v20234_v38 = vld [vmem:[#allocation52_spill] sm:$0xff] }
 0x174   : > { %10622 = vmatpush.msk.msra.mxu3 %vm321_vm0, %v12783_v0  ;;  %20232 = vst [vmem:[#allocation55_spill] sm:$0xff] %v13328_v14  ;;  %v20241_v14 = vld [vmem:[#allocation59_spill] sm:$0xff] }
 0x175   : > { %10574 = vmatmul.msk.f32.gmra.mxu1 %vm312_vm2, %v20234_v38  ;;  %v20243_v38 = vld [vmem:[#allocation63_spill] sm:$0xff] }
 0x176   : > { %10579 = vmatmul.msk.f32.gmra.mxu2 %vm312_vm2, %v20235_v15  ;;  %v20244_v15 = vld [vmem:[#allocation64_spill] sm:$0xff] }
 0x177   : > { %v13338_v41 = vpop.f32.mrf.mxu2  ;;  %10570 = vmatmul.msk.f32.gmra.mxu0 %vm312_vm2, %v20241_v14  ;;  %v20250_v14 = vld [vmem:[#allocation70_spill] sm:$0xff] }
 0x178   : > { %20237 = vst [vmem:[#allocation50_spill] sm:$0xff] %v13338_v41  ;;  %v20323_v41 = vld [vmem:[#allocation203_spill] sm:$0xff] }
 0x179   : > { %v13340_v37 = vpop.f32.mrf.mxu3 }
 0x17a   : > { %20238 = vst [vmem:[#allocation52_spill] sm:$0xff] %v13340_v37  ;;  %v13342_v9 = vpop.f32.mrf.mxu0  ;;  %v2691_v37 = vrot.slane %v13112_v7, 2 }
 0x17b   : > { %10584 = vmatmul.msk.f32.gmra.mxu3 %vm312_vm2, %v20236_v11  ;;  %20239 = vst [vmem:[#allocation54_spill] sm:$0xff] %v13342_v9  ;;  %v13344_v39 = vpop.f32.mrf.mxu1 }
 0x17c   : > { %20240 = vst [vmem:[#allocation56_spill] sm:$0xff] %v13344_v39  ;;  %v20249_v39 = vld [vmem:[#allocation67_spill] sm:$0xff] }
 0x17d   : > { %10575 = vmatmul.msk.f32.gmra.mxu1 %vm312_vm2, %v20242_v33  ;;  %v20251_v33 = vld [vmem:[#allocation71_spill] sm:$0xff] }
 0x17e   : > { %10580 = vmatmul.msk.f32.gmra.mxu2 %vm312_vm2, %v20243_v38  ;;  %v20252_v38 = vld [vmem:[#allocation72_spill] sm:$0xff] }
 0x17f   : > { %10571 = vmatmul.msk.f32.gmra.mxu0 %vm312_vm2, %v20249_v39  ;;  %v20258_v39 = vld [vmem:[#allocation83_spill] sm:$0xff] }
 0x181   : > { %v13354_v11 = vpop.f32.mrf.mxu2 }
 0x182   : > { %20245 = vst [vmem:[#allocation59_spill] sm:$0xff] %v13354_v11  ;;  %v13358_v52 = vpop.f32.mrf.mxu0  ;;  %v20316_v11 = vld [vmem:[#allocation188_spill] sm:$0xff] }
 0x183   : > { %10585 = vmatmul.msk.f32.gmra.mxu3 %vm312_vm2, %v20244_v15  ;;  %20247 = vst [vmem:[#allocation63_spill] sm:$0xff] %v13358_v52  ;;  %v13360_v9 = vpop.f32.mrf.mxu1 }
 0x184   : > { %20248 = vst [vmem:[#allocation64_spill] sm:$0xff] %v13360_v9  ;;  %v20257_v9 = vld [vmem:[#allocation81_spill] sm:$0xff] }
 0x185   : > { %10576 = vmatmul.msk.f32.gmra.mxu1 %vm312_vm2, %v20250_v14  ;;  %v20259_v14 = vld [vmem:[#allocation85_spill] sm:$0xff] }
 0x186   : > { %v13356_v8 = vpop.f32.mrf.mxu3  ;;  %10581 = vmatmul.msk.f32.gmra.mxu2 %vm312_vm2, %v20251_v33  ;;  %v20260_v33 = vld [vmem:[#allocation87_spill] sm:$0xff] }
 0x187   : > { %20246 = vst [vmem:[#allocation62_spill] sm:$0xff] %v13356_v8  ;;  %10588 = vmatmul.msk.f32.vlgmr.msrb.gmra.mxu0 %vm312_vm2, %v20257_v9 }
 0x188   : > { %10627 = vmatpush.msk.msrb.mxu0 %vm321_vm0, %v12783_v0 }
 0x189   : > { %v13370_v15 = vpop.f32.mrf.mxu2 }
 0x18a   : > { %20253 = vst [vmem:[#allocation67_spill] sm:$0xff] %v13370_v15  ;;  %v13374_v51 = vpop.f32.mrf.mxu0 }
 0x18b   : > { %10586 = vmatmul.msk.f32.gmra.mxu3 %vm312_vm2, %v20252_v38  ;;  %20255 = vst [vmem:[#allocation71_spill] sm:$0xff] %v13374_v51  ;;  %v13376_v52 = vpop.f32.mrf.mxu1  ;;  %v20289_v51 = vld [vmem:[#allocation132_spill] sm:$0xff] }
 0x18c   : > { %20256 = vst [vmem:[#allocation72_spill] sm:$0xff] %v13376_v52 }
 0x18d   : > { %10593 = vmatmul.msk.f32.vlgmr.msrb.gmra.mxu1 %vm312_vm2, %v20258_v39 }
 0x18e   : > { %v13372_v50 = vpop.f32.mrf.mxu3  ;;  %10598 = vmatmul.msk.f32.vlgmr.msrb.gmra.mxu2 %vm312_vm2, %v20259_v14  ;;  %10632 = vmatpush.msk.msrb.mxu1 %vm321_vm0, %v12783_v0  ;;  %v20263_v14 = vld [vmem:[#allocation82_spill] sm:$0xff] }
 0x18f   : > { %20254 = vst [vmem:[#allocation70_spill] sm:$0xff] %v13372_v50  ;;  %10637 = vmatpush.msk.msrb.mxu2 %vm321_vm0, %v12783_v0  ;;  %10589 = vmatmul.msk.f32.gmra.mxu0 %vm312_vm2, %v20263_v14  ;;  %v20270_v14 = vld [vmem:[#allocation96_spill] sm:$0xff] }
 0x191   : > { %v13394_v9 = vpop.f32.mrf.mxu2 }
 0x192   : > { %v13398_v39 = vpop.f32.mrf.mxu0 }
 0x193   : > { %10603 = vmatmul.msk.f32.vlgmr.msrb.gmra.mxu3 %vm312_vm2, %v20260_v33  ;;  %20261 = vst [vmem:[#allocation81_spill] sm:$0xff] %v13398_v39  ;;  %v13400_v49 = vpop.f32.mrf.mxu1  ;;  %v20264_v33 = vld [vmem:[#allocation84_spill] sm:$0xff] }
 0x194   : > { %10642 = vmatpush.msk.msrb.mxu3 %vm321_vm0, %v12783_v0  ;;  %20262 = vst [vmem:[#allocation83_spill] sm:$0xff] %v13400_v49 }
 0x195   : > { %10594 = vmatmul.msk.f32.gmra.mxu1 %vm312_vm2, %v20264_v33  ;;  %v20271_v33 = vld [vmem:[#allocation97_spill] sm:$0xff] }
 0x196   : > { %v13396_v38 = vpop.f32.mrf.mxu3  ;;  %10599 = vmatmul.msk.f32.gmra.mxu2 %vm312_vm2, %v20265_v36  ;;  %v20272_v36 = vld [vmem:[#allocation98_spill] sm:$0xff] }
 0x197   : > { %10590 = vmatmul.msk.f32.gmra.mxu0 %vm312_vm2, %v20269_v13  ;;  %v20276_v13 = vld [vmem:[#allocation108_spill] sm:$0xff] }
 0x199   : > { %v13410_v0 = vpop.f32.mrf.mxu2 }
 0x19a   : > { %v13414_v21 = vpop.f32.mrf.mxu0 }
 0x19b   : > { %10604 = vmatmul.msk.f32.gmra.mxu3 %vm312_vm2, %v20266_v35  ;;  %20267 = vst [vmem:[#allocation85_spill] sm:$0xff] %v13414_v21  ;;  %v13416_v2 = vpop.f32.mrf.mxu1 }
 0x19c   : > { %20268 = vst [vmem:[#allocation87_spill] sm:$0xff] %v13416_v2  ;;  %v20275_v2 = vld [vmem:[#allocation105_spill] sm:$0xff] }
 0x19d   : > { %10595 = vmatmul.msk.f32.gmra.mxu1 %vm312_vm2, %v20270_v14  ;;  %v20277_v14 = vld [vmem:[#allocation109_spill] sm:$0xff] }
 0x19e   : > { %v13412_v22 = vpop.f32.mrf.mxu3  ;;  %10600 = vmatmul.msk.f32.gmra.mxu2 %vm312_vm2, %v20271_v33  ;;  %v20278_v33 = vld [vmem:[#allocation110_spill] sm:$0xff] }
 0x19f   : > { %10591 = vmatmul.msk.f32.gmra.mxu0 %vm312_vm2, %v20275_v2  ;;  %v20282_v2 = vld [vmem:[#allocation129_spill] sm:$0xff] }
 0x1a1   : > { %v13426_v35 = vpop.f32.mrf.mxu2 }
 0x1a2   : > { %v13430_v49 = vpop.f32.mrf.mxu0 }
 0x1a3   : > { %10605 = vmatmul.msk.f32.gmra.mxu3 %vm312_vm2, %v20272_v36  ;;  %20273 = vst [vmem:[#allocation82_spill] sm:$0xff] %v13430_v49  ;;  %v13432_v21 = vpop.f32.mrf.mxu1 }
 0x1a4   : > { %20274 = vst [vmem:[#allocation84_spill] sm:$0xff] %v13432_v21  ;;  %v20281_v21 = vld [vmem:[#allocation127_spill] sm:$0xff] }
 0x1a5   : > { %10596 = vmatmul.msk.f32.gmra.mxu1 %vm312_vm2, %v20276_v13  ;;  %v20283_v13 = vld [vmem:[#allocation131_spill] sm:$0xff] }
 0x1a6   : > { %v13428_v55 = vpop.f32.mrf.mxu3  ;;  %10601 = vmatmul.msk.f32.gmra.mxu2 %vm312_vm2, %v20277_v14  ;;  %v20284_v14 = vld [vmem:[#allocation133_spill] sm:$0xff] }
 0x1a7   : > { %10608 = vmatmul.msk.f32.vlgmr.msra.gmra.mxu0 %vm312_vm2, %v20281_v21 }
 0x1a9   : > { %v13442_v36 = vpop.f32.mrf.mxu2 }
 0x1aa   : > { %v13446_v52 = vpop.f32.mrf.mxu0 }
 0x1ab   : > { %10606 = vmatmul.msk.f32.gmra.mxu3 %vm312_vm2, %v20278_v33  ;;  %20279 = vst [vmem:[#allocation86_spill] sm:$0xff] %v13446_v52  ;;  %v13448_v49 = vpop.f32.mrf.mxu1  ;;  %v13461_v33 = vld [vmem:[%s19372_s1 + $0x8] sm:$0x7]  ;;  %v20288_v52 = vld [vmem:[#allocation130_spill] sm:$0xff] }
 0x1ac   : > { %20280 = vst [vmem:[#allocation88_spill] sm:$0xff] %v13448_v49  ;;  %10647 = vmatpush.msk.msra.mxu0 %vm321_vm0, %v13461_v33  ;;  %v20287_v49 = vld [vmem:[#allocation128_spill] sm:$0xff] }
 0x1ad   : > { %10613 = vmatmul.msk.f32.vlgmr.msra.gmra.mxu1 %vm312_vm2, %v20282_v2 }
 0x1ae   : > { %v13444_v39 = vpop.f32.mrf.mxu3  ;;  %10618 = vmatmul.msk.f32.vlgmr.msra.gmra.mxu2 %vm312_vm2, %v20283_v13  ;;  %10652 = vmatpush.msk.msra.mxu1 %vm321_vm0, %v13461_v33 }
 0x1af   : > { %10657 = vmatpush.msk.msra.mxu2 %vm321_vm0, %v13461_v33  ;;  %10609 = vmatmul.msk.f32.gmra.mxu0 %vm312_vm2, %v20287_v49  ;;  %v20294_v49 = vld [vmem:[#allocation144_spill] sm:$0xff] }
 0x1b1   : > { %v13471_v21 = vpop.f32.mrf.mxu2 }
 0x1b2   : > { %v13475_v13 = vpop.f32.mrf.mxu0 }
 0x1b3   : > { %10623 = vmatmul.msk.f32.vlgmr.msra.gmra.mxu3 %vm312_vm2, %v20284_v14  ;;  %20285 = vst [vmem:[#allocation93_spill] sm:$0xff] %v13475_v13  ;;  %v13477_v14 = vpop.f32.mrf.mxu1 }
 0x1b4   : > { %10662 = vmatpush.msk.msra.mxu3 %vm321_vm0, %v13461_v33  ;;  %20286 = vst [vmem:[#allocation96_spill] sm:$0xff] %v13477_v14  ;;  %v20293_v14 = vld [vmem:[#allocation141_spill] sm:$0xff] }
 0x1b5   : > { %10614 = vmatmul.msk.f32.gmra.mxu1 %vm312_vm2, %v20288_v52  ;;  %v20295_v52 = vld [vmem:[#allocation145_spill] sm:$0xff] }
 0x1b6   : > { %v13473_v2 = vpop.f32.mrf.mxu3  ;;  %10619 = vmatmul.msk.f32.gmra.mxu2 %vm312_vm2, %v20289_v51  ;;  %v20296_v51 = vld [vmem:[#allocation146_spill] sm:$0xff] }
 0x1b7   : > { %10610 = vmatmul.msk.f32.gmra.mxu0 %vm312_vm2, %v20293_v14  ;;  %v20300_v14 = vld [vmem:[#allocation156_spill] sm:$0xff] }
 0x1b9   : > { %v13487_v56 = vpop.f32.mrf.mxu2 }
 0x1ba   : > { %v13491_v32 = vpop.f32.mrf.mxu0 }
 0x1bb   : > { %10624 = vmatmul.msk.f32.gmra.mxu3 %vm312_vm2, %v20290_v53  ;;  %20291 = vst [vmem:[#allocation97_spill] sm:$0xff] %v13491_v32  ;;  %v13493_v13 = vpop.f32.mrf.mxu1 }
 0x1bc   : > { %20292 = vst [vmem:[#allocation98_spill] sm:$0xff] %v13493_v13  ;;  %v20299_v13 = vld [vmem:[#allocation153_spill] sm:$0xff] }
 0x1bd   : > { %10615 = vmatmul.msk.f32.gmra.mxu1 %vm312_vm2, %v20294_v49  ;;  %v20301_v49 = vld [vmem:[#allocation157_spill] sm:$0xff] }
 0x1be   : > { %v13489_v42 = vpop.f32.mrf.mxu3  ;;  %10620 = vmatmul.msk.f32.gmra.mxu2 %vm312_vm2, %v20295_v52  ;;  %v20302_v52 = vld [vmem:[#allocation158_spill] sm:$0xff] }
 0x1bf   : > { %10611 = vmatmul.msk.f32.gmra.mxu0 %vm312_vm2, %v20299_v13  ;;  %v20306_v13 = vld [vmem:[#allocation177_spill] sm:$0xff] }
 0x1c1   : > { %v13503_v53 = vpop.f32.mrf.mxu2 }
 0x1c2   : > { %v13507_v17 = vpop.f32.mrf.mxu0 }
 0x1c3   : > { %10625 = vmatmul.msk.f32.gmra.mxu3 %vm312_vm2, %v20296_v51  ;;  %20297 = vst [vmem:[#allocation105_spill] sm:$0xff] %v13507_v17  ;;  %v13509_v32 = vpop.f32.mrf.mxu1 }
 0x1c4   : > { %20298 = vst [vmem:[#allocation108_spill] sm:$0xff] %v13509_v32  ;;  %v20305_v32 = vld [vmem:[#allocation175_spill] sm:$0xff] }
 0x1c5   : > { %10616 = vmatmul.msk.f32.gmra.mxu1 %vm312_vm2, %v20300_v14  ;;  %v20307_v14 = vld [vmem:[#allocation179_spill] sm:$0xff] }
 0x1c6   : > { %v13505_v25 = vpop.f32.mrf.mxu3  ;;  %10621 = vmatmul.msk.f32.gmra.mxu2 %vm312_vm2, %v20301_v49 }
 0x1c7   : > { %10628 = vmatmul.msk.f32.vlgmr.msrb.gmra.mxu0 %vm312_vm2, %v20305_v32 }
 0x1c8   : > { %10667 = vmatpush.msk.msrb.mxu0 %vm321_vm0, %v13461_v33 }
 0x1c9   : > { %v13519_v51 = vpop.f32.mrf.mxu2 }
 0x1ca   : > { %v13523_v50 = vpop.f32.mrf.mxu0 }
 0x1cb   : > { %10626 = vmatmul.msk.f32.gmra.mxu3 %vm312_vm2, %v20302_v52  ;;  %20303 = vst [vmem:[#allocation109_spill] sm:$0xff] %v13523_v50  ;;  %v13525_v17 = vpop.f32.mrf.mxu1  ;;  %v20313_v50 = vld [vmem:[#allocation181_spill] sm:$0xff] }
 0x1cc   : > { %20304 = vst [vmem:[#allocation110_spill] sm:$0xff] %v13525_v17  ;;  %v20312_v17 = vld [vmem:[#allocation180_spill] sm:$0xff] }
 0x1cd   : > { %10633 = vmatmul.msk.f32.vlgmr.msrb.gmra.mxu1 %vm312_vm2, %v20306_v13 }
 0x1ce   : > { %v13521_v62 = vpop.f32.mrf.mxu3  ;;  %10638 = vmatmul.msk.f32.vlgmr.msrb.gmra.mxu2 %vm312_vm2, %v20307_v14  ;;  %10672 = vmatpush.msk.msrb.mxu1 %vm321_vm0, %v13461_v33  ;;  %v20310_v14 = vld [vmem:[#allocation176_spill] sm:$0xff] }
 0x1cf   : > { %10677 = vmatpush.msk.msrb.mxu2 %vm321_vm0, %v13461_v33  ;;  %10629 = vmatmul.msk.f32.gmra.mxu0 %vm312_vm2, %v20310_v14  ;;  %v20317_v14 = vld [vmem:[#allocation191_spill] sm:$0xff] }
 0x1d1   : > { %v13543_v32 = vpop.f32.mrf.mxu2 }
 0x1d2   : > { %v13547_v52 = vpop.f32.mrf.mxu0 }
 0x1d3   : > { %10643 = vmatmul.msk.f32.vlgmr.msrb.gmra.mxu3 %vm312_vm2, %v12908_v54  ;;  %20308 = vst [vmem:[#allocation127_spill] sm:$0xff] %v13547_v52  ;;  %v13549_v13 = vpop.f32.mrf.mxu1  ;;  %v20311_v54 = vld [vmem:[#allocation178_spill] sm:$0xff] }
 0x1d4   : > { %10682 = vmatpush.msk.msrb.mxu3 %vm321_vm0, %v13461_v33  ;;  %20309 = vst [vmem:[#allocation129_spill] sm:$0xff] %v13549_v13 }
 0x1d5   : > { %10634 = vmatmul.msk.f32.gmra.mxu1 %vm312_vm2, %v20311_v54  ;;  %v20318_v54 = vld [vmem:[#allocation192_spill] sm:$0xff] }
 0x1d6   : > { %v13545_v49 = vpop.f32.mrf.mxu3  ;;  %10639 = vmatmul.msk.f32.gmra.mxu2 %vm312_vm2, %v20312_v17  ;;  %v20319_v17 = vld [vmem:[#allocation193_spill] sm:$0xff] }
 0x1d7   : > { %10630 = vmatmul.msk.f32.gmra.mxu0 %vm312_vm2, %v20316_v11 }
 0x1d9   : > { %v13559_v15 = vpop.f32.mrf.mxu2 }
 0x1da   : > { %v13563_v52 = vpop.f32.mrf.mxu0 }
 0x1db   : > { %10644 = vmatmul.msk.f32.gmra.mxu3 %vm312_vm2, %v20313_v50  ;;  %20314 = vst [vmem:[#allocation131_spill] sm:$0xff] %v13563_v52  ;;  %v13565_v13 = vpop.f32.mrf.mxu1 }
 0x1dc   : > { %20315 = vst [vmem:[#allocation133_spill] sm:$0xff] %v13565_v13 }
 0x1dd   : > { %10635 = vmatmul.msk.f32.gmra.mxu1 %vm312_vm2, %v20317_v14  ;;  %v11641_v14 = vld [vmem:[%s11932_s19] sm:$0xff] }
 0x1de   : > { %v13561_v8 = vpop.f32.mrf.mxu3  ;;  %10640 = vmatmul.msk.f32.gmra.mxu2 %vm312_vm2, %v20318_v54  ;;  %v2690_v54 = vrot.slane %v11641_v14, 2  ;;  %v13599_v14 = vld [vmem:[%s11932_s19 + $0x40] sm:$0xff] }
 0x1df   : > { %10631 = vmatmul.msk.f32.gmra.mxu0 %vm312_vm2, %v12994_v23  ;;  %v2781_v7 = vrot.slane %v13599_v14, 2 }
 0x1e1   : > { %v13575_v50 = vpop.f32.mrf.mxu2 }
 0x1e2   : > { %v13579_v13 = vpop.f32.mrf.mxu0 }
 0x1e3   : > { %10645 = vmatmul.msk.f32.gmra.mxu3 %vm312_vm2, %v20319_v17  ;;  %20320 = vst [vmem:[#allocation128_spill] sm:$0xff] %v13579_v13  ;;  %v13581_v11 = vpop.f32.mrf.mxu1  ;;  %v20322_v17 = vld [vmem:[#allocation202_spill] sm:$0xff]  ;;  %v11643_v13 = vld [vmem:[%s11932_s19 + $0x28] sm:$0xff] }
 0x1e4   : > { %20321 = vst [vmem:[#allocation130_spill] sm:$0xff] %v13581_v11  ;;  %v13594_v11 = vld [vmem:[%s11932_s19 + $0x20] sm:$0xff]  ;;  %v2738_v43 = vrot.slane %v11643_v13, 2  ;;  %v2692_v13 = vsel %vm2689_vm3, %v2690_v54, %v2691_v37  ;;  %v11648_v54 = vld [vmem:[%s11932_s19 + $0x10] sm:$0xff] }
 0x1e5   : > { %10636 = vmatmul.msk.f32.gmra.mxu1 %vm312_vm2, %v20322_v17  ;;  %v2737_v23 = vrot.slane %v13594_v11, 2  ;;  %v2782_v17 = vrot.slane %v11645_v16, 2  ;;  %v2693_v26 = vrot.slane %v11648_v54, 2 }
 0x1e6   : > { %v13577_v52 = vpop.f32.mrf.mxu3  ;;  %10641 = vmatmul.msk.f32.gmra.mxu2 %vm312_vm2, %v13008_v4  ;;  %v2825_v4 = vrot.slane %v13604_v60, 2 }
 0x1e7   : > { %v13618_v16 = vsel %vm2689_vm3, %v2737_v23, %v2738_v43  ;;  %v13621_v29 = vsel %vm2689_vm3, %v2781_v7, %v2782_v17  ;;  %10648 = vmatmul.msk.f32.vlgmr.msra.gmra.mxu0 %vm312_vm2, %v2692_v13  ;;  %v13637_v23 = vld [vmem:[%s11932_s19 + $0x30] sm:$0xff] }
 0x1e8   : > { %20326 = vst [vmem:[#allocation141_spill] sm:$0xff] %v13618_v16  ;;  %10687 = vmatpush.msk.msra.mxu0 %vm321_vm0, %v13461_v33  ;;  %v2740_v7 = vrot.slane %v13637_v23, 2 }
 0x1e9   : > { %v13608_v58 = vpop.f32.mrf.mxu2  ;;  %20327 = vst [vmem:[#allocation144_spill] sm:$0xff] %v13621_v29 }
 0x1ea   : > { %v13613_v59 = vpop.f32.mrf.mxu0  ;;  %v13664_v63 = vsel %vm2689_vm3, %v2738_v43, %v2740_v7  ;;  %v13681_v43 = vld [vmem:[%s11932_s19 + $0x38] sm:$0x3f] }
 0x1eb   : > { %10646 = vmatmul.msk.f32.gmra.mxu3 %vm312_vm2, %v20323_v41  ;;  %v2826_v41 = vrot.slane %v11647_v44, 2  ;;  %20324 = vst [vmem:[#allocation132_spill] sm:$0xff] %v13613_v59  ;;  %v13615_v28 = vpop.f32.mrf.mxu1 }
 0x1ec   : > { %20325 = vst [vmem:[#allocation134_spill] sm:$0xff] %v13615_v28  ;;  %v13645_v28 = vld [vmem:[%s11932_s19 + $0x70] sm:$0xff] }
 0x1ed   : > { %v13624_v44 = vsel %vm2689_vm3, %v2825_v4, %v2826_v41  ;;  %10653 = vmatmul.msk.f32.vlgmr.msra.gmra.mxu1 %vm312_vm2, %v13618_v16  ;;  %v13641_v4 = vld [vmem:[%s11932_s19 + $0x50] sm:$0xff]  ;;  %v2828_v54 = vrot.slane %v13645_v28, 2  ;;  %20331 = vst [vmem:[#allocation156_spill] sm:$0xff] %v13664_v63 }
 0x1ee   : > { %v13610_v27 = vpop.f32.mrf.mxu3  ;;  %20328 = vst [vmem:[#allocation145_spill] sm:$0xff] %v13624_v44  ;;  %10658 = vmatmul.msk.f32.vlgmr.msra.gmra.mxu2 %vm312_vm2, %v13621_v29  ;;  %v2784_v13 = vrot.slane %v13641_v4, 2  ;;  %10692 = vmatpush.msk.msra.mxu1 %vm321_vm0, %v13461_v33  ;;  %v2694_v29 = vsel %vm2689_vm3, %v2691_v37, %v2693_v26  ;;  %v11652_v37 = vld [vmem:[%s11932_s19 + $0x18] sm:$0x3f] }
 0x1ef   : > { %10697 = vmatpush.msk.msra.mxu2 %vm321_vm0, %v13461_v33  ;;  %v13670_v46 = vsel %vm2689_vm3, %v2826_v41, %v2828_v54  ;;  %10649 = vmatmul.msk.f32.gmra.mxu0 %vm312_vm2, %v2694_v29  ;;  %v2695_v47 = vrot.slane %v11652_v37, 2  ;;  %20334 = vst [vmem:[#allocation175_spill] sm:$0xff] %v13681_v43  ;;  %v13687_v41 = vld [vmem:[%s11932_s19 + $0x58] sm:$0x3f] }
 0x1f0   : > { %v13667_v48 = vsel %vm2689_vm3, %v2782_v17, %v2784_v13  ;;  %20333 = vst [vmem:[#allocation158_spill] sm:$0xff] %v13670_v46  ;;  %v13684_v17 = vrot.slane %v13681_v43, 2  ;;  %v13690_v29 = vrot.slane %v13687_v41, 2 }
 0x1f1   : > { %v13654_v59 = vpop.f32.mrf.mxu2  ;;  %20332 = vst [vmem:[#allocation157_spill] sm:$0xff] %v13667_v48 }
 0x1f2   : > { %v13659_v16 = vpop.f32.mrf.mxu0  ;;  %20335 = vst [vmem:[#allocation177_spill] sm:$0xff] %v13684_v17  ;;  %v13709_v34 = vsel %vm2689_vm3, %v2740_v7, %v13684_v17  ;;  %v13713_v31 = vsel %vm2689_vm3, %v2784_v13, %v13690_v29 }
 0x1f3   : > { %10663 = vmatmul.msk.f32.vlgmr.msra.gmra.mxu3 %vm312_vm2, %v13624_v44  ;;  %20329 = vst [vmem:[#allocation146_spill] sm:$0xff] %v13659_v16  ;;  %v13661_v5 = vpop.f32.mrf.mxu1 }
 0x1f4   : > { %10702 = vmatpush.msk.msra.mxu3 %vm321_vm0, %v13461_v33  ;;  %20330 = vst [vmem:[#allocation153_spill] sm:$0xff] %v13661_v5  ;;  %v13693_v5 = vld [vmem:[%s11932_s19 + $0x78] sm:$0x3f] }
 0x1f5   : > { %10654 = vmatmul.msk.f32.gmra.mxu1 %vm312_vm2, %v13664_v63  ;;  %20336 = vst [vmem:[#allocation179_spill] sm:$0xff] %v13687_v41  ;;  %v13696_v37 = vrot.slane %v13693_v5, 2  ;;  %v13770_v41 = vld [vmem:[%s11932_s19 + $0xe8] sm:$0xff] }
 0x1f6   : > { %v13656_v44 = vpop.f32.mrf.mxu3  ;;  %10659 = vmatmul.msk.f32.gmra.mxu2 %vm312_vm2, %v13667_v48  ;;  %20337 = vst [vmem:[#allocation176_spill] sm:$0xff] %v13690_v29 }
 0x1f7   : > { %20338 = vst [vmem:[#allocation178_spill] sm:$0xff] %v13693_v5  ;;  %v13717_v19 = vsel %vm2689_vm3, %v2828_v54, %v13696_v37  ;;  %v13738_v54 = vld [vmem:[%s11932_s19 + $0x80] sm:$0xff] }
 0x1f8   : > { %20339 = vst [vmem:[#allocation180_spill] sm:$0xff] %v13696_v37  ;;  %v13766_v5 = vld [vmem:[%s11932_s19 + $0xe0] sm:$0xff] }
 0x1f9   : > { %v13698_v16 = vpop.f32.mrf.mxu2  ;;  %20342 = vst [vmem:[#allocation191_spill] sm:$0xff] %v13709_v34 }
 0x1fa   : > { %v13703_v63 = vpop.f32.mrf.mxu0  ;;  %20343 = vst [vmem:[#allocation192_spill] sm:$0xff] %v13713_v31 }
 0x1fb   : > { %10664 = vmatmul.msk.f32.gmra.mxu3 %vm312_vm2, %v13670_v46  ;;  %v2696_v46 = vsel %vm2689_vm3, %v2693_v26, %v2695_v47  ;;  %20340 = vst [vmem:[#allocation181_spill] sm:$0xff] %v13703_v63  ;;  %v13705_v45 = vpop.f32.mrf.mxu1  ;;  %v13742_v63 = vld [vmem:[%s11932_s19 + $0x88] sm:$0xff] }
 0x1fc   : > { %20341 = vst [vmem:[#allocation188_spill] sm:$0xff] %v13705_v45  ;;  %10650 = vmatmul.msk.f32.gmra.mxu0 %vm312_vm2, %v2696_v46  ;;  %v2869_v45 = vrot.slane %v13738_v54, 2 }
 0x1fd   : > { %20344 = vst [vmem:[#allocation193_spill] sm:$0xff] %v13717_v19  ;;  %10655 = vmatmul.msk.f32.gmra.mxu1 %vm312_vm2, %v13709_v34 }
 0x1fe   : > { %v13700_v48 = vpop.f32.mrf.mxu3  ;;  %10660 = vmatmul.msk.f32.gmra.mxu2 %vm312_vm2, %v13713_v31  ;;  %v13758_v31 = vld [vmem:[%s11932_s19 + $0xc0] sm:$0xff]  ;;  %20353 = vst [vmem:[#allocation267_spill] sm:$0xff] %v13766_v5 }
 0x1ff   : > { %20351 = vst [vmem:[#allocation265_spill] sm:$0xff] %v13758_v31  ;;  %v2957_v34 = vrot.slane %v13758_v31, 2 }
 0x200   : > { %20354 = vst [vmem:[#allocation268_spill] sm:$0xff] %v13770_v41 }
 0x201   : > { %v13726_v26 = vpop.f32.mrf.mxu2 }
 0x202   : > { %20345 = vst [vmem:[#allocation202_spill] sm:$0xff] %v13726_v26  ;;  %v13730_v13 = vpop.f32.mrf.mxu0 }
 0x203   : > { %10665 = vmatmul.msk.f32.gmra.mxu3 %vm312_vm2, %v13717_v19  ;;  %20347 = vst [vmem:[#allocation261_spill] sm:$0xff] %v13730_v13  ;;  %v13732_v46 = vpop.f32.mrf.mxu1  ;;  %v2870_v19 = vrot.slane %v13742_v63, 2  ;;  %v13754_v13 = vld [vmem:[%s11932_s19 + $0xa8] sm:$0xff] }
 0x204   : > { %20348 = vst [vmem:[#allocation262_spill] sm:$0xff] %v13732_v46  ;;  %10651 = vmatmul.msk.f32.gmra.mxu0 %vm312_vm2, %v2695_v47  ;;  %v13750_v47 = vld [vmem:[%s11932_s19 + $0xa0] sm:$0xff] }
 0x205   : > { %10656 = vmatmul.msk.f32.gmra.mxu1 %vm312_vm2, %v13684_v17  ;;  %20349 = vst [vmem:[#allocation263_spill] sm:$0xff] %v13750_v47  ;;  %v2913_v46 = vrot.slane %v13750_v47, 2  ;;  %v2914_v17 = vrot.slane %v13754_v13, 2  ;;  %v3002_v47 = vrot.slane %v13770_v41, 2  ;;  %v13778_v31 = vsel %vm2689_vm3, %v2869_v45, %v2870_v19  ;;  %v13798_v45 = vld [vmem:[%s11932_s19 + $0x90] sm:$0xff] }
 0x206   : > { %v13728_v7 = vpop.f32.mrf.mxu3  ;;  %10661 = vmatmul.msk.f32.gmra.mxu2 %vm312_vm2, %v13690_v29  ;;  %20350 = vst [vmem:[#allocation264_spill] sm:$0xff] %v13754_v13  ;;  %v2958_v29 = vrot.slane %v13762_v18, 2 }
 0x207   : > { %20346 = vst [vmem:[#allocation203_spill] sm:$0xff] %v13728_v7 }
 0x208   : > { %20357 = vst [vmem:[#allocation271_spill] sm:$0xff] %v13778_v31  ;;  %v13788_v10 = vsel %vm2689_vm3, %v2957_v34, %v2958_v29  ;;  %v13808_v34 = vld [vmem:[%s11932_s19 + $0xb0] sm:$0xff] }
 0x209   : > { %v13773_v43 = vpop.f32.mrf.mxu2  ;;  %20361 = vst [vmem:[#allocation275_spill] sm:$0xff] %v13788_v10 }
 0x20a   : > { %20355 = vst [vmem:[#allocation269_spill] sm:$0xff] %v13773_v43  ;;  %v13780_v7 = vpop.f32.mrf.mxu0 }
 0x20b   : > { %10666 = vmatmul.msk.f32.gmra.mxu3 %vm312_vm2, %v13696_v37  ;;  %v3001_v37 = vrot.slane %v13766_v5, 2  ;;  %20358 = vst [vmem:[#allocation272_spill] sm:$0xff] %v13780_v7  ;;  %v13782_v18 = vpop.f32.mrf.mxu1  ;;  %v13785_v5 = vsel %vm2689_vm3, %v2913_v46, %v2914_v17  ;;  %v2872_v7 = vrot.slane %v13798_v45, 2  ;;  %v13812_v46 = vld [vmem:[%s11932_s19 + $0xd0] sm:$0xff] }
 0x20c   : > { %20359 = vst [vmem:[#allocation273_spill] sm:$0xff] %v13782_v18  ;;  %10668 = vmatmul.msk.f32.vlgmr.msrb.gmra.mxu0 %vm312_vm2, %v13778_v31  ;;  %v2960_v18 = vrot.slane %v13812_v46, 2 }
 0x20d   : > { %20360 = vst [vmem:[#allocation274_spill] sm:$0xff] %v13785_v5  ;;  %v13791_v41 = vsel %vm2689_vm3, %v3001_v37, %v3002_v47  ;;  %10673 = vmatmul.msk.f32.vlgmr.msrb.gmra.mxu1 %vm312_vm2, %v13785_v5  ;;  %10707 = vmatpush.msk.msrb.mxu0 %vm321_vm0, %v13461_v33  ;;  %v2916_v37 = vrot.slane %v13808_v34, 2  ;;  %v13816_v5 = vld [vmem:[%s11932_s19 + $0xf0] sm:$0xff] }
 0x20e   : > { %v13775_v13 = vpop.f32.mrf.mxu3  ;;  %20362 = vst [vmem:[#allocation276_spill] sm:$0xff] %v13791_v41  ;;  %10678 = vmatmul.msk.f32.vlgmr.msrb.gmra.mxu2 %vm312_vm2, %v13788_v10  ;;  %v3004_v31 = vrot.slane %v13816_v5, 2  ;;  %10712 = vmatpush.msk.msrb.mxu1 %vm321_vm0, %v13461_v33  ;;  %v13840_v43 = vsel %vm2689_vm3, %v2958_v29, %v2960_v18 }
 0x20f   : > { %20356 = vst [vmem:[#allocation270_spill] sm:$0xff] %v13775_v13  ;;  %10717 = vmatpush.msk.msrb.mxu2 %vm321_vm0, %v13461_v33  ;;  %v13837_v13 = vsel %vm2689_vm3, %v2914_v17, %v2916_v37  ;;  %v13860_v17 = vld [vmem:[%s11932_s19 + $0xb8] sm:$0x3f] }
 0x210   : > { %20363 = vst [vmem:[#allocation277_spill] sm:$0xff] %v13798_v45  ;;  %v13843_v26 = vsel %vm2689_vm3, %v3002_v47, %v3004_v31  ;;  %v13863_v29 = vrot.slane %v13860_v17, 2  ;;  %v13866_v47 = vld [vmem:[%s11932_s19 + $0xd8] sm:$0x3f] }
 0x211   : > { %20364 = vst [vmem:[#allocation278_spill] sm:$0xff] %v13808_v34 }
 0x212   : > { %20365 = vst [vmem:[#allocation279_spill] sm:$0xff] %v13812_v46  ;;  %v13830_v46 = vsel %vm2689_vm3, %v2870_v19, %v2872_v7  ;;  %v13850_v19 = vld [vmem:[%s11932_s19 + $0x98] sm:$0x3f] }
 0x213   : > { %10683 = vmatmul.msk.f32.vlgmr.msrb.gmra.mxu3 %vm312_vm2, %v13791_v41  ;;  %20366 = vst [vmem:[#allocation280_spill] sm:$0xff] %v13816_v5  ;;  %v13825_v41 = vpop.f32.mrf.mxu2  ;;  %v13832_v5 = vpop.f32.mrf.mxu0 }
 0x214   : > { %10722 = vmatpush.msk.msrb.mxu3 %vm321_vm0, %v13461_v33  ;;  %20367 = vst [vmem:[#allocation281_spill] sm:$0xff] %v13825_v41  ;;  %v13834_v34 = vpop.f32.mrf.mxu1  ;;  %10669 = vmatmul.msk.f32.gmra.mxu0 %vm312_vm2, %v13830_v46 }
 0x215   : > { %20369 = vst [vmem:[#allocation283_spill] sm:$0xff] %v13830_v46  ;;  %10674 = vmatmul.msk.f32.gmra.mxu1 %vm312_vm2, %v13837_v13 }
 0x216   : > { %v13827_v10 = vpop.f32.mrf.mxu3  ;;  %20370 = vst [vmem:[#allocation284_spill] sm:$0xff] %v13832_v5  ;;  %v13853_v5 = vrot.slane %v13850_v19, 2  ;;  %10679 = vmatmul.msk.f32.gmra.mxu2 %vm312_vm2, %v13840_v43 }
 0x217   : > { %20368 = vst [vmem:[#allocation282_spill] sm:$0xff] %v13827_v10 }
 0x218   : > { %20371 = vst [vmem:[#allocation285_spill] sm:$0xff] %v13834_v34  ;;  %v13869_v34 = vrot.slane %v13866_v47, 2 }
 0x219   : > { %20372 = vst [vmem:[#allocation286_spill] sm:$0xff] %v13837_v13  ;;  %v13872_v13 = vld [vmem:[%s11932_s19 + $0xf8] sm:$0x3f] }
 0x21a   : > { %20373 = vst [vmem:[#allocation287_spill] sm:$0xff] %v13840_v43  ;;  %v13875_v46 = vrot.slane %v13872_v13, 2 }
 0x21b   : > { %20374 = vst [vmem:[#allocation288_spill] sm:$0xff] %v13843_v26  ;;  %10684 = vmatmul.msk.f32.gmra.mxu3 %vm312_vm2, %v13843_v26  ;;  %v13877_v10 = vpop.f32.mrf.mxu2  ;;  %v13883_v26 = vsel %vm2689_vm3, %v2872_v7, %v13853_v5 }
 0x21c   : > { %20375 = vst [vmem:[#allocation289_spill] sm:$0xff] %v13850_v19  ;;  %v13887_v41 = vpop.f32.mrf.mxu1  ;;  %10670 = vmatmul.msk.f32.gmra.mxu0 %vm312_vm2, %v13883_v26 }
 0x21d   : > { %20376 = vst [vmem:[#allocation290_spill] sm:$0xff] %v13853_v5 }
 0x21e   : > { %20377 = vst [vmem:[#allocation291_spill] sm:$0xff] %v13860_v17  ;;  %v13879_v43 = vpop.f32.mrf.mxu3  ;;  %v13885_v17 = vpop.f32.mrf.mxu0 }
 0x21f   : > { %20378 = vst [vmem:[#allocation292_spill] sm:$0xff] %v13863_v29 }
 0x220   : > { %20379 = vst [vmem:[#allocation293_spill] sm:$0xff] %v13866_v47  ;;  %v13891_v47 = vsel %vm2689_vm3, %v2916_v37, %v13863_v29 }
 0x221   : > { %20380 = vst [vmem:[#allocation294_spill] sm:$0xff] %v13869_v34  ;;  %10675 = vmatmul.msk.f32.gmra.mxu1 %vm312_vm2, %v13891_v47 }
 0x222   : > { %20381 = vst [vmem:[#allocation295_spill] sm:$0xff] %v13872_v13  ;;  %v13895_v13 = vsel %vm2689_vm3, %v2960_v18, %v13869_v34 }
 0x223   : > { %20382 = vst [vmem:[#allocation296_spill] sm:$0xff] %v13875_v46  ;;  %10680 = vmatmul.msk.f32.gmra.mxu2 %vm312_vm2, %v13895_v13  ;;  %v13909_v18 = vpop.f32.mrf.mxu2 }
 0x224   : > { %20383 = vst [vmem:[#allocation297_spill] sm:$0xff] %v13877_v10  ;;  %v13915_v37 = vpop.f32.mrf.mxu1  ;;  %10671 = vmatmul.msk.f32.gmra.mxu0 %vm312_vm2, %v13853_v5  ;;  %v13942_v5 = vld [vmem:[%s11932_s19 + $0x140] sm:$0xff]  ;;  %v13954_v10 = vld [vmem:[%s11932_s19 + $0x168] sm:$0xff] }
 0x225   : > { %20384 = vst [vmem:[#allocation298_spill] sm:$0xff] %v13879_v43  ;;  %v13899_v43 = vsel %vm2689_vm3, %v3004_v31, %v13875_v46 }
 0x226   : > { %20385 = vst [vmem:[#allocation299_spill] sm:$0xff] %v13883_v26  ;;  %10685 = vmatmul.msk.f32.gmra.mxu3 %vm312_vm2, %v13899_v43  ;;  %v13911_v7 = vpop.f32.mrf.mxu3  ;;  %v13913_v31 = vpop.f32.mrf.mxu0  ;;  %v3133_v26 = vrot.slane %v13942_v5, 2 }
 0x227   : > { %20386 = vst [vmem:[#allocation300_spill] sm:$0xff] %v13885_v17 }
 0x228   : > { %20387 = vst [vmem:[#allocation301_spill] sm:$0xff] %v13887_v41  ;;  %v13922_v41 = vld [vmem:[%s11932_s19 + $0x100] sm:$0xff] }
 0x229   : > { %20388 = vst [vmem:[#allocation302_spill] sm:$0xff] %v13891_v47  ;;  %10676 = vmatmul.msk.f32.gmra.mxu1 %vm312_vm2, %v13863_v29  ;;  %v3045_v17 = vrot.slane %v13922_v41, 2  ;;  %v13938_v29 = vld [vmem:[%s11932_s19 + $0x128] sm:$0xff] }
 0x22a   : > { %20389 = vst [vmem:[#allocation303_spill] sm:$0xff] %v13895_v13  ;;  %v3090_v47 = vrot.slane %v13938_v29, 2 }
 0x22b   : > { %20390 = vst [vmem:[#allocation304_spill] sm:$0xff] %v13899_v43  ;;  %v13926_v43 = vld [vmem:[%s11932_s19 + $0x108] sm:$0xff]  ;;  %10681 = vmatmul.msk.f32.gmra.mxu2 %vm312_vm2, %v13869_v34 }
 0x22c   : > { %20391 = vst [vmem:[#allocation305_spill] sm:$0xff] %v13909_v18  ;;  %v3046_v13 = vrot.slane %v13926_v43, 2  ;;  %v13950_v18 = vld [vmem:[%s11932_s19 + $0x160] sm:$0xff] }
 0x22d   : > { %20392 = vst [vmem:[#allocation306_spill] sm:$0xff] %v13911_v7  ;;  %v13946_v7 = vld [vmem:[%s11932_s19 + $0x148] sm:$0xff] }
 0x22e   : > { %20393 = vst [vmem:[#allocation307_spill] sm:$0xff] %v13913_v31  ;;  %10686 = vmatmul.msk.f32.gmra.mxu3 %vm312_vm2, %v13875_v46  ;;  %v3134_v34 = vrot.slane %v13946_v7, 2  ;;  %v3177_v46 = vrot.slane %v13950_v18, 2 }
 0x22f   : > { %20394 = vst [vmem:[#allocation308_spill] sm:$0xff] %v13915_v37  ;;  %v13934_v37 = vld [vmem:[%s11932_s19 + $0x120] sm:$0xff] }
 0x230   : > { %20395 = vst [vmem:[#allocation309_spill] sm:$0xff] %v13922_v41  ;;  %v3089_v31 = vrot.slane %v13934_v37, 2  ;;  %v13964_v41 = vpop.f32.mrf.mxu0  ;;  %v13972_v19 = vsel %vm2689_vm3, %v3133_v26, %v3134_v34  ;;  %v13992_v26 = vld [vmem:[%s11932_s19 + $0x130] sm:$0xff] }
 0x231   : > { %20396 = vst [vmem:[#allocation310_spill] sm:$0xff] %v13926_v43  ;;  %v13957_v43 = vpop.f32.mrf.mxu2 }
 0x232   : > { %20397 = vst [vmem:[#allocation311_spill] sm:$0xff] %v13934_v37  ;;  %v3178_v37 = vrot.slane %v13954_v10, 2 }
 0x233   : > { %20398 = vst [vmem:[#allocation312_spill] sm:$0xff] %v13938_v29  ;;  %v13959_v29 = vpop.f32.mrf.mxu3  ;;  %10698 = vmatmul.msk.f32.vlgmr.msra.gmra.mxu2 %vm312_vm2, %v13972_v19 }
 0x234   : > { %20399 = vst [vmem:[#allocation313_spill] sm:$0xff] %v13942_v5  ;;  %v13962_v5 = vsel %vm2689_vm3, %v3045_v17, %v3046_v13  ;;  %v13982_v17 = vld [vmem:[%s11932_s19 + $0x110] sm:$0xff]  ;;  %10737 = vmatpush.msk.msra.mxu2 %vm321_vm0, %v13461_v33 }
 0x235   : > { %20400 = vst [vmem:[#allocation314_spill] sm:$0xff] %v13946_v7  ;;  %v13966_v7 = vpop.f32.mrf.mxu1  ;;  %10688 = vmatmul.msk.f32.vlgmr.msra.gmra.mxu0 %vm312_vm2, %v13962_v5 }
 0x236   : > { %20401 = vst [vmem:[#allocation315_spill] sm:$0xff] %v13950_v18  ;;  %v13969_v18 = vsel %vm2689_vm3, %v3089_v31, %v3090_v47  ;;  %10727 = vmatpush.msk.msra.mxu0 %vm321_vm0, %v13461_v33  ;;  %v13996_v31 = vld [vmem:[%s11932_s19 + $0x150] sm:$0xff] }
 0x237   : > { %20402 = vst [vmem:[#allocation316_spill] sm:$0xff] %v13954_v10  ;;  %v13975_v10 = vsel %vm2689_vm3, %v3177_v46, %v3178_v37  ;;  %10693 = vmatmul.msk.f32.vlgmr.msra.gmra.mxu1 %vm312_vm2, %v13969_v18  ;;  %v3092_v46 = vrot.slane %v13992_v26, 2 }
 0x238   : > { %20403 = vst [vmem:[#allocation317_spill] sm:$0xff] %v13957_v43  ;;  %10703 = vmatmul.msk.f32.vlgmr.msra.gmra.mxu3 %vm312_vm2, %v13975_v10  ;;  %10732 = vmatpush.msk.msra.mxu1 %vm321_vm0, %v13461_v33 }
 0x239   : > { %20404 = vst [vmem:[#allocation318_spill] sm:$0xff] %v13959_v29  ;;  %10742 = vmatpush.msk.msra.mxu3 %vm321_vm0, %v13461_v33  ;;  %v14021_v29 = vsel %vm2689_vm3, %v3090_v47, %v3092_v46 }
 0x23a   : > { %20405 = vst [vmem:[#allocation319_spill] sm:$0xff] %v13962_v5 }
 0x23b   : > { %20406 = vst [vmem:[#allocation320_spill] sm:$0xff] %v13964_v41  ;;  %v3048_v41 = vrot.slane %v13982_v17, 2 }
 0x23c   : > { %20407 = vst [vmem:[#allocation321_spill] sm:$0xff] %v13966_v7  ;;  %v3136_v7 = vrot.slane %v13996_v31, 2 }
 0x23d   : > { %20408 = vst [vmem:[#allocation322_spill] sm:$0xff] %v13969_v18  ;;  %v14000_v18 = vld [vmem:[%s11932_s19 + $0x170] sm:$0xff] }
 0x23e   : > { %20409 = vst [vmem:[#allocation323_spill] sm:$0xff] %v13972_v19  ;;  %v3180_v5 = vrot.slane %v14000_v18, 2  ;;  %v14011_v19 = vpop.f32.mrf.mxu3  ;;  %v14024_v43 = vsel %vm2689_vm3, %v3134_v34, %v3136_v7  ;;  %v14044_v34 = vld [vmem:[%s11932_s19 + $0x138] sm:$0x3f] }
 0x23f   : > { %20410 = vst [vmem:[#allocation324_spill] sm:$0xff] %v13975_v10  ;;  %v14009_v10 = vpop.f32.mrf.mxu2  ;;  %10694 = vmatmul.msk.f32.gmra.mxu1 %vm312_vm2, %v14021_v29  ;;  %10699 = vmatmul.msk.f32.gmra.mxu2 %vm312_vm2, %v14024_v43  ;;  %v14047_v47 = vrot.slane %v14044_v34, 2 }
 0x240   : > { %20411 = vst [vmem:[#allocation325_spill] sm:$0xff] %v13982_v17  ;;  %v14027_v17 = vsel %vm2689_vm3, %v3178_v37, %v3180_v5  ;;  %v14050_v37 = vld [vmem:[%s11932_s19 + $0x158] sm:$0x3f] }
 0x241   : > { %20412 = vst [vmem:[#allocation326_spill] sm:$0xff] %v13992_v26  ;;  %v14018_v26 = vpop.f32.mrf.mxu1  ;;  %10704 = vmatmul.msk.f32.gmra.mxu3 %vm312_vm2, %v14027_v17 }
 0x242   : > { %20413 = vst [vmem:[#allocation327_spill] sm:$0xff] %v13996_v31  ;;  %v14014_v31 = vsel %vm2689_vm3, %v3046_v13, %v3048_v41  ;;  %v14034_v13 = vld [vmem:[%s11932_s19 + $0x118] sm:$0x3f] }
 0x243   : > { %20414 = vst [vmem:[#allocation328_spill] sm:$0xff] %v14000_v18  ;;  %v14016_v18 = vpop.f32.mrf.mxu0  ;;  %10689 = vmatmul.msk.f32.gmra.mxu0 %vm312_vm2, %v14014_v31 }
 0x244   : > { %20415 = vst [vmem:[#allocation329_spill] sm:$0xff] %v14009_v10 }
 0x245   : > { %20416 = vst [vmem:[#allocation330_spill] sm:$0xff] %v14011_v19 }
 0x246   : > { %20417 = vst [vmem:[#allocation331_spill] sm:$0xff] %v14014_v31 }
 0x247   : > { %20418 = vst [vmem:[#allocation332_spill] sm:$0xff] %v14016_v18  ;;  %v14037_v18 = vrot.slane %v14034_v13, 2  ;;  %v14061_v19 = vpop.f32.mrf.mxu2 }
 0x248   : > { %20419 = vst [vmem:[#allocation333_spill] sm:$0xff] %v14018_v26  ;;  %v14053_v26 = vrot.slane %v14050_v37, 2 }
 0x249   : > { %20420 = vst [vmem:[#allocation334_spill] sm:$0xff] %v14021_v29  ;;  %v14056_v29 = vld [vmem:[%s11932_s19 + $0x178] sm:$0x3f]  ;;  %v14071_v10 = vpop.f32.mrf.mxu1 }
 0x24a   : > { %20421 = vst [vmem:[#allocation335_spill] sm:$0xff] %v14024_v43  ;;  %v14059_v31 = vrot.slane %v14056_v29, 2  ;;  %v14063_v43 = vpop.f32.mrf.mxu3 }
 0x24b   : > { %20422 = vst [vmem:[#allocation336_spill] sm:$0xff] %v14027_v17  ;;  %v14067_v17 = vsel %vm2689_vm3, %v3048_v41, %v14037_v18 }
 0x24c   : > { %20423 = vst [vmem:[#allocation337_spill] sm:$0xff] %v14034_v13  ;;  %10690 = vmatmul.msk.f32.gmra.mxu0 %vm312_vm2, %v14067_v17 }
 0x24d   : > { %20424 = vst [vmem:[#allocation338_spill] sm:$0xff] %v14037_v18 }
 0x24e   : > { %20425 = vst [vmem:[#allocation339_spill] sm:$0xff] %v14044_v34  ;;  %v14069_v34 = vpop.f32.mrf.mxu0 }
 0x24f   : > { %20426 = vst [vmem:[#allocation340_spill] sm:$0xff] %v14047_v47  ;;  %v14093_v41 = vpop.f32.mrf.mxu2 }
 0x250   : > { %20427 = vst [vmem:[#allocation341_spill] sm:$0xff] %v14050_v37  ;;  %v14075_v37 = vsel %vm2689_vm3, %v3092_v46, %v14047_v47 }
 0x251   : > { %20428 = vst [vmem:[#allocation342_spill] sm:$0xff] %v14053_v26  ;;  %10695 = vmatmul.msk.f32.gmra.mxu1 %vm312_vm2, %v14075_v37  ;;  %v14099_v46 = vpop.f32.mrf.mxu1 }
 0x252   : > { %20429 = vst [vmem:[#allocation343_spill] sm:$0xff] %v14056_v29  ;;  %v14079_v29 = vsel %vm2689_vm3, %v3136_v7, %v14053_v26  ;;  %v14095_v7 = vpop.f32.mrf.mxu3 }
 0x253   : > { %20430 = vst [vmem:[#allocation344_spill] sm:$0xff] %v14059_v31  ;;  %10700 = vmatmul.msk.f32.gmra.mxu2 %vm312_vm2, %v14079_v29 }
 0x254   : > { %20431 = vst [vmem:[#allocation345_spill] sm:$0xff] %v14061_v19  ;;  %10691 = vmatmul.msk.f32.gmra.mxu0 %vm312_vm2, %v14037_v18  ;;  %v14126_v18 = vld [vmem:[%s11932_s19 + $0x1c0] sm:$0xff]  ;;  %v14138_v19 = vld [vmem:[%s11932_s19 + $0x1e8] sm:$0xff] }
 0x255   : > { %20432 = vst [vmem:[#allocation346_spill] sm:$0xff] %v14063_v43  ;;  %v14083_v43 = vsel %vm2689_vm3, %v3180_v5, %v14059_v31 }
 0x256   : > { %20433 = vst [vmem:[#allocation347_spill] sm:$0xff] %v14067_v17  ;;  %10705 = vmatmul.msk.f32.gmra.mxu3 %vm312_vm2, %v14083_v43  ;;  %v14097_v5 = vpop.f32.mrf.mxu0  ;;  %v3309_v17 = vrot.slane %v14126_v18, 2 }
 0x257   : > { %20434 = vst [vmem:[#allocation348_spill] sm:$0xff] %v14069_v34 }
 0x258   : > { %20435 = vst [vmem:[#allocation349_spill] sm:$0xff] %v14071_v10  ;;  %v14106_v10 = vld [vmem:[%s11932_s19 + $0x180] sm:$0xff] }
 0x259   : > { %20436 = vst [vmem:[#allocation350_spill] sm:$0xff] %v14075_v37  ;;  %10696 = vmatmul.msk.f32.gmra.mxu1 %vm312_vm2, %v14047_v47  ;;  %v3221_v34 = vrot.slane %v14106_v10, 2  ;;  %v14122_v47 = vld [vmem:[%s11932_s19 + $0x1a8] sm:$0xff] }
 0x25a   : > { %20437 = vst [vmem:[#allocation351_spill] sm:$0xff] %v14079_v29  ;;  %v3266_v37 = vrot.slane %v14122_v47, 2 }
 0x25b   : > { %20438 = vst [vmem:[#allocation352_spill] sm:$0xff] %v14083_v43  ;;  %v14110_v43 = vld [vmem:[%s11932_s19 + $0x188] sm:$0xff]  ;;  %10701 = vmatmul.msk.f32.gmra.mxu2 %vm312_vm2, %v14053_v26 }
 0x25c   : > { %20439 = vst [vmem:[#allocation353_spill] sm:$0xff] %v14093_v41  ;;  %v3222_v29 = vrot.slane %v14110_v43, 2  ;;  %v14134_v41 = vld [vmem:[%s11932_s19 + $0x1e0] sm:$0xff] }
 0x25d   : > { %20440 = vst [vmem:[#allocation354_spill] sm:$0xff] %v14095_v7  ;;  %v14130_v7 = vld [vmem:[%s11932_s19 + $0x1c8] sm:$0xff] }
 0x25e   : > { %20441 = vst [vmem:[#allocation355_spill] sm:$0xff] %v14097_v5  ;;  %10706 = vmatmul.msk.f32.gmra.mxu3 %vm312_vm2, %v14059_v31  ;;  %v3310_v26 = vrot.slane %v14130_v7, 2  ;;  %v3353_v31 = vrot.slane %v14134_v41, 2 }
 0x25f   : > { %20442 = vst [vmem:[#allocation356_spill] sm:$0xff] %v14099_v46  ;;  %v14118_v46 = vld [vmem:[%s11932_s19 + $0x1a0] sm:$0xff] }
 0x260   : > { %20443 = vst [vmem:[#allocation357_spill] sm:$0xff] %v14106_v10  ;;  %v3265_v5 = vrot.slane %v14118_v46, 2  ;;  %v14148_v10 = vpop.f32.mrf.mxu0  ;;  %v14156_v13 = vsel %vm2689_vm3, %v3309_v17, %v3310_v26  ;;  %v14176_v17 = vld [vmem:[%s11932_s19 + $0x1b0] sm:$0xff] }
 0x261   : > { %20444 = vst [vmem:[#allocation358_spill] sm:$0xff] %v14110_v43  ;;  %v14141_v43 = vpop.f32.mrf.mxu2 }
 0x262   : > { %20445 = vst [vmem:[#allocation359_spill] sm:$0xff] %v14118_v46  ;;  %v3354_v46 = vrot.slane %v14138_v19, 2 }
 0x263   : > { %20446 = vst [vmem:[#allocation360_spill] sm:$0xff] %v14122_v47  ;;  %v14143_v47 = vpop.f32.mrf.mxu3  ;;  %10718 = vmatmul.msk.f32.vlgmr.msrb.gmra.mxu2 %vm312_vm2, %v14156_v13 }
 0x264   : > { %20447 = vst [vmem:[#allocation361_spill] sm:$0xff] %v14126_v18  ;;  %v14146_v18 = vsel %vm2689_vm3, %v3221_v34, %v3222_v29  ;;  %v14166_v34 = vld [vmem:[%s11932_s19 + $0x190] sm:$0xff]  ;;  %10757 = vmatpush.msk.msrb.mxu2 %vm321_vm0, %v13461_v33 }
 0x265   : > { %20448 = vst [vmem:[#allocation362_spill] sm:$0xff] %v14130_v7  ;;  %v14150_v7 = vpop.f32.mrf.mxu1  ;;  %10708 = vmatmul.msk.f32.vlgmr.msrb.gmra.mxu0 %vm312_vm2, %v14146_v18 }
 0x266   : > { %20449 = vst [vmem:[#allocation363_spill] sm:$0xff] %v14134_v41  ;;  %v14153_v41 = vsel %vm2689_vm3, %v3265_v5, %v3266_v37  ;;  %10747 = vmatpush.msk.msrb.mxu0 %vm321_vm0, %v13461_v33  ;;  %v14180_v5 = vld [vmem:[%s11932_s19 + $0x1d0] sm:$0xff] }
 0x267   : > { %20450 = vst [vmem:[#allocation364_spill] sm:$0xff] %v14138_v19  ;;  %v14159_v19 = vsel %vm2689_vm3, %v3353_v31, %v3354_v46  ;;  %10713 = vmatmul.msk.f32.vlgmr.msrb.gmra.mxu1 %vm312_vm2, %v14153_v41  ;;  %v3268_v31 = vrot.slane %v14176_v17, 2 }
 0x268   : > { %20451 = vst [vmem:[#allocation365_spill] sm:$0xff] %v14141_v43  ;;  %10723 = vmatmul.msk.f32.vlgmr.msrb.gmra.mxu3 %vm312_vm2, %v14159_v19  ;;  %10752 = vmatpush.msk.msrb.mxu1 %vm321_vm0, %v13461_v33 }
 0x269   : > { %20452 = vst [vmem:[#allocation366_spill] sm:$0xff] %v14143_v47  ;;  %10762 = vmatpush.msk.msrb.mxu3 %vm321_vm0, %v13461_v33  ;;  %v14205_v47 = vsel %vm2689_vm3, %v3266_v37, %v3268_v31 }
 0x26a   : > { %20453 = vst [vmem:[#allocation367_spill] sm:$0xff] %v14146_v18 }
 0x26b   : > { %20454 = vst [vmem:[#allocation368_spill] sm:$0xff] %v14148_v10  ;;  %v3224_v10 = vrot.slane %v14166_v34, 2 }
 0x26c   : > { %20455 = vst [vmem:[#allocation369_spill] sm:$0xff] %v14150_v7  ;;  %v3312_v7 = vrot.slane %v14180_v5, 2 }
 0x26d   : > { %20456 = vst [vmem:[#allocation370_spill] sm:$0xff] %v14153_v41  ;;  %v14184_v41 = vld [vmem:[%s11932_s19 + $0x1f0] sm:$0xff] }
 0x26e   : > { %20457 = vst [vmem:[#allocation371_spill] sm:$0xff] %v14156_v13  ;;  %v3356_v18 = vrot.slane %v14184_v41, 2  ;;  %v14195_v13 = vpop.f32.mrf.mxu3  ;;  %v14208_v43 = vsel %vm2689_vm3, %v3310_v26, %v3312_v7  ;;  %v14228_v26 = vld [vmem:[%s11932_s19 + $0x1b8] sm:$0x3f] }
 0x26f   : > { %20458 = vst [vmem:[#allocation372_spill] sm:$0xff] %v14159_v19  ;;  %v14193_v19 = vpop.f32.mrf.mxu2  ;;  %10714 = vmatmul.msk.f32.gmra.mxu1 %vm312_vm2, %v14205_v47  ;;  %10719 = vmatmul.msk.f32.gmra.mxu2 %vm312_vm2, %v14208_v43  ;;  %v14231_v37 = vrot.slane %v14228_v26, 2 }
 0x270   : > { %20459 = vst [vmem:[#allocation373_spill] sm:$0xff] %v14166_v34  ;;  %v14211_v34 = vsel %vm2689_vm3, %v3354_v46, %v3356_v18  ;;  %v14234_v46 = vld [vmem:[%s11932_s19 + $0x1d8] sm:$0x3f] }
 0x271   : > { %20460 = vst [vmem:[#allocation374_spill] sm:$0xff] %v14176_v17  ;;  %v14202_v17 = vpop.f32.mrf.mxu1  ;;  %10724 = vmatmul.msk.f32.gmra.mxu3 %vm312_vm2, %v14211_v34 }
 0x272   : > { %20461 = vst [vmem:[#allocation375_spill] sm:$0xff] %v14180_v5  ;;  %v14198_v5 = vsel %vm2689_vm3, %v3222_v29, %v3224_v10  ;;  %v14218_v29 = vld [vmem:[%s11932_s19 + $0x198] sm:$0x3f] }
 0x273   : > { %20462 = vst [vmem:[#allocation376_spill] sm:$0xff] %v14184_v41  ;;  %v14200_v41 = vpop.f32.mrf.mxu0  ;;  %10709 = vmatmul.msk.f32.gmra.mxu0 %vm312_vm2, %v14198_v5 }
 0x274   : > { %20463 = vst [vmem:[#allocation377_spill] sm:$0xff] %v14193_v19 }
 0x275   : > { %20464 = vst [vmem:[#allocation378_spill] sm:$0xff] %v14195_v13 }
 0x276   : > { %20465 = vst [vmem:[#allocation379_spill] sm:$0xff] %v14198_v5 }
 0x277   : > { %20466 = vst [vmem:[#allocation380_spill] sm:$0xff] %v14200_v41  ;;  %v14221_v41 = vrot.slane %v14218_v29, 2  ;;  %v14245_v13 = vpop.f32.mrf.mxu2 }
 0x278   : > { %20467 = vst [vmem:[#allocation381_spill] sm:$0xff] %v14202_v17  ;;  %v14237_v17 = vrot.slane %v14234_v46, 2 }
 0x279   : > { %20468 = vst [vmem:[#allocation382_spill] sm:$0xff] %v14205_v47  ;;  %v14240_v47 = vld [vmem:[%s11932_s19 + $0x1f8] sm:$0x3f]  ;;  %v14255_v19 = vpop.f32.mrf.mxu1 }
 0x27a   : > { %20469 = vst [vmem:[#allocation383_spill] sm:$0xff] %v14208_v43  ;;  %v14243_v5 = vrot.slane %v14240_v47, 2  ;;  %v14247_v43 = vpop.f32.mrf.mxu3 }
 0x27b   : > { %20470 = vst [vmem:[#allocation384_spill] sm:$0xff] %v14211_v34  ;;  %v14251_v34 = vsel %vm2689_vm3, %v3224_v10, %v14221_v41 }
 0x27c   : > { %20471 = vst [vmem:[#allocation385_spill] sm:$0xff] %v14218_v29  ;;  %10710 = vmatmul.msk.f32.gmra.mxu0 %vm312_vm2, %v14251_v34 }
 0x27d   : > { %20472 = vst [vmem:[#allocation386_spill] sm:$0xff] %v14221_v41 }
 0x27e   : > { %20473 = vst [vmem:[#allocation387_spill] sm:$0xff] %v14228_v26  ;;  %v14253_v26 = vpop.f32.mrf.mxu0 }
 0x27f   : > { %20474 = vst [vmem:[#allocation388_spill] sm:$0xff] %v14231_v37  ;;  %v14277_v10 = vpop.f32.mrf.mxu2 }
 0x280   : > { %20475 = vst [vmem:[#allocation389_spill] sm:$0xff] %v14234_v46  ;;  %v14259_v46 = vsel %vm2689_vm3, %v3268_v31, %v14231_v37 }
 0x281   : > { %20476 = vst [vmem:[#allocation390_spill] sm:$0xff] %v14237_v17  ;;  %10715 = vmatmul.msk.f32.gmra.mxu1 %vm312_vm2, %v14259_v46  ;;  %v14283_v31 = vpop.f32.mrf.mxu1 }
 0x282   : > { %20477 = vst [vmem:[#allocation391_spill] sm:$0xff] %v14240_v47  ;;  %v14263_v47 = vsel %vm2689_vm3, %v3312_v7, %v14237_v17  ;;  %v14279_v7 = vpop.f32.mrf.mxu3 }
 0x283   : > { %20478 = vst [vmem:[#allocation392_spill] sm:$0xff] %v14243_v5  ;;  %10720 = vmatmul.msk.f32.gmra.mxu2 %vm312_vm2, %v14263_v47 }
 0x284   : > { %20479 = vst [vmem:[#allocation393_spill] sm:$0xff] %v14245_v13  ;;  %10711 = vmatmul.msk.f32.gmra.mxu0 %vm312_vm2, %v14221_v41  ;;  %v14310_v41 = vld [vmem:[%s11932_s19 + $0x240] sm:$0xff]  ;;  %v14322_v13 = vld [vmem:[%s11932_s19 + $0x268] sm:$0xff] }
 0x285   : > { %20480 = vst [vmem:[#allocation394_spill] sm:$0xff] %v14247_v43  ;;  %v14267_v43 = vsel %vm2689_vm3, %v3356_v18, %v14243_v5 }
 0x286   : > { %20481 = vst [vmem:[#allocation395_spill] sm:$0xff] %v14251_v34  ;;  %10725 = vmatmul.msk.f32.gmra.mxu3 %vm312_vm2, %v14267_v43  ;;  %v14281_v18 = vpop.f32.mrf.mxu0  ;;  %v3485_v34 = vrot.slane %v14310_v41, 2 }
 0x287   : > { %20482 = vst [vmem:[#allocation396_spill] sm:$0xff] %v14253_v26 }
 0x288   : > { %20483 = vst [vmem:[#allocation397_spill] sm:$0xff] %v14255_v19  ;;  %v14290_v19 = vld [vmem:[%s11932_s19 + $0x200] sm:$0xff] }
 0x289   : > { %20484 = vst [vmem:[#allocation398_spill] sm:$0xff] %v14259_v46  ;;  %10716 = vmatmul.msk.f32.gmra.mxu1 %vm312_vm2, %v14231_v37  ;;  %v3397_v26 = vrot.slane %v14290_v19, 2  ;;  %v14306_v37 = vld [vmem:[%s11932_s19 + $0x228] sm:$0xff] }
 0x28a   : > { %20485 = vst [vmem:[#allocation399_spill] sm:$0xff] %v14263_v47  ;;  %v3442_v46 = vrot.slane %v14306_v37, 2 }
 0x28b   : > { %20486 = vst [vmem:[#allocation400_spill] sm:$0xff] %v14267_v43  ;;  %v14294_v43 = vld [vmem:[%s11932_s19 + $0x208] sm:$0xff]  ;;  %10721 = vmatmul.msk.f32.gmra.mxu2 %vm312_vm2, %v14237_v17 }
 0x28c   : > { %20487 = vst [vmem:[#allocation401_spill] sm:$0xff] %v14277_v10  ;;  %v3398_v47 = vrot.slane %v14294_v43, 2  ;;  %v14318_v10 = vld [vmem:[%s11932_s19 + $0x260] sm:$0xff] }
 0x28d   : > { %20488 = vst [vmem:[#allocation402_spill] sm:$0xff] %v14279_v7  ;;  %v14314_v7 = vld [vmem:[%s11932_s19 + $0x248] sm:$0xff] }
 0x28e   : > { %20489 = vst [vmem:[#allocation403_spill] sm:$0xff] %v14281_v18  ;;  %10726 = vmatmul.msk.f32.gmra.mxu3 %vm312_vm2, %v14243_v5  ;;  %v3486_v17 = vrot.slane %v14314_v7, 2  ;;  %v3529_v5 = vrot.slane %v14318_v10, 2 }
 0x28f   : > { %20490 = vst [vmem:[#allocation404_spill] sm:$0xff] %v14283_v31  ;;  %v14302_v31 = vld [vmem:[%s11932_s19 + $0x220] sm:$0xff] }
 0x290   : > { %20491 = vst [vmem:[#allocation405_spill] sm:$0xff] %v14290_v19  ;;  %v3441_v18 = vrot.slane %v14302_v31, 2  ;;  %v14332_v19 = vpop.f32.mrf.mxu0  ;;  %v14340_v29 = vsel %vm2689_vm3, %v3485_v34, %v3486_v17  ;;  %v14360_v34 = vld [vmem:[%s11932_s19 + $0x230] sm:$0xff] }
 0x291   : > { %20492 = vst [vmem:[#allocation406_spill] sm:$0xff] %v14294_v43  ;;  %v14325_v43 = vpop.f32.mrf.mxu2 }
 0x292   : > { %20493 = vst [vmem:[#allocation407_spill] sm:$0xff] %v14302_v31  ;;  %v3530_v31 = vrot.slane %v14322_v13, 2 }
 0x293   : > { %20494 = vst [vmem:[#allocation408_spill] sm:$0xff] %v14306_v37  ;;  %v14327_v37 = vpop.f32.mrf.mxu3  ;;  %10738 = vmatmul.msk.f32.vlgmr.msra.gmra.mxu2 %vm312_vm2, %v14340_v29 }
 0x294   : > { %20495 = vst [vmem:[#allocation409_spill] sm:$0xff] %v14310_v41  ;;  %v14330_v41 = vsel %vm2689_vm3, %v3397_v26, %v3398_v47  ;;  %v14350_v26 = vld [vmem:[%s11932_s19 + $0x210] sm:$0xff]  ;;  %10777 = vmatpush.msk.msra.mxu2 %vm321_vm0, %v13461_v33 }
 0x295   : > { %20496 = vst [vmem:[#allocation410_spill] sm:$0xff] %v14314_v7  ;;  %v14334_v7 = vpop.f32.mrf.mxu1  ;;  %10728 = vmatmul.msk.f32.vlgmr.msra.gmra.mxu0 %vm312_vm2, %v14330_v41 }
 0x296   : > { %20497 = vst [vmem:[#allocation411_spill] sm:$0xff] %v14318_v10  ;;  %v14337_v10 = vsel %vm2689_vm3, %v3441_v18, %v3442_v46  ;;  %10767 = vmatpush.msk.msra.mxu0 %vm321_vm0, %v13461_v33  ;;  %v14364_v18 = vld [vmem:[%s11932_s19 + $0x250] sm:$0xff] }
 0x297   : > { %20498 = vst [vmem:[#allocation412_spill] sm:$0xff] %v14322_v13  ;;  %v14343_v13 = vsel %vm2689_vm3, %v3529_v5, %v3530_v31  ;;  %10733 = vmatmul.msk.f32.vlgmr.msra.gmra.mxu1 %vm312_vm2, %v14337_v10  ;;  %v3444_v5 = vrot.slane %v14360_v34, 2 }
 0x298   : > { %20499 = vst [vmem:[#allocation413_spill] sm:$0xff] %v14325_v43  ;;  %10743 = vmatmul.msk.f32.vlgmr.msra.gmra.mxu3 %vm312_vm2, %v14343_v13  ;;  %10772 = vmatpush.msk.msra.mxu1 %vm321_vm0, %v13461_v33  ;;  %v14388_v45 = vpop.f32.mrf.mxu0 }
 0x299   : > { %20500 = vst [vmem:[#allocation414_spill] sm:$0xff] %v14327_v37  ;;  %10782 = vmatpush.msk.msra.mxu3 %vm321_vm0, %v13461_v33  ;;  %v20512_v37 = vld [vmem:[#allocation100_spill] sm:$0xff] }
 0x29a   : > { %20501 = vst [vmem:[#allocation415_spill] sm:$0xff] %v14330_v41 }
 0x29b   : > { %20502 = vst [vmem:[#allocation416_spill] sm:$0xff] %v14332_v19  ;;  %v3400_v19 = vrot.slane %v14350_v26, 2  ;;  %v2857_v43 = vpop.f32.mrf.mxu3 }
 0x29c   : > { %20503 = vst [vmem:[#allocation417_spill] sm:$0xff] %v14334_v7  ;;  %v3488_v7 = vrot.slane %v14364_v18, 2 }
 0x29d   : > { %20504 = vst [vmem:[#allocation418_spill] sm:$0xff] %v14337_v10  ;;  %v14368_v10 = vld [vmem:[%s11932_s19 + $0x270] sm:$0xff] }
 0x29e   : > { %20505 = vst [vmem:[#allocation419_spill] sm:$0xff] %v14340_v29  ;;  %v3532_v41 = vrot.slane %v14368_v10, 2  ;;  %v20511_v29 = vld [vmem:[#allocation99_spill] sm:$0xff]  ;;  %v14396_v33 = vsel %vm2689_vm3, %v3486_v17, %v3488_v7 }
 0x29f   : > { %20506 = vst [vmem:[#allocation420_spill] sm:$0xff] %v14343_v13  ;;  %v1753_v13 = vadd.f32 %v13394_v9, %v20511_v29  ;;  %v14390_v9 = vpop.f32.mrf.mxu1  ;;  %10739 = vmatmul.msk.f32.gmra.mxu2 %vm312_vm2, %v14396_v33 }
 0x2a0   : > { %20507 = vst [vmem:[#allocation421_spill] sm:$0xff] %v14350_v26  ;;  %v14399_v29 = vsel %vm2689_vm3, %v3530_v31, %v3532_v41  ;;  %v14428_v31 = vld [vmem:[%s11932_s19 + $0x278] sm:$0x3f] }
 0x2a1   : > { %20508 = vst [vmem:[#allocation422_spill] sm:$0xff] %v14360_v34  ;;  %v1790_v34 = vadd.f32 %v13396_v38, %v20512_v37  ;;  %v14393_v38 = vsel %vm2689_vm3, %v3442_v46, %v3444_v5  ;;  %10744 = vmatmul.msk.f32.gmra.mxu3 %vm312_vm2, %v14399_v29  ;;  %v14422_v37 = vld [vmem:[%s11932_s19 + $0x258] sm:$0x3f] }
 0x2a2   : > { %20509 = vst [vmem:[#allocation423_spill] sm:$0xff] %v14364_v18  ;;  %v2813_v18 = vpop.f32.mrf.mxu2  ;;  %10734 = vmatmul.msk.f32.gmra.mxu1 %vm312_vm2, %v14393_v38  ;;  %v14425_v46 = vrot.slane %v14422_v37, 2 }
 0x2a3   : > { %20510 = vst [vmem:[#allocation424_spill] sm:$0xff] %v14368_v10  ;;  %v14382_v10 = vsel %vm2689_vm3, %v3398_v47, %v3400_v19  ;;  %v14384_v26 = vadd.f32 %v2813_v18, %v1753_v13  ;;  %v14386_v6 = vadd.f32 %v2857_v43, %v1790_v34  ;;  %v14406_v43 = vld [vmem:[%s11932_s19 + $0x218] sm:$0x3f]  ;;  %v14431_v34 = vrot.slane %v14428_v31, 2  ;;  %v20527_v18 = vld [vmem:[#allocation115_spill] sm:$0xff] }
 0x2a4   : > { %20513 = vst [vmem:[#allocation99_spill] sm:$0xff] %v14382_v10  ;;  %10729 = vmatmul.msk.f32.gmra.mxu0 %vm312_vm2, %v14382_v10  ;;  %v14409_v13 = vrot.slane %v14406_v43, 2  ;;  %v14416_v47 = vld [vmem:[%s11932_s19 + $0x238] sm:$0x3f] }
 0x2a5   : > { %20514 = vst [vmem:[#allocation100_spill] sm:$0xff] %v14386_v6  ;;  %v14419_v17 = vrot.slane %v14416_v47, 2  ;;  %v14445_v6 = vpop.f32.mrf.mxu0 }
 0x2a6   : > { %20515 = vst [vmem:[#allocation425_spill] sm:$0xff] %v14388_v45  ;;  %v20528_v45 = vld [vmem:[#allocation116_spill] sm:$0xff]  ;;  %v14439_v10 = vsel %vm2689_vm3, %v3400_v19, %v14409_v13  ;;  %v20535_v19 = vld [vmem:[#allocation123_spill] sm:$0xff] }
 0x2a7   : > { %20516 = vst [vmem:[#allocation426_spill] sm:$0xff] %v14390_v9  ;;  %v1756_v9 = vadd.f32 %v13410_v0, %v20527_v18  ;;  %v14451_v0 = vsel %vm2689_vm3, %v3444_v5, %v14419_v17  ;;  %v20536_v5 = vld [vmem:[#allocation124_spill] sm:$0xff] }
 0x2a8   : > { %20517 = vst [vmem:[#allocation427_spill] sm:$0xff] %v14393_v38  ;;  %v2860_v38 = vpop.f32.mrf.mxu3 }
 0x2a9   : > { %20518 = vst [vmem:[#allocation428_spill] sm:$0xff] %v14396_v33 }
 0x2aa   : > { %20519 = vst [vmem:[#allocation429_spill] sm:$0xff] %v14399_v29  ;;  %v1793_v29 = vadd.f32 %v13412_v22, %v20528_v45  ;;  %v2816_v33 = vpop.f32.mrf.mxu2  ;;  %v14455_v22 = vsel %vm2689_vm3, %v3488_v7, %v14425_v46  ;;  %v14459_v45 = vsel %vm2689_vm3, %v3532_v41, %v14431_v34  ;;  %10735 = vmatmul.msk.f32.gmra.mxu1 %vm312_vm2, %v14451_v0 }
 0x2ab   : > { %20520 = vst [vmem:[#allocation430_spill] sm:$0xff] %v14409_v13  ;;  %10740 = vmatmul.msk.f32.gmra.mxu2 %vm312_vm2, %v14455_v22  ;;  %10745 = vmatmul.msk.f32.gmra.mxu3 %vm312_vm2, %v14459_v45  ;;  %v1759_v7 = vadd.f32 %v13426_v35, %v20535_v19  ;;  %v1796_v41 = vadd.f32 %v13428_v55, %v20536_v5  ;;  %v14486_v55 = vld [vmem:[%s11932_s19 + $0x280] sm:$0xff]  ;;  %v14490_v19 = vld [vmem:[%s11932_s19 + $0x288] sm:$0xff] }
 0x2ac   : > { %20521 = vst [vmem:[#allocation431_spill] sm:$0xff] %v14416_v47  ;;  %v14441_v47 = vadd.f32 %v2816_v33, %v1756_v9  ;;  %10730 = vmatmul.msk.f32.gmra.mxu0 %vm312_vm2, %v14439_v10  ;;  %v3573_v35 = vrot.slane %v14486_v55, 2  ;;  %v14498_v5 = vld [vmem:[%s11932_s19 + $0x2a0] sm:$0xff] }
 0x2ad   : > { %20522 = vst [vmem:[#allocation432_spill] sm:$0xff] %v14419_v17  ;;  %v14477_v18 = vpop.f32.mrf.mxu0 }
 0x2ae   : > { %20523 = vst [vmem:[#allocation433_spill] sm:$0xff] %v14422_v37  ;;  %v14443_v37 = vadd.f32 %v2860_v38, %v1793_v29 }
 0x2af   : > { %20524 = vst [vmem:[#allocation434_spill] sm:$0xff] %v14425_v46 }
 0x2b0   : > { %20525 = vst [vmem:[#allocation435_spill] sm:$0xff] %v14428_v31  ;;  %v14447_v31 = vpop.f32.mrf.mxu1  ;;  %v2863_v38 = vpop.f32.mrf.mxu3 }
 0x2b1   : > { %20526 = vst [vmem:[#allocation436_spill] sm:$0xff] %v14431_v34  ;;  %v14475_v29 = vadd.f32 %v2863_v38, %v1796_v41  ;;  %v3617_v41 = vrot.slane %v14498_v5, 2 }
 0x2b2   : > { %20529 = vst [vmem:[#allocation115_spill] sm:$0xff] %v14439_v10  ;;  %v2819_v9 = vpop.f32.mrf.mxu2  ;;  %10736 = vmatmul.msk.f32.gmra.mxu1 %vm312_vm2, %v14419_v17  ;;  %v20548_v10 = vld [vmem:[#allocation136_spill] sm:$0xff] }
 0x2b3   : > { %20530 = vst [vmem:[#allocation116_spill] sm:$0xff] %v14445_v6  ;;  %v14473_v33 = vadd.f32 %v2819_v9, %v1759_v7  ;;  %v3574_v7 = vrot.slane %v14490_v19, 2  ;;  %10741 = vmatmul.msk.f32.gmra.mxu2 %vm312_vm2, %v14425_v46  ;;  %10746 = vmatmul.msk.f32.gmra.mxu3 %vm312_vm2, %v14431_v34  ;;  %v14502_v9 = vld [vmem:[%s11932_s19 + $0x2a8] sm:$0xff]  ;;  %v14514_v46 = vld [vmem:[%s11932_s19 + $0x2e0] sm:$0xff] }
 0x2b4   : > { %20531 = vst [vmem:[#allocation437_spill] sm:$0xff] %v14447_v31  ;;  %10731 = vmatmul.msk.f32.gmra.mxu0 %vm312_vm2, %v14409_v13  ;;  %v3618_v38 = vrot.slane %v14502_v9, 2  ;;  %v14510_v6 = vld [vmem:[%s11932_s19 + $0x2c8] sm:$0xff]  ;;  %v3705_v34 = vrot.slane %v14514_v46, 2 }
 0x2b5   : > { %20532 = vst [vmem:[#allocation438_spill] sm:$0xff] %v14451_v0  ;;  %v3662_v17 = vrot.slane %v14510_v6, 2  ;;  %v20547_v0 = vld [vmem:[#allocation135_spill] sm:$0xff] }
 0x2b6   : > { %20533 = vst [vmem:[#allocation439_spill] sm:$0xff] %v14455_v22  ;;  %v1762_v13 = vadd.f32 %v13442_v36, %v20547_v0  ;;  %v14537_v36 = vsel %vm2689_vm3, %v3617_v41, %v3618_v38  ;;  %v14558_v0 = vld [vmem:[%s11932_s19 + $0x2b0] sm:$0xff] }
 0x2b7   : > { %20534 = vst [vmem:[#allocation440_spill] sm:$0xff] %v14459_v45  ;;  %v14518_v45 = vld [vmem:[%s11932_s19 + $0x2e8] sm:$0xff]  ;;  %v14571_v41 = vld [vmem:[%s11932_s19 + $0x2f0] sm:$0xff] }
 0x2b8   : > { %20537 = vst [vmem:[#allocation123_spill] sm:$0xff] %v14473_v33  ;;  %v14479_v31 = vpop.f32.mrf.mxu1  ;;  %v3706_v22 = vrot.slane %v14518_v45, 2  ;;  %v14532_v33 = vpop.f32.mrf.mxu0 }
 0x2b9   : > { %20538 = vst [vmem:[#allocation124_spill] sm:$0xff] %v14475_v29 }
 0x2ba   : > { %20539 = vst [vmem:[#allocation441_spill] sm:$0xff] %v14477_v18  ;;  %10753 = vmatmul.msk.f32.vlgmr.msrb.gmra.mxu1 %vm312_vm2, %v14537_v36 }
 0x2bb   : > { %20540 = vst [vmem:[#allocation442_spill] sm:$0xff] %v14479_v31  ;;  %v14506_v31 = vld [vmem:[%s11932_s19 + $0x2c0] sm:$0xff] }
 0x2bc   : > { %20541 = vst [vmem:[#allocation443_spill] sm:$0xff] %v14498_v5  ;;  %v3661_v18 = vrot.slane %v14506_v31, 2  ;;  %v2866_v5 = vpop.f32.mrf.mxu3 }
 0x2bd   : > { %20542 = vst [vmem:[#allocation444_spill] sm:$0xff] %v14502_v9  ;;  %v1799_v9 = vadd.f32 %v13444_v39, %v20548_v10  ;;  %v14543_v10 = vsel %vm2689_vm3, %v3705_v34, %v3706_v22  ;;  %v3620_v34 = vrot.slane %v14558_v0, 2 }
 0x2be   : > { %20543 = vst [vmem:[#allocation445_spill] sm:$0xff] %v14506_v31  ;;  %v2822_v31 = vpop.f32.mrf.mxu2  ;;  %v14540_v39 = vsel %vm2689_vm3, %v3661_v18, %v3662_v17  ;;  %10763 = vmatmul.msk.f32.vlgmr.msrb.gmra.mxu3 %vm312_vm2, %v14543_v10  ;;  %v14564_v18 = vld [vmem:[%s19372_s1 + $0xc] sm:$0x7] }
 0x2bf   : > { %20544 = vst [vmem:[#allocation446_spill] sm:$0xff] %v14510_v6  ;;  %v14526_v6 = vsel %vm2689_vm3, %v3573_v35, %v3574_v7  ;;  %v14528_v29 = vadd.f32 %v2822_v31, %v1762_v13  ;;  %v14550_v13 = vld [vmem:[%s11932_s19 + $0x290] sm:$0xff]  ;;  %10758 = vmatmul.msk.f32.vlgmr.msrb.gmra.mxu2 %vm312_vm2, %v14540_v39  ;;  %10802 = vmatpush.msk.msrb.mxu3 %vm321_vm0, %v14564_v18 }
 0x2c0   : > { %20545 = vst [vmem:[#allocation447_spill] sm:$0xff] %v14514_v46  ;;  %v14530_v46 = vadd.f32 %v2866_v5, %v1799_v9  ;;  %10748 = vmatmul.msk.f32.vlgmr.msrb.gmra.mxu0 %vm312_vm2, %v14526_v6  ;;  %v3576_v31 = vrot.slane %v14550_v13, 2  ;;  %v14567_v35 = vld [vmem:[%s11932_s19 + $0x2d0] sm:$0xff]  ;;  %v3708_v9 = vrot.slane %v14571_v41, 2  ;;  %10797 = vmatpush.msk.msrb.mxu2 %vm321_vm0, %v14564_v18 }
 0x2c1   : > { %20546 = vst [vmem:[#allocation448_spill] sm:$0xff] %v14518_v45  ;;  %v14534_v45 = vpop.f32.mrf.mxu1  ;;  %v3664_v5 = vrot.slane %v14567_v35, 2  ;;  %10787 = vmatpush.msk.msrb.mxu0 %vm321_vm0, %v14564_v18  ;;  %10792 = vmatpush.msk.msrb.mxu1 %vm321_vm0, %v14564_v18 }
 0x2c2   : > { %20549 = vst [vmem:[#allocation135_spill] sm:$0xff] %v14526_v6 }
 0x2c3   : > { %20550 = vst [vmem:[#allocation136_spill] sm:$0xff] %v14530_v46  ;;  %v14604_v46 = vsel %vm2689_vm3, %v3706_v22, %v3708_v9 }
 0x2c4   : > { %20551 = vst [vmem:[#allocation449_spill] sm:$0xff] %v14532_v33  ;;  %v3033_v6 = vpop.f32.mrf.mxu3 }
 0x2c5   : > { %20552 = vst [vmem:[#allocation450_spill] sm:$0xff] %v14534_v45  ;;  %v20559_v45 = vld [vmem:[#allocation147_spill] sm:$0xff] }
 0x2c6   : > { %20553 = vst [vmem:[#allocation451_spill] sm:$0xff] %v14537_v36  ;;  %v1901_v33 = vadd.f32 %v13471_v21, %v20559_v45  ;;  %v2989_v36 = vpop.f32.mrf.mxu2  ;;  %v14593_v45 = vpop.f32.mrf.mxu0  ;;  %10764 = vmatmul.msk.f32.gmra.mxu3 %vm312_vm2, %v14604_v46 }
 0x2c7   : > { %20554 = vst [vmem:[#allocation452_spill] sm:$0xff] %v14540_v39 }
 0x2c8   : > { %20555 = vst [vmem:[#allocation453_spill] sm:$0xff] %v14543_v10  ;;  %v20560_v10 = vld [vmem:[#allocation148_spill] sm:$0xff] }
 0x2c9   : > { %20556 = vst [vmem:[#allocation454_spill] sm:$0xff] %v14558_v0  ;;  %v1938_v39 = vadd.f32 %v13473_v2, %v20560_v10  ;;  %v14595_v2 = vpop.f32.mrf.mxu1  ;;  %v14598_v10 = vsel %vm2689_vm3, %v3618_v38, %v3620_v34  ;;  %v14601_v0 = vsel %vm2689_vm3, %v3662_v17, %v3664_v5  ;;  %v14621_v17 = vld [vmem:[%s11932_s19 + $0x2b8] sm:$0x3f] }
 0x2ca   : > { %20557 = vst [vmem:[#allocation455_spill] sm:$0xff] %v14567_v35  ;;  %v14589_v35 = vadd.f32 %v2989_v36, %v1901_v33  ;;  %10754 = vmatmul.msk.f32.gmra.mxu1 %vm312_vm2, %v14598_v10  ;;  %10759 = vmatmul.msk.f32.gmra.mxu2 %vm312_vm2, %v14601_v0  ;;  %v14624_v22 = vrot.slane %v14621_v17, 2  ;;  %v14633_v36 = vld [vmem:[%s11932_s19 + $0x2f8] sm:$0x3f] }
 0x2cb   : > { %20558 = vst [vmem:[#allocation456_spill] sm:$0xff] %v14571_v41  ;;  %v14587_v41 = vsel %vm2689_vm3, %v3574_v7, %v3576_v31  ;;  %v14591_v21 = vadd.f32 %v3033_v6, %v1938_v39  ;;  %v14611_v6 = vld [vmem:[%s11932_s19 + $0x298] sm:$0x3f]  ;;  %v14636_v39 = vrot.slane %v14633_v36, 2 }
 0x2cc   : > { %20561 = vst [vmem:[#allocation147_spill] sm:$0xff] %v14587_v41  ;;  %10749 = vmatmul.msk.f32.gmra.mxu0 %vm312_vm2, %v14587_v41  ;;  %v14614_v33 = vrot.slane %v14611_v6, 2  ;;  %v14627_v7 = vld [vmem:[%s11932_s19 + $0x2d8] sm:$0x3f]  ;;  %v3036_v41 = vpop.f32.mrf.mxu3 }
 0x2cd   : > { %20562 = vst [vmem:[#allocation148_spill] sm:$0xff] %v14589_v35  ;;  %v14630_v38 = vrot.slane %v14627_v7, 2 }
 0x2ce   : > { %20563 = vst [vmem:[#allocation457_spill] sm:$0xff] %v14591_v21  ;;  %v14650_v35 = vpop.f32.mrf.mxu0 }
 0x2cf   : > { %20564 = vst [vmem:[#allocation458_spill] sm:$0xff] %v14593_v45 }
 0x2d0   : > { %20565 = vst [vmem:[#allocation459_spill] sm:$0xff] %v14595_v2  ;;  %v20576_v2 = vld [vmem:[#allocation163_spill] sm:$0xff] }
 0x2d1   : > { %20566 = vst [vmem:[#allocation460_spill] sm:$0xff] %v14598_v10  ;;  %v1904_v45 = vadd.f32 %v13487_v56, %v20576_v2  ;;  %v2992_v10 = vpop.f32.mrf.mxu2  ;;  %v14656_v56 = vsel %vm2689_vm3, %v3620_v34, %v14624_v22  ;;  %v20585_v34 = vld [vmem:[#allocation172_spill] sm:$0xff] }
 0x2d2   : > { %20567 = vst [vmem:[#allocation461_spill] sm:$0xff] %v14601_v0  ;;  %v20577_v0 = vld [vmem:[#allocation164_spill] sm:$0xff]  ;;  %10755 = vmatmul.msk.f32.gmra.mxu1 %vm312_vm2, %v14656_v56 }
 0x2d3   : > { %20568 = vst [vmem:[#allocation462_spill] sm:$0xff] %v14604_v46  ;;  %v1941_v46 = vadd.f32 %v13489_v42, %v20577_v0  ;;  %v14646_v21 = vadd.f32 %v2992_v10, %v1904_v45  ;;  %v14660_v42 = vsel %vm2689_vm3, %v3664_v5, %v14630_v38  ;;  %v1944_v5 = vadd.f32 %v13505_v25, %v20585_v34  ;;  %v14691_v25 = vld [vmem:[%s11932_s19 + $0x300] sm:$0xff] }
 0x2d4   : > { %20569 = vst [vmem:[#allocation463_spill] sm:$0xff] %v14614_v33  ;;  %10760 = vmatmul.msk.f32.gmra.mxu2 %vm312_vm2, %v14660_v42  ;;  %v14703_v34 = vld [vmem:[%s11932_s19 + $0x320] sm:$0xff] }
 0x2d5   : > { %20570 = vst [vmem:[#allocation464_spill] sm:$0xff] %v14621_v17  ;;  %v14644_v17 = vsel %vm2689_vm3, %v3576_v31, %v14614_v33  ;;  %v14664_v31 = vsel %vm2689_vm3, %v3708_v9, %v14636_v39  ;;  %v3039_v9 = vpop.f32.mrf.mxu3 }
 0x2d6   : > { %20571 = vst [vmem:[#allocation465_spill] sm:$0xff] %v14624_v22  ;;  %10750 = vmatmul.msk.f32.gmra.mxu0 %vm312_vm2, %v14644_v17  ;;  %10765 = vmatmul.msk.f32.gmra.mxu3 %vm312_vm2, %v14664_v31  ;;  %v14680_v2 = vadd.f32 %v3039_v9, %v1944_v5  ;;  %v14682_v10 = vpop.f32.mrf.mxu0  ;;  %v3793_v5 = vrot.slane %v14703_v34, 2 }
 0x2d7   : > { %20572 = vst [vmem:[#allocation466_spill] sm:$0xff] %v14627_v7  ;;  %v14648_v7 = vadd.f32 %v3036_v41, %v1941_v46  ;;  %v20584_v46 = vld [vmem:[#allocation171_spill] sm:$0xff] }
 0x2d8   : > { %20573 = vst [vmem:[#allocation467_spill] sm:$0xff] %v14630_v38  ;;  %v1907_v0 = vadd.f32 %v13503_v53, %v20584_v46  ;;  %v3749_v53 = vrot.slane %v14691_v25, 2  ;;  %v14695_v46 = vld [vmem:[%s11932_s19 + $0x308] sm:$0xff] }
 0x2d9   : > { %20574 = vst [vmem:[#allocation468_spill] sm:$0xff] %v14633_v36  ;;  %v14652_v36 = vpop.f32.mrf.mxu1  ;;  %v2995_v41 = vpop.f32.mrf.mxu2 }
 0x2da   : > { %20575 = vst [vmem:[#allocation469_spill] sm:$0xff] %v14636_v39  ;;  %v14678_v45 = vadd.f32 %v2995_v41, %v1907_v0  ;;  %10756 = vmatmul.msk.f32.gmra.mxu1 %vm312_vm2, %v14624_v22  ;;  %v3750_v0 = vrot.slane %v14695_v46, 2  ;;  %v14707_v41 = vld [vmem:[%s11932_s19 + $0x328] sm:$0xff] }
 0x2db   : > { %20578 = vst [vmem:[#allocation163_spill] sm:$0xff] %v14644_v17  ;;  %v3794_v9 = vrot.slane %v14707_v41, 2  ;;  %v20597_v17 = vld [vmem:[#allocation183_spill] sm:$0xff] }
 0x2dc   : > { %20579 = vst [vmem:[#allocation164_spill] sm:$0xff] %v14650_v35  ;;  %10761 = vmatmul.msk.f32.gmra.mxu2 %vm312_vm2, %v14630_v38  ;;  %v14715_v35 = vld [vmem:[%s11932_s19 + $0x348] sm:$0xff]  ;;  %v14719_v38 = vld [vmem:[%s11932_s19 + $0x360] sm:$0xff] }
 0x2dd   : > { %20580 = vst [vmem:[#allocation470_spill] sm:$0xff] %v14652_v36  ;;  %v3838_v22 = vrot.slane %v14715_v35, 2 }
 0x2de   : > { %20581 = vst [vmem:[#allocation471_spill] sm:$0xff] %v14656_v56  ;;  %10751 = vmatmul.msk.f32.gmra.mxu0 %vm312_vm2, %v14614_v33  ;;  %10766 = vmatmul.msk.f32.gmra.mxu3 %vm312_vm2, %v14636_v39  ;;  %v3881_v39 = vrot.slane %v14719_v38, 2  ;;  %v20596_v56 = vld [vmem:[#allocation182_spill] sm:$0xff] }
 0x2df   : > { %20582 = vst [vmem:[#allocation472_spill] sm:$0xff] %v14660_v42  ;;  %v1910_v33 = vadd.f32 %v13519_v51, %v20596_v56  ;;  %v14742_v51 = vsel %vm2689_vm3, %v3793_v5, %v3794_v9 }
 0x2e0   : > { %20583 = vst [vmem:[#allocation473_spill] sm:$0xff] %v14664_v31  ;;  %v14723_v31 = vld [vmem:[%s11932_s19 + $0x368] sm:$0xff] }
 0x2e1   : > { %20586 = vst [vmem:[#allocation171_spill] sm:$0xff] %v14678_v45  ;;  %v14684_v36 = vpop.f32.mrf.mxu1  ;;  %v3882_v42 = vrot.slane %v14723_v31, 2  ;;  %v14737_v45 = vpop.f32.mrf.mxu0 }
 0x2e2   : > { %20587 = vst [vmem:[#allocation172_spill] sm:$0xff] %v14680_v2  ;;  %10773 = vmatmul.msk.f32.vlgmr.msra.gmra.mxu1 %vm312_vm2, %v14742_v51 }
 0x2e3   : > { %20588 = vst [vmem:[#allocation474_spill] sm:$0xff] %v14682_v10  ;;  %10812 = vmatpush.msk.msra.mxu1 %vm321_vm0, %v14564_v18 }
 0x2e4   : > { %20589 = vst [vmem:[#allocation475_spill] sm:$0xff] %v14684_v36  ;;  %v14711_v36 = vld [vmem:[%s11932_s19 + $0x340] sm:$0xff] }
 0x2e5   : > { %20590 = vst [vmem:[#allocation476_spill] sm:$0xff] %v14703_v34  ;;  %v3837_v10 = vrot.slane %v14711_v36, 2  ;;  %v3042_v34 = vpop.f32.mrf.mxu3 }
 0x2e6   : > { %20591 = vst [vmem:[#allocation477_spill] sm:$0xff] %v14707_v41  ;;  %v1947_v41 = vadd.f32 %v13521_v62, %v20597_v17  ;;  %v14748_v17 = vsel %vm2689_vm3, %v3881_v39, %v3882_v42  ;;  %v14765_v39 = vld [vmem:[%s11932_s19 + $0x330] sm:$0xff] }
 0x2e7   : > { %20592 = vst [vmem:[#allocation478_spill] sm:$0xff] %v14711_v36  ;;  %v2998_v36 = vpop.f32.mrf.mxu2  ;;  %v14745_v62 = vsel %vm2689_vm3, %v3837_v10, %v3838_v22  ;;  %10783 = vmatmul.msk.f32.vlgmr.msra.gmra.mxu3 %vm312_vm2, %v14748_v17  ;;  %v3796_v56 = vrot.slane %v14765_v39, 2  ;;  %v14769_v10 = vld [vmem:[%s11932_s19 + $0x350] sm:$0xff] }
 0x2e8   : > { %20593 = vst [vmem:[#allocation479_spill] sm:$0xff] %v14715_v35  ;;  %v14731_v35 = vsel %vm2689_vm3, %v3749_v53, %v3750_v0  ;;  %v14733_v2 = vadd.f32 %v2998_v36, %v1910_v33  ;;  %v14755_v33 = vld [vmem:[%s11932_s19 + $0x310] sm:$0xff]  ;;  %10778 = vmatmul.msk.f32.vlgmr.msra.gmra.mxu2 %vm312_vm2, %v14745_v62  ;;  %v3840_v53 = vrot.slane %v14769_v10, 2  ;;  %10822 = vmatpush.msk.msra.mxu3 %vm321_vm0, %v14564_v18 }
 0x2e9   : > { %20594 = vst [vmem:[#allocation480_spill] sm:$0xff] %v14719_v38  ;;  %v14735_v38 = vadd.f32 %v3042_v34, %v1947_v41  ;;  %10768 = vmatmul.msk.f32.vlgmr.msra.gmra.mxu0 %vm312_vm2, %v14731_v35  ;;  %v3752_v36 = vrot.slane %v14755_v33, 2  ;;  %v14773_v34 = vld [vmem:[%s11932_s19 + $0x370] sm:$0xff]  ;;  %10817 = vmatpush.msk.msra.mxu2 %vm321_vm0, %v14564_v18  ;;  %v20607_v41 = vld [vmem:[#allocation194_spill] sm:$0xff] }
 0x2ea   : > { %20595 = vst [vmem:[#allocation481_spill] sm:$0xff] %v14723_v31  ;;  %v14739_v31 = vpop.f32.mrf.mxu1  ;;  %10807 = vmatpush.msk.msra.mxu0 %vm321_vm0, %v14564_v18  ;;  %v3884_v5 = vrot.slane %v14773_v34, 2 }
 0x2eb   : > { %20598 = vst [vmem:[#allocation182_spill] sm:$0xff] %v14731_v35  ;;  %v14787_v35 = vsel %vm2689_vm3, %v3750_v0, %v3752_v36 }
 0x2ec   : > { %20599 = vst [vmem:[#allocation183_spill] sm:$0xff] %v14737_v45  ;;  %v20608_v45 = vld [vmem:[#allocation195_spill] sm:$0xff] }
 0x2ed   : > { %20600 = vst [vmem:[#allocation482_spill] sm:$0xff] %v14739_v31  ;;  %v2049_v31 = vadd.f32 %v13543_v32, %v20607_v41  ;;  %v14804_v41 = vsel %vm2689_vm3, %v3882_v42, %v3884_v5 }
 0x2ee   : > { %20601 = vst [vmem:[#allocation483_spill] sm:$0xff] %v14742_v51  ;;  %v3209_v51 = vpop.f32.mrf.mxu3 }
 0x2ef   : > { %20602 = vst [vmem:[#allocation484_spill] sm:$0xff] %v14745_v62  ;;  %v3165_v62 = vpop.f32.mrf.mxu2  ;;  %10784 = vmatmul.msk.f32.gmra.mxu3 %vm312_vm2, %v14804_v41 }
 0x2f0   : > { %20603 = vst [vmem:[#allocation485_spill] sm:$0xff] %v14748_v17  ;;  %v2086_v17 = vadd.f32 %v13545_v49, %v20608_v45  ;;  %v14798_v49 = vsel %vm2689_vm3, %v3794_v9, %v3796_v56  ;;  %v14801_v45 = vsel %vm2689_vm3, %v3838_v22, %v3840_v53  ;;  %v14821_v22 = vld [vmem:[%s11932_s19 + $0x338] sm:$0x3f] }
 0x2f1   : > { %20604 = vst [vmem:[#allocation486_spill] sm:$0xff] %v14765_v39  ;;  %v14793_v39 = vpop.f32.mrf.mxu0  ;;  %10769 = vmatmul.msk.f32.gmra.mxu0 %vm312_vm2, %v14787_v35  ;;  %10774 = vmatmul.msk.f32.gmra.mxu1 %vm312_vm2, %v14798_v49  ;;  %v14824_v42 = vrot.slane %v14821_v22, 2  ;;  %v14827_v9 = vld [vmem:[%s11932_s19 + $0x358] sm:$0x3f] }
 0x2f2   : > { %20605 = vst [vmem:[#allocation487_spill] sm:$0xff] %v14769_v10  ;;  %v14791_v10 = vadd.f32 %v3209_v51, %v2086_v17  ;;  %v14795_v32 = vpop.f32.mrf.mxu1  ;;  %10779 = vmatmul.msk.f32.gmra.mxu2 %vm312_vm2, %v14801_v45  ;;  %v14830_v51 = vrot.slane %v14827_v9, 2 }
 0x2f3   : > { %20606 = vst [vmem:[#allocation488_spill] sm:$0xff] %v14773_v34  ;;  %v14789_v34 = vadd.f32 %v3165_v62, %v2049_v31  ;;  %v14811_v31 = vld [vmem:[%s11932_s19 + $0x318] sm:$0x3f] }
 0x2f4   : > { %20609 = vst [vmem:[#allocation194_spill] sm:$0xff] %v14787_v35  ;;  %v14814_v0 = vrot.slane %v14811_v31, 2  ;;  %v14833_v62 = vld [vmem:[%s11932_s19 + $0x378] sm:$0x3f] }
 0x2f5   : > { %20610 = vst [vmem:[#allocation195_spill] sm:$0xff] %v14791_v10  ;;  %v14836_v17 = vrot.slane %v14833_v62, 2 }
 0x2f6   : > { %20611 = vst [vmem:[#allocation489_spill] sm:$0xff] %v14793_v39  ;;  %v14844_v35 = vsel %vm2689_vm3, %v3752_v36, %v14814_v0  ;;  %v2055_v36 = vadd.f32 %v13575_v50, %v13063_v61  ;;  %v2058_v61 = vadd.f32 %v13608_v58, %v13079_v24  ;;  %v2234_v24 = vadd.f32 %v13656_v44, %v13105_v3  ;;  %v11754_v3 = vld [vmem:[%s11932_s19 + $0x68] sm:$0xff] }
 0x2f7   : > { %20612 = vst [vmem:[#allocation490_spill] sm:$0xff] %v14795_v32  ;;  %v20623_v32 = vld [vmem:[#allocation208_spill] sm:$0xff]  ;;  %v2237_v44 = vadd.f32 %v13700_v48, %v13124_v40  ;;  %v20638_v40 = vld [vmem:[#allocation277_spill] sm:$0xff]  ;;  %v20640_v48 = vld [vmem:[#allocation202_spill] sm:$0xff] }
 0x2f8   : > { %20613 = vst [vmem:[#allocation491_spill] sm:$0xff] %v14798_v49  ;;  %v2052_v39 = vadd.f32 %v13559_v15, %v20623_v32  ;;  %v3212_v49 = vpop.f32.mrf.mxu3  ;;  %v14856_v15 = vsel %vm2689_vm3, %v3796_v56, %v14824_v42 }
 0x2f9   : > { %20614 = vst [vmem:[#allocation492_spill] sm:$0xff] %v14801_v45  ;;  %v3168_v45 = vpop.f32.mrf.mxu2  ;;  %v14850_v10 = vpop.f32.mrf.mxu0  ;;  %10770 = vmatmul.msk.f32.gmra.mxu0 %vm312_vm2, %v14844_v35  ;;  %10775 = vmatmul.msk.f32.gmra.mxu1 %vm312_vm2, %v14856_v15 }
 0x2fa   : > { %20615 = vst [vmem:[#allocation493_spill] sm:$0xff] %v14804_v41  ;;  %v2089_v41 = vadd.f32 %v13561_v8, %v13033_v30  ;;  %v14860_v30 = vsel %vm2689_vm3, %v3840_v53, %v14830_v51  ;;  %v14864_v8 = vsel %vm2689_vm3, %v3884_v5, %v14836_v17 }
 0x2fb   : > { %20616 = vst [vmem:[#allocation494_spill] sm:$0xff] %v14814_v0  ;;  %10780 = vmatmul.msk.f32.gmra.mxu2 %vm312_vm2, %v14860_v30  ;;  %10785 = vmatmul.msk.f32.gmra.mxu3 %vm312_vm2, %v14864_v8 }
 0x2fc   : > { %20617 = vst [vmem:[#allocation495_spill] sm:$0xff] %v14821_v22  ;;  %v14846_v22 = vadd.f32 %v3168_v45, %v2052_v39  ;;  %v2092_v39 = vadd.f32 %v13577_v52, %v13065_v20  ;;  %v2095_v20 = vadd.f32 %v13610_v27, %v13081_v57  ;;  %v2197_v57 = vadd.f32 %v13654_v59, %v13103_v1  ;;  %v11753_v1 = vld [vmem:[%s11932_s19 + $0x48] sm:$0xff] }
 0x2fd   : > { %20618 = vst [vmem:[#allocation496_spill] sm:$0xff] %v14824_v42  ;;  %v2200_v59 = vadd.f32 %v13698_v16, %v13122_v12  ;;  %v20639_v12 = vld [vmem:[#allocation223_spill] sm:$0xff]  ;;  %v20641_v16 = vld [vmem:[#allocation224_spill] sm:$0xff] }
 0x2fe   : > { %20619 = vst [vmem:[#allocation497_spill] sm:$0xff] %v14827_v9  ;;  %v14848_v9 = vadd.f32 %v3212_v49, %v2089_v41 }
 0x2ff   : > { %20620 = vst [vmem:[#allocation498_spill] sm:$0xff] %v14830_v51 }
 0x300   : > { %20621 = vst [vmem:[#allocation499_spill] sm:$0xff] %v14833_v62  ;;  %v14852_v62 = vpop.f32.mrf.mxu1  ;;  %v3215_v53 = vpop.f32.mrf.mxu3 }
 0x301   : > { %20622 = vst [vmem:[#allocation500_spill] sm:$0xff] %v14836_v17  ;;  %v3171_v56 = vpop.f32.mrf.mxu2  ;;  %v14880_v32 = vadd.f32 %v3215_v53, %v2092_v39  ;;  %v14882_v49 = vpop.f32.mrf.mxu0  ;;  %10771 = vmatmul.msk.f32.gmra.mxu0 %vm312_vm2, %v14814_v0  ;;  %10776 = vmatmul.msk.f32.gmra.mxu1 %vm312_vm2, %v14824_v42  ;;  %v11752_v53 = vld [vmem:[%s11932_s19 + $0x28] sm:$0xff] }
 0x302   : > { %20624 = vst [vmem:[#allocation208_spill] sm:$0xff] %v14844_v35  ;;  %v14878_v5 = vadd.f32 %v3171_v56, %v2055_v36 }
 0x303   : > { %20625 = vst [vmem:[#allocation501_spill] sm:$0xff] %v14850_v10  ;;  %10781 = vmatmul.msk.f32.gmra.mxu2 %vm312_vm2, %v14830_v51  ;;  %10786 = vmatmul.msk.f32.gmra.mxu3 %vm312_vm2, %v14836_v17 }
 0x304   : > { %20626 = vst [vmem:[#allocation502_spill] sm:$0xff] %v14852_v62 }
 0x305   : > { %20627 = vst [vmem:[#allocation503_spill] sm:$0xff] %v14856_v15  ;;  %v20746_v15 = vld [vmem:[#allocation360_spill] sm:$0xff] }
 0x306   : > { %20628 = vst [vmem:[#allocation504_spill] sm:$0xff] %v14860_v30 }
 0x307   : > { %20629 = vst [vmem:[#allocation505_spill] sm:$0xff] %v14864_v8 }
 0x308   : > { %20630 = vst [vmem:[#allocation506_spill] sm:$0xff] %v14882_v49  ;;  %v14884_v45 = vpop.f32.mrf.mxu1  ;;  %v3218_v50 = vpop.f32.mrf.mxu3  ;;  %v20705_v49 = vld [vmem:[#allocation312_spill] sm:$0xff] }
 0x309   : > { %20631 = vst [vmem:[#allocation507_spill] sm:$0xff] %v14884_v45  ;;  %v3174_v52 = vpop.f32.mrf.mxu2  ;;  %v14900_v36 = vadd.f32 %v3218_v50, %v2095_v20  ;;  %v14902_v39 = vpop.f32.mrf.mxu0  ;;  %10788 = vmatmul.msk.f32.vlgmr.msrb.gmra.mxu0 %vm312_vm2, %v13594_v11  ;;  %10793 = vmatmul.msk.f32.vlgmr.msrb.gmra.mxu1 %vm312_vm2, %v13599_v14 }
 0x30a   : > { %v14898_v41 = vadd.f32 %v3174_v52, %v2058_v61  ;;  %20632 = vst [vmem:[#allocation508_spill] sm:$0xff] %v14902_v39  ;;  %10827 = vmatpush.msk.msrb.mxu0 %vm321_vm0, %v14564_v18  ;;  %10832 = vmatpush.msk.msrb.mxu1 %vm321_vm0, %v14564_v18 }
 0x30b   : > { %10798 = vmatmul.msk.f32.vlgmr.msrb.gmra.mxu2 %vm312_vm2, %v13604_v60  ;;  %10803 = vmatmul.msk.f32.vlgmr.msrb.gmra.mxu3 %vm312_vm2, %v13738_v54 }
 0x30c   : > { %10837 = vmatpush.msk.msrb.mxu2 %vm321_vm0, %v14564_v18  ;;  %10842 = vmatpush.msk.msrb.mxu3 %vm321_vm0, %v14564_v18 }
 0x310   : > { %v14904_v56 = vpop.f32.mrf.mxu1  ;;  %v3385_v58 = vpop.f32.mrf.mxu3 }
 0x311   : > { %20633 = vst [vmem:[#allocation509_spill] sm:$0xff] %v14904_v56  ;;  %v3341_v27 = vpop.f32.mrf.mxu2  ;;  %v14928_v11 = vadd.f32 %v3385_v58, %v2234_v24  ;;  %v14930_v14 = vpop.f32.mrf.mxu0  ;;  %10789 = vmatmul.msk.f32.gmra.mxu0 %vm312_vm2, %v11752_v53  ;;  %10794 = vmatmul.msk.f32.gmra.mxu1 %vm312_vm2, %v11753_v1 }
 0x312   : > { %v14926_v60 = vadd.f32 %v3341_v27, %v2197_v57  ;;  %20634 = vst [vmem:[#allocation510_spill] sm:$0xff] %v14930_v14  ;;  %v20642_v27 = vld [vmem:[#allocation203_spill] sm:$0xff] }
 0x313   : > { %10799 = vmatmul.msk.f32.gmra.mxu2 %vm312_vm2, %v11754_v3  ;;  %10804 = vmatmul.msk.f32.gmra.mxu3 %vm312_vm2, %v13742_v63  ;;  %v2203_v63 = vadd.f32 %v20640_v48, %v20639_v12  ;;  %v2240_v58 = vadd.f32 %v20642_v27, %v20641_v16  ;;  %v20650_v12 = vld [vmem:[#allocation269_spill] sm:$0xff]  ;;  %v20652_v16 = vld [vmem:[#allocation270_spill] sm:$0xff] }
 0x318   : > { %v14932_v54 = vpop.f32.mrf.mxu1  ;;  %v3388_v20 = vpop.f32.mrf.mxu3 }
 0x319   : > { %20635 = vst [vmem:[#allocation511_spill] sm:$0xff] %v14932_v54  ;;  %v3344_v61 = vpop.f32.mrf.mxu2  ;;  %v14948_v50 = vadd.f32 %v3388_v20, %v2237_v44  ;;  %v14950_v57 = vpop.f32.mrf.mxu0  ;;  %10790 = vmatmul.msk.f32.gmra.mxu0 %vm312_vm2, %v13637_v23  ;;  %10795 = vmatmul.msk.f32.gmra.mxu1 %vm312_vm2, %v13641_v4  ;;  %v20646_v44 = vld [vmem:[#allocation179_spill] sm:$0xff]  ;;  %v20648_v20 = vld [vmem:[#allocation289_spill] sm:$0xff] }
 0x31a   : > { %v14946_v52 = vadd.f32 %v3344_v61, %v2200_v59  ;;  %20636 = vst [vmem:[#allocation512_spill] sm:$0xff] %v14950_v57  ;;  %v20647_v61 = vld [vmem:[#allocation178_spill] sm:$0xff] }
 0x31b   : > { %10800 = vmatmul.msk.f32.gmra.mxu2 %vm312_vm2, %v13645_v28  ;;  %10805 = vmatmul.msk.f32.gmra.mxu3 %vm312_vm2, %v20638_v40  ;;  %v20645_v28 = vld [vmem:[#allocation175_spill] sm:$0xff] }
 0x31c   : > { %v20649_v40 = vld [vmem:[#allocation227_spill] sm:$0xff] }
 0x31d   : > { %v2206_v48 = vadd.f32 %v20650_v12, %v20649_v40  ;;  %v20657_v40 = vld [vmem:[#allocation267_spill] sm:$0xff]  ;;  %v20658_v12 = vld [vmem:[#allocation309_spill] sm:$0xff] }
 0x320   : > { %v14952_v24 = vpop.f32.mrf.mxu1  ;;  %v3391_v1 = vpop.f32.mrf.mxu3 }
 0x321   : > { %20637 = vst [vmem:[#allocation513_spill] sm:$0xff] %v14952_v24  ;;  %v3347_v53 = vpop.f32.mrf.mxu2  ;;  %v14968_v23 = vadd.f32 %v3391_v1, %v2240_v58  ;;  %v14970_v59 = vpop.f32.mrf.mxu0  ;;  %10791 = vmatmul.msk.f32.gmra.mxu0 %vm312_vm2, %v20645_v28  ;;  %10796 = vmatmul.msk.f32.gmra.mxu1 %vm312_vm2, %v20646_v44 }
 0x322   : > { %v14966_v3 = vadd.f32 %v3347_v53, %v2203_v63  ;;  %20643 = vst [vmem:[#allocation277_spill] sm:$0xff] %v14970_v59  ;;  %v20651_v63 = vld [vmem:[#allocation228_spill] sm:$0xff] }
 0x323   : > { %10801 = vmatmul.msk.f32.gmra.mxu2 %vm312_vm2, %v20647_v61  ;;  %10806 = vmatmul.msk.f32.gmra.mxu3 %vm312_vm2, %v20648_v20  ;;  %v2243_v27 = vadd.f32 %v20652_v16, %v20651_v63  ;;  %v20655_v61 = vld [vmem:[#allocation263_spill] sm:$0xff]  ;;  %v20656_v20 = vld [vmem:[#allocation265_spill] sm:$0xff]  ;;  %v20665_v59 = vld [vmem:[#allocation264_spill] sm:$0xff] }
 0x324   : > { %v20660_v63 = vld [vmem:[#allocation281_spill] sm:$0xff] }
 0x328   : > { %v14972_v4 = vpop.f32.mrf.mxu1  ;;  %v3394_v53 = vpop.f32.mrf.mxu3 }
 0x329   : > { %20644 = vst [vmem:[#allocation223_spill] sm:$0xff] %v14972_v4  ;;  %v3350_v58 = vpop.f32.mrf.mxu2  ;;  %v14988_v28 = vadd.f32 %v3394_v53, %v2243_v27  ;;  %v14990_v4 = vpop.f32.mrf.mxu0  ;;  %10808 = vmatmul.msk.f32.vlgmr.msra.gmra.mxu0 %vm312_vm2, %v20655_v61  ;;  %10813 = vmatmul.msk.f32.vlgmr.msra.gmra.mxu1 %vm312_vm2, %v20656_v20  ;;  %v20661_v27 = vld [vmem:[#allocation232_spill] sm:$0xff] }
 0x32a   : > { %v14986_v1 = vadd.f32 %v3350_v58, %v2206_v48  ;;  %20653 = vst [vmem:[#allocation202_spill] sm:$0xff] %v14990_v4  ;;  %10847 = vmatpush.msk.msra.mxu0 %vm321_vm0, %v14564_v18  ;;  %v20659_v48 = vld [vmem:[#allocation231_spill] sm:$0xff]  ;;  %v20662_v58 = vld [vmem:[#allocation282_spill] sm:$0xff]  ;;  %10852 = vmatpush.msk.msra.mxu1 %vm321_vm0, %v14564_v18 }
 0x32b   : > { %10818 = vmatmul.msk.f32.vlgmr.msra.gmra.mxu2 %vm312_vm2, %v20657_v40  ;;  %10823 = vmatmul.msk.f32.vlgmr.msra.gmra.mxu3 %vm312_vm2, %v20658_v12  ;;  %v2345_v16 = vadd.f32 %v20660_v63, %v20659_v48  ;;  %v2382_v53 = vadd.f32 %v20662_v58, %v20661_v27  ;;  %v20666_v48 = vld [vmem:[#allocation266_spill] sm:$0xff]  ;;  %v20667_v63 = vld [vmem:[#allocation268_spill] sm:$0xff]  ;;  %v20670_v58 = vld [vmem:[#allocation297_spill] sm:$0xff] }
 0x32c   : > { %10857 = vmatpush.msk.msra.mxu2 %vm321_vm0, %v14564_v18  ;;  %10862 = vmatpush.msk.msra.mxu3 %vm321_vm0, %v14564_v18  ;;  %v20668_v27 = vld [vmem:[#allocation310_spill] sm:$0xff] }
 0x330   : > { %v14992_v44 = vpop.f32.mrf.mxu1  ;;  %v3561_v20 = vpop.f32.mrf.mxu3 }
 0x331   : > { %20654 = vst [vmem:[#allocation224_spill] sm:$0xff] %v14992_v44  ;;  %v3517_v61 = vpop.f32.mrf.mxu2  ;;  %v15016_v12 = vadd.f32 %v3561_v20, %v2382_v53  ;;  %v15018_v44 = vpop.f32.mrf.mxu0  ;;  %10809 = vmatmul.msk.f32.gmra.mxu0 %vm312_vm2, %v20665_v59  ;;  %10814 = vmatmul.msk.f32.gmra.mxu1 %vm312_vm2, %v20666_v48  ;;  %v20672_v20 = vld [vmem:[#allocation298_spill] sm:$0xff] }
 0x332   : > { %v15014_v40 = vadd.f32 %v3517_v61, %v2345_v16  ;;  %20663 = vst [vmem:[#allocation203_spill] sm:$0xff] %v15018_v44  ;;  %v20669_v16 = vld [vmem:[#allocation235_spill] sm:$0xff]  ;;  %v20671_v61 = vld [vmem:[#allocation236_spill] sm:$0xff] }
 0x333   : > { %10819 = vmatmul.msk.f32.gmra.mxu2 %vm312_vm2, %v20667_v63  ;;  %10824 = vmatmul.msk.f32.gmra.mxu3 %vm312_vm2, %v20668_v27  ;;  %v2348_v53 = vadd.f32 %v20670_v58, %v20669_v16  ;;  %v2385_v44 = vadd.f32 %v20672_v20, %v20671_v61  ;;  %v20675_v63 = vld [vmem:[#allocation278_spill] sm:$0xff]  ;;  %v20676_v27 = vld [vmem:[#allocation279_spill] sm:$0xff]  ;;  %v20677_v16 = vld [vmem:[#allocation280_spill] sm:$0xff] }
 0x334   : > { %v20678_v58 = vld [vmem:[#allocation325_spill] sm:$0xff]  ;;  %v20682_v61 = vld [vmem:[#allocation306_spill] sm:$0xff] }
 0x338   : > { %v15020_v4 = vpop.f32.mrf.mxu1 }
 0x339   : > { %20664 = vst [vmem:[#allocation175_spill] sm:$0xff] %v15020_v4  ;;  %v3520_v24 = vpop.f32.mrf.mxu2  ;;  %v3564_v4 = vpop.f32.mrf.mxu3  ;;  %10810 = vmatmul.msk.f32.gmra.mxu0 %vm312_vm2, %v20675_v63  ;;  %10815 = vmatmul.msk.f32.gmra.mxu1 %vm312_vm2, %v20676_v27 }
 0x33a   : > { %v15034_v57 = vadd.f32 %v3520_v24, %v2348_v53  ;;  %v15036_v59 = vadd.f32 %v3564_v4, %v2385_v44  ;;  %v15038_v54 = vpop.f32.mrf.mxu0  ;;  %v20679_v24 = vld [vmem:[#allocation239_spill] sm:$0xff]  ;;  %v20680_v53 = vld [vmem:[#allocation305_spill] sm:$0xff]  ;;  %v20681_v44 = vld [vmem:[#allocation240_spill] sm:$0xff] }
 0x33b   : > { %20673 = vst [vmem:[#allocation179_spill] sm:$0xff] %v15038_v54  ;;  %10820 = vmatmul.msk.f32.gmra.mxu2 %vm312_vm2, %v20677_v16  ;;  %10825 = vmatmul.msk.f32.gmra.mxu3 %vm312_vm2, %v20678_v58  ;;  %v2351_v4 = vadd.f32 %v20680_v53, %v20679_v24  ;;  %v2388_v20 = vadd.f32 %v20682_v61, %v20681_v44  ;;  %v20685_v16 = vld [vmem:[#allocation291_spill] sm:$0xff]  ;;  %v20686_v58 = vld [vmem:[#allocation293_spill] sm:$0xff]  ;;  %v20691_v44 = vld [vmem:[#allocation244_spill] sm:$0xff] }
 0x33c   : > { %v20687_v24 = vld [vmem:[#allocation295_spill] sm:$0xff]  ;;  %v20688_v53 = vld [vmem:[#allocation337_spill] sm:$0xff]  ;;  %v20692_v61 = vld [vmem:[#allocation318_spill] sm:$0xff] }
 0x340   : > { %v15040_v48 = vpop.f32.mrf.mxu1 }
 0x341   : > { %20674 = vst [vmem:[#allocation178_spill] sm:$0xff] %v15040_v48  ;;  %v3523_v54 = vpop.f32.mrf.mxu2  ;;  %v3567_v48 = vpop.f32.mrf.mxu3  ;;  %10811 = vmatmul.msk.f32.gmra.mxu0 %vm312_vm2, %v20685_v16  ;;  %10816 = vmatmul.msk.f32.gmra.mxu1 %vm312_vm2, %v20686_v58 }
 0x342   : > { %v15054_v14 = vadd.f32 %v3523_v54, %v2351_v4  ;;  %v15056_v63 = vadd.f32 %v3567_v48, %v2388_v20  ;;  %v15058_v56 = vpop.f32.mrf.mxu0  ;;  %v20689_v54 = vld [vmem:[#allocation243_spill] sm:$0xff]  ;;  %v20690_v4 = vld [vmem:[#allocation317_spill] sm:$0xff]  ;;  %v2391_v20 = vadd.f32 %v20692_v61, %v20691_v44  ;;  %v20701_v44 = vld [vmem:[#allocation248_spill] sm:$0xff] }
 0x343   : > { %20683 = vst [vmem:[#allocation289_spill] sm:$0xff] %v15058_v56  ;;  %10821 = vmatmul.msk.f32.gmra.mxu2 %vm312_vm2, %v20687_v24  ;;  %10826 = vmatmul.msk.f32.gmra.mxu3 %vm312_vm2, %v20688_v53  ;;  %v2354_v48 = vadd.f32 %v20690_v4, %v20689_v54  ;;  %v20695_v24 = vld [vmem:[#allocation311_spill] sm:$0xff]  ;;  %v20696_v53 = vld [vmem:[#allocation313_spill] sm:$0xff]  ;;  %v20702_v61 = vld [vmem:[#allocation330_spill] sm:$0xff] }
 0x344   : > { %v20697_v54 = vld [vmem:[#allocation315_spill] sm:$0xff]  ;;  %v20700_v4 = vld [vmem:[#allocation329_spill] sm:$0xff] }
 0x348   : > { %v15060_v27 = vpop.f32.mrf.mxu1 }
 0x349   : > { %20684 = vst [vmem:[#allocation227_spill] sm:$0xff] %v15060_v27  ;;  %v3526_v56 = vpop.f32.mrf.mxu2  ;;  %v3570_v27 = vpop.f32.mrf.mxu3  ;;  %10828 = vmatmul.msk.f32.vlgmr.msrb.gmra.mxu0 %vm312_vm2, %v20695_v24  ;;  %10833 = vmatmul.msk.f32.vlgmr.msrb.gmra.mxu1 %vm312_vm2, %v20696_v53 }
 0x34a   : > { %v15074_v39 = vadd.f32 %v3526_v56, %v2354_v48  ;;  %v15076_v16 = vadd.f32 %v3570_v27, %v2391_v20  ;;  %v15078_v45 = vpop.f32.mrf.mxu0  ;;  %10867 = vmatpush.msk.msrb.mxu0 %vm321_vm0, %v14564_v18  ;;  %v20698_v56 = vld [vmem:[#allocation357_spill] sm:$0xff]  ;;  %v20699_v27 = vld [vmem:[#allocation247_spill] sm:$0xff]  ;;  %v2530_v20 = vadd.f32 %v20702_v61, %v20701_v44  ;;  %10872 = vmatpush.msk.msrb.mxu1 %vm321_vm0, %v14564_v18  ;;  %v20708_v44 = vld [vmem:[#allocation358_spill] sm:$0xff] }
 0x34b   : > { %20693 = vst [vmem:[#allocation269_spill] sm:$0xff] %v15078_v45  ;;  %10838 = vmatmul.msk.f32.vlgmr.msrb.gmra.mxu2 %vm312_vm2, %v20697_v54  ;;  %10843 = vmatmul.msk.f32.vlgmr.msrb.gmra.mxu3 %vm312_vm2, %v20698_v56  ;;  %v2493_v48 = vadd.f32 %v20700_v4, %v20699_v27  ;;  %v20706_v27 = vld [vmem:[#allocation314_spill] sm:$0xff]  ;;  %v20707_v4 = vld [vmem:[#allocation316_spill] sm:$0xff]  ;;  %v20710_v61 = vld [vmem:[#allocation345_spill] sm:$0xff] }
 0x34c   : > { %10877 = vmatpush.msk.msrb.mxu2 %vm321_vm0, %v14564_v18  ;;  %10882 = vmatpush.msk.msrb.mxu3 %vm321_vm0, %v14564_v18 }
 0x350   : > { %v15080_v58 = vpop.f32.mrf.mxu1 }
 0x351   : > { %20694 = vst [vmem:[#allocation228_spill] sm:$0xff] %v15080_v58  ;;  %v3693_v24 = vpop.f32.mrf.mxu2  ;;  %v3737_v53 = vpop.f32.mrf.mxu3  ;;  %10829 = vmatmul.msk.f32.gmra.mxu0 %vm312_vm2, %v20705_v49  ;;  %10834 = vmatmul.msk.f32.gmra.mxu1 %vm312_vm2, %v20706_v27 }
 0x352   : > { %v15102_v54 = vadd.f32 %v3693_v24, %v2493_v48  ;;  %v15104_v56 = vadd.f32 %v3737_v53, %v2530_v20  ;;  %v15106_v58 = vpop.f32.mrf.mxu0  ;;  %v20709_v48 = vld [vmem:[#allocation251_spill] sm:$0xff]  ;;  %v20711_v24 = vld [vmem:[#allocation252_spill] sm:$0xff]  ;;  %v20712_v53 = vld [vmem:[#allocation346_spill] sm:$0xff] }
 0x353   : > { %20703 = vst [vmem:[#allocation270_spill] sm:$0xff] %v15106_v58  ;;  %10839 = vmatmul.msk.f32.gmra.mxu2 %vm312_vm2, %v20707_v4  ;;  %10844 = vmatmul.msk.f32.gmra.mxu3 %vm312_vm2, %v20708_v44  ;;  %v2496_v20 = vadd.f32 %v20710_v61, %v20709_v48  ;;  %v2533_v58 = vadd.f32 %v20712_v53, %v20711_v24  ;;  %v20715_v4 = vld [vmem:[#allocation326_spill] sm:$0xff]  ;;  %v20716_v44 = vld [vmem:[#allocation327_spill] sm:$0xff]  ;;  %v20717_v48 = vld [vmem:[#allocation328_spill] sm:$0xff] }
 0x354   : > { %v20718_v61 = vld [vmem:[#allocation373_spill] sm:$0xff]  ;;  %v20722_v24 = vld [vmem:[#allocation354_spill] sm:$0xff] }
 0x358   : > { %v15108_v45 = vpop.f32.mrf.mxu1 }
 0x359   : > { %20704 = vst [vmem:[#allocation263_spill] sm:$0xff] %v15108_v45  ;;  %v3696_v62 = vpop.f32.mrf.mxu2  ;;  %v3740_v45 = vpop.f32.mrf.mxu3  ;;  %10830 = vmatmul.msk.f32.gmra.mxu0 %vm312_vm2, %v20715_v4  ;;  %10835 = vmatmul.msk.f32.gmra.mxu1 %vm312_vm2, %v20716_v44 }
 0x35a   : > { %v15122_v10 = vadd.f32 %v3696_v62, %v2496_v20  ;;  %v15124_v49 = vadd.f32 %v3740_v45, %v2533_v58  ;;  %v15126_v17 = vpop.f32.mrf.mxu0  ;;  %v20719_v62 = vld [vmem:[#allocation255_spill] sm:$0xff]  ;;  %v20720_v20 = vld [vmem:[#allocation353_spill] sm:$0xff]  ;;  %v20721_v58 = vld [vmem:[#allocation256_spill] sm:$0xff] }
 0x35b   : > { %20713 = vst [vmem:[#allocation265_spill] sm:$0xff] %v15126_v17  ;;  %10840 = vmatmul.msk.f32.gmra.mxu2 %vm312_vm2, %v20717_v48  ;;  %10845 = vmatmul.msk.f32.gmra.mxu3 %vm312_vm2, %v20718_v61  ;;  %v2499_v45 = vadd.f32 %v20720_v20, %v20719_v62  ;;  %v2536_v53 = vadd.f32 %v20722_v24, %v20721_v58  ;;  %v20725_v48 = vld [vmem:[#allocation339_spill] sm:$0xff]  ;;  %v20726_v61 = vld [vmem:[#allocation341_spill] sm:$0xff]  ;;  %v20731_v58 = vld [vmem:[#allocation40_spill] sm:$0xff] }
 0x35c   : > { %v20727_v62 = vld [vmem:[#allocation343_spill] sm:$0xff]  ;;  %v20728_v20 = vld [vmem:[#allocation385_spill] sm:$0xff]  ;;  %v20732_v24 = vld [vmem:[#allocation366_spill] sm:$0xff] }
 0x360   : > { %v15128_v27 = vpop.f32.mrf.mxu1 }
 0x361   : > { %20714 = vst [vmem:[#allocation267_spill] sm:$0xff] %v15128_v27  ;;  %v3699_v17 = vpop.f32.mrf.mxu2  ;;  %v3743_v27 = vpop.f32.mrf.mxu3  ;;  %10831 = vmatmul.msk.f32.gmra.mxu0 %vm312_vm2, %v20725_v48  ;;  %10836 = vmatmul.msk.f32.gmra.mxu1 %vm312_vm2, %v20726_v61 }
 0x362   : > { %v15142_v51 = vadd.f32 %v3699_v17, %v2499_v45  ;;  %v15144_v4 = vadd.f32 %v3743_v27, %v2536_v53  ;;  %v15146_v42 = vpop.f32.mrf.mxu0  ;;  %v20729_v17 = vld [vmem:[#allocation39_spill] sm:$0xff]  ;;  %v20730_v45 = vld [vmem:[#allocation365_spill] sm:$0xff]  ;;  %v2539_v53 = vadd.f32 %v20732_v24, %v20731_v58  ;;  %v20742_v24 = vld [vmem:[#allocation378_spill] sm:$0xff] }
 0x363   : > { %20723 = vst [vmem:[#allocation309_spill] sm:$0xff] %v15146_v42  ;;  %10841 = vmatmul.msk.f32.gmra.mxu2 %vm312_vm2, %v20727_v62  ;;  %10846 = vmatmul.msk.f32.gmra.mxu3 %vm312_vm2, %v20728_v20  ;;  %v2502_v27 = vadd.f32 %v20730_v45, %v20729_v17  ;;  %v20735_v62 = vld [vmem:[#allocation359_spill] sm:$0xff]  ;;  %v20736_v20 = vld [vmem:[#allocation361_spill] sm:$0xff] }
 0x364   : > { %v20737_v17 = vld [vmem:[#allocation363_spill] sm:$0xff]  ;;  %v20740_v45 = vld [vmem:[#allocation377_spill] sm:$0xff] }
 0x365   : > { %v20741_v58 = vld [vmem:[#allocation51_spill] sm:$0xff] }
 0x368   : > { %v15148_v44 = vpop.f32.mrf.mxu1 }
 0x369   : > { %20724 = vst [vmem:[#allocation231_spill] sm:$0xff] %v15148_v44  ;;  %v3702_v42 = vpop.f32.mrf.mxu2  ;;  %v3746_v44 = vpop.f32.mrf.mxu3  ;;  %10848 = vmatmul.msk.f32.vlgmr.msra.gmra.mxu0 %vm312_vm2, %v20735_v62  ;;  %10853 = vmatmul.msk.f32.vlgmr.msra.gmra.mxu1 %vm312_vm2, %v20736_v20 }
 0x36a   : > { %v15162_v8 = vadd.f32 %v3702_v42, %v2502_v27  ;;  %v15164_v48 = vadd.f32 %v3746_v44, %v2539_v53  ;;  %v15166_v30 = vpop.f32.mrf.mxu0  ;;  %10887 = vmatpush.msk.msra.mxu0 %vm321_vm0, %v14564_v18  ;;  %v20738_v42 = vld [vmem:[#allocation405_spill] sm:$0xff]  ;;  %v2678_v53 = vadd.f32 %v20742_v24, %v20741_v58  ;;  %10892 = vmatpush.msk.msra.mxu1 %vm321_vm0, %v14564_v18  ;;  %v20749_v58 = vld [vmem:[#allocation406_spill] sm:$0xff] }
 0x36b   : > { %20733 = vst [vmem:[#allocation281_spill] sm:$0xff] %v15166_v30  ;;  %10858 = vmatmul.msk.f32.vlgmr.msra.gmra.mxu2 %vm312_vm2, %v20737_v17  ;;  %10863 = vmatmul.msk.f32.vlgmr.msra.gmra.mxu3 %vm312_vm2, %v20738_v42  ;;  %v20739_v44 = vld [vmem:[#allocation49_spill] sm:$0xff] }
 0x36c   : > { %10897 = vmatpush.msk.msra.mxu2 %vm321_vm0, %v14564_v18  ;;  %10902 = vmatpush.msk.msra.mxu3 %vm321_vm0, %v14564_v18  ;;  %v2641_v27 = vadd.f32 %v20740_v45, %v20739_v44  ;;  %v20747_v44 = vld [vmem:[#allocation362_spill] sm:$0xff]  ;;  %v20748_v45 = vld [vmem:[#allocation364_spill] sm:$0xff]  ;;  %v20751_v24 = vld [vmem:[#allocation393_spill] sm:$0xff] }
 0x370   : > { %v15168_v61 = vpop.f32.mrf.mxu1 }
 0x371   : > { %20734 = vst [vmem:[#allocation232_spill] sm:$0xff] %v15168_v61  ;;  %v3869_v62 = vpop.f32.mrf.mxu2  ;;  %v3913_v20 = vpop.f32.mrf.mxu3  ;;  %10849 = vmatmul.msk.f32.gmra.mxu0 %vm312_vm2, %v20746_v15  ;;  %10854 = vmatmul.msk.f32.gmra.mxu1 %vm312_vm2, %v20747_v44 }
 0x372   : > { %v15190_v17 = vadd.f32 %v3869_v62, %v2641_v27  ;;  %v15192_v42 = vadd.f32 %v3913_v20, %v2678_v53  ;;  %v15194_v61 = vpop.f32.mrf.mxu0  ;;  %v20750_v27 = vld [vmem:[#allocation50_spill] sm:$0xff]  ;;  %v20752_v62 = vld [vmem:[#allocation52_spill] sm:$0xff] }
 0x373   : > { %20744 = vst [vmem:[#allocation264_spill] sm:$0xff] %v15194_v61  ;;  %10859 = vmatmul.msk.f32.gmra.mxu2 %vm312_vm2, %v20748_v45  ;;  %10864 = vmatmul.msk.f32.gmra.mxu3 %vm312_vm2, %v20749_v58  ;;  %v2644_v53 = vadd.f32 %v20751_v24, %v20750_v27  ;;  %v20753_v20 = vld [vmem:[#allocation394_spill] sm:$0xff]  ;;  %v20759_v58 = vld [vmem:[#allocation375_spill] sm:$0xff]  ;;  %v20760_v27 = vld [vmem:[#allocation376_spill] sm:$0xff] }
 0x374   : > { %20743 = vst [vmem:[#allocation282_spill] sm:$0xff] %v15192_v42  ;;  %v2681_v61 = vadd.f32 %v20753_v20, %v20752_v62  ;;  %v20758_v45 = vld [vmem:[#allocation374_spill] sm:$0xff]  ;;  %v20761_v24 = vld [vmem:[#allocation421_spill] sm:$0xff] }
 0x375   : > { %v20765_v62 = vld [vmem:[#allocation402_spill] sm:$0xff] }
 0x378   : > { %v15196_v30 = vpop.f32.mrf.mxu1 }
 0x379   : > { %20745 = vst [vmem:[#allocation266_spill] sm:$0xff] %v15196_v30  ;;  %v3872_v0 = vpop.f32.mrf.mxu2  ;;  %v3916_v30 = vpop.f32.mrf.mxu3  ;;  %10850 = vmatmul.msk.f32.gmra.mxu0 %vm312_vm2, %v20758_v45  ;;  %10855 = vmatmul.msk.f32.gmra.mxu1 %vm312_vm2, %v20759_v58 }
 0x37a   : > { %v15210_v35 = vadd.f32 %v3872_v0, %v2644_v53  ;;  %v15212_v15 = vadd.f32 %v3916_v30, %v2681_v61  ;;  %v15214_v42 = vpop.f32.mrf.mxu0  ;;  %v20762_v0 = vld [vmem:[#allocation59_spill] sm:$0xff]  ;;  %v20763_v53 = vld [vmem:[#allocation401_spill] sm:$0xff]  ;;  %v20764_v61 = vld [vmem:[#allocation62_spill] sm:$0xff] }
 0x37b   : > { %20756 = vst [vmem:[#allocation235_spill] sm:$0xff] %v15214_v42  ;;  %10860 = vmatmul.msk.f32.gmra.mxu2 %vm312_vm2, %v20760_v27  ;;  %10865 = vmatmul.msk.f32.gmra.mxu3 %vm312_vm2, %v20761_v24  ;;  %v2647_v30 = vadd.f32 %v20763_v53, %v20762_v0  ;;  %v2684_v20 = vadd.f32 %v20765_v62, %v20764_v61  ;;  %v20769_v27 = vld [vmem:[#allocation387_spill] sm:$0xff]  ;;  %v20770_v24 = vld [vmem:[#allocation389_spill] sm:$0xff]  ;;  %v20775_v61 = vld [vmem:[#allocation414_spill] sm:$0xff] }
 0x37c   : > { %20754 = vst [vmem:[#allocation268_spill] sm:$0xff] %v15210_v35  ;;  %v20771_v0 = vld [vmem:[#allocation391_spill] sm:$0xff]  ;;  %v20773_v53 = vld [vmem:[#allocation413_spill] sm:$0xff] }
 0x37d   : > { %20755 = vst [vmem:[#allocation310_spill] sm:$0xff] %v15212_v15 }
 0x380   : > { %v15216_v44 = vpop.f32.mrf.mxu1 }
 0x381   : > { %20757 = vst [vmem:[#allocation297_spill] sm:$0xff] %v15216_v44  ;;  %v3875_v42 = vpop.f32.mrf.mxu2  ;;  %v3919_v44 = vpop.f32.mrf.mxu3  ;;  %10851 = vmatmul.msk.f32.gmra.mxu0 %vm312_vm2, %v20769_v27  ;;  %10856 = vmatmul.msk.f32.gmra.mxu1 %vm312_vm2, %v20770_v24 }
 0x382   : > { %v15230_v15 = vadd.f32 %v3875_v42, %v2647_v30  ;;  %v15232_v45 = vadd.f32 %v3919_v44, %v2684_v20  ;;  %v15234_v35 = vpop.f32.mrf.mxu0  ;;  %v20772_v42 = vld [vmem:[#allocation67_spill] sm:$0xff]  ;;  %v20774_v30 = vld [vmem:[#allocation70_spill] sm:$0xff] }
 0x383   : > { %20767 = vst [vmem:[#allocation298_spill] sm:$0xff] %v15234_v35  ;;  %10861 = vmatmul.msk.f32.gmra.mxu2 %vm312_vm2, %v20771_v0  ;;  %10866 = vmatmul.msk.f32.gmra.mxu3 %vm312_vm2, %v14406_v43  ;;  %v2650_v44 = vadd.f32 %v20773_v53, %v20772_v42  ;;  %v2687_v62 = vadd.f32 %v20775_v61, %v20774_v30  ;;  %v20778_v0 = vld [vmem:[#allocation407_spill] sm:$0xff]  ;;  %v20779_v43 = vld [vmem:[#allocation409_spill] sm:$0xff]  ;;  %v20781_v30 = vld [vmem:[#allocation100_spill] sm:$0xff] }
 0x384   : > { %20766 = vst [vmem:[#allocation236_spill] sm:$0xff] %v15232_v45  ;;  %v20780_v42 = vld [vmem:[#allocation411_spill] sm:$0xff] }
 0x388   : > { %v15236_v58 = vpop.f32.mrf.mxu1 }
 0x389   : > { %20768 = vst [vmem:[#allocation278_spill] sm:$0xff] %v15236_v58  ;;  %v3878_v20 = vpop.f32.mrf.mxu2  ;;  %v3922_v58 = vpop.f32.mrf.mxu3  ;;  %10868 = vmatmul.msk.f32.vlgmr.msrb.gmra.mxu0 %vm312_vm2, %v20778_v0  ;;  %10873 = vmatmul.msk.f32.vlgmr.msrb.gmra.mxu1 %vm312_vm2, %v20779_v43  ;;  %v20785_v0 = vld [vmem:[#allocation410_spill] sm:$0xff]  ;;  %v20786_v43 = vld [vmem:[#allocation412_spill] sm:$0xff] }
 0x38a   : > { %v15250_v35 = vadd.f32 %v3878_v20, %v2650_v44  ;;  %v15252_v27 = vadd.f32 %v3922_v58, %v2687_v62  ;;  %v15254_v45 = vpop.f32.mrf.mxu0  ;;  %10907 = vmatpush.msk.msrb.mxu0 %vm321_vm0, %v14564_v18  ;;  %10912 = vmatpush.msk.msrb.mxu1 %vm321_vm0, %v14564_v18  ;;  %v20784_v20 = vld [vmem:[#allocation408_spill] sm:$0xff] }
 0x38b   : > { %20776 = vst [vmem:[#allocation279_spill] sm:$0xff] %v15254_v45  ;;  %10878 = vmatmul.msk.f32.vlgmr.msrb.gmra.mxu2 %vm312_vm2, %v20780_v42  ;;  %10883 = vmatmul.msk.f32.vlgmr.msrb.gmra.mxu3 %vm312_vm2, %v14486_v55  ;;  %v20835_v45 = vld [vmem:[#allocation481_spill] sm:$0xff] }
 0x38c   : > { %10917 = vmatpush.msk.msrb.mxu2 %vm321_vm0, %v14564_v18  ;;  %10922 = vmatpush.msk.msrb.mxu3 %vm321_vm0, %v14564_v18 }
 0x390   : > { %v15256_v24 = vpop.f32.mrf.mxu1 }
 0x391   : > { %20777 = vst [vmem:[#allocation280_spill] sm:$0xff] %v15256_v24  ;;  %v4115_v58 = vpop.f32.mrf.mxu2  ;;  %v4144_v53 = vpop.f32.mrf.mxu3  ;;  %10869 = vmatmul.msk.f32.gmra.mxu0 %vm312_vm2, %v20784_v20  ;;  %10874 = vmatmul.msk.f32.gmra.mxu1 %vm312_vm2, %v20785_v0  ;;  %v20789_v20 = vld [vmem:[#allocation422_spill] sm:$0xff]  ;;  %v20790_v0 = vld [vmem:[#allocation423_spill] sm:$0xff] }
 0x392   : > { %v15275_v44 = vadd.f32 %v4115_v58, %v14384_v26  ;;  %v15278_v61 = vadd.f32 %v4144_v53, %v20781_v30  ;;  %v15280_v62 = vpop.f32.mrf.mxu0  ;;  %v20834_v24 = vld [vmem:[#allocation479_spill] sm:$0xff] }
 0x393   : > { %20782 = vst [vmem:[#allocation325_spill] sm:$0xff] %v15280_v62  ;;  %10879 = vmatmul.msk.f32.gmra.mxu2 %vm312_vm2, %v20786_v43  ;;  %10884 = vmatmul.msk.f32.gmra.mxu3 %vm312_vm2, %v14490_v19  ;;  %v20791_v43 = vld [vmem:[#allocation424_spill] sm:$0xff] }
 0x394   : > { %v20811_v62 = vld [vmem:[#allocation448_spill] sm:$0xff] }
 0x398   : > { %v15282_v55 = vpop.f32.mrf.mxu1 }
 0x399   : > { %20783 = vst [vmem:[#allocation239_spill] sm:$0xff] %v15282_v55  ;;  %v4118_v26 = vpop.f32.mrf.mxu2  ;;  %v4147_v18 = vpop.f32.mrf.mxu3  ;;  %10870 = vmatmul.msk.f32.gmra.mxu0 %vm312_vm2, %v20789_v20  ;;  %10875 = vmatmul.msk.f32.gmra.mxu1 %vm312_vm2, %v20790_v0  ;;  %v20796_v55 = vld [vmem:[#allocation431_spill] sm:$0xff]  ;;  %v20797_v0 = vld [vmem:[#allocation433_spill] sm:$0xff] }
 0x39a   : > { %v15293_v42 = vadd.f32 %v4118_v26, %v14441_v47  ;;  %v15296_v58 = vadd.f32 %v4147_v18, %v14443_v37  ;;  %v15298_v53 = vpop.f32.mrf.mxu0  ;;  %v20792_v37 = vld [vmem:[#allocation123_spill] sm:$0xff]  ;;  %v20793_v18 = vld [vmem:[#allocation124_spill] sm:$0xff] }
 0x39b   : > { %20787 = vst [vmem:[#allocation305_spill] sm:$0xff] %v15298_v53  ;;  %10880 = vmatmul.msk.f32.gmra.mxu2 %vm312_vm2, %v20791_v43  ;;  %10885 = vmatmul.msk.f32.gmra.mxu3 %vm312_vm2, %v14550_v13  ;;  %v20798_v43 = vld [vmem:[#allocation435_spill] sm:$0xff] }
 0x3a0   : > { %v15300_v30 = vpop.f32.mrf.mxu1 }
 0x3a1   : > { %20788 = vst [vmem:[#allocation240_spill] sm:$0xff] %v15300_v30  ;;  %v4121_v47 = vpop.f32.mrf.mxu2  ;;  %v4150_v19 = vpop.f32.mrf.mxu3  ;;  %10871 = vmatmul.msk.f32.gmra.mxu0 %vm312_vm2, %v20796_v55  ;;  %10876 = vmatmul.msk.f32.gmra.mxu1 %vm312_vm2, %v20797_v0  ;;  %v20803_v0 = vld [vmem:[#allocation445_spill] sm:$0xff] }
 0x3a2   : > { %v15311_v26 = vadd.f32 %v4121_v47, %v20792_v37  ;;  %v15314_v53 = vadd.f32 %v4150_v19, %v20793_v18  ;;  %v15316_v30 = vpop.f32.mrf.mxu0  ;;  %v20799_v37 = vld [vmem:[#allocation136_spill] sm:$0xff] }
 0x3a3   : > { %20794 = vst [vmem:[#allocation306_spill] sm:$0xff] %v15316_v30  ;;  %10881 = vmatmul.msk.f32.gmra.mxu2 %vm312_vm2, %v20798_v43  ;;  %10886 = vmatmul.msk.f32.gmra.mxu3 %vm312_vm2, %v14611_v6  ;;  %v20802_v30 = vld [vmem:[#allocation443_spill] sm:$0xff] }
 0x3a4   : > { %v20804_v43 = vld [vmem:[#allocation447_spill] sm:$0xff] }
 0x3a8   : > { %v15318_v20 = vpop.f32.mrf.mxu1 }
 0x3a9   : > { %20795 = vst [vmem:[#allocation291_spill] sm:$0xff] %v15318_v20  ;;  %v4124_v13 = vpop.f32.mrf.mxu2  ;;  %v4153_v47 = vpop.f32.mrf.mxu3  ;;  %10888 = vmatmul.msk.f32.vlgmr.msra.gmra.mxu0 %vm312_vm2, %v20802_v30  ;;  %10893 = vmatmul.msk.f32.vlgmr.msra.gmra.mxu1 %vm312_vm2, %v20803_v0 }
 0x3aa   : > { %v15329_v19 = vadd.f32 %v4124_v13, %v14528_v29  ;;  %v15332_v18 = vadd.f32 %v4153_v47, %v20799_v37  ;;  %v15334_v20 = vpop.f32.mrf.mxu0  ;;  %v15349_v29 = vld [vmem:[%s19372_s1 + $0x10] sm:$0x7] }
 0x3ab   : > { %20800 = vst [vmem:[#allocation293_spill] sm:$0xff] %v15334_v20  ;;  %10898 = vmatmul.msk.f32.vlgmr.msra.gmra.mxu2 %vm312_vm2, %v20804_v43  ;;  %10903 = vmatmul.msk.f32.vlgmr.msra.gmra.mxu3 %vm312_vm2, %v14691_v25  ;;  %v20805_v25 = vld [vmem:[#allocation148_spill] sm:$0xff]  ;;  %v20806_v47 = vld [vmem:[#allocation457_spill] sm:$0xff]  ;;  %v20810_v20 = vld [vmem:[#allocation446_spill] sm:$0xff] }
 0x3ac   : > { %10937 = vmatpush.msk.msra.mxu2 %vm321_vm0, %v15349_v29  ;;  %10942 = vmatpush.msk.msra.mxu3 %vm321_vm0, %v15349_v29 }
 0x3ad   : > { %10927 = vmatpush.msk.msra.mxu0 %vm321_vm0, %v15349_v29  ;;  %10932 = vmatpush.msk.msra.mxu1 %vm321_vm0, %v15349_v29 }
 0x3b0   : > { %v15336_v55 = vpop.f32.mrf.mxu1 }
 0x3b1   : > { %20801 = vst [vmem:[#allocation295_spill] sm:$0xff] %v15336_v55  ;;  %v4231_v6 = vpop.f32.mrf.mxu2  ;;  %v4260_v30 = vpop.f32.mrf.mxu3  ;;  %v20809_v55 = vld [vmem:[#allocation444_spill] sm:$0xff]  ;;  %10894 = vmatmul.msk.f32.gmra.mxu1 %vm312_vm2, %v20810_v20  ;;  %v20815_v20 = vld [vmem:[#allocation455_spill] sm:$0xff] }
 0x3b2   : > { %v15360_v13 = vadd.f32 %v4231_v6, %v20805_v25  ;;  %v15363_v37 = vadd.f32 %v4260_v30, %v20806_v47  ;;  %v15365_v0 = vpop.f32.mrf.mxu0  ;;  %10889 = vmatmul.msk.f32.gmra.mxu0 %vm312_vm2, %v20809_v55 }
 0x3b3   : > { %20807 = vst [vmem:[#allocation337_spill] sm:$0xff] %v15365_v0  ;;  %10899 = vmatmul.msk.f32.gmra.mxu2 %vm312_vm2, %v20811_v62  ;;  %10904 = vmatmul.msk.f32.gmra.mxu3 %vm312_vm2, %v14695_v46  ;;  %v20814_v0 = vld [vmem:[#allocation454_spill] sm:$0xff]  ;;  %v20816_v62 = vld [vmem:[#allocation456_spill] sm:$0xff]  ;;  %v20817_v46 = vld [vmem:[#allocation171_spill] sm:$0xff] }
 0x3b8   : > { %v15367_v43 = vpop.f32.mrf.mxu1 }
 0x3b9   : > { %20808 = vst [vmem:[#allocation243_spill] sm:$0xff] %v15367_v43  ;;  %v4234_v6 = vpop.f32.mrf.mxu2  ;;  %v4263_v25 = vpop.f32.mrf.mxu3  ;;  %10895 = vmatmul.msk.f32.gmra.mxu1 %vm312_vm2, %v20815_v20  ;;  %v20821_v20 = vld [vmem:[#allocation464_spill] sm:$0xff] }
 0x3ba   : > { %v15378_v30 = vadd.f32 %v4234_v6, %v14646_v21  ;;  %v15381_v47 = vadd.f32 %v4263_v25, %v14648_v7  ;;  %v15383_v43 = vpop.f32.mrf.mxu0  ;;  %10890 = vmatmul.msk.f32.gmra.mxu0 %vm312_vm2, %v20814_v0  ;;  %v20818_v25 = vld [vmem:[#allocation172_spill] sm:$0xff] }
 0x3bb   : > { %20812 = vst [vmem:[#allocation317_spill] sm:$0xff] %v15383_v43  ;;  %10900 = vmatmul.msk.f32.gmra.mxu2 %vm312_vm2, %v20816_v62  ;;  %10905 = vmatmul.msk.f32.gmra.mxu3 %vm312_vm2, %v14755_v33  ;;  %v20822_v62 = vld [vmem:[#allocation466_spill] sm:$0xff]  ;;  %v20823_v33 = vld [vmem:[#allocation468_spill] sm:$0xff] }
 0x3c0   : > { %v15385_v55 = vpop.f32.mrf.mxu1 }
 0x3c1   : > { %20813 = vst [vmem:[#allocation244_spill] sm:$0xff] %v15385_v55  ;;  %v4237_v21 = vpop.f32.mrf.mxu2  ;;  %v4266_v7 = vpop.f32.mrf.mxu3  ;;  %10896 = vmatmul.msk.f32.gmra.mxu1 %vm312_vm2, %v20822_v62  ;;  %v15424_v62 = vld [vmem:[%s11932_s19 + $0x380] sm:$0xff] }
 0x3c2   : > { %v15396_v6 = vadd.f32 %v4237_v21, %v20817_v46  ;;  %v15399_v55 = vadd.f32 %v4266_v7, %v20818_v25  ;;  %v15401_v43 = vpop.f32.mrf.mxu0  ;;  %10891 = vmatmul.msk.f32.gmra.mxu0 %vm312_vm2, %v20821_v20 }
 0x3c3   : > { %20819 = vst [vmem:[#allocation318_spill] sm:$0xff] %v15401_v43  ;;  %10901 = vmatmul.msk.f32.gmra.mxu2 %vm312_vm2, %v20823_v33  ;;  %10906 = vmatmul.msk.f32.gmra.mxu3 %vm312_vm2, %v14811_v31  ;;  %v20826_v43 = vld [vmem:[#allocation476_spill] sm:$0xff]  ;;  %v20827_v33 = vld [vmem:[#allocation478_spill] sm:$0xff] }
 0x3c8   : > { %v15403_v0 = vpop.f32.mrf.mxu1 }
 0x3c9   : > { %20820 = vst [vmem:[#allocation311_spill] sm:$0xff] %v15403_v0  ;;  %v4240_v21 = vpop.f32.mrf.mxu2  ;;  %v4269_v46 = vpop.f32.mrf.mxu3  ;;  %10913 = vmatmul.msk.f32.vlgmr.msrb.gmra.mxu1 %vm312_vm2, %v20827_v33 }
 0x3ca   : > { %v15414_v7 = vadd.f32 %v4240_v21, %v14733_v2  ;;  %v15417_v25 = vadd.f32 %v4269_v46, %v14735_v38  ;;  %v15419_v0 = vpop.f32.mrf.mxu0  ;;  %10908 = vmatmul.msk.f32.vlgmr.msrb.gmra.mxu0 %vm312_vm2, %v20826_v43  ;;  %v20828_v2 = vld [vmem:[#allocation480_spill] sm:$0xff]  ;;  %10952 = vmatpush.msk.msrb.mxu1 %vm321_vm0, %v15349_v29  ;;  %v20829_v21 = vld [vmem:[#allocation195_spill] sm:$0xff] }
 0x3cb   : > { %20824 = vst [vmem:[#allocation313_spill] sm:$0xff] %v15419_v0  ;;  %10947 = vmatpush.msk.msrb.mxu0 %vm321_vm0, %v15349_v29  ;;  %10918 = vmatmul.msk.f32.vlgmr.msrb.gmra.mxu2 %vm312_vm2, %v20828_v2  ;;  %v20833_v0 = vld [vmem:[#allocation477_spill] sm:$0xff] }
 0x3cc   : > { %10923 = vmatmul.msk.f32.vlgmr.msrb.gmra.mxu3 %vm312_vm2, %v15424_v62  ;;  %10957 = vmatpush.msk.msrb.mxu2 %vm321_vm0, %v15349_v29 }
 0x3cd   : > { %10962 = vmatpush.msk.msrb.mxu3 %vm321_vm0, %v15349_v29 }
 0x3d0   : > { %v15421_v20 = vpop.f32.mrf.mxu1 }
 0x3d1   : > { %20825 = vst [vmem:[#allocation315_spill] sm:$0xff] %v15421_v20  ;;  %v4347_v38 = vpop.f32.mrf.mxu2  ;;  %v4376_v31 = vpop.f32.mrf.mxu3  ;;  %v15453_v20 = vld [vmem:[%s11932_s19 + $0x388] sm:$0xff]  ;;  %10914 = vmatmul.msk.f32.gmra.mxu1 %vm312_vm2, %v20834_v24  ;;  %v15474_v24 = vld [vmem:[%s11932_s19 + $0x390] sm:$0xff] }
 0x3d2   : > { %v15443_v43 = vadd.f32 %v4347_v38, %v14789_v34  ;;  %v15446_v46 = vadd.f32 %v4376_v31, %v20829_v21  ;;  %v15448_v33 = vpop.f32.mrf.mxu0  ;;  %10909 = vmatmul.msk.f32.gmra.mxu0 %vm312_vm2, %v20833_v0 }
 0x3d3   : > { %20831 = vst [vmem:[#allocation247_spill] sm:$0xff] %v15448_v33  ;;  %10919 = vmatmul.msk.f32.gmra.mxu2 %vm312_vm2, %v20835_v45  ;;  %v20839_v33 = vld [vmem:[#allocation486_spill] sm:$0xff]  ;;  %v20840_v45 = vld [vmem:[#allocation487_spill] sm:$0xff] }
 0x3d4   : > { %20830 = vst [vmem:[#allocation357_spill] sm:$0xff] %v15446_v46  ;;  %10924 = vmatmul.msk.f32.gmra.mxu3 %vm312_vm2, %v15453_v20  ;;  %v20841_v46 = vld [vmem:[#allocation488_spill] sm:$0xff] }
 0x3d8   : > { %v15450_v2 = vpop.f32.mrf.mxu1 }
 0x3d9   : > { %20832 = vst [vmem:[#allocation329_spill] sm:$0xff] %v15450_v2  ;;  %v4350_v34 = vpop.f32.mrf.mxu2  ;;  %v4379_v38 = vpop.f32.mrf.mxu3  ;;  %10915 = vmatmul.msk.f32.gmra.mxu1 %vm312_vm2, %v20840_v45  ;;  %v20844_v45 = vld [vmem:[#allocation495_spill] sm:$0xff] }
 0x3da   : > { %v15464_v31 = vadd.f32 %v4350_v34, %v14846_v22  ;;  %v15467_v21 = vadd.f32 %v4379_v38, %v14848_v9  ;;  %v15469_v2 = vpop.f32.mrf.mxu0  ;;  %10910 = vmatmul.msk.f32.gmra.mxu0 %vm312_vm2, %v20839_v33 }
 0x3db   : > { %20837 = vst [vmem:[#allocation330_spill] sm:$0xff] %v15469_v2  ;;  %10920 = vmatmul.msk.f32.gmra.mxu2 %vm312_vm2, %v20841_v46  ;;  %v15495_v2 = vld [vmem:[%s11932_s19 + $0x398] sm:$0x3f]  ;;  %v20845_v46 = vld [vmem:[#allocation497_spill] sm:$0xff] }
 0x3dc   : > { %20836 = vst [vmem:[#allocation248_spill] sm:$0xff] %v15467_v21  ;;  %10925 = vmatmul.msk.f32.gmra.mxu3 %vm312_vm2, %v15474_v24  ;;  %v20846_v21 = vld [vmem:[#allocation499_spill] sm:$0xff] }
 0x3e0   : > { %v15471_v0 = vpop.f32.mrf.mxu1 }
 0x3e1   : > { %20838 = vst [vmem:[#allocation312_spill] sm:$0xff] %v15471_v0  ;;  %v4353_v22 = vpop.f32.mrf.mxu2  ;;  %v4382_v9 = vpop.f32.mrf.mxu3  ;;  %10916 = vmatmul.msk.f32.gmra.mxu1 %vm312_vm2, %v20845_v46  ;;  %v20851_v46 = vld [vmem:[#allocation4_spill] sm:$0xff] }
 0x3e2   : > { %v15485_v34 = vadd.f32 %v4353_v22, %v14878_v5  ;;  %v15488_v38 = vadd.f32 %v4382_v9, %v14880_v32  ;;  %v15490_v0 = vpop.f32.mrf.mxu0  ;;  %10911 = vmatmul.msk.f32.gmra.mxu0 %vm312_vm2, %v20844_v45 }
 0x3e3   : > { %20842 = vst [vmem:[#allocation314_spill] sm:$0xff] %v15490_v0  ;;  %10921 = vmatmul.msk.f32.gmra.mxu2 %vm312_vm2, %v20846_v21  ;;  %v20850_v0 = vld [vmem:[#allocation3_spill] sm:$0xff]  ;;  %v20852_v21 = vld [vmem:[#allocation5_spill] sm:$0xff] }
 0x3e4   : > { %10926 = vmatmul.msk.f32.gmra.mxu3 %vm312_vm2, %v15495_v2 }
 0x3e8   : > { %v15492_v33 = vpop.f32.mrf.mxu1 }
 0x3e9   : > { %20843 = vst [vmem:[#allocation316_spill] sm:$0xff] %v15492_v33  ;;  %v4356_v5 = vpop.f32.mrf.mxu2  ;;  %v4385_v32 = vpop.f32.mrf.mxu3  ;;  %10933 = vmatmul.msk.f32.vlgmr.msra.gmra.mxu1 %vm312_vm2, %v20851_v46  ;;  %v20858_v46 = vld [vmem:[#allocation8_spill] sm:$0xff] }
 0x3ea   : > { %v15506_v22 = vadd.f32 %v4356_v5, %v14898_v41  ;;  %v15509_v9 = vadd.f32 %v4385_v32, %v14900_v36  ;;  %v15511_v33 = vpop.f32.mrf.mxu0  ;;  %10928 = vmatmul.msk.f32.vlgmr.msra.gmra.mxu0 %vm312_vm2, %v20850_v0  ;;  %v20853_v41 = vld [vmem:[#allocation15_spill] sm:$0xff]  ;;  %10972 = vmatpush.msk.msra.mxu1 %vm321_vm0, %v15349_v29 }
 0x3eb   : > { %20848 = vst [vmem:[#allocation251_spill] sm:$0xff] %v15511_v33  ;;  %10967 = vmatpush.msk.msra.mxu0 %vm321_vm0, %v15349_v29  ;;  %10938 = vmatmul.msk.f32.vlgmr.msra.gmra.mxu2 %vm312_vm2, %v20852_v21  ;;  %v20857_v21 = vld [vmem:[#allocation7_spill] sm:$0xff] }
 0x3ec   : > { %20847 = vst [vmem:[#allocation358_spill] sm:$0xff] %v15509_v9  ;;  %10943 = vmatmul.msk.f32.vlgmr.msra.gmra.mxu3 %vm312_vm2, %v20853_v41  ;;  %10977 = vmatpush.msk.msra.mxu2 %vm321_vm0, %v15349_v29  ;;  %v20856_v41 = vld [vmem:[#allocation6_spill] sm:$0xff]  ;;  %v20859_v9 = vld [vmem:[#allocation19_spill] sm:$0xff] }
 0x3ed   : > { %10982 = vmatpush.msk.msra.mxu3 %vm321_vm0, %v15349_v29 }
 0x3f0   : > { %v15513_v45 = vpop.f32.mrf.mxu1 }
 0x3f1   : > { %20849 = vst [vmem:[#allocation345_spill] sm:$0xff] %v15513_v45  ;;  %v4463_v36 = vpop.f32.mrf.mxu2  ;;  %v4492_v0 = vpop.f32.mrf.mxu3  ;;  %10934 = vmatmul.msk.f32.gmra.mxu1 %vm312_vm2, %v20857_v21  ;;  %v20863_v21 = vld [vmem:[#allocation13_spill] sm:$0xff] }
 0x3f2   : > { %v15532_v5 = vadd.f32 %v4463_v36, %v14926_v60  ;;  %v15535_v32 = vadd.f32 %v4492_v0, %v14928_v11  ;;  %v15537_v45 = vpop.f32.mrf.mxu0  ;;  %10929 = vmatmul.msk.f32.gmra.mxu0 %vm312_vm2, %v20856_v41 }
 0x3f3   : > { %20854 = vst [vmem:[#allocation252_spill] sm:$0xff] %v15537_v45  ;;  %10939 = vmatmul.msk.f32.gmra.mxu2 %vm312_vm2, %v20858_v46  ;;  %v20862_v45 = vld [vmem:[#allocation12_spill] sm:$0xff]  ;;  %v20864_v46 = vld [vmem:[#allocation14_spill] sm:$0xff] }
 0x3f4   : > { %10944 = vmatmul.msk.f32.gmra.mxu3 %vm312_vm2, %v20859_v9  ;;  %v20865_v9 = vld [vmem:[#allocation27_spill] sm:$0xff] }
 0x3f8   : > { %v15539_v33 = vpop.f32.mrf.mxu1 }
 0x3f9   : > { %20855 = vst [vmem:[#allocation346_spill] sm:$0xff] %v15539_v33  ;;  %v4466_v60 = vpop.f32.mrf.mxu2  ;;  %v4495_v36 = vpop.f32.mrf.mxu3  ;;  %10935 = vmatmul.msk.f32.gmra.mxu1 %vm312_vm2, %v20863_v21  ;;  %v20869_v21 = vld [vmem:[#allocation10_spill] sm:$0xff] }
 0x3fa   : > { %v15550_v11 = vadd.f32 %v4466_v60, %v14946_v52  ;;  %v15553_v0 = vadd.f32 %v4495_v36, %v14948_v50  ;;  %v15555_v33 = vpop.f32.mrf.mxu0  ;;  %10930 = vmatmul.msk.f32.gmra.mxu0 %vm312_vm2, %v20862_v45 }
 0x3fb   : > { %20860 = vst [vmem:[#allocation326_spill] sm:$0xff] %v15555_v33  ;;  %10940 = vmatmul.msk.f32.gmra.mxu2 %vm312_vm2, %v20864_v46  ;;  %v20868_v33 = vld [vmem:[#allocation9_spill] sm:$0xff]  ;;  %v20870_v46 = vld [vmem:[#allocation11_spill] sm:$0xff] }
 0x3fc   : > { %10945 = vmatmul.msk.f32.gmra.mxu3 %vm312_vm2, %v20865_v9  ;;  %v20871_v9 = vld [vmem:[#allocation23_spill] sm:$0xff] }
 0x400   : > { %v15557_v41 = vpop.f32.mrf.mxu1 }
 0x401   : > { %20861 = vst [vmem:[#allocation327_spill] sm:$0xff] %v15557_v41  ;;  %v4469_v52 = vpop.f32.mrf.mxu2  ;;  %v4498_v60 = vpop.f32.mrf.mxu3  ;;  %10936 = vmatmul.msk.f32.gmra.mxu1 %vm312_vm2, %v20869_v21  ;;  %v20875_v21 = vld [vmem:[#allocation17_spill] sm:$0xff] }
 0x402   : > { %v15568_v50 = vadd.f32 %v4469_v52, %v14966_v3  ;;  %v15571_v36 = vadd.f32 %v4498_v60, %v14968_v23  ;;  %v15573_v41 = vpop.f32.mrf.mxu0  ;;  %10931 = vmatmul.msk.f32.gmra.mxu0 %vm312_vm2, %v20868_v33 }
 0x403   : > { %20866 = vst [vmem:[#allocation328_spill] sm:$0xff] %v15573_v41  ;;  %10941 = vmatmul.msk.f32.gmra.mxu2 %vm312_vm2, %v20870_v46  ;;  %v20874_v41 = vld [vmem:[#allocation16_spill] sm:$0xff]  ;;  %v20882_v46 = vld [vmem:[#allocation22_spill] sm:$0xff] }
 0x404   : > { %10946 = vmatmul.msk.f32.gmra.mxu3 %vm312_vm2, %v20871_v9  ;;  %v20876_v9 = vld [vmem:[#allocation18_spill] sm:$0xff] }
 0x408   : > { %v15575_v45 = vpop.f32.mrf.mxu1 }
 0x409   : > { %20867 = vst [vmem:[#allocation373_spill] sm:$0xff] %v15575_v45  ;;  %v4472_v3 = vpop.f32.mrf.mxu2  ;;  %v4501_v52 = vpop.f32.mrf.mxu3  ;;  %10953 = vmatmul.msk.f32.vlgmr.msrb.gmra.mxu1 %vm312_vm2, %v20875_v21  ;;  %v20881_v21 = vld [vmem:[#allocation21_spill] sm:$0xff] }
 0x40a   : > { %v15586_v23 = vadd.f32 %v4472_v3, %v14986_v1  ;;  %v15589_v60 = vadd.f32 %v4501_v52, %v14988_v28  ;;  %v15591_v45 = vpop.f32.mrf.mxu0  ;;  %10948 = vmatmul.msk.f32.vlgmr.msrb.gmra.mxu0 %vm312_vm2, %v20874_v41  ;;  %v20877_v1 = vld [vmem:[#allocation31_spill] sm:$0xff]  ;;  %10992 = vmatpush.msk.msrb.mxu1 %vm321_vm0, %v15349_v29 }
 0x40b   : > { %20872 = vst [vmem:[#allocation255_spill] sm:$0xff] %v15591_v45  ;;  %10987 = vmatpush.msk.msrb.mxu0 %vm321_vm0, %v15349_v29  ;;  %10958 = vmatmul.msk.f32.vlgmr.msrb.gmra.mxu2 %vm312_vm2, %v20876_v9  ;;  %v20880_v9 = vld [vmem:[#allocation20_spill] sm:$0xff]  ;;  %v20883_v41 = vld [vmem:[#allocation35_spill] sm:$0xff] }
 0x40c   : > { %10963 = vmatmul.msk.f32.vlgmr.msrb.gmra.mxu3 %vm312_vm2, %v20877_v1  ;;  %10997 = vmatpush.msk.msrb.mxu2 %vm321_vm0, %v15349_v29 }
 0x40d   : > { %11002 = vmatpush.msk.msrb.mxu3 %vm321_vm0, %v15349_v29 }
 0x410   : > { %v15593_v33 = vpop.f32.mrf.mxu1 }
 0x411   : > { %20873 = vst [vmem:[#allocation353_spill] sm:$0xff] %v15593_v33  ;;  %v4579_v28 = vpop.f32.mrf.mxu2  ;;  %v4608_v3 = vpop.f32.mrf.mxu3  ;;  %10954 = vmatmul.msk.f32.gmra.mxu1 %vm312_vm2, %v20881_v21  ;;  %v20887_v21 = vld [vmem:[#allocation29_spill] sm:$0xff] }
 0x412   : > { %v15612_v52 = vadd.f32 %v4579_v28, %v15014_v40  ;;  %v15615_v33 = vadd.f32 %v4608_v3, %v15016_v12  ;;  %v15617_v45 = vpop.f32.mrf.mxu0  ;;  %10949 = vmatmul.msk.f32.gmra.mxu0 %vm312_vm2, %v20880_v9  ;;  %v20886_v9 = vld [vmem:[#allocation28_spill] sm:$0xff] }
 0x413   : > { %20878 = vst [vmem:[#allocation256_spill] sm:$0xff] %v15617_v45  ;;  %10959 = vmatmul.msk.f32.gmra.mxu2 %vm312_vm2, %v20882_v46  ;;  %v20888_v46 = vld [vmem:[#allocation30_spill] sm:$0xff] }
 0x414   : > { %10964 = vmatmul.msk.f32.gmra.mxu3 %vm312_vm2, %v20883_v41  ;;  %v20889_v41 = vld [vmem:[#allocation45_spill] sm:$0xff] }
 0x418   : > { %v15619_v1 = vpop.f32.mrf.mxu1 }
 0x419   : > { %20879 = vst [vmem:[#allocation354_spill] sm:$0xff] %v15619_v1  ;;  %v4582_v40 = vpop.f32.mrf.mxu2  ;;  %v4611_v28 = vpop.f32.mrf.mxu3  ;;  %10955 = vmatmul.msk.f32.gmra.mxu1 %vm312_vm2, %v20887_v21  ;;  %v20893_v21 = vld [vmem:[#allocation25_spill] sm:$0xff] }
 0x41a   : > { %v15630_v12 = vadd.f32 %v4582_v40, %v15034_v57  ;;  %v15633_v3 = vadd.f32 %v4611_v28, %v15036_v59  ;;  %v15635_v1 = vpop.f32.mrf.mxu0  ;;  %10950 = vmatmul.msk.f32.gmra.mxu0 %vm312_vm2, %v20886_v9  ;;  %v20892_v9 = vld [vmem:[#allocation24_spill] sm:$0xff] }
 0x41b   : > { %20884 = vst [vmem:[#allocation339_spill] sm:$0xff] %v15635_v1  ;;  %10960 = vmatmul.msk.f32.gmra.mxu2 %vm312_vm2, %v20888_v46  ;;  %v20894_v46 = vld [vmem:[#allocation26_spill] sm:$0xff] }
 0x41c   : > { %10965 = vmatmul.msk.f32.gmra.mxu3 %vm312_vm2, %v20889_v41  ;;  %v20895_v41 = vld [vmem:[#allocation41_spill] sm:$0xff] }
 0x420   : > { %v15637_v45 = vpop.f32.mrf.mxu1 }
 0x421   : > { %20885 = vst [vmem:[#allocation341_spill] sm:$0xff] %v15637_v45  ;;  %v4585_v57 = vpop.f32.mrf.mxu2  ;;  %v4614_v40 = vpop.f32.mrf.mxu3  ;;  %10956 = vmatmul.msk.f32.gmra.mxu1 %vm312_vm2, %v20893_v21  ;;  %v20899_v21 = vld [vmem:[#allocation33_spill] sm:$0xff] }
 0x422   : > { %v15648_v59 = vadd.f32 %v4585_v57, %v15054_v14  ;;  %v15651_v28 = vadd.f32 %v4614_v40, %v15056_v63  ;;  %v15653_v45 = vpop.f32.mrf.mxu0  ;;  %10951 = vmatmul.msk.f32.gmra.mxu0 %vm312_vm2, %v20892_v9  ;;  %v20898_v9 = vld [vmem:[#allocation32_spill] sm:$0xff] }
 0x423   : > { %20890 = vst [vmem:[#allocation343_spill] sm:$0xff] %v15653_v45  ;;  %10961 = vmatmul.msk.f32.gmra.mxu2 %vm312_vm2, %v20894_v46  ;;  %v20906_v46 = vld [vmem:[#allocation38_spill] sm:$0xff] }
 0x424   : > { %10966 = vmatmul.msk.f32.gmra.mxu3 %vm312_vm2, %v20895_v41  ;;  %v20900_v41 = vld [vmem:[#allocation34_spill] sm:$0xff] }
 0x428   : > { %v15655_v1 = vpop.f32.mrf.mxu1 }
 0x429   : > { %20891 = vst [vmem:[#allocation385_spill] sm:$0xff] %v15655_v1  ;;  %v4588_v14 = vpop.f32.mrf.mxu2  ;;  %v4617_v57 = vpop.f32.mrf.mxu3  ;;  %10973 = vmatmul.msk.f32.vlgmr.msra.gmra.mxu1 %vm312_vm2, %v20899_v21  ;;  %v20905_v21 = vld [vmem:[#allocation37_spill] sm:$0xff] }
 0x42a   : > { %v15666_v63 = vadd.f32 %v4588_v14, %v15074_v39  ;;  %v15669_v40 = vadd.f32 %v4617_v57, %v15076_v16  ;;  %v15671_v1 = vpop.f32.mrf.mxu0  ;;  %10968 = vmatmul.msk.f32.vlgmr.msra.gmra.mxu0 %vm312_vm2, %v20898_v9  ;;  %v20901_v39 = vld [vmem:[#allocation57_spill] sm:$0xff]  ;;  %11012 = vmatpush.msk.msra.mxu1 %vm321_vm0, %v15349_v29 }
 0x42b   : > { %20896 = vst [vmem:[#allocation39_spill] sm:$0xff] %v15671_v1  ;;  %11007 = vmatpush.msk.msra.mxu0 %vm321_vm0, %v15349_v29  ;;  %10978 = vmatmul.msk.f32.vlgmr.msra.gmra.mxu2 %vm312_vm2, %v20900_v41  ;;  %v20904_v41 = vld [vmem:[#allocation36_spill] sm:$0xff]  ;;  %v20907_v9 = vld [vmem:[#allocation65_spill] sm:$0xff] }
 0x42c   : > { %10983 = vmatmul.msk.f32.vlgmr.msra.gmra.mxu3 %vm312_vm2, %v20901_v39  ;;  %11017 = vmatpush.msk.msra.mxu2 %vm321_vm0, %v15349_v29 }
 0x42d   : > { %11022 = vmatpush.msk.msra.mxu3 %vm321_vm0, %v15349_v29 }
 0x430   : > { %v15673_v45 = vpop.f32.mrf.mxu1 }
 0x431   : > { %20897 = vst [vmem:[#allocation365_spill] sm:$0xff] %v15673_v45  ;;  %v4695_v16 = vpop.f32.mrf.mxu2  ;;  %v4724_v14 = vpop.f32.mrf.mxu3  ;;  %10974 = vmatmul.msk.f32.gmra.mxu1 %vm312_vm2, %v20905_v21  ;;  %v20911_v21 = vld [vmem:[#allocation47_spill] sm:$0xff] }
 0x432   : > { %v15692_v57 = vadd.f32 %v4695_v16, %v15102_v54  ;;  %v15695_v45 = vadd.f32 %v4724_v14, %v15104_v56  ;;  %v15697_v1 = vpop.f32.mrf.mxu0  ;;  %10969 = vmatmul.msk.f32.gmra.mxu0 %vm312_vm2, %v20904_v41  ;;  %v20910_v41 = vld [vmem:[#allocation46_spill] sm:$0xff] }
 0x433   : > { %20902 = vst [vmem:[#allocation40_spill] sm:$0xff] %v15697_v1  ;;  %10979 = vmatmul.msk.f32.gmra.mxu2 %vm312_vm2, %v20906_v46  ;;  %v20912_v46 = vld [vmem:[#allocation48_spill] sm:$0xff] }
 0x434   : > { %10984 = vmatmul.msk.f32.gmra.mxu3 %vm312_vm2, %v20907_v9  ;;  %v20913_v9 = vld [vmem:[#allocation77_spill] sm:$0xff] }
 0x438   : > { %v15699_v39 = vpop.f32.mrf.mxu1 }
 0x439   : > { %20903 = vst [vmem:[#allocation366_spill] sm:$0xff] %v15699_v39  ;;  %v4698_v54 = vpop.f32.mrf.mxu2  ;;  %v4727_v16 = vpop.f32.mrf.mxu3  ;;  %10975 = vmatmul.msk.f32.gmra.mxu1 %vm312_vm2, %v20911_v21  ;;  %v20917_v21 = vld [vmem:[#allocation43_spill] sm:$0xff] }
 0x43a   : > { %v15710_v56 = vadd.f32 %v4698_v54, %v15122_v10  ;;  %v15713_v14 = vadd.f32 %v4727_v16, %v15124_v49  ;;  %v15715_v39 = vpop.f32.mrf.mxu0  ;;  %10970 = vmatmul.msk.f32.gmra.mxu0 %vm312_vm2, %v20910_v41  ;;  %v20916_v41 = vld [vmem:[#allocation42_spill] sm:$0xff] }
 0x43b   : > { %20908 = vst [vmem:[#allocation359_spill] sm:$0xff] %v15715_v39  ;;  %10980 = vmatmul.msk.f32.gmra.mxu2 %vm312_vm2, %v20912_v46  ;;  %v20918_v46 = vld [vmem:[#allocation44_spill] sm:$0xff] }
 0x43c   : > { %10985 = vmatmul.msk.f32.gmra.mxu3 %vm312_vm2, %v20913_v9  ;;  %v20919_v9 = vld [vmem:[#allocation73_spill] sm:$0xff] }
 0x440   : > { %v15717_v1 = vpop.f32.mrf.mxu1 }
 0x441   : > { %20909 = vst [vmem:[#allocation361_spill] sm:$0xff] %v15717_v1  ;;  %v4701_v10 = vpop.f32.mrf.mxu2  ;;  %v4730_v54 = vpop.f32.mrf.mxu3  ;;  %10976 = vmatmul.msk.f32.gmra.mxu1 %vm312_vm2, %v20917_v21  ;;  %v20924_v21 = vld [vmem:[#allocation60_spill] sm:$0xff] }
 0x442   : > { %v15728_v49 = vadd.f32 %v4701_v10, %v15142_v51  ;;  %v15731_v16 = vadd.f32 %v4730_v54, %v15144_v4  ;;  %v15733_v1 = vpop.f32.mrf.mxu0  ;;  %10971 = vmatmul.msk.f32.gmra.mxu0 %vm312_vm2, %v20916_v41  ;;  %v20923_v41 = vld [vmem:[#allocation58_spill] sm:$0xff] }
 0x443   : > { %20914 = vst [vmem:[#allocation363_spill] sm:$0xff] %v15733_v1  ;;  %10981 = vmatmul.msk.f32.gmra.mxu2 %vm312_vm2, %v20918_v46  ;;  %v20933_v46 = vld [vmem:[#allocation68_spill] sm:$0xff] }
 0x444   : > { %10986 = vmatmul.msk.f32.gmra.mxu3 %vm312_vm2, %v20919_v9  ;;  %v20925_v9 = vld [vmem:[#allocation61_spill] sm:$0xff] }
 0x448   : > { %v15735_v39 = vpop.f32.mrf.mxu1 }
 0x449   : > { %20915 = vst [vmem:[#allocation405_spill] sm:$0xff] %v15735_v39  ;;  %v4704_v51 = vpop.f32.mrf.mxu2  ;;  %v4733_v10 = vpop.f32.mrf.mxu3  ;;  %10993 = vmatmul.msk.f32.vlgmr.msrb.gmra.mxu1 %vm312_vm2, %v20924_v21  ;;  %v20932_v21 = vld [vmem:[#allocation66_spill] sm:$0xff] }
 0x44a   : > { %v15746_v4 = vadd.f32 %v4704_v51, %v15162_v8  ;;  %v15749_v54 = vadd.f32 %v4733_v10, %v15164_v48  ;;  %v15751_v39 = vpop.f32.mrf.mxu0  ;;  %10988 = vmatmul.msk.f32.vlgmr.msrb.gmra.mxu0 %vm312_vm2, %v20923_v41  ;;  %v20926_v8 = vld [vmem:[#allocation90_spill] sm:$0xff]  ;;  %11032 = vmatpush.msk.msrb.mxu1 %vm321_vm0, %v15349_v29  ;;  %v20934_v41 = vld [vmem:[#allocation69_spill] sm:$0xff] }
 0x44b   : > { %20921 = vst [vmem:[#allocation377_spill] sm:$0xff] %v15751_v39  ;;  %11027 = vmatpush.msk.msrb.mxu0 %vm321_vm0, %v15349_v29  ;;  %10998 = vmatmul.msk.f32.vlgmr.msrb.gmra.mxu2 %vm312_vm2, %v20925_v9 }
 0x44c   : > { %20920 = vst [vmem:[#allocation49_spill] sm:$0xff] %v15749_v54  ;;  %11003 = vmatmul.msk.f32.vlgmr.msrb.gmra.mxu3 %vm312_vm2, %v20926_v8  ;;  %11037 = vmatpush.msk.msrb.mxu2 %vm321_vm0, %v15349_v29  ;;  %v20935_v54 = vld [vmem:[#allocation101_spill] sm:$0xff] }
 0x44d   : > { %11042 = vmatpush.msk.msrb.mxu3 %vm321_vm0, %v15349_v29 }
 0x450   : > { %v15753_v1 = vpop.f32.mrf.mxu1 }
 0x451   : > { %20922 = vst [vmem:[#allocation51_spill] sm:$0xff] %v15753_v1  ;;  %v4811_v48 = vpop.f32.mrf.mxu2  ;;  %v4852_v51 = vpop.f32.mrf.mxu3  ;;  %v20928_v1 = vld [vmem:[#allocation282_spill] sm:$0xff]  ;;  %10994 = vmatmul.msk.f32.gmra.mxu1 %vm312_vm2, %v20933_v46  ;;  %v20942_v46 = vld [vmem:[#allocation79_spill] sm:$0xff] }
 0x452   : > { %v15772_v10 = vadd.f32 %v4811_v48, %v15190_v17  ;;  %v15775_v39 = vadd.f32 %v4852_v51, %v20928_v1  ;;  %v15777_v9 = vpop.f32.mrf.mxu0  ;;  %10989 = vmatmul.msk.f32.gmra.mxu0 %vm312_vm2, %v20932_v21  ;;  %v20936_v1 = vld [vmem:[#allocation268_spill] sm:$0xff] }
 0x453   : > { %20930 = vst [vmem:[#allocation362_spill] sm:$0xff] %v15777_v9  ;;  %10999 = vmatmul.msk.f32.gmra.mxu2 %vm312_vm2, %v20934_v41  ;;  %v20937_v9 = vld [vmem:[#allocation310_spill] sm:$0xff]  ;;  %v20943_v41 = vld [vmem:[#allocation80_spill] sm:$0xff] }
 0x454   : > { %20927 = vst [vmem:[#allocation378_spill] sm:$0xff] %v15772_v10  ;;  %11004 = vmatmul.msk.f32.gmra.mxu3 %vm312_vm2, %v20935_v54  ;;  %v20941_v10 = vld [vmem:[#allocation78_spill] sm:$0xff]  ;;  %v20944_v54 = vld [vmem:[#allocation117_spill] sm:$0xff] }
 0x455   : > { %20929 = vst [vmem:[#allocation360_spill] sm:$0xff] %v15775_v39 }
 0x458   : > { %v15779_v8 = vpop.f32.mrf.mxu1 }
 0x459   : > { %20931 = vst [vmem:[#allocation364_spill] sm:$0xff] %v15779_v8  ;;  %v4814_v17 = vpop.f32.mrf.mxu2  ;;  %v4855_v48 = vpop.f32.mrf.mxu3  ;;  %10995 = vmatmul.msk.f32.gmra.mxu1 %vm312_vm2, %v20942_v46  ;;  %v20949_v46 = vld [vmem:[#allocation75_spill] sm:$0xff] }
 0x45a   : > { %v15790_v51 = vadd.f32 %v4814_v17, %v20936_v1  ;;  %v15793_v39 = vadd.f32 %v4855_v48, %v20937_v9  ;;  %v15795_v8 = vpop.f32.mrf.mxu0  ;;  %10990 = vmatmul.msk.f32.gmra.mxu0 %vm312_vm2, %v20941_v10  ;;  %v20945_v48 = vld [vmem:[#allocation236_spill] sm:$0xff] }
 0x45b   : > { %20939 = vst [vmem:[#allocation50_spill] sm:$0xff] %v15795_v8  ;;  %11000 = vmatmul.msk.f32.gmra.mxu2 %vm312_vm2, %v20943_v41  ;;  %v20950_v41 = vld [vmem:[#allocation76_spill] sm:$0xff] }
 0x45c   : > { %20938 = vst [vmem:[#allocation406_spill] sm:$0xff] %v15793_v39  ;;  %11005 = vmatmul.msk.f32.gmra.mxu3 %vm312_vm2, %v20944_v54  ;;  %v20948_v39 = vld [vmem:[#allocation74_spill] sm:$0xff]  ;;  %v20951_v54 = vld [vmem:[#allocation111_spill] sm:$0xff] }
 0x460   : > { %v15797_v21 = vpop.f32.mrf.mxu1 }
 0x461   : > { %20940 = vst [vmem:[#allocation393_spill] sm:$0xff] %v15797_v21  ;;  %v4817_v17 = vpop.f32.mrf.mxu2  ;;  %v4858_v1 = vpop.f32.mrf.mxu3  ;;  %10996 = vmatmul.msk.f32.gmra.mxu1 %vm312_vm2, %v20949_v46  ;;  %v20955_v46 = vld [vmem:[#allocation94_spill] sm:$0xff] }
 0x462   : > { %v15808_v9 = vadd.f32 %v4817_v17, %v15230_v15  ;;  %v15811_v8 = vadd.f32 %v4858_v1, %v20945_v48  ;;  %v15813_v21 = vpop.f32.mrf.mxu0  ;;  %10991 = vmatmul.msk.f32.gmra.mxu0 %vm312_vm2, %v20948_v39  ;;  %v20954_v39 = vld [vmem:[#allocation92_spill] sm:$0xff] }
 0x463   : > { %20946 = vst [vmem:[#allocation52_spill] sm:$0xff] %v15813_v21  ;;  %11001 = vmatmul.msk.f32.gmra.mxu2 %vm312_vm2, %v20950_v41  ;;  %v20962_v41 = vld [vmem:[#allocation107_spill] sm:$0xff] }
 0x464   : > { %11006 = vmatmul.msk.f32.gmra.mxu3 %vm312_vm2, %v20951_v54  ;;  %v20956_v54 = vld [vmem:[#allocation95_spill] sm:$0xff] }
 0x468   : > { %v15815_v10 = vpop.f32.mrf.mxu1 }
 0x469   : > { %20947 = vst [vmem:[#allocation394_spill] sm:$0xff] %v15815_v10  ;;  %v4820_v15 = vpop.f32.mrf.mxu2  ;;  %v4861_v17 = vpop.f32.mrf.mxu3  ;;  %11013 = vmatmul.msk.f32.vlgmr.msra.gmra.mxu1 %vm312_vm2, %v20955_v46  ;;  %v20961_v46 = vld [vmem:[#allocation106_spill] sm:$0xff] }
 0x46a   : > { %v15826_v1 = vadd.f32 %v4820_v15, %v15250_v35  ;;  %v15829_v48 = vadd.f32 %v4861_v17, %v15252_v27  ;;  %v15831_v10 = vpop.f32.mrf.mxu0  ;;  %11008 = vmatmul.msk.f32.vlgmr.msra.gmra.mxu0 %vm312_vm2, %v20954_v39  ;;  %v20957_v35 = vld [vmem:[#allocation137_spill] sm:$0xff]  ;;  %11052 = vmatpush.msk.msra.mxu1 %vm321_vm0, %v15349_v29  ;;  %v20987_v39 = vld [vmem:[#allocation196_spill] sm:$0xff] }
 0x46b   : > { %20952 = vst [vmem:[#allocation374_spill] sm:$0xff] %v15831_v10  ;;  %11047 = vmatpush.msk.msra.mxu0 %vm321_vm0, %v15349_v29  ;;  %11018 = vmatmul.msk.f32.vlgmr.msra.gmra.mxu2 %vm312_vm2, %v20956_v54  ;;  %v20960_v54 = vld [vmem:[#allocation104_spill] sm:$0xff] }
 0x46c   : > { %11023 = vmatmul.msk.f32.vlgmr.msra.gmra.mxu3 %vm312_vm2, %v20957_v35  ;;  %11057 = vmatpush.msk.msra.mxu2 %vm321_vm0, %v15349_v29 }
 0x46d   : > { %11062 = vmatpush.msk.msra.mxu3 %vm321_vm0, %v15349_v29  ;;  %v20963_v29 = vld [vmem:[#allocation149_spill] sm:$0xff] }
 0x470   : > { %v15833_v21 = vpop.f32.mrf.mxu1 }
 0x471   : > { %20953 = vst [vmem:[#allocation375_spill] sm:$0xff] %v15833_v21  ;;  %v5054_v27 = vpop.f32.mrf.mxu2  ;;  %v5083_v15 = vpop.f32.mrf.mxu3  ;;  %11014 = vmatmul.msk.f32.gmra.mxu1 %vm312_vm2, %v20961_v46  ;;  %v20967_v46 = vld [vmem:[#allocation121_spill] sm:$0xff] }
 0x472   : > { %v15852_v17 = vadd.f32 %v5054_v27, %v15275_v44  ;;  %v15855_v21 = vadd.f32 %v5083_v15, %v15278_v61  ;;  %v15857_v10 = vpop.f32.mrf.mxu0  ;;  %11009 = vmatmul.msk.f32.gmra.mxu0 %vm312_vm2, %v20960_v54  ;;  %v20966_v54 = vld [vmem:[#allocation120_spill] sm:$0xff] }
 0x473   : > { %20958 = vst [vmem:[#allocation376_spill] sm:$0xff] %v15857_v10  ;;  %11019 = vmatmul.msk.f32.gmra.mxu2 %vm312_vm2, %v20962_v41  ;;  %v20968_v41 = vld [vmem:[#allocation122_spill] sm:$0xff] }
 0x474   : > { %11024 = vmatmul.msk.f32.gmra.mxu3 %vm312_vm2, %v20963_v29  ;;  %v20969_v29 = vld [vmem:[#allocation165_spill] sm:$0xff] }
 0x478   : > { %v15859_v35 = vpop.f32.mrf.mxu1 }
 0x479   : > { %20959 = vst [vmem:[#allocation421_spill] sm:$0xff] %v15859_v35  ;;  %v5057_v44 = vpop.f32.mrf.mxu2  ;;  %v5086_v27 = vpop.f32.mrf.mxu3  ;;  %11015 = vmatmul.msk.f32.gmra.mxu1 %vm312_vm2, %v20967_v46  ;;  %v20973_v46 = vld [vmem:[#allocation113_spill] sm:$0xff] }
 0x47a   : > { %v15870_v61 = vadd.f32 %v5057_v44, %v15293_v42  ;;  %v15873_v15 = vadd.f32 %v5086_v27, %v15296_v58  ;;  %v15875_v35 = vpop.f32.mrf.mxu0  ;;  %11010 = vmatmul.msk.f32.gmra.mxu0 %vm312_vm2, %v20966_v54  ;;  %v20972_v54 = vld [vmem:[#allocation112_spill] sm:$0xff] }
 0x47b   : > { %20964 = vst [vmem:[#allocation59_spill] sm:$0xff] %v15875_v35  ;;  %11020 = vmatmul.msk.f32.gmra.mxu2 %vm312_vm2, %v20968_v41  ;;  %v20974_v41 = vld [vmem:[#allocation114_spill] sm:$0xff] }
 0x47c   : > { %11025 = vmatmul.msk.f32.gmra.mxu3 %vm312_vm2, %v20969_v29  ;;  %v20975_v29 = vld [vmem:[#allocation159_spill] sm:$0xff] }
 0x480   : > { %v15877_v10 = vpop.f32.mrf.mxu1 }
 0x481   : > { %20965 = vst [vmem:[#allocation401_spill] sm:$0xff] %v15877_v10  ;;  %v5060_v42 = vpop.f32.mrf.mxu2  ;;  %v5089_v44 = vpop.f32.mrf.mxu3  ;;  %11016 = vmatmul.msk.f32.gmra.mxu1 %vm312_vm2, %v20973_v46  ;;  %v20979_v46 = vld [vmem:[#allocation142_spill] sm:$0xff] }
 0x482   : > { %v15888_v58 = vadd.f32 %v5060_v42, %v15311_v26  ;;  %v15891_v27 = vadd.f32 %v5089_v44, %v15314_v53  ;;  %v15893_v10 = vpop.f32.mrf.mxu0  ;;  %11011 = vmatmul.msk.f32.gmra.mxu0 %vm312_vm2, %v20972_v54  ;;  %v20978_v54 = vld [vmem:[#allocation140_spill] sm:$0xff] }
 0x483   : > { %20970 = vst [vmem:[#allocation62_spill] sm:$0xff] %v15893_v10  ;;  %11021 = vmatmul.msk.f32.gmra.mxu2 %vm312_vm2, %v20974_v41  ;;  %v20980_v41 = vld [vmem:[#allocation143_spill] sm:$0xff] }
 0x484   : > { %11026 = vmatmul.msk.f32.gmra.mxu3 %vm312_vm2, %v20975_v29  ;;  %v20981_v29 = vld [vmem:[#allocation184_spill] sm:$0xff] }
 0x488   : > { %v15895_v35 = vpop.f32.mrf.mxu1 }
 0x489   : > { %20971 = vst [vmem:[#allocation402_spill] sm:$0xff] %v15895_v35  ;;  %v5063_v26 = vpop.f32.mrf.mxu2  ;;  %v5092_v42 = vpop.f32.mrf.mxu3  ;;  %11033 = vmatmul.msk.f32.vlgmr.msrb.gmra.mxu1 %vm312_vm2, %v20979_v46  ;;  %v20985_v46 = vld [vmem:[#allocation154_spill] sm:$0xff] }
 0x48a   : > { %v15906_v53 = vadd.f32 %v5063_v26, %v15329_v19  ;;  %v15909_v44 = vadd.f32 %v5092_v42, %v15332_v18  ;;  %v15911_v35 = vpop.f32.mrf.mxu0  ;;  %11028 = vmatmul.msk.f32.vlgmr.msrb.gmra.mxu0 %vm312_vm2, %v20978_v54  ;;  %v15926_v19 = vld [vmem:[%s19372_s1 + $0x14] sm:$0x7]  ;;  %v20986_v54 = vld [vmem:[#allocation155_spill] sm:$0xff] }
 0x48b   : > { %20976 = vst [vmem:[#allocation387_spill] sm:$0xff] %v15911_v35  ;;  %11038 = vmatmul.msk.f32.vlgmr.msrb.gmra.mxu2 %vm312_vm2, %v20980_v41  ;;  %11067 = vmatpush.msk.msrb.mxu0 %vm321_vm0, %v15926_v19  ;;  %v20984_v41 = vld [vmem:[#allocation152_spill] sm:$0xff] }
 0x48c   : > { %11043 = vmatmul.msk.f32.vlgmr.msrb.gmra.mxu3 %vm312_vm2, %v20981_v29  ;;  %11077 = vmatpush.msk.msrb.mxu2 %vm321_vm0, %v15926_v19 }
 0x48d   : > { %11082 = vmatpush.msk.msrb.mxu3 %vm321_vm0, %v15926_v19  ;;  %11072 = vmatpush.msk.msrb.mxu1 %vm321_vm0, %v15926_v19 }
 0x490   : > { %v15913_v10 = vpop.f32.mrf.mxu1 }
 0x491   : > { %20977 = vst [vmem:[#allocation389_spill] sm:$0xff] %v15913_v10  ;;  %v5170_v18 = vpop.f32.mrf.mxu2  ;;  %v5199_v26 = vpop.f32.mrf.mxu3  ;;  %11034 = vmatmul.msk.f32.gmra.mxu1 %vm312_vm2, %v20985_v46  ;;  %v20991_v46 = vld [vmem:[#allocation169_spill] sm:$0xff] }
 0x492   : > { %v15937_v42 = vadd.f32 %v5170_v18, %v15360_v13  ;;  %v15940_v10 = vadd.f32 %v5199_v26, %v15363_v37  ;;  %v15942_v35 = vpop.f32.mrf.mxu0  ;;  %11029 = vmatmul.msk.f32.gmra.mxu0 %vm312_vm2, %v20984_v41  ;;  %v20990_v41 = vld [vmem:[#allocation168_spill] sm:$0xff] }
 0x493   : > { %20982 = vst [vmem:[#allocation391_spill] sm:$0xff] %v15942_v35  ;;  %11039 = vmatmul.msk.f32.gmra.mxu2 %vm312_vm2, %v20986_v54  ;;  %v20992_v54 = vld [vmem:[#allocation170_spill] sm:$0xff] }
 0x494   : > { %11044 = vmatmul.msk.f32.gmra.mxu3 %vm312_vm2, %v20987_v39  ;;  %v20993_v39 = vld [vmem:[#allocation209_spill] sm:$0xff] }
 0x498   : > { %v15944_v29 = vpop.f32.mrf.mxu1 }
 0x499   : > { %20983 = vst [vmem:[#allocation67_spill] sm:$0xff] %v15944_v29  ;;  %v5173_v13 = vpop.f32.mrf.mxu2  ;;  %v5202_v18 = vpop.f32.mrf.mxu3  ;;  %11035 = vmatmul.msk.f32.gmra.mxu1 %vm312_vm2, %v20991_v46  ;;  %v20997_v46 = vld [vmem:[#allocation161_spill] sm:$0xff] }
 0x49a   : > { %v15955_v37 = vadd.f32 %v5173_v13, %v15378_v30  ;;  %v15958_v26 = vadd.f32 %v5202_v18, %v15381_v47  ;;  %v15960_v29 = vpop.f32.mrf.mxu0  ;;  %11030 = vmatmul.msk.f32.gmra.mxu0 %vm312_vm2, %v20990_v41  ;;  %v20996_v41 = vld [vmem:[#allocation160_spill] sm:$0xff] }
 0x49b   : > { %20988 = vst [vmem:[#allocation413_spill] sm:$0xff] %v15960_v29  ;;  %11040 = vmatmul.msk.f32.gmra.mxu2 %vm312_vm2, %v20992_v54  ;;  %v20998_v54 = vld [vmem:[#allocation162_spill] sm:$0xff] }
 0x49c   : > { %11045 = vmatmul.msk.f32.gmra.mxu3 %vm312_vm2, %v20993_v39  ;;  %v20999_v39 = vld [vmem:[#allocation204_spill] sm:$0xff] }
 0x4a0   : > { %v15962_v35 = vpop.f32.mrf.mxu1 }
 0x4a1   : > { %20989 = vst [vmem:[#allocation70_spill] sm:$0xff] %v15962_v35  ;;  %v5176_v30 = vpop.f32.mrf.mxu2  ;;  %v5205_v13 = vpop.f32.mrf.mxu3  ;;  %11036 = vmatmul.msk.f32.gmra.mxu1 %vm312_vm2, %v20997_v46 }
 0x4a2   : > { %v15973_v47 = vadd.f32 %v5176_v30, %v15396_v6  ;;  %v15976_v18 = vadd.f32 %v5205_v13, %v15399_v55  ;;  %v15978_v35 = vpop.f32.mrf.mxu0  ;;  %11031 = vmatmul.msk.f32.gmra.mxu0 %vm312_vm2, %v20996_v41  ;;  %v5762_v6 = vrot.slane %v15424_v62, 1  ;;  %v5763_v55 = vrot.slane %v15453_v20, 1  ;;  %v21004_v62 = vld [vmem:[#allocation189_spill] sm:$0xff] }
 0x4a3   : > { %20994 = vst [vmem:[#allocation414_spill] sm:$0xff] %v15978_v35  ;;  %11041 = vmatmul.msk.f32.gmra.mxu2 %vm312_vm2, %v20998_v54 }
 0x4a4   : > { %11046 = vmatmul.msk.f32.gmra.mxu3 %vm312_vm2, %v20999_v39  ;;  %v16003_v54 = vsel %vm304_vm1, %v5762_v6, %v5763_v55  ;;  %v21003_v39 = vld [vmem:[#allocation187_spill] sm:$0xff] }
 0x4a5   : > { %21002 = vst [vmem:[#allocation100_spill] sm:$0xff] %v16003_v54 }
 0x4a8   : > { %v15980_v29 = vpop.f32.mrf.mxu1 }
 0x4a9   : > { %20995 = vst [vmem:[#allocation407_spill] sm:$0xff] %v15980_v29  ;;  %v5179_v30 = vpop.f32.mrf.mxu2  ;;  %v5208_v13 = vpop.f32.mrf.mxu3  ;;  %11053 = vmatmul.msk.f32.vlgmr.msra.gmra.mxu1 %vm312_vm2, %v21004_v62  ;;  %v21011_v62 = vld [vmem:[#allocation200_spill] sm:$0xff] }
 0x4aa   : > { %v15993_v29 = vadd.f32 %v5179_v30, %v15414_v7  ;;  %v15996_v35 = vadd.f32 %v5208_v13, %v15417_v25  ;;  %v15998_v41 = vpop.f32.mrf.mxu0  ;;  %11048 = vmatmul.msk.f32.vlgmr.msra.gmra.mxu0 %vm312_vm2, %v21003_v39  ;;  %v21005_v7 = vld [vmem:[#allocation190_spill] sm:$0xff]  ;;  %v5765_v25 = vrot.slane %v15474_v24, 1  ;;  %11092 = vmatpush.msk.msra.mxu1 %vm321_vm0, %v15926_v19  ;;  %v21006_v13 = vld [vmem:[#allocation357_spill] sm:$0xff] }
 0x4ab   : > { %21000 = vst [vmem:[#allocation409_spill] sm:$0xff] %v15998_v41  ;;  %11087 = vmatpush.msk.msra.mxu0 %vm321_vm0, %v15926_v19  ;;  %11058 = vmatmul.msk.f32.vlgmr.msra.gmra.mxu2 %vm312_vm2, %v21005_v7  ;;  %v21010_v7 = vld [vmem:[#allocation199_spill] sm:$0xff]  ;;  %v21012_v39 = vld [vmem:[#allocation201_spill] sm:$0xff] }
 0x4ac   : > { %11063 = vmatmul.msk.f32.vlgmr.msra.gmra.mxu3 %vm312_vm2, %v16003_v54  ;;  %11097 = vmatpush.msk.msra.mxu2 %vm321_vm0, %v15926_v19  ;;  %v16033_v54 = vsel %vm304_vm1, %v5763_v55, %v5765_v25 }
 0x4ad   : > { %11102 = vmatpush.msk.msra.mxu3 %vm321_vm0, %v15926_v19  ;;  %21009 = vst [vmem:[#allocation412_spill] sm:$0xff] %v16033_v54 }
 0x4b0   : > { %v16000_v46 = vpop.f32.mrf.mxu1 }
 0x4b1   : > { %21001 = vst [vmem:[#allocation411_spill] sm:$0xff] %v16000_v46  ;;  %v5286_v20 = vpop.f32.mrf.mxu2  ;;  %v5315_v6 = vpop.f32.mrf.mxu3  ;;  %11054 = vmatmul.msk.f32.gmra.mxu1 %vm312_vm2, %v21011_v62 }
 0x4b2   : > { %v16023_v30 = vadd.f32 %v5286_v20, %v15443_v43  ;;  %v16026_v46 = vadd.f32 %v5315_v6, %v21006_v13  ;;  %v16028_v41 = vpop.f32.mrf.mxu0  ;;  %11049 = vmatmul.msk.f32.gmra.mxu0 %vm312_vm2, %v21010_v7  ;;  %v16044_v43 = vrot.slane %v15495_v2, 1  ;;  %v21014_v13 = vld [vmem:[#allocation248_spill] sm:$0xff]  ;;  %v21019_v2 = vld [vmem:[#allocation213_spill] sm:$0xff]  ;;  %v21020_v7 = vld [vmem:[#allocation214_spill] sm:$0xff] }
 0x4b3   : > { %21007 = vst [vmem:[#allocation408_spill] sm:$0xff] %v16028_v41  ;;  %11059 = vmatmul.msk.f32.gmra.mxu2 %vm312_vm2, %v21012_v39 }
 0x4b4   : > { %11064 = vmatmul.msk.f32.gmra.mxu3 %vm312_vm2, %v16033_v54  ;;  %21013 = vst [vmem:[#allocation422_spill] sm:$0xff] %v16044_v43  ;;  %v16058_v39 = vsel %vm304_vm1, %v5765_v25, %v16044_v43  ;;  %v21018_v54 = vld [vmem:[#allocation212_spill] sm:$0xff] }
 0x4b5   : > { %21017 = vst [vmem:[#allocation123_spill] sm:$0xff] %v16058_v39 }
 0x4b8   : > { %v16030_v24 = vpop.f32.mrf.mxu1 }
 0x4b9   : > { %21008 = vst [vmem:[#allocation410_spill] sm:$0xff] %v16030_v24  ;;  %v5289_v20 = vpop.f32.mrf.mxu2  ;;  %v5318_v6 = vpop.f32.mrf.mxu3  ;;  %11055 = vmatmul.msk.f32.gmra.mxu1 %vm312_vm2, %v21019_v2  ;;  %v21024_v2 = vld [vmem:[#allocation206_spill] sm:$0xff] }
 0x4ba   : > { %v16047_v55 = vadd.f32 %v5289_v20, %v15464_v31  ;;  %v16050_v24 = vadd.f32 %v5318_v6, %v21014_v13  ;;  %v16052_v41 = vpop.f32.mrf.mxu0  ;;  %11050 = vmatmul.msk.f32.gmra.mxu0 %vm312_vm2, %v21018_v54  ;;  %v21104_v54 = vld [vmem:[#allocation370_spill] sm:$0xff] }
 0x4bb   : > { %21015 = vst [vmem:[#allocation423_spill] sm:$0xff] %v16052_v41  ;;  %11060 = vmatmul.msk.f32.gmra.mxu2 %vm312_vm2, %v21020_v7  ;;  %v21023_v41 = vld [vmem:[#allocation205_spill] sm:$0xff]  ;;  %v21025_v7 = vld [vmem:[#allocation207_spill] sm:$0xff] }
 0x4bc   : > { %11065 = vmatmul.msk.f32.gmra.mxu3 %vm312_vm2, %v16058_v39 }
 0x4c0   : > { %v16054_v62 = vpop.f32.mrf.mxu1 }
 0x4c1   : > { %21016 = vst [vmem:[#allocation424_spill] sm:$0xff] %v16054_v62  ;;  %v5292_v31 = vpop.f32.mrf.mxu2  ;;  %v5321_v20 = vpop.f32.mrf.mxu3  ;;  %11056 = vmatmul.msk.f32.gmra.mxu1 %vm312_vm2, %v21024_v2  ;;  %v21030_v2 = vld [vmem:[#allocation144_spill] sm:$0xff] }
 0x4c2   : > { %v16069_v6 = vadd.f32 %v5292_v31, %v15485_v34  ;;  %v16072_v25 = vadd.f32 %v5321_v20, %v15488_v38  ;;  %v16074_v13 = vpop.f32.mrf.mxu0  ;;  %11051 = vmatmul.msk.f32.gmra.mxu0 %vm312_vm2, %v21023_v41  ;;  %v21026_v20 = vld [vmem:[#allocation358_spill] sm:$0xff]  ;;  %v21029_v41 = vld [vmem:[#allocation141_spill] sm:$0xff] }
 0x4c3   : > { %21021 = vst [vmem:[#allocation124_spill] sm:$0xff] %v16074_v13  ;;  %11061 = vmatmul.msk.f32.gmra.mxu2 %vm312_vm2, %v21025_v7  ;;  %v21038_v7 = vld [vmem:[#allocation283_spill] sm:$0xff] }
 0x4c4   : > { %11066 = vmatmul.msk.f32.gmra.mxu3 %vm312_vm2, %v16044_v43  ;;  %v21031_v43 = vld [vmem:[#allocation145_spill] sm:$0xff] }
 0x4c8   : > { %v16076_v62 = vpop.f32.mrf.mxu1 }
 0x4c9   : > { %21022 = vst [vmem:[#allocation431_spill] sm:$0xff] %v16076_v62  ;;  %v5295_v34 = vpop.f32.mrf.mxu2  ;;  %v5324_v31 = vpop.f32.mrf.mxu3  ;;  %11073 = vmatmul.msk.f32.vlgmr.msrb.gmra.mxu1 %vm312_vm2, %v21030_v2  ;;  %v21037_v2 = vld [vmem:[#allocation158_spill] sm:$0xff] }
 0x4ca   : > { %v16087_v38 = vadd.f32 %v5295_v34, %v15506_v22  ;;  %v16090_v13 = vadd.f32 %v5324_v31, %v21026_v20  ;;  %v16092_v62 = vpop.f32.mrf.mxu0  ;;  %11068 = vmatmul.msk.f32.vlgmr.msrb.gmra.mxu0 %vm312_vm2, %v21029_v41  ;;  %v21032_v22 = vld [vmem:[#allocation271_spill] sm:$0xff]  ;;  %11112 = vmatpush.msk.msrb.mxu1 %vm321_vm0, %v15926_v19 }
 0x4cb   : > { %21027 = vst [vmem:[#allocation433_spill] sm:$0xff] %v16092_v62  ;;  %11107 = vmatpush.msk.msrb.mxu0 %vm321_vm0, %v15926_v19  ;;  %11078 = vmatmul.msk.f32.vlgmr.msrb.gmra.mxu2 %vm312_vm2, %v21031_v43  ;;  %v21036_v43 = vld [vmem:[#allocation157_spill] sm:$0xff] }
 0x4cc   : > { %11083 = vmatmul.msk.f32.vlgmr.msrb.gmra.mxu3 %vm312_vm2, %v21032_v22  ;;  %11117 = vmatpush.msk.msrb.mxu2 %vm321_vm0, %v15926_v19  ;;  %v21035_v22 = vld [vmem:[#allocation156_spill] sm:$0xff] }
 0x4cd   : > { %11122 = vmatpush.msk.msrb.mxu3 %vm321_vm0, %v15926_v19 }
 0x4d0   : > { %v16094_v39 = vpop.f32.mrf.mxu1 }
 0x4d1   : > { %21028 = vst [vmem:[#allocation435_spill] sm:$0xff] %v16094_v39  ;;  %v5402_v41 = vpop.f32.mrf.mxu2  ;;  %v5431_v34 = vpop.f32.mrf.mxu3  ;;  %11074 = vmatmul.msk.f32.gmra.mxu1 %vm312_vm2, %v21036_v43  ;;  %v21042_v43 = vld [vmem:[#allocation192_spill] sm:$0xff] }
 0x4d2   : > { %v16113_v31 = vadd.f32 %v5402_v41, %v15532_v5  ;;  %v16116_v20 = vadd.f32 %v5431_v34, %v15535_v32  ;;  %v16118_v39 = vpop.f32.mrf.mxu0  ;;  %11069 = vmatmul.msk.f32.gmra.mxu0 %vm312_vm2, %v21035_v22 }
 0x4d3   : > { %21033 = vst [vmem:[#allocation136_spill] sm:$0xff] %v16118_v39  ;;  %11079 = vmatmul.msk.f32.gmra.mxu2 %vm312_vm2, %v21037_v2  ;;  %v21041_v39 = vld [vmem:[#allocation191_spill] sm:$0xff]  ;;  %v21043_v2 = vld [vmem:[#allocation193_spill] sm:$0xff] }
 0x4d4   : > { %11084 = vmatmul.msk.f32.gmra.mxu3 %vm312_vm2, %v21038_v7  ;;  %v21044_v7 = vld [vmem:[#allocation299_spill] sm:$0xff] }
 0x4d8   : > { %v16120_v62 = vpop.f32.mrf.mxu1 }
 0x4d9   : > { %21034 = vst [vmem:[#allocation443_spill] sm:$0xff] %v16120_v62  ;;  %v5405_v5 = vpop.f32.mrf.mxu2  ;;  %v5434_v41 = vpop.f32.mrf.mxu3  ;;  %11075 = vmatmul.msk.f32.gmra.mxu1 %vm312_vm2, %v21042_v43  ;;  %v21048_v43 = vld [vmem:[#allocation176_spill] sm:$0xff] }
 0x4da   : > { %v16131_v32 = vadd.f32 %v5405_v5, %v15550_v11  ;;  %v16134_v34 = vadd.f32 %v5434_v41, %v15553_v0  ;;  %v16136_v62 = vpop.f32.mrf.mxu0  ;;  %11070 = vmatmul.msk.f32.gmra.mxu0 %vm312_vm2, %v21041_v39 }
 0x4db   : > { %21039 = vst [vmem:[#allocation445_spill] sm:$0xff] %v16136_v62  ;;  %11080 = vmatmul.msk.f32.gmra.mxu2 %vm312_vm2, %v21043_v2  ;;  %v21047_v62 = vld [vmem:[#allocation177_spill] sm:$0xff]  ;;  %v21049_v2 = vld [vmem:[#allocation180_spill] sm:$0xff] }
 0x4dc   : > { %11085 = vmatmul.msk.f32.gmra.mxu3 %vm312_vm2, %v21044_v7  ;;  %v21050_v7 = vld [vmem:[#allocation290_spill] sm:$0xff] }
 0x4e0   : > { %v16138_v22 = vpop.f32.mrf.mxu1 }
 0x4e1   : > { %21040 = vst [vmem:[#allocation447_spill] sm:$0xff] %v16138_v22  ;;  %v5408_v11 = vpop.f32.mrf.mxu2  ;;  %v5437_v5 = vpop.f32.mrf.mxu3  ;;  %11076 = vmatmul.msk.f32.gmra.mxu1 %vm312_vm2, %v21048_v43  ;;  %v21054_v43 = vld [vmem:[#allocation275_spill] sm:$0xff] }
 0x4e2   : > { %v16149_v0 = vadd.f32 %v5408_v11, %v15568_v50  ;;  %v16152_v41 = vadd.f32 %v5437_v5, %v15571_v36  ;;  %v16154_v22 = vpop.f32.mrf.mxu0  ;;  %11071 = vmatmul.msk.f32.gmra.mxu0 %vm312_vm2, %v21047_v62 }
 0x4e3   : > { %21045 = vst [vmem:[#allocation148_spill] sm:$0xff] %v16154_v22  ;;  %11081 = vmatmul.msk.f32.gmra.mxu2 %vm312_vm2, %v21049_v2  ;;  %v21053_v22 = vld [vmem:[#allocation274_spill] sm:$0xff]  ;;  %v21061_v2 = vld [vmem:[#allocation288_spill] sm:$0xff] }
 0x4e4   : > { %11086 = vmatmul.msk.f32.gmra.mxu3 %vm312_vm2, %v21050_v7  ;;  %v21055_v7 = vld [vmem:[#allocation276_spill] sm:$0xff] }
 0x4e8   : > { %v16156_v39 = vpop.f32.mrf.mxu1 }
 0x4e9   : > { %21046 = vst [vmem:[#allocation457_spill] sm:$0xff] %v16156_v39  ;;  %v5411_v50 = vpop.f32.mrf.mxu2  ;;  %v5440_v11 = vpop.f32.mrf.mxu3  ;;  %11093 = vmatmul.msk.f32.vlgmr.msra.gmra.mxu1 %vm312_vm2, %v21054_v43  ;;  %v21060_v43 = vld [vmem:[#allocation287_spill] sm:$0xff] }
 0x4ea   : > { %v16167_v36 = vadd.f32 %v5411_v50, %v15586_v23  ;;  %v16170_v5 = vadd.f32 %v5440_v11, %v15589_v60  ;;  %v16172_v39 = vpop.f32.mrf.mxu0  ;;  %11088 = vmatmul.msk.f32.vlgmr.msra.gmra.mxu0 %vm312_vm2, %v21053_v22  ;;  %v21056_v23 = vld [vmem:[#allocation319_spill] sm:$0xff]  ;;  %11132 = vmatpush.msk.msra.mxu1 %vm321_vm0, %v15926_v19 }
 0x4eb   : > { %21051 = vst [vmem:[#allocation444_spill] sm:$0xff] %v16172_v39  ;;  %11127 = vmatpush.msk.msra.mxu0 %vm321_vm0, %v15926_v19  ;;  %11098 = vmatmul.msk.f32.vlgmr.msra.gmra.mxu2 %vm312_vm2, %v21055_v7  ;;  %v21059_v7 = vld [vmem:[#allocation286_spill] sm:$0xff]  ;;  %v21062_v22 = vld [vmem:[#allocation331_spill] sm:$0xff] }
 0x4ec   : > { %11103 = vmatmul.msk.f32.vlgmr.msra.gmra.mxu3 %vm312_vm2, %v21056_v23  ;;  %11137 = vmatpush.msk.msra.mxu2 %vm321_vm0, %v15926_v19 }
 0x4ed   : > { %11142 = vmatpush.msk.msra.mxu3 %vm321_vm0, %v15926_v19 }
 0x4f0   : > { %v16174_v62 = vpop.f32.mrf.mxu1 }
 0x4f1   : > { %21052 = vst [vmem:[#allocation446_spill] sm:$0xff] %v16174_v62  ;;  %v5518_v60 = vpop.f32.mrf.mxu2  ;;  %v5547_v50 = vpop.f32.mrf.mxu3  ;;  %11094 = vmatmul.msk.f32.gmra.mxu1 %vm312_vm2, %v21060_v43  ;;  %v21066_v43 = vld [vmem:[#allocation303_spill] sm:$0xff] }
 0x4f2   : > { %v16193_v11 = vadd.f32 %v5518_v60, %v15612_v52  ;;  %v16196_v62 = vadd.f32 %v5547_v50, %v15615_v33  ;;  %v16198_v39 = vpop.f32.mrf.mxu0  ;;  %11089 = vmatmul.msk.f32.gmra.mxu0 %vm312_vm2, %v21059_v7  ;;  %v21065_v7 = vld [vmem:[#allocation302_spill] sm:$0xff] }
 0x4f3   : > { %21057 = vst [vmem:[#allocation448_spill] sm:$0xff] %v16198_v39  ;;  %11099 = vmatmul.msk.f32.gmra.mxu2 %vm312_vm2, %v21061_v2  ;;  %v21067_v2 = vld [vmem:[#allocation304_spill] sm:$0xff] }
 0x4f4   : > { %11104 = vmatmul.msk.f32.gmra.mxu3 %vm312_vm2, %v21062_v22  ;;  %v21068_v22 = vld [vmem:[#allocation347_spill] sm:$0xff] }
 0x4f8   : > { %v16200_v23 = vpop.f32.mrf.mxu1 }
 0x4f9   : > { %21058 = vst [vmem:[#allocation454_spill] sm:$0xff] %v16200_v23  ;;  %v5521_v52 = vpop.f32.mrf.mxu2  ;;  %v5550_v60 = vpop.f32.mrf.mxu3  ;;  %11095 = vmatmul.msk.f32.gmra.mxu1 %vm312_vm2, %v21066_v43  ;;  %v21072_v43 = vld [vmem:[#allocation294_spill] sm:$0xff] }
 0x4fa   : > { %v16211_v33 = vadd.f32 %v5521_v52, %v15630_v12  ;;  %v16214_v50 = vadd.f32 %v5550_v60, %v15633_v3  ;;  %v16216_v23 = vpop.f32.mrf.mxu0  ;;  %11090 = vmatmul.msk.f32.gmra.mxu0 %vm312_vm2, %v21065_v7  ;;  %v21071_v7 = vld [vmem:[#allocation292_spill] sm:$0xff] }
 0x4fb   : > { %21063 = vst [vmem:[#allocation455_spill] sm:$0xff] %v16216_v23  ;;  %11100 = vmatmul.msk.f32.gmra.mxu2 %vm312_vm2, %v21067_v2  ;;  %v21073_v2 = vld [vmem:[#allocation296_spill] sm:$0xff] }
 0x4fc   : > { %11105 = vmatmul.msk.f32.gmra.mxu3 %vm312_vm2, %v21068_v22  ;;  %v21074_v22 = vld [vmem:[#allocation338_spill] sm:$0xff] }
 0x500   : > { %v16218_v39 = vpop.f32.mrf.mxu1 }
 0x501   : > { %21064 = vst [vmem:[#allocation456_spill] sm:$0xff] %v16218_v39  ;;  %v5524_v12 = vpop.f32.mrf.mxu2  ;;  %v5553_v52 = vpop.f32.mrf.mxu3  ;;  %11096 = vmatmul.msk.f32.gmra.mxu1 %vm312_vm2, %v21072_v43  ;;  %v21078_v43 = vld [vmem:[#allocation323_spill] sm:$0xff] }
 0x502   : > { %v16229_v3 = vadd.f32 %v5524_v12, %v15648_v59  ;;  %v16232_v60 = vadd.f32 %v5553_v52, %v15651_v28  ;;  %v16234_v39 = vpop.f32.mrf.mxu0  ;;  %11091 = vmatmul.msk.f32.gmra.mxu0 %vm312_vm2, %v21071_v7  ;;  %v21077_v7 = vld [vmem:[#allocation322_spill] sm:$0xff] }
 0x503   : > { %21069 = vst [vmem:[#allocation171_spill] sm:$0xff] %v16234_v39  ;;  %11101 = vmatmul.msk.f32.gmra.mxu2 %vm312_vm2, %v21073_v2  ;;  %v21085_v2 = vld [vmem:[#allocation336_spill] sm:$0xff] }
 0x504   : > { %11106 = vmatmul.msk.f32.gmra.mxu3 %vm312_vm2, %v21074_v22  ;;  %v21079_v22 = vld [vmem:[#allocation324_spill] sm:$0xff] }
 0x508   : > { %v16236_v23 = vpop.f32.mrf.mxu1 }
 0x509   : > { %21070 = vst [vmem:[#allocation172_spill] sm:$0xff] %v16236_v23  ;;  %v5527_v59 = vpop.f32.mrf.mxu2  ;;  %v5556_v12 = vpop.f32.mrf.mxu3  ;;  %11113 = vmatmul.msk.f32.vlgmr.msrb.gmra.mxu1 %vm312_vm2, %v21078_v43  ;;  %v21084_v43 = vld [vmem:[#allocation335_spill] sm:$0xff] }
 0x50a   : > { %v16247_v28 = vadd.f32 %v5527_v59, %v15666_v63  ;;  %v16250_v52 = vadd.f32 %v5556_v12, %v15669_v40  ;;  %v16252_v23 = vpop.f32.mrf.mxu0  ;;  %11108 = vmatmul.msk.f32.vlgmr.msrb.gmra.mxu0 %vm312_vm2, %v21077_v7  ;;  %v21080_v63 = vld [vmem:[#allocation367_spill] sm:$0xff]  ;;  %11152 = vmatpush.msk.msrb.mxu1 %vm321_vm0, %v15926_v19 }
 0x50b   : > { %21075 = vst [vmem:[#allocation464_spill] sm:$0xff] %v16252_v23  ;;  %11147 = vmatpush.msk.msrb.mxu0 %vm321_vm0, %v15926_v19  ;;  %11118 = vmatmul.msk.f32.vlgmr.msrb.gmra.mxu2 %vm312_vm2, %v21079_v22  ;;  %v21083_v22 = vld [vmem:[#allocation334_spill] sm:$0xff]  ;;  %v21086_v7 = vld [vmem:[#allocation379_spill] sm:$0xff] }
 0x50c   : > { %11123 = vmatmul.msk.f32.vlgmr.msrb.gmra.mxu3 %vm312_vm2, %v21080_v63  ;;  %11157 = vmatpush.msk.msrb.mxu2 %vm321_vm0, %v15926_v19 }
 0x50d   : > { %11162 = vmatpush.msk.msrb.mxu3 %vm321_vm0, %v15926_v19 }
 0x510   : > { %v16254_v39 = vpop.f32.mrf.mxu1 }
 0x511   : > { %21076 = vst [vmem:[#allocation466_spill] sm:$0xff] %v16254_v39  ;;  %v5634_v40 = vpop.f32.mrf.mxu2  ;;  %v5663_v59 = vpop.f32.mrf.mxu3  ;;  %11114 = vmatmul.msk.f32.gmra.mxu1 %vm312_vm2, %v21084_v43  ;;  %v21090_v43 = vld [vmem:[#allocation351_spill] sm:$0xff] }
 0x512   : > { %v16273_v12 = vadd.f32 %v5634_v40, %v15692_v57  ;;  %v16276_v39 = vadd.f32 %v5663_v59, %v15695_v45  ;;  %v16278_v23 = vpop.f32.mrf.mxu0  ;;  %11109 = vmatmul.msk.f32.gmra.mxu0 %vm312_vm2, %v21083_v22  ;;  %v21089_v22 = vld [vmem:[#allocation350_spill] sm:$0xff] }
 0x513   : > { %21081 = vst [vmem:[#allocation468_spill] sm:$0xff] %v16278_v23  ;;  %11119 = vmatmul.msk.f32.gmra.mxu2 %vm312_vm2, %v21085_v2  ;;  %v21091_v2 = vld [vmem:[#allocation352_spill] sm:$0xff] }
 0x514   : > { %11124 = vmatmul.msk.f32.gmra.mxu3 %vm312_vm2, %v21086_v7  ;;  %v21092_v7 = vld [vmem:[#allocation395_spill] sm:$0xff] }
 0x518   : > { %v16280_v63 = vpop.f32.mrf.mxu1 }
 0x519   : > { %21082 = vst [vmem:[#allocation476_spill] sm:$0xff] %v16280_v63  ;;  %v5637_v57 = vpop.f32.mrf.mxu2  ;;  %v5666_v40 = vpop.f32.mrf.mxu3  ;;  %11115 = vmatmul.msk.f32.gmra.mxu1 %vm312_vm2, %v21090_v43  ;;  %v21096_v43 = vld [vmem:[#allocation342_spill] sm:$0xff] }
 0x51a   : > { %v16291_v45 = vadd.f32 %v5637_v57, %v15710_v56  ;;  %v16294_v59 = vadd.f32 %v5666_v40, %v15713_v14  ;;  %v16296_v63 = vpop.f32.mrf.mxu0  ;;  %11110 = vmatmul.msk.f32.gmra.mxu0 %vm312_vm2, %v21089_v22  ;;  %v21095_v22 = vld [vmem:[#allocation340_spill] sm:$0xff] }
 0x51b   : > { %21087 = vst [vmem:[#allocation478_spill] sm:$0xff] %v16296_v63  ;;  %11120 = vmatmul.msk.f32.gmra.mxu2 %vm312_vm2, %v21091_v2  ;;  %v21097_v2 = vld [vmem:[#allocation344_spill] sm:$0xff] }
 0x51c   : > { %11125 = vmatmul.msk.f32.gmra.mxu3 %vm312_vm2, %v21092_v7  ;;  %v21098_v7 = vld [vmem:[#allocation386_spill] sm:$0xff] }
 0x520   : > { %v16298_v23 = vpop.f32.mrf.mxu1 }
 0x521   : > { %21088 = vst [vmem:[#allocation480_spill] sm:$0xff] %v16298_v23  ;;  %v5640_v56 = vpop.f32.mrf.mxu2  ;;  %v5669_v57 = vpop.f32.mrf.mxu3  ;;  %11116 = vmatmul.msk.f32.gmra.mxu1 %vm312_vm2, %v21096_v43  ;;  %v21105_v43 = vld [vmem:[#allocation371_spill] sm:$0xff] }
 0x522   : > { %v16309_v14 = vadd.f32 %v5640_v56, %v15728_v49  ;;  %v16312_v40 = vadd.f32 %v5669_v57, %v15731_v16  ;;  %v16314_v23 = vpop.f32.mrf.mxu0  ;;  %11111 = vmatmul.msk.f32.gmra.mxu0 %vm312_vm2, %v21095_v22  ;;  %v21100_v57 = vld [vmem:[#allocation49_spill] sm:$0xff] }
 0x523   : > { %21093 = vst [vmem:[#allocation195_spill] sm:$0xff] %v16314_v23  ;;  %11121 = vmatmul.msk.f32.gmra.mxu2 %vm312_vm2, %v21097_v2  ;;  %v21113_v2 = vld [vmem:[#allocation382_spill] sm:$0xff] }
 0x524   : > { %11126 = vmatmul.msk.f32.gmra.mxu3 %vm312_vm2, %v21098_v7  ;;  %v21106_v7 = vld [vmem:[#allocation372_spill] sm:$0xff] }
 0x528   : > { %v16316_v63 = vpop.f32.mrf.mxu1 }
 0x529   : > { %21094 = vst [vmem:[#allocation477_spill] sm:$0xff] %v16316_v63  ;;  %v5643_v49 = vpop.f32.mrf.mxu2  ;;  %v5672_v56 = vpop.f32.mrf.mxu3  ;;  %11133 = vmatmul.msk.f32.vlgmr.msra.gmra.mxu1 %vm312_vm2, %v21105_v43 }
 0x52a   : > { %v16327_v16 = vadd.f32 %v5643_v49, %v15746_v4  ;;  %v16330_v23 = vadd.f32 %v5672_v56, %v21100_v57  ;;  %v16332_v63 = vpop.f32.mrf.mxu0  ;;  %11128 = vmatmul.msk.f32.vlgmr.msra.gmra.mxu0 %vm312_vm2, %v21104_v54  ;;  %v21107_v4 = vld [vmem:[#allocation415_spill] sm:$0xff]  ;;  %11172 = vmatpush.msk.msra.mxu1 %vm321_vm0, %v15926_v19  ;;  %v21108_v57 = vld [vmem:[#allocation378_spill] sm:$0xff] }
 0x52b   : > { %21102 = vst [vmem:[#allocation486_spill] sm:$0xff] %v16332_v63  ;;  %11167 = vmatpush.msk.msra.mxu0 %vm321_vm0, %v15926_v19  ;;  %11138 = vmatmul.msk.f32.vlgmr.msra.gmra.mxu2 %vm312_vm2, %v21106_v7  ;;  %v21109_v63 = vld [vmem:[#allocation360_spill] sm:$0xff]  ;;  %v21114_v54 = vld [vmem:[#allocation383_spill] sm:$0xff] }
 0x52c   : > { %21099 = vst [vmem:[#allocation479_spill] sm:$0xff] %v16327_v16  ;;  %11143 = vmatmul.msk.f32.vlgmr.msra.gmra.mxu3 %vm312_vm2, %v21107_v4  ;;  %11177 = vmatpush.msk.msra.mxu2 %vm321_vm0, %v15926_v19  ;;  %v21116_v16 = vld [vmem:[#allocation99_spill] sm:$0xff] }
 0x52d   : > { %21101 = vst [vmem:[#allocation481_spill] sm:$0xff] %v16330_v23  ;;  %11182 = vmatpush.msk.msra.mxu3 %vm321_vm0, %v15926_v19  ;;  %v21115_v23 = vld [vmem:[#allocation384_spill] sm:$0xff] }
 0x530   : > { %v16334_v22 = vpop.f32.mrf.mxu1 }
 0x531   : > { %21103 = vst [vmem:[#allocation487_spill] sm:$0xff] %v16334_v22  ;;  %v5750_v49 = vpop.f32.mrf.mxu2  ;;  %v5794_v56 = vpop.f32.mrf.mxu3  ;;  %11134 = vmatmul.msk.f32.gmra.mxu1 %vm312_vm2, %v21114_v54  ;;  %v21121_v54 = vld [vmem:[#allocation399_spill] sm:$0xff] }
 0x532   : > { %v16353_v22 = vadd.f32 %v5750_v49, %v21108_v57  ;;  %v16356_v43 = vadd.f32 %v5794_v56, %v21109_v63  ;;  %v16358_v7 = vpop.f32.mrf.mxu0  ;;  %11129 = vmatmul.msk.f32.gmra.mxu0 %vm312_vm2, %v21113_v2  ;;  %v21117_v56 = vld [vmem:[#allocation406_spill] sm:$0xff] }
 0x533   : > { %21111 = vst [vmem:[#allocation495_spill] sm:$0xff] %v16358_v7  ;;  %11139 = vmatmul.msk.f32.gmra.mxu2 %vm312_vm2, %v21115_v23  ;;  %v21122_v23 = vld [vmem:[#allocation400_spill] sm:$0xff] }
 0x534   : > { %21110 = vst [vmem:[#allocation488_spill] sm:$0xff] %v16356_v43  ;;  %11144 = vmatmul.msk.f32.gmra.mxu3 %vm312_vm2, %v21116_v16  ;;  %v21120_v43 = vld [vmem:[#allocation398_spill] sm:$0xff]  ;;  %v21123_v16 = vld [vmem:[#allocation115_spill] sm:$0xff] }
 0x538   : > { %v16360_v4 = vpop.f32.mrf.mxu1 }
 0x539   : > { %21112 = vst [vmem:[#allocation497_spill] sm:$0xff] %v16360_v4  ;;  %v5753_v49 = vpop.f32.mrf.mxu2  ;;  %v5797_v57 = vpop.f32.mrf.mxu3  ;;  %11135 = vmatmul.msk.f32.gmra.mxu1 %vm312_vm2, %v21121_v54  ;;  %v21127_v54 = vld [vmem:[#allocation390_spill] sm:$0xff] }
 0x53a   : > { %v16371_v63 = vadd.f32 %v5753_v49, %v15790_v51  ;;  %v16374_v7 = vadd.f32 %v5797_v57, %v21117_v56  ;;  %v16376_v4 = vpop.f32.mrf.mxu0  ;;  %11130 = vmatmul.msk.f32.gmra.mxu0 %vm312_vm2, %v21120_v43  ;;  %v21126_v43 = vld [vmem:[#allocation388_spill] sm:$0xff] }
 0x53b   : > { %21118 = vst [vmem:[#allocation499_spill] sm:$0xff] %v16376_v4  ;;  %11140 = vmatmul.msk.f32.gmra.mxu2 %vm312_vm2, %v21122_v23  ;;  %v21128_v23 = vld [vmem:[#allocation392_spill] sm:$0xff] }
 0x53c   : > { %11145 = vmatmul.msk.f32.gmra.mxu3 %vm312_vm2, %v21123_v16  ;;  %v21129_v16 = vld [vmem:[#allocation430_spill] sm:$0xff] }
 0x540   : > { %v16378_v2 = vpop.f32.mrf.mxu1 }
 0x541   : > { %21119 = vst [vmem:[#allocation3_spill] sm:$0xff] %v16378_v2  ;;  %v5756_v51 = vpop.f32.mrf.mxu2  ;;  %v5800_v49 = vpop.f32.mrf.mxu3  ;;  %11136 = vmatmul.msk.f32.gmra.mxu1 %vm312_vm2, %v21127_v54  ;;  %v21133_v54 = vld [vmem:[#allocation419_spill] sm:$0xff] }
 0x542   : > { %v16389_v57 = vadd.f32 %v5756_v51, %v15808_v9  ;;  %v16392_v56 = vadd.f32 %v5800_v49, %v15811_v8  ;;  %v16394_v2 = vpop.f32.mrf.mxu0  ;;  %11131 = vmatmul.msk.f32.gmra.mxu0 %vm312_vm2, %v21126_v43  ;;  %v21132_v43 = vld [vmem:[#allocation418_spill] sm:$0xff] }
 0x543   : > { %21124 = vst [vmem:[#allocation6_spill] sm:$0xff] %v16394_v2  ;;  %11141 = vmatmul.msk.f32.gmra.mxu2 %vm312_vm2, %v21128_v23  ;;  %v21138_v23 = vld [vmem:[#allocation427_spill] sm:$0xff] }
 0x544   : > { %11146 = vmatmul.msk.f32.gmra.mxu3 %vm312_vm2, %v21129_v16  ;;  %v21134_v16 = vld [vmem:[#allocation420_spill] sm:$0xff] }
 0x548   : > { %v16396_v4 = vpop.f32.mrf.mxu1 }
 0x549   : > { %21125 = vst [vmem:[#allocation12_spill] sm:$0xff] %v16396_v4  ;;  %v5759_v9 = vpop.f32.mrf.mxu2  ;;  %v5803_v51 = vpop.f32.mrf.mxu3  ;;  %11153 = vmatmul.msk.f32.vlgmr.msrb.gmra.mxu1 %vm312_vm2, %v21133_v54 }
 0x54a   : > { %v16407_v8 = vadd.f32 %v5759_v9, %v15826_v1  ;;  %v16410_v49 = vadd.f32 %v5803_v51, %v15829_v48  ;;  %v16412_v4 = vpop.f32.mrf.mxu0  ;;  %11148 = vmatmul.msk.f32.vlgmr.msrb.gmra.mxu0 %vm312_vm2, %v21132_v43  ;;  %v21135_v1 = vld [vmem:[#allocation135_spill] sm:$0xff]  ;;  %11192 = vmatpush.msk.msrb.mxu1 %vm321_vm0, %v15926_v19  ;;  %v21165_v43 = vld [vmem:[#allocation194_spill] sm:$0xff] }
 0x54b   : > { %21130 = vst [vmem:[#allocation9_spill] sm:$0xff] %v16412_v4  ;;  %11187 = vmatpush.msk.msrb.mxu0 %vm321_vm0, %v15926_v19  ;;  %11158 = vmatmul.msk.f32.vlgmr.msrb.gmra.mxu2 %vm312_vm2, %v21134_v16  ;;  %v21140_v4 = vld [vmem:[#allocation429_spill] sm:$0xff] }
 0x54c   : > { %11163 = vmatmul.msk.f32.vlgmr.msrb.gmra.mxu3 %vm312_vm2, %v21135_v1  ;;  %11197 = vmatpush.msk.msrb.mxu2 %vm321_vm0, %v15926_v19 }
 0x54d   : > { %11202 = vmatpush.msk.msrb.mxu3 %vm321_vm0, %v15926_v19  ;;  %v21141_v19 = vld [vmem:[#allocation147_spill] sm:$0xff] }
 0x550   : > { %v16414_v2 = vpop.f32.mrf.mxu1 }
 0x551   : > { %21131 = vst [vmem:[#allocation282_spill] sm:$0xff] %v16414_v2  ;;  %v5996_v48 = vpop.f32.mrf.mxu2  ;;  %v6025_v9 = vpop.f32.mrf.mxu3  ;;  %v21139_v2 = vld [vmem:[#allocation428_spill] sm:$0xff] }
 0x552   : > { %v16433_v51 = vadd.f32 %v5996_v48, %v15852_v17  ;;  %v16436_v54 = vadd.f32 %v6025_v9, %v15855_v21  ;;  %v16438_v16 = vpop.f32.mrf.mxu0  ;;  %11149 = vmatmul.msk.f32.gmra.mxu0 %vm312_vm2, %v21138_v23  ;;  %11154 = vmatmul.msk.f32.gmra.mxu1 %vm312_vm2, %v21139_v2  ;;  %v21144_v23 = vld [vmem:[#allocation438_spill] sm:$0xff]  ;;  %v21145_v2 = vld [vmem:[#allocation439_spill] sm:$0xff] }
 0x553   : > { %21136 = vst [vmem:[#allocation268_spill] sm:$0xff] %v16438_v16  ;;  %11159 = vmatmul.msk.f32.gmra.mxu2 %vm312_vm2, %v21140_v4  ;;  %v21146_v4 = vld [vmem:[#allocation440_spill] sm:$0xff] }
 0x554   : > { %11164 = vmatmul.msk.f32.gmra.mxu3 %vm312_vm2, %v21141_v19  ;;  %v21147_v19 = vld [vmem:[#allocation163_spill] sm:$0xff] }
 0x558   : > { %v16440_v1 = vpop.f32.mrf.mxu1 }
 0x559   : > { %21137 = vst [vmem:[#allocation310_spill] sm:$0xff] %v16440_v1  ;;  %v5999_v17 = vpop.f32.mrf.mxu2  ;;  %v6028_v48 = vpop.f32.mrf.mxu3 }
 0x55a   : > { %v16451_v21 = vadd.f32 %v5999_v17, %v15870_v61  ;;  %v16454_v9 = vadd.f32 %v6028_v48, %v15873_v15  ;;  %v16456_v1 = vpop.f32.mrf.mxu0  ;;  %11150 = vmatmul.msk.f32.gmra.mxu0 %vm312_vm2, %v21144_v23  ;;  %11155 = vmatmul.msk.f32.gmra.mxu1 %vm312_vm2, %v21145_v2  ;;  %v21150_v23 = vld [vmem:[#allocation432_spill] sm:$0xff]  ;;  %v21151_v2 = vld [vmem:[#allocation434_spill] sm:$0xff] }
 0x55b   : > { %21142 = vst [vmem:[#allocation236_spill] sm:$0xff] %v16456_v1  ;;  %11160 = vmatmul.msk.f32.gmra.mxu2 %vm312_vm2, %v21146_v4  ;;  %v21152_v4 = vld [vmem:[#allocation436_spill] sm:$0xff] }
 0x55c   : > { %11165 = vmatmul.msk.f32.gmra.mxu3 %vm312_vm2, %v21147_v19  ;;  %v21153_v19 = vld [vmem:[#allocation463_spill] sm:$0xff] }
 0x560   : > { %v16458_v16 = vpop.f32.mrf.mxu1 }
 0x561   : > { %21143 = vst [vmem:[#allocation357_spill] sm:$0xff] %v16458_v16  ;;  %v6002_v61 = vpop.f32.mrf.mxu2  ;;  %v6031_v17 = vpop.f32.mrf.mxu3 }
 0x562   : > { %v16469_v15 = vadd.f32 %v6002_v61, %v15888_v58  ;;  %v16472_v48 = vadd.f32 %v6031_v17, %v15891_v27  ;;  %v16474_v16 = vpop.f32.mrf.mxu0  ;;  %11151 = vmatmul.msk.f32.gmra.mxu0 %vm312_vm2, %v21150_v23  ;;  %11156 = vmatmul.msk.f32.gmra.mxu1 %vm312_vm2, %v21151_v2  ;;  %v21156_v23 = vld [vmem:[#allocation451_spill] sm:$0xff]  ;;  %v21157_v2 = vld [vmem:[#allocation452_spill] sm:$0xff] }
 0x563   : > { %21148 = vst [vmem:[#allocation248_spill] sm:$0xff] %v16474_v16  ;;  %11161 = vmatmul.msk.f32.gmra.mxu2 %vm312_vm2, %v21152_v4  ;;  %v21158_v4 = vld [vmem:[#allocation453_spill] sm:$0xff] }
 0x564   : > { %11166 = vmatmul.msk.f32.gmra.mxu3 %vm312_vm2, %v21153_v19  ;;  %v21159_v19 = vld [vmem:[#allocation182_spill] sm:$0xff] }
 0x568   : > { %v16476_v1 = vpop.f32.mrf.mxu1 }
 0x569   : > { %21149 = vst [vmem:[#allocation358_spill] sm:$0xff] %v16476_v1  ;;  %v6005_v58 = vpop.f32.mrf.mxu2  ;;  %v6034_v61 = vpop.f32.mrf.mxu3 }
 0x56a   : > { %v16487_v27 = vadd.f32 %v6005_v58, %v15906_v53  ;;  %v16490_v17 = vadd.f32 %v6034_v61, %v15909_v44  ;;  %v16492_v1 = vpop.f32.mrf.mxu0  ;;  %11168 = vmatmul.msk.f32.vlgmr.msra.gmra.mxu0 %vm312_vm2, %v21156_v23  ;;  %11173 = vmatmul.msk.f32.vlgmr.msra.gmra.mxu1 %vm312_vm2, %v21157_v2  ;;  %v16507_v53 = vld [vmem:[%s19372_s1 + $0x18] sm:$0x7] }
 0x56b   : > { %21154 = vst [vmem:[#allocation141_spill] sm:$0xff] %v16492_v1  ;;  %11178 = vmatmul.msk.f32.vlgmr.msra.gmra.mxu2 %vm312_vm2, %v21158_v4  ;;  %11207 = vmatpush.msk.msra.mxu0 %vm321_vm0, %v16507_v53  ;;  %v21163_v1 = vld [vmem:[#allocation461_spill] sm:$0xff]  ;;  %v21164_v23 = vld [vmem:[#allocation462_spill] sm:$0xff] }
 0x56c   : > { %11183 = vmatmul.msk.f32.vlgmr.msra.gmra.mxu3 %vm312_vm2, %v21159_v19  ;;  %11217 = vmatpush.msk.msra.mxu2 %vm321_vm0, %v16507_v53 }
 0x56d   : > { %11222 = vmatpush.msk.msra.mxu3 %vm321_vm0, %v16507_v53  ;;  %11212 = vmatpush.msk.msra.mxu1 %vm321_vm0, %v16507_v53 }
 0x570   : > { %v16494_v16 = vpop.f32.mrf.mxu1 }
 0x571   : > { %21155 = vst [vmem:[#allocation156_spill] sm:$0xff] %v16494_v16  ;;  %v6112_v44 = vpop.f32.mrf.mxu2  ;;  %v6141_v58 = vpop.f32.mrf.mxu3  ;;  %v21162_v16 = vld [vmem:[#allocation460_spill] sm:$0xff] }
 0x572   : > { %v16518_v61 = vadd.f32 %v6112_v44, %v15937_v42  ;;  %v16521_v19 = vadd.f32 %v6141_v58, %v15940_v10  ;;  %v16523_v4 = vpop.f32.mrf.mxu0  ;;  %11169 = vmatmul.msk.f32.gmra.mxu0 %vm312_vm2, %v21162_v16  ;;  %11174 = vmatmul.msk.f32.gmra.mxu1 %vm312_vm2, %v21163_v1  ;;  %v21168_v1 = vld [vmem:[#allocation471_spill] sm:$0xff]  ;;  %v21176_v16 = vld [vmem:[#allocation465_spill] sm:$0xff] }
 0x573   : > { %21160 = vst [vmem:[#allocation191_spill] sm:$0xff] %v16523_v4  ;;  %11179 = vmatmul.msk.f32.gmra.mxu2 %vm312_vm2, %v21164_v23  ;;  %v21169_v23 = vld [vmem:[#allocation472_spill] sm:$0xff] }
 0x574   : > { %11184 = vmatmul.msk.f32.gmra.mxu3 %vm312_vm2, %v21165_v43  ;;  %v21170_v43 = vld [vmem:[#allocation473_spill] sm:$0xff] }
 0x578   : > { %v16525_v2 = vpop.f32.mrf.mxu1 }
 0x579   : > { %21161 = vst [vmem:[#allocation177_spill] sm:$0xff] %v16525_v2  ;;  %v6115_v42 = vpop.f32.mrf.mxu2  ;;  %v6144_v44 = vpop.f32.mrf.mxu3 }
 0x57a   : > { %v16536_v10 = vadd.f32 %v6115_v42, %v15955_v37  ;;  %v16539_v58 = vadd.f32 %v6144_v44, %v15958_v26  ;;  %v16541_v2 = vpop.f32.mrf.mxu0  ;;  %11170 = vmatmul.msk.f32.gmra.mxu0 %vm312_vm2, %v21168_v1  ;;  %11175 = vmatmul.msk.f32.gmra.mxu1 %vm312_vm2, %v21169_v23  ;;  %v21171_v37 = vld [vmem:[#allocation208_spill] sm:$0xff]  ;;  %v21177_v23 = vld [vmem:[#allocation467_spill] sm:$0xff] }
 0x57b   : > { %21166 = vst [vmem:[#allocation49_spill] sm:$0xff] %v16541_v2  ;;  %11180 = vmatmul.msk.f32.gmra.mxu2 %vm312_vm2, %v21170_v43  ;;  %v21178_v43 = vld [vmem:[#allocation469_spill] sm:$0xff] }
 0x57c   : > { %11185 = vmatmul.msk.f32.gmra.mxu3 %vm312_vm2, %v21171_v37  ;;  %v21179_v37 = vld [vmem:[#allocation494_spill] sm:$0xff] }
 0x580   : > { %v16543_v4 = vpop.f32.mrf.mxu1 }
 0x581   : > { %21167 = vst [vmem:[#allocation378_spill] sm:$0xff] %v16543_v4  ;;  %v6118_v26 = vpop.f32.mrf.mxu2  ;;  %v6147_v42 = vpop.f32.mrf.mxu3 }
 0x582   : > { %v16554_v44 = vadd.f32 %v6118_v26, %v15973_v47  ;;  %v16557_v4 = vadd.f32 %v6147_v42, %v15976_v18  ;;  %v16559_v2 = vpop.f32.mrf.mxu0  ;;  %11171 = vmatmul.msk.f32.gmra.mxu0 %vm312_vm2, %v21176_v16  ;;  %11176 = vmatmul.msk.f32.gmra.mxu1 %vm312_vm2, %v21177_v23  ;;  %v16572_v47 = vld [vmem:[%s11932_s19 + $0x380] sm:$0xff]  ;;  %v16576_v26 = vld [vmem:[%s11932_s19 + $0x388] sm:$0xff] }
 0x583   : > { %21174 = vst [vmem:[#allocation514_spill] sm:$0xff] %v16559_v2  ;;  %11181 = vmatmul.msk.f32.gmra.mxu2 %vm312_vm2, %v21178_v43  ;;  %v6704_v18 = vrot.slane %v16572_v47, 2  ;;  %v6705_v42 = vrot.slane %v16576_v26, 2 }
 0x584   : > { %21172 = vst [vmem:[#allocation360_spill] sm:$0xff] %v16554_v44  ;;  %11186 = vmatmul.msk.f32.gmra.mxu3 %vm312_vm2, %v21179_v37  ;;  %v21186_v44 = vld [vmem:[#allocation484_spill] sm:$0xff] }
 0x585   : > { %21173 = vst [vmem:[#allocation406_spill] sm:$0xff] %v16557_v4  ;;  %v16590_v4 = vsel %vm2689_vm3, %v6704_v18, %v6705_v42 }
 0x586   : > { %21180 = vst [vmem:[#allocation516_spill] sm:$0xff] %v16572_v47  ;;  %v21185_v47 = vld [vmem:[#allocation483_spill] sm:$0xff] }
 0x587   : > { %21181 = vst [vmem:[#allocation517_spill] sm:$0xff] %v16576_v26  ;;  %v21194_v26 = vld [vmem:[#allocation493_spill] sm:$0xff] }
 0x588   : > { %v16561_v1 = vpop.f32.mrf.mxu1  ;;  %21184 = vst [vmem:[#allocation520_spill] sm:$0xff] %v16590_v4 }
 0x589   : > { %21175 = vst [vmem:[#allocation515_spill] sm:$0xff] %v16561_v1  ;;  %v6121_v1 = vpop.f32.mrf.mxu2  ;;  %v6150_v2 = vpop.f32.mrf.mxu3 }
 0x58a   : > { %v16580_v16 = vadd.f32 %v6121_v1, %v15993_v29  ;;  %v16583_v23 = vadd.f32 %v6150_v2, %v15996_v35  ;;  %v16585_v43 = vpop.f32.mrf.mxu0  ;;  %11188 = vmatmul.msk.f32.vlgmr.msrb.gmra.mxu0 %vm312_vm2, %v21185_v47  ;;  %11193 = vmatmul.msk.f32.vlgmr.msrb.gmra.mxu1 %vm312_vm2, %v21186_v44  ;;  %v21187_v29 = vld [vmem:[#allocation485_spill] sm:$0xff]  ;;  %v21192_v47 = vld [vmem:[#allocation491_spill] sm:$0xff] }
 0x58b   : > { %21182 = vst [vmem:[#allocation518_spill] sm:$0xff] %v16585_v43  ;;  %11227 = vmatpush.msk.msrb.mxu0 %vm321_vm0, %v16507_v53  ;;  %11198 = vmatmul.msk.f32.vlgmr.msrb.gmra.mxu2 %vm312_vm2, %v21187_v29  ;;  %v16603_v35 = vld [vmem:[%s11932_s19 + $0x390] sm:$0xff] }
 0x58c   : > { %11203 = vmatmul.msk.f32.vlgmr.msrb.gmra.mxu3 %vm312_vm2, %v16590_v4  ;;  %21188 = vst [vmem:[#allocation521_spill] sm:$0xff] %v16603_v35  ;;  %v6707_v2 = vrot.slane %v16603_v35, 2  ;;  %11237 = vmatpush.msk.msrb.mxu2 %vm321_vm0, %v16507_v53  ;;  %v21193_v35 = vld [vmem:[#allocation492_spill] sm:$0xff] }
 0x58d   : > { %11242 = vmatpush.msk.msrb.mxu3 %vm321_vm0, %v16507_v53  ;;  %11232 = vmatpush.msk.msrb.mxu1 %vm321_vm0, %v16507_v53 }
 0x58e   : > { %v16623_v43 = vsel %vm2689_vm3, %v6705_v42, %v6707_v2 }
 0x58f   : > { %21191 = vst [vmem:[#allocation524_spill] sm:$0xff] %v16623_v43 }
 0x590   : > { %v16587_v37 = vpop.f32.mrf.mxu1 }
 0x591   : > { %21183 = vst [vmem:[#allocation519_spill] sm:$0xff] %v16587_v37  ;;  %v6228_v1 = vpop.f32.mrf.mxu2  ;;  %v6257_v18 = vpop.f32.mrf.mxu3 }
 0x592   : > { %v16613_v29 = vadd.f32 %v6228_v1, %v16023_v30  ;;  %v16616_v4 = vadd.f32 %v6257_v18, %v16026_v46  ;;  %v16618_v44 = vpop.f32.mrf.mxu0  ;;  %11189 = vmatmul.msk.f32.gmra.mxu0 %vm312_vm2, %v21192_v47  ;;  %11194 = vmatmul.msk.f32.gmra.mxu1 %vm312_vm2, %v21193_v35  ;;  %v16634_v46 = vld [vmem:[%s11932_s19 + $0x398] sm:$0x3f]  ;;  %v21201_v47 = vld [vmem:[#allocation504_spill] sm:$0xff] }
 0x593   : > { %21189 = vst [vmem:[#allocation522_spill] sm:$0xff] %v16618_v44  ;;  %11199 = vmatmul.msk.f32.gmra.mxu2 %vm312_vm2, %v21194_v26  ;;  %v16637_v30 = vrot.slane %v16634_v46, 2  ;;  %v21200_v26 = vld [vmem:[#allocation503_spill] sm:$0xff] }
 0x594   : > { %11204 = vmatmul.msk.f32.gmra.mxu3 %vm312_vm2, %v16623_v43  ;;  %21195 = vst [vmem:[#allocation525_spill] sm:$0xff] %v16634_v46  ;;  %v21202_v46 = vld [vmem:[#allocation505_spill] sm:$0xff] }
 0x595   : > { %21196 = vst [vmem:[#allocation526_spill] sm:$0xff] %v16637_v30  ;;  %v16651_v43 = vsel %vm2689_vm3, %v6707_v2, %v16637_v30 }
 0x596   : > { %21199 = vst [vmem:[#allocation529_spill] sm:$0xff] %v16651_v43 }
 0x598   : > { %v16620_v37 = vpop.f32.mrf.mxu1 }
 0x599   : > { %21190 = vst [vmem:[#allocation523_spill] sm:$0xff] %v16620_v37  ;;  %v6231_v1 = vpop.f32.mrf.mxu2  ;;  %v6260_v42 = vpop.f32.mrf.mxu3 }
 0x59a   : > { %v16640_v18 = vadd.f32 %v6231_v1, %v16047_v55  ;;  %v16643_v37 = vadd.f32 %v6260_v42, %v16050_v24  ;;  %v16645_v35 = vpop.f32.mrf.mxu0  ;;  %11190 = vmatmul.msk.f32.gmra.mxu0 %vm312_vm2, %v21200_v26  ;;  %11195 = vmatmul.msk.f32.gmra.mxu1 %vm312_vm2, %v21201_v47  ;;  %v21205_v47 = vld [vmem:[#allocation496_spill] sm:$0xff] }
 0x59b   : > { %21197 = vst [vmem:[#allocation527_spill] sm:$0xff] %v16645_v35  ;;  %11200 = vmatmul.msk.f32.gmra.mxu2 %vm312_vm2, %v21202_v46  ;;  %v21206_v46 = vld [vmem:[#allocation498_spill] sm:$0xff]  ;;  %v11760_v35 = vld [vmem:[%s11932_s19 + $0x60] sm:$0xff]  ;;  %v11813_v26 = vld [vmem:[%s11932_s19 + $0x208] sm:$0xff] }
 0x59c   : > { %11205 = vmatmul.msk.f32.gmra.mxu3 %vm312_vm2, %v16651_v43  ;;  %v21207_v43 = vld [vmem:[#allocation500_spill] sm:$0xff] }
 0x5a0   : > { %v16647_v44 = vpop.f32.mrf.mxu1 }
 0x5a1   : > { %21198 = vst [vmem:[#allocation528_spill] sm:$0xff] %v16647_v44  ;;  %v6234_v24 = vpop.f32.mrf.mxu2  ;;  %v6263_v55 = vpop.f32.mrf.mxu3 }
 0x5a2   : > { %v16662_v1 = vadd.f32 %v6234_v24, %v16069_v6  ;;  %v16665_v2 = vadd.f32 %v6263_v55, %v16072_v25  ;;  %v16667_v42 = vpop.f32.mrf.mxu0  ;;  %11191 = vmatmul.msk.f32.gmra.mxu0 %vm312_vm2, %v21205_v47  ;;  %11196 = vmatmul.msk.f32.gmra.mxu1 %vm312_vm2, %v21206_v46  ;;  %v11759_v46 = vld [vmem:[%s11932_s19 + $0x40] sm:$0xff] }
 0x5a3   : > { %21203 = vst [vmem:[#allocation530_spill] sm:$0xff] %v16667_v42  ;;  %11201 = vmatmul.msk.f32.gmra.mxu2 %vm312_vm2, %v21207_v43  ;;  %v11764_v43 = vld [vmem:[%s11932_s19 + $0x68] sm:$0xff] }
 0x5a4   : > { %11206 = vmatmul.msk.f32.gmra.mxu3 %vm312_vm2, %v16637_v30  ;;  %v11763_v30 = vld [vmem:[%s11932_s19 + $0x48] sm:$0xff] }
 0x5a8   : > { %v16669_v44 = vpop.f32.mrf.mxu1 }
 0x5a9   : > { %21204 = vst [vmem:[#allocation531_spill] sm:$0xff] %v16669_v44  ;;  %v6237_v6 = vpop.f32.mrf.mxu2  ;;  %v6266_v25 = vpop.f32.mrf.mxu3 }
 0x5aa   : > { %v16680_v24 = vadd.f32 %v6237_v6, %v16087_v38  ;;  %v16683_v55 = vadd.f32 %v6266_v25, %v16090_v13  ;;  %v16685_v44 = vpop.f32.mrf.mxu0  ;;  %11208 = vmatmul.msk.f32.vlgmr.msra.gmra.mxu0 %vm312_vm2, %v11759_v46  ;;  %11213 = vmatmul.msk.f32.vlgmr.msra.gmra.mxu1 %vm312_vm2, %v11760_v35  ;;  %v11761_v38 = vld [vmem:[%s11932_s19 + $0x80] sm:$0xff] }
 0x5ab   : > { %21208 = vst [vmem:[#allocation532_spill] sm:$0xff] %v16685_v44  ;;  %11247 = vmatpush.msk.msra.mxu0 %vm321_vm0, %v16507_v53  ;;  %11218 = vmatmul.msk.f32.vlgmr.msra.gmra.mxu2 %vm312_vm2, %v11761_v38  ;;  %v11762_v13 = vld [vmem:[%s11932_s19 + $0xa0] sm:$0xff] }
 0x5ac   : > { %11223 = vmatmul.msk.f32.vlgmr.msra.gmra.mxu3 %vm312_vm2, %v11762_v13  ;;  %11257 = vmatpush.msk.msra.mxu2 %vm321_vm0, %v16507_v53 }
 0x5ad   : > { %11262 = vmatpush.msk.msra.mxu3 %vm321_vm0, %v16507_v53  ;;  %11252 = vmatpush.msk.msra.mxu1 %vm321_vm0, %v16507_v53 }
 0x5b0   : > { %v16687_v42 = vpop.f32.mrf.mxu1 }
 0x5b1   : > { %21209 = vst [vmem:[#allocation533_spill] sm:$0xff] %v16687_v42  ;;  %v6344_v35 = vpop.f32.mrf.mxu2  ;;  %v6373_v46 = vpop.f32.mrf.mxu3  ;;  %v11765_v42 = vld [vmem:[%s11932_s19 + $0x88] sm:$0xff] }
 0x5b2   : > { %v16706_v6 = vadd.f32 %v6344_v35, %v16113_v31  ;;  %v16709_v25 = vadd.f32 %v6373_v46, %v16116_v20  ;;  %v16711_v38 = vpop.f32.mrf.mxu0  ;;  %11209 = vmatmul.msk.f32.gmra.mxu0 %vm312_vm2, %v11763_v30  ;;  %11214 = vmatmul.msk.f32.gmra.mxu1 %vm312_vm2, %v11764_v43  ;;  %v11766_v31 = vld [vmem:[%s11932_s19 + $0xa8] sm:$0xff]  ;;  %v11767_v43 = vld [vmem:[%s11932_s19 + $0x50] sm:$0xff] }
 0x5b3   : > { %21210 = vst [vmem:[#allocation534_spill] sm:$0xff] %v16711_v38  ;;  %11219 = vmatmul.msk.f32.gmra.mxu2 %vm312_vm2, %v11765_v42  ;;  %v11768_v42 = vld [vmem:[%s11932_s19 + $0x70] sm:$0xff] }
 0x5b4   : > { %11224 = vmatmul.msk.f32.gmra.mxu3 %vm312_vm2, %v11766_v31  ;;  %v11769_v31 = vld [vmem:[%s11932_s19 + $0x90] sm:$0xff] }
 0x5b8   : > { %v16713_v13 = vpop.f32.mrf.mxu1 }
 0x5b9   : > { %21211 = vst [vmem:[#allocation535_spill] sm:$0xff] %v16713_v13  ;;  %v6347_v20 = vpop.f32.mrf.mxu2  ;;  %v6376_v35 = vpop.f32.mrf.mxu3 }
 0x5ba   : > { %v16724_v46 = vadd.f32 %v6347_v20, %v16131_v32  ;;  %v16727_v13 = vadd.f32 %v6376_v35, %v16134_v34  ;;  %v16729_v30 = vpop.f32.mrf.mxu0  ;;  %11210 = vmatmul.msk.f32.gmra.mxu0 %vm312_vm2, %v11767_v43  ;;  %11215 = vmatmul.msk.f32.gmra.mxu1 %vm312_vm2, %v11768_v42  ;;  %v11770_v32 = vld [vmem:[%s11932_s19 + $0xb0] sm:$0xff]  ;;  %v11771_v42 = vld [vmem:[%s11932_s19 + $0x58] sm:$0x3f] }
 0x5bb   : > { %21212 = vst [vmem:[#allocation536_spill] sm:$0xff] %v16729_v30  ;;  %11220 = vmatmul.msk.f32.gmra.mxu2 %vm312_vm2, %v11769_v31  ;;  %v11772_v31 = vld [vmem:[%s11932_s19 + $0x78] sm:$0x3f] }
 0x5bc   : > { %11225 = vmatmul.msk.f32.gmra.mxu3 %vm312_vm2, %v11770_v32  ;;  %v11773_v32 = vld [vmem:[%s11932_s19 + $0x98] sm:$0x3f] }
 0x5c0   : > { %v16731_v38 = vpop.f32.mrf.mxu1 }
 0x5c1   : > { %21213 = vst [vmem:[#allocation537_spill] sm:$0xff] %v16731_v38  ;;  %v6350_v34 = vpop.f32.mrf.mxu2  ;;  %v6379_v20 = vpop.f32.mrf.mxu3 }
 0x5c2   : > { %v16742_v35 = vadd.f32 %v6350_v34, %v16149_v0  ;;  %v16745_v38 = vadd.f32 %v6379_v20, %v16152_v41  ;;  %v16747_v43 = vpop.f32.mrf.mxu0  ;;  %11211 = vmatmul.msk.f32.gmra.mxu0 %vm312_vm2, %v11771_v42  ;;  %11216 = vmatmul.msk.f32.gmra.mxu1 %vm312_vm2, %v11772_v31  ;;  %v11774_v0 = vld [vmem:[%s11932_s19 + $0xb8] sm:$0x3f]  ;;  %v11775_v31 = vld [vmem:[%s11932_s19 + $0xc0] sm:$0xff] }
 0x5c3   : > { %21214 = vst [vmem:[#allocation538_spill] sm:$0xff] %v16747_v43  ;;  %11221 = vmatmul.msk.f32.gmra.mxu2 %vm312_vm2, %v11773_v32  ;;  %v11776_v32 = vld [vmem:[%s11932_s19 + $0xe0] sm:$0xff] }
 0x5c4   : > { %11226 = vmatmul.msk.f32.gmra.mxu3 %vm312_vm2, %v11774_v0 }
 0x5c8   : > { %v16749_v30 = vpop.f32.mrf.mxu1 }
 0x5c9   : > { %21215 = vst [vmem:[#allocation539_spill] sm:$0xff] %v16749_v30  ;;  %v6353_v41 = vpop.f32.mrf.mxu2  ;;  %v6382_v34 = vpop.f32.mrf.mxu3 }
 0x5ca   : > { %v16760_v20 = vadd.f32 %v6353_v41, %v16167_v36  ;;  %v16763_v30 = vadd.f32 %v6382_v34, %v16170_v5  ;;  %v16765_v42 = vpop.f32.mrf.mxu0  ;;  %11228 = vmatmul.msk.f32.vlgmr.msrb.gmra.mxu0 %vm312_vm2, %v11775_v31  ;;  %11233 = vmatmul.msk.f32.vlgmr.msrb.gmra.mxu1 %vm312_vm2, %v11776_v32  ;;  %v11777_v36 = vld [vmem:[%s11932_s19 + $0x100] sm:$0xff] }
 0x5cb   : > { %21216 = vst [vmem:[#allocation540_spill] sm:$0xff] %v16765_v42  ;;  %11267 = vmatpush.msk.msrb.mxu0 %vm321_vm0, %v16507_v53  ;;  %11238 = vmatmul.msk.f32.vlgmr.msrb.gmra.mxu2 %vm312_vm2, %v11777_v36  ;;  %v11778_v5 = vld [vmem:[%s11932_s19 + $0x120] sm:$0xff]  ;;  %v11781_v42 = vld [vmem:[%s11932_s19 + $0x108] sm:$0xff] }
 0x5cc   : > { %11243 = vmatmul.msk.f32.vlgmr.msrb.gmra.mxu3 %vm312_vm2, %v11778_v5  ;;  %11277 = vmatpush.msk.msrb.mxu2 %vm321_vm0, %v16507_v53  ;;  %v11779_v5 = vld [vmem:[%s11932_s19 + $0xc8] sm:$0xff] }
 0x5cd   : > { %11282 = vmatpush.msk.msrb.mxu3 %vm321_vm0, %v16507_v53  ;;  %11272 = vmatpush.msk.msrb.mxu1 %vm321_vm0, %v16507_v53 }
 0x5d0   : > { %v16767_v43 = vpop.f32.mrf.mxu1 }
 0x5d1   : > { %21217 = vst [vmem:[#allocation541_spill] sm:$0xff] %v16767_v43  ;;  %v6460_v0 = vpop.f32.mrf.mxu2  ;;  %v6489_v41 = vpop.f32.mrf.mxu3  ;;  %v11780_v43 = vld [vmem:[%s11932_s19 + $0xe8] sm:$0xff] }
 0x5d2   : > { %v16786_v34 = vadd.f32 %v6460_v0, %v16193_v11  ;;  %v16789_v31 = vadd.f32 %v6489_v41, %v16196_v62  ;;  %v16791_v32 = vpop.f32.mrf.mxu0  ;;  %11229 = vmatmul.msk.f32.gmra.mxu0 %vm312_vm2, %v11779_v5  ;;  %11234 = vmatmul.msk.f32.gmra.mxu1 %vm312_vm2, %v11780_v43  ;;  %v11782_v11 = vld [vmem:[%s11932_s19 + $0x128] sm:$0xff]  ;;  %v11783_v43 = vld [vmem:[%s11932_s19 + $0xd0] sm:$0xff] }
 0x5d3   : > { %21218 = vst [vmem:[#allocation542_spill] sm:$0xff] %v16791_v32  ;;  %11239 = vmatmul.msk.f32.gmra.mxu2 %vm312_vm2, %v11781_v42  ;;  %v11784_v42 = vld [vmem:[%s11932_s19 + $0xf0] sm:$0xff] }
 0x5d4   : > { %11244 = vmatmul.msk.f32.gmra.mxu3 %vm312_vm2, %v11782_v11  ;;  %v11785_v11 = vld [vmem:[%s11932_s19 + $0x110] sm:$0xff] }
 0x5d8   : > { %v16793_v36 = vpop.f32.mrf.mxu1 }
 0x5d9   : > { %21219 = vst [vmem:[#allocation543_spill] sm:$0xff] %v16793_v36  ;;  %v6463_v62 = vpop.f32.mrf.mxu2  ;;  %v6492_v0 = vpop.f32.mrf.mxu3 }
 0x5da   : > { %v16804_v41 = vadd.f32 %v6463_v62, %v16211_v33  ;;  %v16807_v36 = vadd.f32 %v6492_v0, %v16214_v50  ;;  %v16809_v5 = vpop.f32.mrf.mxu0  ;;  %11230 = vmatmul.msk.f32.gmra.mxu0 %vm312_vm2, %v11783_v43  ;;  %11235 = vmatmul.msk.f32.gmra.mxu1 %vm312_vm2, %v11784_v42  ;;  %v11786_v33 = vld [vmem:[%s11932_s19 + $0x130] sm:$0xff]  ;;  %v11787_v42 = vld [vmem:[%s11932_s19 + $0xd8] sm:$0x3f] }
 0x5db   : > { %21220 = vst [vmem:[#allocation544_spill] sm:$0xff] %v16809_v5  ;;  %11240 = vmatmul.msk.f32.gmra.mxu2 %vm312_vm2, %v11785_v11  ;;  %v11788_v11 = vld [vmem:[%s11932_s19 + $0xf8] sm:$0x3f] }
 0x5dc   : > { %11245 = vmatmul.msk.f32.gmra.mxu3 %vm312_vm2, %v11786_v33  ;;  %v11789_v33 = vld [vmem:[%s11932_s19 + $0x118] sm:$0x3f] }
 0x5e0   : > { %v16811_v32 = vpop.f32.mrf.mxu1 }
 0x5e1   : > { %21221 = vst [vmem:[#allocation545_spill] sm:$0xff] %v16811_v32  ;;  %v6466_v50 = vpop.f32.mrf.mxu2  ;;  %v6495_v62 = vpop.f32.mrf.mxu3 }
 0x5e2   : > { %v16822_v0 = vadd.f32 %v6466_v50, %v16229_v3  ;;  %v16825_v32 = vadd.f32 %v6495_v62, %v16232_v60  ;;  %v16827_v43 = vpop.f32.mrf.mxu0  ;;  %11231 = vmatmul.msk.f32.gmra.mxu0 %vm312_vm2, %v11787_v42  ;;  %11236 = vmatmul.msk.f32.gmra.mxu1 %vm312_vm2, %v11788_v11  ;;  %v11790_v3 = vld [vmem:[%s11932_s19 + $0x138] sm:$0x3f]  ;;  %v11791_v11 = vld [vmem:[%s11932_s19 + $0x140] sm:$0xff] }
 0x5e3   : > { %21222 = vst [vmem:[#allocation546_spill] sm:$0xff] %v16827_v43  ;;  %11241 = vmatmul.msk.f32.gmra.mxu2 %vm312_vm2, %v11789_v33  ;;  %v11792_v33 = vld [vmem:[%s11932_s19 + $0x160] sm:$0xff] }
 0x5e4   : > { %11246 = vmatmul.msk.f32.gmra.mxu3 %vm312_vm2, %v11790_v3 }
 0x5e8   : > { %v16829_v5 = vpop.f32.mrf.mxu1 }
 0x5e9   : > { %21223 = vst [vmem:[#allocation547_spill] sm:$0xff] %v16829_v5  ;;  %v6469_v60 = vpop.f32.mrf.mxu2  ;;  %v6498_v50 = vpop.f32.mrf.mxu3 }
 0x5ea   : > { %v16840_v62 = vadd.f32 %v6469_v60, %v16247_v28  ;;  %v16843_v5 = vadd.f32 %v6498_v50, %v16250_v52  ;;  %v16845_v42 = vpop.f32.mrf.mxu0  ;;  %11248 = vmatmul.msk.f32.vlgmr.msra.gmra.mxu0 %vm312_vm2, %v11791_v11  ;;  %11253 = vmatmul.msk.f32.vlgmr.msra.gmra.mxu1 %vm312_vm2, %v11792_v33  ;;  %v11793_v28 = vld [vmem:[%s11932_s19 + $0x180] sm:$0xff] }
 0x5eb   : > { %21224 = vst [vmem:[#allocation548_spill] sm:$0xff] %v16845_v42  ;;  %11287 = vmatpush.msk.msra.mxu0 %vm321_vm0, %v16507_v53  ;;  %11258 = vmatmul.msk.f32.vlgmr.msra.gmra.mxu2 %vm312_vm2, %v11793_v28  ;;  %v11794_v52 = vld [vmem:[%s11932_s19 + $0x1a0] sm:$0xff]  ;;  %v11797_v42 = vld [vmem:[%s11932_s19 + $0x188] sm:$0xff] }
 0x5ec   : > { %11263 = vmatmul.msk.f32.vlgmr.msra.gmra.mxu3 %vm312_vm2, %v11794_v52  ;;  %11297 = vmatpush.msk.msra.mxu2 %vm321_vm0, %v16507_v53  ;;  %v11795_v52 = vld [vmem:[%s11932_s19 + $0x148] sm:$0xff] }
 0x5ed   : > { %11302 = vmatpush.msk.msra.mxu3 %vm321_vm0, %v16507_v53  ;;  %11292 = vmatpush.msk.msra.mxu1 %vm321_vm0, %v16507_v53 }
 0x5f0   : > { %v16847_v43 = vpop.f32.mrf.mxu1 }
 0x5f1   : > { %21225 = vst [vmem:[#allocation549_spill] sm:$0xff] %v16847_v43  ;;  %v6576_v3 = vpop.f32.mrf.mxu2  ;;  %v6605_v60 = vpop.f32.mrf.mxu3  ;;  %v11796_v43 = vld [vmem:[%s11932_s19 + $0x168] sm:$0xff] }
 0x5f2   : > { %v16866_v50 = vadd.f32 %v6576_v3, %v16273_v12  ;;  %v16869_v11 = vadd.f32 %v6605_v60, %v16276_v39  ;;  %v16871_v33 = vpop.f32.mrf.mxu0  ;;  %11249 = vmatmul.msk.f32.gmra.mxu0 %vm312_vm2, %v11795_v52  ;;  %11254 = vmatmul.msk.f32.gmra.mxu1 %vm312_vm2, %v11796_v43  ;;  %v11798_v12 = vld [vmem:[%s11932_s19 + $0x1a8] sm:$0xff]  ;;  %v11799_v43 = vld [vmem:[%s11932_s19 + $0x150] sm:$0xff] }
 0x5f3   : > { %21226 = vst [vmem:[#allocation550_spill] sm:$0xff] %v16871_v33  ;;  %11259 = vmatmul.msk.f32.gmra.mxu2 %vm312_vm2, %v11797_v42  ;;  %v11800_v42 = vld [vmem:[%s11932_s19 + $0x170] sm:$0xff] }
 0x5f4   : > { %11264 = vmatmul.msk.f32.gmra.mxu3 %vm312_vm2, %v11798_v12  ;;  %v11801_v12 = vld [vmem:[%s11932_s19 + $0x190] sm:$0xff] }
 0x5f8   : > { %v16873_v28 = vpop.f32.mrf.mxu1 }
 0x5f9   : > { %21227 = vst [vmem:[#allocation551_spill] sm:$0xff] %v16873_v28  ;;  %v6579_v39 = vpop.f32.mrf.mxu2  ;;  %v6608_v3 = vpop.f32.mrf.mxu3 }
 0x5fa   : > { %v16884_v60 = vadd.f32 %v6579_v39, %v16291_v45  ;;  %v16887_v28 = vadd.f32 %v6608_v3, %v16294_v59  ;;  %v16889_v52 = vpop.f32.mrf.mxu0  ;;  %11250 = vmatmul.msk.f32.gmra.mxu0 %vm312_vm2, %v11799_v43  ;;  %11255 = vmatmul.msk.f32.gmra.mxu1 %vm312_vm2, %v11800_v42  ;;  %v11802_v45 = vld [vmem:[%s11932_s19 + $0x1b0] sm:$0xff]  ;;  %v11803_v42 = vld [vmem:[%s11932_s19 + $0x158] sm:$0x3f] }
 0x5fb   : > { %21228 = vst [vmem:[#allocation552_spill] sm:$0xff] %v16889_v52  ;;  %11260 = vmatmul.msk.f32.gmra.mxu2 %vm312_vm2, %v11801_v12  ;;  %v11804_v12 = vld [vmem:[%s11932_s19 + $0x178] sm:$0x3f] }
 0x5fc   : > { %11265 = vmatmul.msk.f32.gmra.mxu3 %vm312_vm2, %v11802_v45  ;;  %v11805_v45 = vld [vmem:[%s11932_s19 + $0x198] sm:$0x3f] }
 0x600   : > { %v16891_v33 = vpop.f32.mrf.mxu1 }
 0x601   : > { %21229 = vst [vmem:[#allocation553_spill] sm:$0xff] %v16891_v33  ;;  %v6582_v59 = vpop.f32.mrf.mxu2  ;;  %v6611_v39 = vpop.f32.mrf.mxu3 }
 0x602   : > { %v16902_v3 = vadd.f32 %v6582_v59, %v16309_v14  ;;  %v16905_v33 = vadd.f32 %v6611_v39, %v16312_v40  ;;  %v16907_v43 = vpop.f32.mrf.mxu0  ;;  %11251 = vmatmul.msk.f32.gmra.mxu0 %vm312_vm2, %v11803_v42  ;;  %11256 = vmatmul.msk.f32.gmra.mxu1 %vm312_vm2, %v11804_v12  ;;  %v11806_v14 = vld [vmem:[%s11932_s19 + $0x1b8] sm:$0x3f]  ;;  %v21232_v39 = vld [vmem:[#allocation479_spill] sm:$0xff] }
 0x603   : > { %21230 = vst [vmem:[#allocation554_spill] sm:$0xff] %v16907_v43  ;;  %11261 = vmatmul.msk.f32.gmra.mxu2 %vm312_vm2, %v11805_v45  ;;  %v11807_v12 = vld [vmem:[%s11932_s19 + $0x1c0] sm:$0xff] }
 0x604   : > { %11266 = vmatmul.msk.f32.gmra.mxu3 %vm312_vm2, %v11806_v14  ;;  %v11808_v45 = vld [vmem:[%s11932_s19 + $0x1e0] sm:$0xff] }
 0x605   : > { %v11809_v14 = vld [vmem:[%s11932_s19 + $0x200] sm:$0xff] }
 0x608   : > { %v16909_v52 = vpop.f32.mrf.mxu1 }
 0x609   : > { %21231 = vst [vmem:[#allocation555_spill] sm:$0xff] %v16909_v52  ;;  %v6585_v40 = vpop.f32.mrf.mxu2  ;;  %v6614_v59 = vpop.f32.mrf.mxu3  ;;  %v21233_v52 = vld [vmem:[#allocation481_spill] sm:$0xff] }
 0x60a   : > { %v16920_v43 = vadd.f32 %v6585_v40, %v21232_v39  ;;  %v16923_v44 = vadd.f32 %v6614_v59, %v21233_v52  ;;  %v16925_v42 = vpop.f32.mrf.mxu0  ;;  %11268 = vmatmul.msk.f32.vlgmr.msrb.gmra.mxu0 %vm312_vm2, %v11807_v12  ;;  %11273 = vmatmul.msk.f32.vlgmr.msrb.gmra.mxu1 %vm312_vm2, %v11808_v45  ;;  %v11810_v52 = vld [vmem:[%s11932_s19 + $0x220] sm:$0xff]  ;;  %v21236_v12 = vld [vmem:[#allocation488_spill] sm:$0xff] }
 0x60b   : > { %21234 = vst [vmem:[#allocation479_spill] sm:$0xff] %v16925_v42  ;;  %11307 = vmatpush.msk.msrb.mxu0 %vm321_vm0, %v16507_v53  ;;  %11278 = vmatmul.msk.f32.vlgmr.msrb.gmra.mxu2 %vm312_vm2, %v11809_v14  ;;  %v11812_v42 = vld [vmem:[%s11932_s19 + $0x1e8] sm:$0xff] }
 0x60c   : > { %11283 = vmatmul.msk.f32.vlgmr.msrb.gmra.mxu3 %vm312_vm2, %v11810_v52  ;;  %11317 = vmatpush.msk.msrb.mxu2 %vm321_vm0, %v16507_v53 }
 0x60d   : > { %11322 = vmatpush.msk.msrb.mxu3 %vm321_vm0, %v16507_v53  ;;  %11312 = vmatpush.msk.msrb.mxu1 %vm321_vm0, %v16507_v53 }
 0x610   : > { %v16927_v47 = vpop.f32.mrf.mxu1 }
 0x611   : > { %21235 = vst [vmem:[#allocation481_spill] sm:$0xff] %v16927_v47  ;;  %v6692_v40 = vpop.f32.mrf.mxu2  ;;  %v6736_v59 = vpop.f32.mrf.mxu3  ;;  %v11811_v47 = vld [vmem:[%s11932_s19 + $0x1c8] sm:$0xff] }
 0x612   : > { %v16946_v39 = vadd.f32 %v6692_v40, %v16353_v22  ;;  %v16949_v45 = vadd.f32 %v6736_v59, %v21236_v12  ;;  %v16951_v14 = vpop.f32.mrf.mxu0  ;;  %11269 = vmatmul.msk.f32.gmra.mxu0 %vm312_vm2, %v11811_v47  ;;  %11274 = vmatmul.msk.f32.gmra.mxu1 %vm312_vm2, %v11812_v42  ;;  %v11814_v22 = vld [vmem:[%s11932_s19 + $0x228] sm:$0xff]  ;;  %v11815_v42 = vld [vmem:[%s11932_s19 + $0x1d0] sm:$0xff] }
 0x613   : > { %21237 = vst [vmem:[#allocation488_spill] sm:$0xff] %v16951_v14  ;;  %11279 = vmatmul.msk.f32.gmra.mxu2 %vm312_vm2, %v11813_v26  ;;  %v11816_v26 = vld [vmem:[%s11932_s19 + $0x1f0] sm:$0xff] }
 0x614   : > { %11284 = vmatmul.msk.f32.gmra.mxu3 %vm312_vm2, %v11814_v22  ;;  %v11817_v22 = vld [vmem:[%s11932_s19 + $0x210] sm:$0xff] }
 0x618   : > { %v16953_v52 = vpop.f32.mrf.mxu1 }
 0x619   : > { %21238 = vst [vmem:[#allocation556_spill] sm:$0xff] %v16953_v52  ;;  %v6695_v40 = vpop.f32.mrf.mxu2  ;;  %v6739_v59 = vpop.f32.mrf.mxu3 }
 0x61a   : > { %v16964_v12 = vadd.f32 %v6695_v40, %v16371_v63  ;;  %v16967_v52 = vadd.f32 %v6739_v59, %v16374_v7  ;;  %v16969_v47 = vpop.f32.mrf.mxu0  ;;  %11270 = vmatmul.msk.f32.gmra.mxu0 %vm312_vm2, %v11815_v42  ;;  %11275 = vmatmul.msk.f32.gmra.mxu1 %vm312_vm2, %v11816_v26  ;;  %v11818_v63 = vld [vmem:[%s11932_s19 + $0x230] sm:$0xff]  ;;  %v11819_v26 = vld [vmem:[%s11932_s19 + $0x1d8] sm:$0x3f] }
 0x61b   : > { %21239 = vst [vmem:[#allocation557_spill] sm:$0xff] %v16969_v47  ;;  %11280 = vmatmul.msk.f32.gmra.mxu2 %vm312_vm2, %v11817_v22  ;;  %v11820_v22 = vld [vmem:[%s11932_s19 + $0x1f8] sm:$0x3f] }
 0x61c   : > { %11285 = vmatmul.msk.f32.gmra.mxu3 %vm312_vm2, %v11818_v63  ;;  %v11821_v63 = vld [vmem:[%s11932_s19 + $0x218] sm:$0x3f] }
 0x620   : > { %v16971_v14 = vpop.f32.mrf.mxu1 }
 0x621   : > { %21240 = vst [vmem:[#allocation558_spill] sm:$0xff] %v16971_v14  ;;  %v6698_v7 = vpop.f32.mrf.mxu2  ;;  %v6742_v40 = vpop.f32.mrf.mxu3 }
 0x622   : > { %v16982_v59 = vadd.f32 %v6698_v7, %v16389_v57  ;;  %v16985_v14 = vadd.f32 %v6742_v40, %v16392_v56  ;;  %v16987_v42 = vpop.f32.mrf.mxu0  ;;  %11271 = vmatmul.msk.f32.gmra.mxu0 %vm312_vm2, %v11819_v26  ;;  %11276 = vmatmul.msk.f32.gmra.mxu1 %vm312_vm2, %v11820_v22  ;;  %v11822_v57 = vld [vmem:[%s11932_s19 + $0x238] sm:$0x3f]  ;;  %v11823_v22 = vld [vmem:[%s11932_s19 + $0x240] sm:$0xff] }
 0x623   : > { %21241 = vst [vmem:[#allocation559_spill] sm:$0xff] %v16987_v42  ;;  %11281 = vmatmul.msk.f32.gmra.mxu2 %vm312_vm2, %v11821_v63  ;;  %v11824_v63 = vld [vmem:[%s11932_s19 + $0x260] sm:$0xff] }
 0x624   : > { %11286 = vmatmul.msk.f32.gmra.mxu3 %vm312_vm2, %v11822_v57 }
 0x628   : > { %v16989_v47 = vpop.f32.mrf.mxu1 }
 0x629   : > { %21242 = vst [vmem:[#allocation560_spill] sm:$0xff] %v16989_v47  ;;  %v6701_v56 = vpop.f32.mrf.mxu2  ;;  %v6745_v7 = vpop.f32.mrf.mxu3 }
 0x62a   : > { %v17000_v40 = vadd.f32 %v6701_v56, %v16407_v8  ;;  %v17003_v47 = vadd.f32 %v6745_v7, %v16410_v49  ;;  %v17005_v26 = vpop.f32.mrf.mxu0  ;;  %11288 = vmatmul.msk.f32.vlgmr.msra.gmra.mxu0 %vm312_vm2, %v11823_v22  ;;  %11293 = vmatmul.msk.f32.vlgmr.msra.gmra.mxu1 %vm312_vm2, %v11824_v63  ;;  %v11825_v8 = vld [vmem:[%s11932_s19 + $0x280] sm:$0xff] }
 0x62b   : > { %21243 = vst [vmem:[#allocation561_spill] sm:$0xff] %v17005_v26  ;;  %11327 = vmatpush.msk.msra.mxu0 %vm321_vm0, %v16507_v53  ;;  %11298 = vmatmul.msk.f32.vlgmr.msra.gmra.mxu2 %vm312_vm2, %v11825_v8  ;;  %v11826_v49 = vld [vmem:[%s11932_s19 + $0x2a0] sm:$0xff] }
 0x62c   : > { %11303 = vmatmul.msk.f32.vlgmr.msra.gmra.mxu3 %vm312_vm2, %v11826_v49  ;;  %11337 = vmatpush.msk.msra.mxu2 %vm321_vm0, %v16507_v53  ;;  %v11827_v49 = vld [vmem:[%s11932_s19 + $0x248] sm:$0xff]  ;;  %v11840_v26 = vld [vmem:[%s11932_s19 + $0x2e0] sm:$0xff] }
 0x62d   : > { %11342 = vmatpush.msk.msra.mxu3 %vm321_vm0, %v16507_v53  ;;  %11332 = vmatpush.msk.msra.mxu1 %vm321_vm0, %v16507_v53  ;;  %v11829_v53 = vld [vmem:[%s11932_s19 + $0x288] sm:$0xff] }
 0x630   : > { %v17007_v42 = vpop.f32.mrf.mxu1 }
 0x631   : > { %21244 = vst [vmem:[#allocation562_spill] sm:$0xff] %v17007_v42  ;;  %v6938_v57 = vpop.f32.mrf.mxu2  ;;  %v6967_v56 = vpop.f32.mrf.mxu3  ;;  %v11828_v42 = vld [vmem:[%s11932_s19 + $0x268] sm:$0xff] }
 0x632   : > { %v17026_v7 = vadd.f32 %v6938_v57, %v16433_v51  ;;  %v17029_v22 = vadd.f32 %v6967_v56, %v16436_v54  ;;  %v17031_v63 = vpop.f32.mrf.mxu0  ;;  %11289 = vmatmul.msk.f32.gmra.mxu0 %vm312_vm2, %v11827_v49  ;;  %11294 = vmatmul.msk.f32.gmra.mxu1 %vm312_vm2, %v11828_v42  ;;  %v11830_v51 = vld [vmem:[%s11932_s19 + $0x2a8] sm:$0xff]  ;;  %v11831_v42 = vld [vmem:[%s11932_s19 + $0x250] sm:$0xff] }
 0x633   : > { %21245 = vst [vmem:[#allocation563_spill] sm:$0xff] %v17031_v63  ;;  %11299 = vmatmul.msk.f32.gmra.mxu2 %vm312_vm2, %v11829_v53  ;;  %v11832_v53 = vld [vmem:[%s11932_s19 + $0x270] sm:$0xff] }
 0x634   : > { %11304 = vmatmul.msk.f32.gmra.mxu3 %vm312_vm2, %v11830_v51  ;;  %v11833_v51 = vld [vmem:[%s11932_s19 + $0x290] sm:$0xff] }
 0x638   : > { %v17033_v8 = vpop.f32.mrf.mxu1 }
 0x639   : > { %21246 = vst [vmem:[#allocation564_spill] sm:$0xff] %v17033_v8  ;;  %v6941_v54 = vpop.f32.mrf.mxu2  ;;  %v6970_v57 = vpop.f32.mrf.mxu3 }
 0x63a   : > { %v17044_v56 = vadd.f32 %v6941_v54, %v16451_v21  ;;  %v17047_v8 = vadd.f32 %v6970_v57, %v16454_v9  ;;  %v17049_v49 = vpop.f32.mrf.mxu0  ;;  %11290 = vmatmul.msk.f32.gmra.mxu0 %vm312_vm2, %v11831_v42  ;;  %11295 = vmatmul.msk.f32.gmra.mxu1 %vm312_vm2, %v11832_v53  ;;  %v11834_v21 = vld [vmem:[%s11932_s19 + $0x2b0] sm:$0xff]  ;;  %v11835_v53 = vld [vmem:[%s11932_s19 + $0x258] sm:$0x3f] }
 0x63b   : > { %21247 = vst [vmem:[#allocation565_spill] sm:$0xff] %v17049_v49  ;;  %11300 = vmatmul.msk.f32.gmra.mxu2 %vm312_vm2, %v11833_v51  ;;  %v11836_v51 = vld [vmem:[%s11932_s19 + $0x278] sm:$0x3f] }
 0x63c   : > { %11305 = vmatmul.msk.f32.gmra.mxu3 %vm312_vm2, %v11834_v21  ;;  %v11837_v21 = vld [vmem:[%s11932_s19 + $0x298] sm:$0x3f] }
 0x640   : > { %v17051_v63 = vpop.f32.mrf.mxu1 }
 0x641   : > { %21248 = vst [vmem:[#allocation566_spill] sm:$0xff] %v17051_v63  ;;  %v6944_v9 = vpop.f32.mrf.mxu2  ;;  %v6973_v54 = vpop.f32.mrf.mxu3 }
 0x642   : > { %v17062_v57 = vadd.f32 %v6944_v9, %v16469_v15  ;;  %v17065_v63 = vadd.f32 %v6973_v54, %v16472_v48  ;;  %v17067_v42 = vpop.f32.mrf.mxu0  ;;  %11291 = vmatmul.msk.f32.gmra.mxu0 %vm312_vm2, %v11835_v53  ;;  %11296 = vmatmul.msk.f32.gmra.mxu1 %vm312_vm2, %v11836_v51  ;;  %v11838_v15 = vld [vmem:[%s11932_s19 + $0x2b8] sm:$0x3f]  ;;  %v11839_v51 = vld [vmem:[%s11932_s19 + $0x2c0] sm:$0xff] }
 0x643   : > { %21249 = vst [vmem:[#allocation567_spill] sm:$0xff] %v17067_v42  ;;  %11301 = vmatmul.msk.f32.gmra.mxu2 %vm312_vm2, %v11837_v21  ;;  %v11841_v21 = vld [vmem:[%s11932_s19 + $0x300] sm:$0xff] }
 0x644   : > { %11306 = vmatmul.msk.f32.gmra.mxu3 %vm312_vm2, %v11838_v15 }
 0x648   : > { %v17069_v49 = vpop.f32.mrf.mxu1 }
 0x649   : > { %21250 = vst [vmem:[#allocation568_spill] sm:$0xff] %v17069_v49  ;;  %v6947_v48 = vpop.f32.mrf.mxu2  ;;  %v6976_v9 = vpop.f32.mrf.mxu3 }
 0x64a   : > { %v17080_v54 = vadd.f32 %v6947_v48, %v16487_v27  ;;  %v17083_v49 = vadd.f32 %v6976_v9, %v16490_v17  ;;  %v17085_v53 = vpop.f32.mrf.mxu0  ;;  %11308 = vmatmul.msk.f32.vlgmr.msrb.gmra.mxu0 %vm312_vm2, %v11839_v51  ;;  %11313 = vmatmul.msk.f32.vlgmr.msrb.gmra.mxu1 %vm312_vm2, %v11840_v26  ;;  %v11842_v27 = vld [vmem:[%s11932_s19 + $0x320] sm:$0xff]  ;;  %v17100_v17 = vld [vmem:[%s19372_s1 + $0x1c] sm:$0x7] }
 0x64b   : > { %21251 = vst [vmem:[#allocation569_spill] sm:$0xff] %v17085_v53  ;;  %11318 = vmatmul.msk.f32.vlgmr.msrb.gmra.mxu2 %vm312_vm2, %v11841_v21  ;;  %11347 = vmatpush.msk.msrb.mxu0 %vm321_vm0, %v17100_v17  ;;  %v11845_v53 = vld [vmem:[%s11932_s19 + $0x308] sm:$0xff] }
 0x64c   : > { %11323 = vmatmul.msk.f32.vlgmr.msrb.gmra.mxu3 %vm312_vm2, %v11842_v27  ;;  %11357 = vmatpush.msk.msrb.mxu2 %vm321_vm0, %v17100_v17  ;;  %v11843_v27 = vld [vmem:[%s11932_s19 + $0x2c8] sm:$0xff] }
 0x64d   : > { %11362 = vmatpush.msk.msrb.mxu3 %vm321_vm0, %v17100_v17  ;;  %11352 = vmatpush.msk.msrb.mxu1 %vm321_vm0, %v17100_v17 }
 0x650   : > { %v17087_v42 = vpop.f32.mrf.mxu1 }
 0x651   : > { %21252 = vst [vmem:[#allocation570_spill] sm:$0xff] %v17087_v42  ;;  %v7054_v26 = vpop.f32.mrf.mxu2  ;;  %v7083_v15 = vpop.f32.mrf.mxu3  ;;  %v11844_v42 = vld [vmem:[%s11932_s19 + $0x2e8] sm:$0xff] }
 0x652   : > { %v17111_v48 = vadd.f32 %v7054_v26, %v16518_v61  ;;  %v17114_v9 = vadd.f32 %v7083_v15, %v16521_v19  ;;  %v17116_v51 = vpop.f32.mrf.mxu0  ;;  %11309 = vmatmul.msk.f32.gmra.mxu0 %vm312_vm2, %v11843_v27  ;;  %11314 = vmatmul.msk.f32.gmra.mxu1 %vm312_vm2, %v11844_v42  ;;  %v11846_v61 = vld [vmem:[%s11932_s19 + $0x328] sm:$0xff]  ;;  %v11847_v42 = vld [vmem:[%s11932_s19 + $0x2d0] sm:$0xff] }
 0x653   : > { %21253 = vst [vmem:[#allocation571_spill] sm:$0xff] %v17116_v51  ;;  %11319 = vmatmul.msk.f32.gmra.mxu2 %vm312_vm2, %v11845_v53  ;;  %v11848_v53 = vld [vmem:[%s11932_s19 + $0x2f0] sm:$0xff] }
 0x654   : > { %11324 = vmatmul.msk.f32.gmra.mxu3 %vm312_vm2, %v11846_v61  ;;  %v11849_v61 = vld [vmem:[%s11932_s19 + $0x310] sm:$0xff] }
 0x658   : > { %v17118_v21 = vpop.f32.mrf.mxu1 }
 0x659   : > { %21254 = vst [vmem:[#allocation572_spill] sm:$0xff] %v17118_v21  ;;  %v7057_v19 = vpop.f32.mrf.mxu2  ;;  %v7086_v26 = vpop.f32.mrf.mxu3 }
 0x65a   : > { %v17129_v15 = vadd.f32 %v7057_v19, %v16536_v10  ;;  %v17132_v21 = vadd.f32 %v7086_v26, %v16539_v58  ;;  %v17134_v27 = vpop.f32.mrf.mxu0  ;;  %11310 = vmatmul.msk.f32.gmra.mxu0 %vm312_vm2, %v11847_v42  ;;  %11315 = vmatmul.msk.f32.gmra.mxu1 %vm312_vm2, %v11848_v53  ;;  %v11850_v10 = vld [vmem:[%s11932_s19 + $0x330] sm:$0xff]  ;;  %v21259_v26 = vld [vmem:[#allocation360_spill] sm:$0xff]  ;;  %v11851_v53 = vld [vmem:[%s11932_s19 + $0x2d8] sm:$0x3f] }
 0x65b   : > { %21257 = vst [vmem:[#allocation575_spill] sm:$0xff] %v17134_v27  ;;  %11320 = vmatmul.msk.f32.gmra.mxu2 %vm312_vm2, %v11849_v61  ;;  %v11852_v61 = vld [vmem:[%s11932_s19 + $0x2f8] sm:$0x3f] }
 0x65c   : > { %21255 = vst [vmem:[#allocation573_spill] sm:$0xff] %v17129_v15  ;;  %11325 = vmatmul.msk.f32.gmra.mxu3 %vm312_vm2, %v11850_v10  ;;  %v11853_v10 = vld [vmem:[%s11932_s19 + $0x318] sm:$0x3f] }
 0x65d   : > { %21256 = vst [vmem:[#allocation574_spill] sm:$0xff] %v17132_v21 }
 0x660   : > { %v17136_v51 = vpop.f32.mrf.mxu1 }
 0x661   : > { %21258 = vst [vmem:[#allocation576_spill] sm:$0xff] %v17136_v51  ;;  %v7060_v58 = vpop.f32.mrf.mxu2  ;;  %v7089_v19 = vpop.f32.mrf.mxu3  ;;  %v21260_v51 = vld [vmem:[#allocation406_spill] sm:$0xff] }
 0x662   : > { %v17147_v27 = vadd.f32 %v7060_v58, %v21259_v26  ;;  %v17150_v21 = vadd.f32 %v7089_v19, %v21260_v51  ;;  %v17152_v42 = vpop.f32.mrf.mxu0  ;;  %11311 = vmatmul.msk.f32.gmra.mxu0 %vm312_vm2, %v11851_v53  ;;  %11316 = vmatmul.msk.f32.gmra.mxu1 %vm312_vm2, %v11852_v61  ;;  %v11854_v58 = vld [vmem:[%s11932_s19 + $0x338] sm:$0x3f]  ;;  %v11855_v61 = vld [vmem:[%s11932_s19 + $0x340] sm:$0xff] }
 0x663   : > { %21262 = vst [vmem:[#allocation406_spill] sm:$0xff] %v17152_v42  ;;  %11321 = vmatmul.msk.f32.gmra.mxu2 %vm312_vm2, %v11853_v10  ;;  %v11856_v10 = vld [vmem:[%s11932_s19 + $0x360] sm:$0xff] }
 0x664   : > { %21261 = vst [vmem:[#allocation360_spill] sm:$0xff] %v17150_v21  ;;  %11326 = vmatmul.msk.f32.gmra.mxu3 %vm312_vm2, %v11854_v58  ;;  %v17175_v21 = vld [vmem:[%s11932_s19 + $0x3a0] sm:$0xff] }
 0x668   : > { %v17154_v15 = vpop.f32.mrf.mxu1 }
 0x669   : > { %21263 = vst [vmem:[#allocation577_spill] sm:$0xff] %v17154_v15  ;;  %v7063_v51 = vpop.f32.mrf.mxu2  ;;  %v7092_v19 = vpop.f32.mrf.mxu3 }
 0x66a   : > { %v17165_v26 = vadd.f32 %v7063_v51, %v16580_v16  ;;  %v17168_v15 = vadd.f32 %v7092_v19, %v16583_v23  ;;  %v17170_v42 = vpop.f32.mrf.mxu0  ;;  %11328 = vmatmul.msk.f32.vlgmr.msra.gmra.mxu0 %vm312_vm2, %v11855_v61  ;;  %11333 = vmatmul.msk.f32.vlgmr.msra.gmra.mxu1 %vm312_vm2, %v11856_v10  ;;  %v21266_v23 = vld [vmem:[#allocation516_spill] sm:$0xff] }
 0x66b   : > { %21264 = vst [vmem:[#allocation578_spill] sm:$0xff] %v17170_v42  ;;  %11367 = vmatpush.msk.msra.mxu0 %vm321_vm0, %v17100_v17  ;;  %11338 = vmatmul.msk.f32.vlgmr.msra.gmra.mxu2 %vm312_vm2, %v21266_v23  ;;  %v17204_v23 = vld [vmem:[%s11932_s19 + $0x3a8] sm:$0xff] }
 0x66c   : > { %11343 = vmatmul.msk.f32.vlgmr.msra.gmra.mxu3 %vm312_vm2, %v17175_v21  ;;  %11377 = vmatpush.msk.msra.mxu2 %vm321_vm0, %v17100_v17  ;;  %v11858_v42 = vld [vmem:[%s11932_s19 + $0x368] sm:$0xff] }
 0x66d   : > { %11382 = vmatpush.msk.msra.mxu3 %vm321_vm0, %v17100_v17  ;;  %11372 = vmatpush.msk.msra.mxu1 %vm321_vm0, %v17100_v17 }
 0x670   : > { %v17172_v53 = vpop.f32.mrf.mxu1 }
 0x671   : > { %21265 = vst [vmem:[#allocation579_spill] sm:$0xff] %v17172_v53  ;;  %v7170_v16 = vpop.f32.mrf.mxu2  ;;  %v7199_v58 = vpop.f32.mrf.mxu3  ;;  %v11857_v53 = vld [vmem:[%s11932_s19 + $0x348] sm:$0xff] }
 0x672   : > { %v17194_v51 = vadd.f32 %v7170_v16, %v16613_v29  ;;  %v17197_v19 = vadd.f32 %v7199_v58, %v16616_v4  ;;  %v17199_v61 = vpop.f32.mrf.mxu0  ;;  %11329 = vmatmul.msk.f32.gmra.mxu0 %vm312_vm2, %v11857_v53  ;;  %11334 = vmatmul.msk.f32.gmra.mxu1 %vm312_vm2, %v11858_v42  ;;  %v21270_v29 = vld [vmem:[#allocation517_spill] sm:$0xff] }
 0x673   : > { %21268 = vst [vmem:[#allocation580_spill] sm:$0xff] %v17199_v61  ;;  %11339 = vmatmul.msk.f32.gmra.mxu2 %vm312_vm2, %v21270_v29  ;;  %v17225_v42 = vld [vmem:[%s11932_s19 + $0x3b0] sm:$0xff] }
 0x674   : > { %21267 = vst [vmem:[#allocation516_spill] sm:$0xff] %v17197_v19  ;;  %11344 = vmatmul.msk.f32.gmra.mxu3 %vm312_vm2, %v17204_v23  ;;  %v11859_v29 = vld [vmem:[%s11932_s19 + $0x350] sm:$0xff] }
 0x675   : > { %v11860_v19 = vld [vmem:[%s11932_s19 + $0x370] sm:$0xff] }
 0x678   : > { %v17201_v10 = vpop.f32.mrf.mxu1 }
 0x679   : > { %21269 = vst [vmem:[#allocation581_spill] sm:$0xff] %v17201_v10  ;;  %v7173_v4 = vpop.f32.mrf.mxu2  ;;  %v7202_v16 = vpop.f32.mrf.mxu3 }
 0x67a   : > { %v17215_v58 = vadd.f32 %v7173_v4, %v16640_v18  ;;  %v17218_v10 = vadd.f32 %v7202_v16, %v16643_v37  ;;  %v17220_v61 = vpop.f32.mrf.mxu0  ;;  %11330 = vmatmul.msk.f32.gmra.mxu0 %vm312_vm2, %v11859_v29  ;;  %11335 = vmatmul.msk.f32.gmra.mxu1 %vm312_vm2, %v11860_v19  ;;  %v21275_v18 = vld [vmem:[#allocation521_spill] sm:$0xff]  ;;  %v11861_v19 = vld [vmem:[%s11932_s19 + $0x358] sm:$0x3f] }
 0x67b   : > { %21273 = vst [vmem:[#allocation583_spill] sm:$0xff] %v17220_v61  ;;  %11340 = vmatmul.msk.f32.gmra.mxu2 %vm312_vm2, %v21275_v18  ;;  %v11862_v18 = vld [vmem:[%s11932_s19 + $0x378] sm:$0x3f] }
 0x67c   : > { %21271 = vst [vmem:[#allocation517_spill] sm:$0xff] %v17215_v58  ;;  %11345 = vmatmul.msk.f32.gmra.mxu3 %vm312_vm2, %v17225_v42  ;;  %v21278_v58 = vld [vmem:[#allocation525_spill] sm:$0xff] }
 0x67d   : > { %21272 = vst [vmem:[#allocation582_spill] sm:$0xff] %v17218_v10  ;;  %v17246_v10 = vld [vmem:[%s11932_s19 + $0x3b8] sm:$0x3f] }
 0x680   : > { %v17222_v53 = vpop.f32.mrf.mxu1 }
 0x681   : > { %21274 = vst [vmem:[#allocation584_spill] sm:$0xff] %v17222_v53  ;;  %v7176_v37 = vpop.f32.mrf.mxu2  ;;  %v7205_v4 = vpop.f32.mrf.mxu3 }
 0x682   : > { %v17236_v16 = vadd.f32 %v7176_v37, %v16662_v1  ;;  %v17239_v53 = vadd.f32 %v7205_v4, %v16665_v2  ;;  %v17241_v61 = vpop.f32.mrf.mxu0  ;;  %11331 = vmatmul.msk.f32.gmra.mxu0 %vm312_vm2, %v11861_v19  ;;  %11336 = vmatmul.msk.f32.gmra.mxu1 %vm312_vm2, %v11862_v18  ;;  %v21283_v18 = vld [vmem:[#allocation5_spill] sm:$0xff] }
 0x683   : > { %21276 = vst [vmem:[#allocation521_spill] sm:$0xff] %v17241_v61  ;;  %11341 = vmatmul.msk.f32.gmra.mxu2 %vm312_vm2, %v21278_v58  ;;  %v21282_v61 = vld [vmem:[#allocation4_spill] sm:$0xff]  ;;  %v21284_v58 = vld [vmem:[#allocation15_spill] sm:$0xff] }
 0x684   : > { %11346 = vmatmul.msk.f32.gmra.mxu3 %vm312_vm2, %v17246_v10 }
 0x688   : > { %v17243_v29 = vpop.f32.mrf.mxu1 }
 0x689   : > { %21277 = vst [vmem:[#allocation585_spill] sm:$0xff] %v17243_v29  ;;  %v7179_v1 = vpop.f32.mrf.mxu2  ;;  %v7208_v2 = vpop.f32.mrf.mxu3 }
 0x68a   : > { %v17257_v37 = vadd.f32 %v7179_v1, %v16680_v24  ;;  %v17260_v4 = vadd.f32 %v7208_v2, %v16683_v55  ;;  %v17262_v29 = vpop.f32.mrf.mxu0  ;;  %11348 = vmatmul.msk.f32.vlgmr.msrb.gmra.mxu0 %vm312_vm2, %v21282_v61  ;;  %11353 = vmatmul.msk.f32.vlgmr.msrb.gmra.mxu1 %vm312_vm2, %v21283_v18  ;;  %v21285_v24 = vld [vmem:[#allocation16_spill] sm:$0xff] }
 0x68b   : > { %21280 = vst [vmem:[#allocation586_spill] sm:$0xff] %v17262_v29  ;;  %11387 = vmatpush.msk.msrb.mxu0 %vm321_vm0, %v17100_v17  ;;  %11358 = vmatmul.msk.f32.vlgmr.msrb.gmra.mxu2 %vm312_vm2, %v21284_v58  ;;  %v21290_v29 = vld [vmem:[#allocation19_spill] sm:$0xff] }
 0x68c   : > { %21279 = vst [vmem:[#allocation525_spill] sm:$0xff] %v17260_v4  ;;  %11363 = vmatmul.msk.f32.vlgmr.msrb.gmra.mxu3 %vm312_vm2, %v21285_v24  ;;  %11397 = vmatpush.msk.msrb.mxu2 %vm321_vm0, %v17100_v17  ;;  %v21288_v24 = vld [vmem:[#allocation7_spill] sm:$0xff]  ;;  %v21291_v4 = vld [vmem:[#allocation20_spill] sm:$0xff] }
 0x68d   : > { %11402 = vmatpush.msk.msrb.mxu3 %vm321_vm0, %v17100_v17  ;;  %11392 = vmatpush.msk.msrb.mxu1 %vm321_vm0, %v17100_v17 }
 0x690   : > { %v17264_v19 = vpop.f32.mrf.mxu1 }
 0x691   : > { %21281 = vst [vmem:[#allocation587_spill] sm:$0xff] %v17264_v19  ;;  %v7286_v55 = vpop.f32.mrf.mxu2  ;;  %v7315_v61 = vpop.f32.mrf.mxu3  ;;  %v21289_v19 = vld [vmem:[#allocation8_spill] sm:$0xff] }
 0x692   : > { %v17283_v1 = vadd.f32 %v7286_v55, %v16706_v6  ;;  %v17286_v2 = vadd.f32 %v7315_v61, %v16709_v25  ;;  %v17288_v18 = vpop.f32.mrf.mxu0  ;;  %11349 = vmatmul.msk.f32.gmra.mxu0 %vm312_vm2, %v21288_v24  ;;  %11354 = vmatmul.msk.f32.gmra.mxu1 %vm312_vm2, %v21289_v19  ;;  %v21295_v19 = vld [vmem:[#allocation14_spill] sm:$0xff] }
 0x693   : > { %21286 = vst [vmem:[#allocation4_spill] sm:$0xff] %v17288_v18  ;;  %11359 = vmatmul.msk.f32.gmra.mxu2 %vm312_vm2, %v21290_v29  ;;  %v21294_v18 = vld [vmem:[#allocation13_spill] sm:$0xff]  ;;  %v21296_v29 = vld [vmem:[#allocation27_spill] sm:$0xff] }
 0x694   : > { %11364 = vmatmul.msk.f32.gmra.mxu3 %vm312_vm2, %v21291_v4  ;;  %v21297_v4 = vld [vmem:[#allocation28_spill] sm:$0xff] }
 0x698   : > { %v17290_v58 = vpop.f32.mrf.mxu1 }
 0x699   : > { %21287 = vst [vmem:[#allocation5_spill] sm:$0xff] %v17290_v58  ;;  %v7289_v6 = vpop.f32.mrf.mxu2  ;;  %v7318_v55 = vpop.f32.mrf.mxu3 }
 0x69a   : > { %v17301_v25 = vadd.f32 %v7289_v6, %v16724_v46  ;;  %v17304_v61 = vadd.f32 %v7318_v55, %v16727_v13  ;;  %v17306_v58 = vpop.f32.mrf.mxu0  ;;  %11350 = vmatmul.msk.f32.gmra.mxu0 %vm312_vm2, %v21294_v18  ;;  %11355 = vmatmul.msk.f32.gmra.mxu1 %vm312_vm2, %v21295_v19  ;;  %v21301_v19 = vld [vmem:[#allocation11_spill] sm:$0xff] }
 0x69b   : > { %21292 = vst [vmem:[#allocation15_spill] sm:$0xff] %v17306_v58  ;;  %11360 = vmatmul.msk.f32.gmra.mxu2 %vm312_vm2, %v21296_v29  ;;  %v21300_v58 = vld [vmem:[#allocation10_spill] sm:$0xff]  ;;  %v21302_v29 = vld [vmem:[#allocation23_spill] sm:$0xff] }
 0x69c   : > { %11365 = vmatmul.msk.f32.gmra.mxu3 %vm312_vm2, %v21297_v4  ;;  %v21303_v4 = vld [vmem:[#allocation24_spill] sm:$0xff] }
 0x6a0   : > { %v17308_v24 = vpop.f32.mrf.mxu1 }
 0x6a1   : > { %21293 = vst [vmem:[#allocation16_spill] sm:$0xff] %v17308_v24  ;;  %v7292_v46 = vpop.f32.mrf.mxu2  ;;  %v7321_v6 = vpop.f32.mrf.mxu3 }
 0x6a2   : > { %v17319_v13 = vadd.f32 %v7292_v46, %v16742_v35  ;;  %v17322_v55 = vadd.f32 %v7321_v6, %v16745_v38  ;;  %v17324_v24 = vpop.f32.mrf.mxu0  ;;  %11351 = vmatmul.msk.f32.gmra.mxu0 %vm312_vm2, %v21300_v58  ;;  %11356 = vmatmul.msk.f32.gmra.mxu1 %vm312_vm2, %v21301_v19  ;;  %v21307_v19 = vld [vmem:[#allocation18_spill] sm:$0xff] }
 0x6a3   : > { %21298 = vst [vmem:[#allocation7_spill] sm:$0xff] %v17324_v24  ;;  %11361 = vmatmul.msk.f32.gmra.mxu2 %vm312_vm2, %v21302_v29  ;;  %v21306_v24 = vld [vmem:[#allocation17_spill] sm:$0xff]  ;;  %v21308_v29 = vld [vmem:[#allocation31_spill] sm:$0xff] }
 0x6a4   : > { %11366 = vmatmul.msk.f32.gmra.mxu3 %vm312_vm2, %v21303_v4 }
 0x6a8   : > { %v17326_v18 = vpop.f32.mrf.mxu1 }
 0x6a9   : > { %21299 = vst [vmem:[#allocation8_spill] sm:$0xff] %v17326_v18  ;;  %v7295_v35 = vpop.f32.mrf.mxu2  ;;  %v7324_v46 = vpop.f32.mrf.mxu3 }
 0x6aa   : > { %v17337_v38 = vadd.f32 %v7295_v35, %v16760_v20  ;;  %v17340_v6 = vadd.f32 %v7324_v46, %v16763_v30  ;;  %v17342_v18 = vpop.f32.mrf.mxu0  ;;  %11368 = vmatmul.msk.f32.vlgmr.msra.gmra.mxu0 %vm312_vm2, %v21306_v24  ;;  %11373 = vmatmul.msk.f32.vlgmr.msra.gmra.mxu1 %vm312_vm2, %v21307_v19  ;;  %v21309_v20 = vld [vmem:[#allocation32_spill] sm:$0xff] }
 0x6ab   : > { %21304 = vst [vmem:[#allocation19_spill] sm:$0xff] %v17342_v18  ;;  %11407 = vmatpush.msk.msra.mxu0 %vm321_vm0, %v17100_v17  ;;  %11378 = vmatmul.msk.f32.vlgmr.msra.gmra.mxu2 %vm312_vm2, %v21308_v29  ;;  %v21312_v29 = vld [vmem:[#allocation21_spill] sm:$0xff]  ;;  %v21315_v18 = vld [vmem:[#allocation36_spill] sm:$0xff] }
 0x6ac   : > { %11383 = vmatmul.msk.f32.vlgmr.msra.gmra.mxu3 %vm312_vm2, %v21309_v20  ;;  %11417 = vmatpush.msk.msra.mxu2 %vm321_vm0, %v17100_v17  ;;  %v21313_v20 = vld [vmem:[#allocation22_spill] sm:$0xff] }
 0x6ad   : > { %11422 = vmatpush.msk.msra.mxu3 %vm321_vm0, %v17100_v17  ;;  %11412 = vmatpush.msk.msra.mxu1 %vm321_vm0, %v17100_v17 }
 0x6b0   : > { %v17344_v58 = vpop.f32.mrf.mxu1 }
 0x6b1   : > { %21305 = vst [vmem:[#allocation20_spill] sm:$0xff] %v17344_v58  ;;  %v7402_v30 = vpop.f32.mrf.mxu2  ;;  %v7431_v24 = vpop.f32.mrf.mxu3  ;;  %v21314_v58 = vld [vmem:[#allocation35_spill] sm:$0xff] }
 0x6b2   : > { %v17363_v4 = vadd.f32 %v7402_v30, %v16786_v34  ;;  %v17366_v35 = vadd.f32 %v7431_v24, %v16789_v31  ;;  %v17368_v46 = vpop.f32.mrf.mxu0  ;;  %11369 = vmatmul.msk.f32.gmra.mxu0 %vm312_vm2, %v21312_v29  ;;  %11374 = vmatmul.msk.f32.gmra.mxu1 %vm312_vm2, %v21313_v20  ;;  %v21319_v20 = vld [vmem:[#allocation30_spill] sm:$0xff] }
 0x6b3   : > { %21310 = vst [vmem:[#allocation13_spill] sm:$0xff] %v17368_v46  ;;  %11379 = vmatmul.msk.f32.gmra.mxu2 %vm312_vm2, %v21314_v58  ;;  %v21318_v46 = vld [vmem:[#allocation29_spill] sm:$0xff] }
 0x6b4   : > { %11384 = vmatmul.msk.f32.gmra.mxu3 %vm312_vm2, %v21315_v18  ;;  %v21320_v58 = vld [vmem:[#allocation45_spill] sm:$0xff]  ;;  %v21321_v18 = vld [vmem:[#allocation46_spill] sm:$0xff] }
 0x6b8   : > { %v17370_v19 = vpop.f32.mrf.mxu1 }
 0x6b9   : > { %21311 = vst [vmem:[#allocation14_spill] sm:$0xff] %v17370_v19  ;;  %v7405_v34 = vpop.f32.mrf.mxu2  ;;  %v7434_v30 = vpop.f32.mrf.mxu3 }
 0x6ba   : > { %v17381_v31 = vadd.f32 %v7405_v34, %v16804_v41  ;;  %v17384_v24 = vadd.f32 %v7434_v30, %v16807_v36  ;;  %v17386_v19 = vpop.f32.mrf.mxu0  ;;  %11370 = vmatmul.msk.f32.gmra.mxu0 %vm312_vm2, %v21318_v46  ;;  %11375 = vmatmul.msk.f32.gmra.mxu1 %vm312_vm2, %v21319_v20  ;;  %v21325_v20 = vld [vmem:[#allocation26_spill] sm:$0xff] }
 0x6bb   : > { %21316 = vst [vmem:[#allocation27_spill] sm:$0xff] %v17386_v19  ;;  %11380 = vmatmul.msk.f32.gmra.mxu2 %vm312_vm2, %v21320_v58  ;;  %v21324_v19 = vld [vmem:[#allocation25_spill] sm:$0xff] }
 0x6bc   : > { %11385 = vmatmul.msk.f32.gmra.mxu3 %vm312_vm2, %v21321_v18  ;;  %v21326_v58 = vld [vmem:[#allocation41_spill] sm:$0xff]  ;;  %v21327_v18 = vld [vmem:[#allocation42_spill] sm:$0xff] }
 0x6c0   : > { %v17388_v29 = vpop.f32.mrf.mxu1 }
 0x6c1   : > { %21317 = vst [vmem:[#allocation28_spill] sm:$0xff] %v17388_v29  ;;  %v7408_v41 = vpop.f32.mrf.mxu2  ;;  %v7437_v34 = vpop.f32.mrf.mxu3 }
 0x6c2   : > { %v17399_v36 = vadd.f32 %v7408_v41, %v16822_v0  ;;  %v17402_v30 = vadd.f32 %v7437_v34, %v16825_v32  ;;  %v17404_v29 = vpop.f32.mrf.mxu0  ;;  %11371 = vmatmul.msk.f32.gmra.mxu0 %vm312_vm2, %v21324_v19  ;;  %11376 = vmatmul.msk.f32.gmra.mxu1 %vm312_vm2, %v21325_v20  ;;  %v21331_v20 = vld [vmem:[#allocation34_spill] sm:$0xff] }
 0x6c3   : > { %21322 = vst [vmem:[#allocation10_spill] sm:$0xff] %v17404_v29  ;;  %11381 = vmatmul.msk.f32.gmra.mxu2 %vm312_vm2, %v21326_v58  ;;  %v21330_v29 = vld [vmem:[#allocation33_spill] sm:$0xff] }
 0x6c4   : > { %11386 = vmatmul.msk.f32.gmra.mxu3 %vm312_vm2, %v21327_v18  ;;  %v21332_v58 = vld [vmem:[#allocation57_spill] sm:$0xff] }
 0x6c8   : > { %v17406_v46 = vpop.f32.mrf.mxu1 }
 0x6c9   : > { %21323 = vst [vmem:[#allocation11_spill] sm:$0xff] %v17406_v46  ;;  %v7411_v0 = vpop.f32.mrf.mxu2  ;;  %v7440_v41 = vpop.f32.mrf.mxu3 }
 0x6ca   : > { %v17417_v32 = vadd.f32 %v7411_v0, %v16840_v62  ;;  %v17420_v34 = vadd.f32 %v7440_v41, %v16843_v5  ;;  %v17422_v46 = vpop.f32.mrf.mxu0  ;;  %11388 = vmatmul.msk.f32.vlgmr.msrb.gmra.mxu0 %vm312_vm2, %v21330_v29  ;;  %11393 = vmatmul.msk.f32.vlgmr.msrb.gmra.mxu1 %vm312_vm2, %v21331_v20  ;;  %v21333_v62 = vld [vmem:[#allocation58_spill] sm:$0xff] }
 0x6cb   : > { %21328 = vst [vmem:[#allocation23_spill] sm:$0xff] %v17422_v46  ;;  %11427 = vmatpush.msk.msrb.mxu0 %vm321_vm0, %v17100_v17  ;;  %11398 = vmatmul.msk.f32.vlgmr.msrb.gmra.mxu2 %vm312_vm2, %v21332_v58  ;;  %v21336_v58 = vld [vmem:[#allocation37_spill] sm:$0xff]  ;;  %v21339_v46 = vld [vmem:[#allocation66_spill] sm:$0xff] }
 0x6cc   : > { %11403 = vmatmul.msk.f32.vlgmr.msrb.gmra.mxu3 %vm312_vm2, %v21333_v62  ;;  %11437 = vmatpush.msk.msrb.mxu2 %vm321_vm0, %v17100_v17  ;;  %v21337_v62 = vld [vmem:[#allocation38_spill] sm:$0xff] }
 0x6cd   : > { %11442 = vmatpush.msk.msrb.mxu3 %vm321_vm0, %v17100_v17  ;;  %11432 = vmatpush.msk.msrb.mxu1 %vm321_vm0, %v17100_v17 }
 0x6d0   : > { %v17424_v19 = vpop.f32.mrf.mxu1 }
 0x6d1   : > { %21329 = vst [vmem:[#allocation24_spill] sm:$0xff] %v17424_v19  ;;  %v7518_v5 = vpop.f32.mrf.mxu2  ;;  %v7547_v29 = vpop.f32.mrf.mxu3  ;;  %v21338_v19 = vld [vmem:[#allocation65_spill] sm:$0xff] }
 0x6d2   : > { %v17443_v18 = vadd.f32 %v7518_v5, %v16866_v50  ;;  %v17446_v0 = vadd.f32 %v7547_v29, %v16869_v11  ;;  %v17448_v41 = vpop.f32.mrf.mxu0  ;;  %11389 = vmatmul.msk.f32.gmra.mxu0 %vm312_vm2, %v21336_v58  ;;  %11394 = vmatmul.msk.f32.gmra.mxu1 %vm312_vm2, %v21337_v62  ;;  %v21343_v62 = vld [vmem:[#allocation48_spill] sm:$0xff] }
 0x6d3   : > { %21334 = vst [vmem:[#allocation17_spill] sm:$0xff] %v17448_v41  ;;  %11399 = vmatmul.msk.f32.gmra.mxu2 %vm312_vm2, %v21338_v19  ;;  %v21342_v41 = vld [vmem:[#allocation47_spill] sm:$0xff]  ;;  %v21344_v19 = vld [vmem:[#allocation77_spill] sm:$0xff] }
 0x6d4   : > { %11404 = vmatmul.msk.f32.gmra.mxu3 %vm312_vm2, %v21339_v46  ;;  %v21345_v46 = vld [vmem:[#allocation78_spill] sm:$0xff] }
 0x6d8   : > { %v17450_v20 = vpop.f32.mrf.mxu1 }
 0x6d9   : > { %21335 = vst [vmem:[#allocation18_spill] sm:$0xff] %v17450_v20  ;;  %v7521_v50 = vpop.f32.mrf.mxu2  ;;  %v7550_v5 = vpop.f32.mrf.mxu3 }
 0x6da   : > { %v17461_v11 = vadd.f32 %v7521_v50, %v16884_v60  ;;  %v17464_v29 = vadd.f32 %v7550_v5, %v16887_v28  ;;  %v17466_v20 = vpop.f32.mrf.mxu0  ;;  %11390 = vmatmul.msk.f32.gmra.mxu0 %vm312_vm2, %v21342_v41  ;;  %11395 = vmatmul.msk.f32.gmra.mxu1 %vm312_vm2, %v21343_v62  ;;  %v21349_v62 = vld [vmem:[#allocation44_spill] sm:$0xff] }
 0x6db   : > { %21340 = vst [vmem:[#allocation31_spill] sm:$0xff] %v17466_v20  ;;  %11400 = vmatmul.msk.f32.gmra.mxu2 %vm312_vm2, %v21344_v19  ;;  %v21348_v20 = vld [vmem:[#allocation43_spill] sm:$0xff]  ;;  %v21350_v19 = vld [vmem:[#allocation73_spill] sm:$0xff] }
 0x6dc   : > { %11405 = vmatmul.msk.f32.gmra.mxu3 %vm312_vm2, %v21345_v46  ;;  %v21351_v46 = vld [vmem:[#allocation74_spill] sm:$0xff] }
 0x6e0   : > { %v17468_v58 = vpop.f32.mrf.mxu1 }
 0x6e1   : > { %21341 = vst [vmem:[#allocation32_spill] sm:$0xff] %v17468_v58  ;;  %v7524_v60 = vpop.f32.mrf.mxu2  ;;  %v7553_v50 = vpop.f32.mrf.mxu3 }
 0x6e2   : > { %v17479_v28 = vadd.f32 %v7524_v60, %v16902_v3  ;;  %v17482_v5 = vadd.f32 %v7553_v50, %v16905_v33  ;;  %v17484_v58 = vpop.f32.mrf.mxu0  ;;  %11391 = vmatmul.msk.f32.gmra.mxu0 %vm312_vm2, %v21348_v20  ;;  %11396 = vmatmul.msk.f32.gmra.mxu1 %vm312_vm2, %v21349_v62  ;;  %v21355_v62 = vld [vmem:[#allocation61_spill] sm:$0xff] }
 0x6e3   : > { %21346 = vst [vmem:[#allocation21_spill] sm:$0xff] %v17484_v58  ;;  %11401 = vmatmul.msk.f32.gmra.mxu2 %vm312_vm2, %v21350_v19  ;;  %v21354_v58 = vld [vmem:[#allocation60_spill] sm:$0xff]  ;;  %v21356_v19 = vld [vmem:[#allocation90_spill] sm:$0xff] }
 0x6e4   : > { %11406 = vmatmul.msk.f32.gmra.mxu3 %vm312_vm2, %v21351_v46 }
 0x6e8   : > { %v17486_v41 = vpop.f32.mrf.mxu1 }
 0x6e9   : > { %21347 = vst [vmem:[#allocation22_spill] sm:$0xff] %v17486_v41  ;;  %v7527_v3 = vpop.f32.mrf.mxu2  ;;  %v7556_v60 = vpop.f32.mrf.mxu3 }
 0x6ea   : > { %v17497_v33 = vadd.f32 %v7527_v3, %v16920_v43  ;;  %v17500_v50 = vadd.f32 %v7556_v60, %v16923_v44  ;;  %v17502_v41 = vpop.f32.mrf.mxu0  ;;  %11408 = vmatmul.msk.f32.vlgmr.msra.gmra.mxu0 %vm312_vm2, %v21354_v58  ;;  %11413 = vmatmul.msk.f32.vlgmr.msra.gmra.mxu1 %vm312_vm2, %v21355_v62  ;;  %v21357_v43 = vld [vmem:[#allocation92_spill] sm:$0xff] }
 0x6eb   : > { %21352 = vst [vmem:[#allocation35_spill] sm:$0xff] %v17502_v41  ;;  %11447 = vmatpush.msk.msra.mxu0 %vm321_vm0, %v17100_v17  ;;  %11418 = vmatmul.msk.f32.vlgmr.msra.gmra.mxu2 %vm312_vm2, %v21356_v19  ;;  %v21360_v19 = vld [vmem:[#allocation68_spill] sm:$0xff] }
 0x6ec   : > { %11423 = vmatmul.msk.f32.vlgmr.msra.gmra.mxu3 %vm312_vm2, %v21357_v43  ;;  %11457 = vmatpush.msk.msra.mxu2 %vm321_vm0, %v17100_v17  ;;  %v21361_v43 = vld [vmem:[#allocation69_spill] sm:$0xff]  ;;  %v21363_v41 = vld [vmem:[#allocation104_spill] sm:$0xff] }
 0x6ed   : > { %11462 = vmatpush.msk.msra.mxu3 %vm321_vm0, %v17100_v17  ;;  %11452 = vmatpush.msk.msra.mxu1 %vm321_vm0, %v17100_v17 }
 0x6f0   : > { %v17504_v20 = vpop.f32.mrf.mxu1 }
 0x6f1   : > { %21353 = vst [vmem:[#allocation36_spill] sm:$0xff] %v17504_v20  ;;  %v7634_v44 = vpop.f32.mrf.mxu2  ;;  %v7675_v58 = vpop.f32.mrf.mxu3  ;;  %v21362_v20 = vld [vmem:[#allocation101_spill] sm:$0xff] }
 0x6f2   : > { %v17523_v46 = vadd.f32 %v7634_v44, %v16946_v39  ;;  %v17526_v3 = vadd.f32 %v7675_v58, %v16949_v45  ;;  %v17528_v60 = vpop.f32.mrf.mxu0  ;;  %11409 = vmatmul.msk.f32.gmra.mxu0 %vm312_vm2, %v21360_v19  ;;  %11414 = vmatmul.msk.f32.gmra.mxu1 %vm312_vm2, %v21361_v43  ;;  %v21367_v43 = vld [vmem:[#allocation80_spill] sm:$0xff] }
 0x6f3   : > { %21358 = vst [vmem:[#allocation29_spill] sm:$0xff] %v17528_v60  ;;  %11419 = vmatmul.msk.f32.gmra.mxu2 %vm312_vm2, %v21362_v20  ;;  %v21366_v60 = vld [vmem:[#allocation79_spill] sm:$0xff]  ;;  %v21368_v20 = vld [vmem:[#allocation117_spill] sm:$0xff] }
 0x6f4   : > { %11424 = vmatmul.msk.f32.gmra.mxu3 %vm312_vm2, %v21363_v41  ;;  %v21369_v41 = vld [vmem:[#allocation120_spill] sm:$0xff] }
 0x6f8   : > { %v17530_v62 = vpop.f32.mrf.mxu1 }
 0x6f9   : > { %21359 = vst [vmem:[#allocation30_spill] sm:$0xff] %v17530_v62  ;;  %v7637_v39 = vpop.f32.mrf.mxu2  ;;  %v7678_v44 = vpop.f32.mrf.mxu3 }
 0x6fa   : > { %v17541_v45 = vadd.f32 %v7637_v39, %v16964_v12  ;;  %v17544_v58 = vadd.f32 %v7678_v44, %v16967_v52  ;;  %v17546_v62 = vpop.f32.mrf.mxu0  ;;  %11410 = vmatmul.msk.f32.gmra.mxu0 %vm312_vm2, %v21366_v60  ;;  %11415 = vmatmul.msk.f32.gmra.mxu1 %vm312_vm2, %v21367_v43  ;;  %v21373_v43 = vld [vmem:[#allocation76_spill] sm:$0xff] }
 0x6fb   : > { %21364 = vst [vmem:[#allocation45_spill] sm:$0xff] %v17546_v62  ;;  %11420 = vmatmul.msk.f32.gmra.mxu2 %vm312_vm2, %v21368_v20  ;;  %v21372_v62 = vld [vmem:[#allocation75_spill] sm:$0xff] }
 0x6fc   : > { %11425 = vmatmul.msk.f32.gmra.mxu3 %vm312_vm2, %v21369_v41  ;;  %v21374_v20 = vld [vmem:[#allocation111_spill] sm:$0xff]  ;;  %v21375_v41 = vld [vmem:[#allocation112_spill] sm:$0xff] }
 0x700   : > { %v17548_v19 = vpop.f32.mrf.mxu1 }
 0x701   : > { %21365 = vst [vmem:[#allocation46_spill] sm:$0xff] %v17548_v19  ;;  %v7640_v12 = vpop.f32.mrf.mxu2  ;;  %v7681_v39 = vpop.f32.mrf.mxu3 }
 0x702   : > { %v17559_v52 = vadd.f32 %v7640_v12, %v16982_v59  ;;  %v17562_v44 = vadd.f32 %v7681_v39, %v16985_v14  ;;  %v17564_v19 = vpop.f32.mrf.mxu0  ;;  %11411 = vmatmul.msk.f32.gmra.mxu0 %vm312_vm2, %v21372_v62  ;;  %11416 = vmatmul.msk.f32.gmra.mxu1 %vm312_vm2, %v21373_v43  ;;  %v21378_v43 = vld [vmem:[#allocation95_spill] sm:$0xff] }
 0x703   : > { %21370 = vst [vmem:[#allocation25_spill] sm:$0xff] %v17564_v19  ;;  %11421 = vmatmul.msk.f32.gmra.mxu2 %vm312_vm2, %v21374_v20  ;;  %v21377_v19 = vld [vmem:[#allocation94_spill] sm:$0xff]  ;;  %v21379_v20 = vld [vmem:[#allocation137_spill] sm:$0xff] }
 0x704   : > { %11426 = vmatmul.msk.f32.gmra.mxu3 %vm312_vm2, %v21375_v41 }
 0x708   : > { %v17566_v60 = vpop.f32.mrf.mxu1 }
 0x709   : > { %21371 = vst [vmem:[#allocation26_spill] sm:$0xff] %v17566_v60  ;;  %v7643_v59 = vpop.f32.mrf.mxu2  ;;  %v7684_v12 = vpop.f32.mrf.mxu3 }
 0x70a   : > { %v17577_v14 = vadd.f32 %v7643_v59, %v17000_v40  ;;  %v17580_v39 = vadd.f32 %v7684_v12, %v17003_v47  ;;  %v17582_v60 = vpop.f32.mrf.mxu0  ;;  %11428 = vmatmul.msk.f32.vlgmr.msrb.gmra.mxu0 %vm312_vm2, %v21377_v19  ;;  %11433 = vmatmul.msk.f32.vlgmr.msrb.gmra.mxu1 %vm312_vm2, %v21378_v43  ;;  %v21380_v40 = vld [vmem:[#allocation140_spill] sm:$0xff] }
 0x70b   : > { %11467 = vmatpush.msk.msrb.mxu0 %vm321_vm0, %v17100_v17  ;;  %11438 = vmatmul.msk.f32.vlgmr.msrb.gmra.mxu2 %vm312_vm2, %v21379_v20  ;;  %v21383_v20 = vld [vmem:[#allocation106_spill] sm:$0xff] }
 0x70c   : > { %21376 = vst [vmem:[#allocation41_spill] sm:$0xff] %v17580_v39  ;;  %11443 = vmatmul.msk.f32.vlgmr.msrb.gmra.mxu3 %vm312_vm2, %v21380_v40  ;;  %11477 = vmatpush.msk.msrb.mxu2 %vm321_vm0, %v17100_v17  ;;  %v21384_v40 = vld [vmem:[#allocation107_spill] sm:$0xff]  ;;  %v21385_v39 = vld [vmem:[#allocation149_spill] sm:$0xff] }
 0x70d   : > { %11482 = vmatpush.msk.msrb.mxu3 %vm321_vm0, %v17100_v17  ;;  %11472 = vmatpush.msk.msrb.mxu1 %vm321_vm0, %v17100_v17  ;;  %v21386_v17 = vld [vmem:[#allocation152_spill] sm:$0xff] }
 0x710   : > { %v17584_v62 = vpop.f32.mrf.mxu1 }
 0x711   : > { %v7877_v47 = vpop.f32.mrf.mxu2  ;;  %v7906_v19 = vpop.f32.mrf.mxu3 }
 0x712   : > { %v17603_v41 = vadd.f32 %v7877_v47, %v17026_v7  ;;  %v17606_v59 = vadd.f32 %v7906_v19, %v17029_v22  ;;  %v17608_v12 = vpop.f32.mrf.mxu0  ;;  %11429 = vmatmul.msk.f32.gmra.mxu0 %vm312_vm2, %v21383_v20  ;;  %11434 = vmatmul.msk.f32.gmra.mxu1 %vm312_vm2, %v21384_v40  ;;  %v21390_v40 = vld [vmem:[#allocation122_spill] sm:$0xff] }
 0x713   : > { %11439 = vmatmul.msk.f32.gmra.mxu2 %vm312_vm2, %v21385_v39  ;;  %v21391_v39 = vld [vmem:[#allocation165_spill] sm:$0xff] }
 0x714   : > { %21381 = vst [vmem:[#allocation42_spill] sm:$0xff] %v17603_v41  ;;  %11444 = vmatmul.msk.f32.gmra.mxu3 %vm312_vm2, %v21386_v17  ;;  %v21389_v41 = vld [vmem:[#allocation121_spill] sm:$0xff]  ;;  %v21392_v17 = vld [vmem:[#allocation168_spill] sm:$0xff] }
 0x715   : > { %21382 = vst [vmem:[#allocation33_spill] sm:$0xff] %v17606_v59 }
 0x718   : > { %v17610_v43 = vpop.f32.mrf.mxu1 }
 0x719   : > { %v7880_v7 = vpop.f32.mrf.mxu2  ;;  %v7909_v47 = vpop.f32.mrf.mxu3 }
 0x71a   : > { %v17621_v22 = vadd.f32 %v7880_v7, %v17044_v56  ;;  %v17624_v19 = vadd.f32 %v7909_v47, %v17047_v8  ;;  %v17626_v59 = vpop.f32.mrf.mxu0  ;;  %11430 = vmatmul.msk.f32.gmra.mxu0 %vm312_vm2, %v21389_v41  ;;  %11435 = vmatmul.msk.f32.gmra.mxu1 %vm312_vm2, %v21390_v40  ;;  %v21396_v40 = vld [vmem:[#allocation114_spill] sm:$0xff] }
 0x71b   : > { %11440 = vmatmul.msk.f32.gmra.mxu2 %vm312_vm2, %v21391_v39  ;;  %v21397_v39 = vld [vmem:[#allocation159_spill] sm:$0xff] }
 0x71c   : > { %21387 = vst [vmem:[#allocation34_spill] sm:$0xff] %v17621_v22  ;;  %11445 = vmatmul.msk.f32.gmra.mxu3 %vm312_vm2, %v21392_v17  ;;  %v21395_v22 = vld [vmem:[#allocation113_spill] sm:$0xff]  ;;  %v21398_v17 = vld [vmem:[#allocation160_spill] sm:$0xff] }
 0x71d   : > { %21388 = vst [vmem:[#allocation57_spill] sm:$0xff] %v17624_v19 }
 0x720   : > { %v17628_v20 = vpop.f32.mrf.mxu1 }
 0x721   : > { %v7883_v56 = vpop.f32.mrf.mxu2  ;;  %v7912_v7 = vpop.f32.mrf.mxu3 }
 0x722   : > { %v17639_v8 = vadd.f32 %v7883_v56, %v17062_v57  ;;  %v17642_v47 = vadd.f32 %v7912_v7, %v17065_v63  ;;  %v17644_v19 = vpop.f32.mrf.mxu0  ;;  %11431 = vmatmul.msk.f32.gmra.mxu0 %vm312_vm2, %v21395_v22  ;;  %11436 = vmatmul.msk.f32.gmra.mxu1 %vm312_vm2, %v21396_v40  ;;  %v8585_v57 = vrot.slane %v17175_v21, 1  ;;  %v8586_v63 = vrot.slane %v17204_v23, 1  ;;  %v21405_v23 = vld [vmem:[#allocation184_spill] sm:$0xff] }
 0x723   : > { %11441 = vmatmul.msk.f32.gmra.mxu2 %vm312_vm2, %v21397_v39  ;;  %v21403_v39 = vld [vmem:[#allocation142_spill] sm:$0xff] }
 0x724   : > { %21393 = vst [vmem:[#allocation58_spill] sm:$0xff] %v17639_v8  ;;  %11446 = vmatmul.msk.f32.gmra.mxu3 %vm312_vm2, %v21398_v17  ;;  %v21404_v17 = vld [vmem:[#allocation143_spill] sm:$0xff]  ;;  %v8587_v21 = vsel %vm304_vm1, %v8585_v57, %v8586_v63  ;;  %v8588_v57 = vrot.slane %v17225_v42, 1 }
 0x725   : > { %21394 = vst [vmem:[#allocation37_spill] sm:$0xff] %v17642_v47 }
 0x726   : > { %v8589_v42 = vsel %vm304_vm1, %v8586_v63, %v8588_v57  ;;  %v21420_v63 = vld [vmem:[#allocation169_spill] sm:$0xff] }
 0x728   : > { %v17646_v41 = vpop.f32.mrf.mxu1 }
 0x729   : > { %v7886_v56 = vpop.f32.mrf.mxu2  ;;  %v7915_v7 = vpop.f32.mrf.mxu3 }
 0x72a   : > { %v17659_v47 = vadd.f32 %v7886_v56, %v17080_v54  ;;  %v17662_v22 = vadd.f32 %v7915_v7, %v17083_v49  ;;  %v17664_v8 = vpop.f32.mrf.mxu0  ;;  %11448 = vmatmul.msk.f32.vlgmr.msra.gmra.mxu0 %vm312_vm2, %v21403_v39  ;;  %11453 = vmatmul.msk.f32.vlgmr.msra.gmra.mxu1 %vm312_vm2, %v21404_v17  ;;  %v21406_v54 = vld [vmem:[#allocation187_spill] sm:$0xff] }
 0x72b   : > { %21401 = vst [vmem:[#allocation66_spill] sm:$0xff] %v17664_v8  ;;  %11458 = vmatmul.msk.f32.vlgmr.msra.gmra.mxu2 %vm312_vm2, %v21405_v23  ;;  %v17680_v49 = vld [vmem:[%s19372_s1 + $0x20] sm:$0x7]  ;;  %v21422_v8 = vld [vmem:[#allocation209_spill] sm:$0xff] }
 0x72c   : > { %21399 = vst [vmem:[#allocation38_spill] sm:$0xff] %v17659_v47  ;;  %11463 = vmatmul.msk.f32.vlgmr.msra.gmra.mxu3 %vm312_vm2, %v21406_v54  ;;  %11497 = vmatpush.msk.msra.mxu2 %vm321_vm0, %v17680_v49  ;;  %v21412_v47 = vld [vmem:[#allocation155_spill] sm:$0xff] }
 0x72d   : > { %21400 = vst [vmem:[#allocation65_spill] sm:$0xff] %v17662_v22  ;;  %11502 = vmatpush.msk.msra.mxu3 %vm321_vm0, %v17680_v49  ;;  %11487 = vmatpush.msk.msra.mxu0 %vm321_vm0, %v17680_v49  ;;  %v21411_v22 = vld [vmem:[#allocation154_spill] sm:$0xff] }
 0x72e   : > { %11492 = vmatpush.msk.msra.mxu1 %vm321_vm0, %v17680_v49 }
 0x730   : > { %v17666_v40 = vpop.f32.mrf.mxu1 }
 0x731   : > { %21402 = vst [vmem:[#allocation47_spill] sm:$0xff] %v17666_v40  ;;  %v7993_v56 = vpop.f32.mrf.mxu2  ;;  %v8022_v7 = vpop.f32.mrf.mxu3  ;;  %v21413_v40 = vld [vmem:[#allocation196_spill] sm:$0xff] }
 0x732   : > { %v17692_v39 = vadd.f32 %v7993_v56, %v17111_v48  ;;  %v17695_v17 = vadd.f32 %v8022_v7, %v17114_v9  ;;  %v17697_v23 = vpop.f32.mrf.mxu0  ;;  %11449 = vmatmul.msk.f32.gmra.mxu0 %vm312_vm2, %v21411_v22  ;;  %11454 = vmatmul.msk.f32.gmra.mxu1 %vm312_vm2, %v21412_v47  ;;  %v21414_v48 = vld [vmem:[#allocation199_spill] sm:$0xff]  ;;  %v19962_v9 = vrot.slane %v17246_v10, 1 }
 0x733   : > { %21409 = vst [vmem:[#allocation78_spill] sm:$0xff] %v17697_v23  ;;  %11459 = vmatmul.msk.f32.gmra.mxu2 %vm312_vm2, %v21413_v40  ;;  %v21421_v40 = vld [vmem:[#allocation170_spill] sm:$0xff] }
 0x734   : > { %21407 = vst [vmem:[#allocation48_spill] sm:$0xff] %v17692_v39  ;;  %11464 = vmatmul.msk.f32.gmra.mxu3 %vm312_vm2, %v21414_v48  ;;  %v8591_v48 = vsel %vm304_vm1, %v8588_v57, %v19962_v9  ;;  %v21427_v57 = vld [vmem:[#allocation162_spill] sm:$0xff] }
 0x735   : > { %21408 = vst [vmem:[#allocation77_spill] sm:$0xff] %v17695_v17  ;;  %v21415_v17 = vld [vmem:[#allocation573_spill] sm:$0xff] }
 0x738   : > { %v17699_v54 = vpop.f32.mrf.mxu1 }
 0x739   : > { %21410 = vst [vmem:[#allocation43_spill] sm:$0xff] %v17699_v54  ;;  %v7996_v56 = vpop.f32.mrf.mxu2  ;;  %v8025_v7 = vpop.f32.mrf.mxu3  ;;  %v21417_v54 = vld [vmem:[#allocation574_spill] sm:$0xff] }
 0x73a   : > { %v17712_v39 = vadd.f32 %v7996_v56, %v21415_v17  ;;  %v17715_v22 = vadd.f32 %v8025_v7, %v21417_v54  ;;  %v17717_v23 = vpop.f32.mrf.mxu0  ;;  %11450 = vmatmul.msk.f32.gmra.mxu0 %vm312_vm2, %v21420_v63  ;;  %11455 = vmatmul.msk.f32.gmra.mxu1 %vm312_vm2, %v21421_v40  ;;  %v21423_v17 = vld [vmem:[#allocation212_spill] sm:$0xff] }
 0x73b   : > { %11460 = vmatmul.msk.f32.gmra.mxu2 %vm312_vm2, %v21422_v8  ;;  %v21428_v8 = vld [vmem:[#allocation204_spill] sm:$0xff] }
 0x73c   : > { %21416 = vst [vmem:[#allocation44_spill] sm:$0xff] %v17712_v39  ;;  %11465 = vmatmul.msk.f32.gmra.mxu3 %vm312_vm2, %v21423_v17  ;;  %v21429_v17 = vld [vmem:[#allocation205_spill] sm:$0xff] }
 0x73d   : > { %21418 = vst [vmem:[#allocation73_spill] sm:$0xff] %v17715_v22  ;;  %v21424_v22 = vld [vmem:[#allocation360_spill] sm:$0xff] }
 0x740   : > { %v17719_v47 = vpop.f32.mrf.mxu1 }
 0x741   : > { %21419 = vst [vmem:[#allocation74_spill] sm:$0xff] %v17719_v47  ;;  %v7999_v54 = vpop.f32.mrf.mxu2  ;;  %v8028_v56 = vpop.f32.mrf.mxu3  ;;  %v21426_v47 = vld [vmem:[#allocation161_spill] sm:$0xff] }
 0x742   : > { %v17733_v7 = vadd.f32 %v7999_v54, %v17147_v27  ;;  %v17736_v63 = vadd.f32 %v8028_v56, %v21424_v22  ;;  %v17738_v39 = vpop.f32.mrf.mxu0  ;;  %11451 = vmatmul.msk.f32.gmra.mxu0 %vm312_vm2, %v21426_v47  ;;  %11456 = vmatmul.msk.f32.gmra.mxu1 %vm312_vm2, %v21427_v57  ;;  %v21432_v57 = vld [vmem:[#allocation190_spill] sm:$0xff] }
 0x743   : > { %11461 = vmatmul.msk.f32.gmra.mxu2 %vm312_vm2, %v21428_v8  ;;  %v21433_v8 = vld [vmem:[#allocation100_spill] sm:$0xff] }
 0x744   : > { %21425 = vst [vmem:[#allocation60_spill] sm:$0xff] %v17736_v63  ;;  %11466 = vmatmul.msk.f32.gmra.mxu3 %vm312_vm2, %v21429_v17  ;;  %v21431_v63 = vld [vmem:[#allocation189_spill] sm:$0xff]  ;;  %v21435_v17 = vld [vmem:[#allocation516_spill] sm:$0xff] }
 0x748   : > { %v17740_v40 = vpop.f32.mrf.mxu1 }
 0x749   : > { %v8002_v27 = vpop.f32.mrf.mxu2  ;;  %v8031_v54 = vpop.f32.mrf.mxu3 }
 0x74a   : > { %v17751_v22 = vadd.f32 %v8002_v27, %v17165_v26  ;;  %v17754_v56 = vadd.f32 %v8031_v54, %v17168_v15  ;;  %v17756_v9 = vpop.f32.mrf.mxu0  ;;  %11468 = vmatmul.msk.f32.vlgmr.msrb.gmra.mxu0 %vm312_vm2, %v21431_v63  ;;  %11473 = vmatmul.msk.f32.vlgmr.msrb.gmra.mxu1 %vm312_vm2, %v21432_v57  ;;  %v21439_v57 = vld [vmem:[#allocation200_spill] sm:$0xff] }
 0x74b   : > { %11507 = vmatpush.msk.msrb.mxu0 %vm321_vm0, %v17680_v49  ;;  %11478 = vmatmul.msk.f32.vlgmr.msrb.gmra.mxu2 %vm312_vm2, %v21433_v8  ;;  %v21440_v8 = vld [vmem:[#allocation201_spill] sm:$0xff] }
 0x74c   : > { %21430 = vst [vmem:[#allocation61_spill] sm:$0xff] %v17754_v56  ;;  %11483 = vmatmul.msk.f32.vlgmr.msrb.gmra.mxu3 %vm312_vm2, %v8587_v21  ;;  %11517 = vmatpush.msk.msrb.mxu2 %vm321_vm0, %v17680_v49  ;;  %v21441_v56 = vld [vmem:[#allocation412_spill] sm:$0xff] }
 0x74d   : > { %11522 = vmatpush.msk.msrb.mxu3 %vm321_vm0, %v17680_v49  ;;  %11512 = vmatpush.msk.msrb.mxu1 %vm321_vm0, %v17680_v49 }
 0x750   : > { %v17758_v47 = vpop.f32.mrf.mxu1 }
 0x751   : > { %v8109_v15 = vpop.f32.mrf.mxu2  ;;  %v8138_v26 = vpop.f32.mrf.mxu3 }
 0x752   : > { %v17776_v63 = vadd.f32 %v8109_v15, %v17194_v51  ;;  %v17779_v27 = vadd.f32 %v8138_v26, %v21435_v17  ;;  %v17781_v54 = vpop.f32.mrf.mxu0  ;;  %11469 = vmatmul.msk.f32.gmra.mxu0 %vm312_vm2, %v21439_v57  ;;  %11474 = vmatmul.msk.f32.gmra.mxu1 %vm312_vm2, %v21440_v8  ;;  %v21444_v17 = vld [vmem:[#allocation582_spill] sm:$0xff]  ;;  %v21446_v57 = vld [vmem:[#allocation213_spill] sm:$0xff] }
 0x753   : > { %21437 = vst [vmem:[#allocation68_spill] sm:$0xff] %v17781_v54  ;;  %11479 = vmatmul.msk.f32.gmra.mxu2 %vm312_vm2, %v21441_v56  ;;  %v21447_v8 = vld [vmem:[#allocation214_spill] sm:$0xff]  ;;  %v21448_v56 = vld [vmem:[#allocation123_spill] sm:$0xff] }
 0x754   : > { %21434 = vst [vmem:[#allocation90_spill] sm:$0xff] %v17776_v63  ;;  %11484 = vmatmul.msk.f32.gmra.mxu3 %vm312_vm2, %v8589_v42  ;;  %v21442_v63 = vld [vmem:[#allocation517_spill] sm:$0xff] }
 0x755   : > { %21436 = vst [vmem:[#allocation92_spill] sm:$0xff] %v17779_v27 }
 0x758   : > { %v17783_v21 = vpop.f32.mrf.mxu1 }
 0x759   : > { %21438 = vst [vmem:[#allocation69_spill] sm:$0xff] %v17783_v21  ;;  %v8112_v51 = vpop.f32.mrf.mxu2  ;;  %v8141_v15 = vpop.f32.mrf.mxu3 }
 0x75a   : > { %v17793_v26 = vadd.f32 %v8112_v51, %v21442_v63  ;;  %v17796_v27 = vadd.f32 %v8141_v15, %v21444_v17  ;;  %v17798_v21 = vpop.f32.mrf.mxu0  ;;  %11470 = vmatmul.msk.f32.gmra.mxu0 %vm312_vm2, %v21446_v57  ;;  %11475 = vmatmul.msk.f32.gmra.mxu1 %vm312_vm2, %v21447_v8  ;;  %v21453_v57 = vld [vmem:[#allocation206_spill] sm:$0xff]  ;;  %v21454_v8 = vld [vmem:[#allocation207_spill] sm:$0xff] }
 0x75b   : > { %11480 = vmatmul.msk.f32.gmra.mxu2 %vm312_vm2, %v21448_v56  ;;  %v21455_v56 = vld [vmem:[#allocation422_spill] sm:$0xff] }
 0x75c   : > { %21443 = vst [vmem:[#allocation101_spill] sm:$0xff] %v17793_v26  ;;  %11485 = vmatmul.msk.f32.gmra.mxu3 %vm312_vm2, %v8591_v48  ;;  %v21456_v48 = vrot.slane %v17246_v10, 1  ;;  %v21464_v10 = vld [vmem:[#allocation271_spill] sm:$0xff] }
 0x75d   : > { %21445 = vst [vmem:[#allocation104_spill] sm:$0xff] %v17796_v27 }
 0x760   : > { %v17800_v54 = vpop.f32.mrf.mxu1 }
 0x761   : > { %v8115_v42 = vpop.f32.mrf.mxu2  ;;  %v8144_v63 = vpop.f32.mrf.mxu3 }
 0x762   : > { %v17810_v51 = vadd.f32 %v8115_v42, %v17236_v16  ;;  %v17813_v15 = vadd.f32 %v8144_v63, %v17239_v53  ;;  %v17815_v17 = vpop.f32.mrf.mxu0  ;;  %11471 = vmatmul.msk.f32.gmra.mxu0 %vm312_vm2, %v21453_v57  ;;  %11476 = vmatmul.msk.f32.gmra.mxu1 %vm312_vm2, %v21454_v8  ;;  %v21458_v63 = vld [vmem:[#allocation525_spill] sm:$0xff]  ;;  %v21462_v8 = vld [vmem:[#allocation144_spill] sm:$0xff] }
 0x763   : > { %21451 = vst [vmem:[#allocation117_spill] sm:$0xff] %v17815_v17  ;;  %11481 = vmatmul.msk.f32.gmra.mxu2 %vm312_vm2, %v21455_v56  ;;  %v21463_v56 = vld [vmem:[#allocation145_spill] sm:$0xff] }
 0x764   : > { %21449 = vst [vmem:[#allocation79_spill] sm:$0xff] %v17810_v51  ;;  %11486 = vmatmul.msk.f32.gmra.mxu3 %vm312_vm2, %v21456_v48 }
 0x765   : > { %21450 = vst [vmem:[#allocation80_spill] sm:$0xff] %v17813_v15 }
 0x768   : > { %v17817_v27 = vpop.f32.mrf.mxu1 }
 0x769   : > { %21452 = vst [vmem:[#allocation120_spill] sm:$0xff] %v17817_v27  ;;  %v8118_v16 = vpop.f32.mrf.mxu2  ;;  %v8147_v53 = vpop.f32.mrf.mxu3  ;;  %v21637_v27 = vld [vmem:[#allocation153_spill] sm:$0xff] }
 0x76a   : > { %v17829_v42 = vadd.f32 %v8118_v16, %v17257_v37  ;;  %v17832_v15 = vadd.f32 %v8147_v53, %v21458_v63  ;;  %v17834_v51 = vpop.f32.mrf.mxu0  ;;  %11488 = vmatmul.msk.f32.vlgmr.msra.gmra.mxu0 %vm312_vm2, %v21462_v8  ;;  %11493 = vmatmul.msk.f32.vlgmr.msra.gmra.mxu1 %vm312_vm2, %v21463_v56  ;;  %v21465_v37 = vld [vmem:[#allocation274_spill] sm:$0xff] }
 0x76b   : > { %21460 = vst [vmem:[#allocation111_spill] sm:$0xff] %v17834_v51  ;;  %11527 = vmatpush.msk.msra.mxu0 %vm321_vm0, %v17680_v49  ;;  %11498 = vmatmul.msk.f32.vlgmr.msra.gmra.mxu2 %vm312_vm2, %v21464_v10  ;;  %v21470_v10 = vld [vmem:[#allocation157_spill] sm:$0xff]  ;;  %v21634_v51 = vld [vmem:[#allocation146_spill] sm:$0xff] }
 0x76c   : > { %21457 = vst [vmem:[#allocation75_spill] sm:$0xff] %v17829_v42  ;;  %11503 = vmatmul.msk.f32.vlgmr.msra.gmra.mxu3 %vm312_vm2, %v21465_v37  ;;  %11537 = vmatpush.msk.msra.mxu2 %vm321_vm0, %v17680_v49  ;;  %v21471_v37 = vld [vmem:[#allocation158_spill] sm:$0xff] }
 0x76d   : > { %21459 = vst [vmem:[#allocation76_spill] sm:$0xff] %v17832_v15  ;;  %11542 = vmatpush.msk.msra.mxu3 %vm321_vm0, %v17680_v49  ;;  %11532 = vmatpush.msk.msra.mxu1 %vm321_vm0, %v17680_v49  ;;  %v21472_v15 = vld [vmem:[#allocation283_spill] sm:$0xff]  ;;  %v21473_v42 = vld [vmem:[#allocation286_spill] sm:$0xff] }
 0x770   : > { %v17836_v57 = vpop.f32.mrf.mxu1 }
 0x771   : > { %21461 = vst [vmem:[#allocation112_spill] sm:$0xff] %v17836_v57  ;;  %v8225_v48 = vpop.f32.mrf.mxu2  ;;  %v8254_v16 = vpop.f32.mrf.mxu3 }
 0x772   : > { %v17855_v53 = vadd.f32 %v8225_v48, %v17283_v1  ;;  %v17858_v63 = vadd.f32 %v8254_v16, %v17286_v2  ;;  %v17860_v8 = vpop.f32.mrf.mxu0  ;;  %11489 = vmatmul.msk.f32.gmra.mxu0 %vm312_vm2, %v21470_v10  ;;  %11494 = vmatmul.msk.f32.gmra.mxu1 %vm312_vm2, %v21471_v37  ;;  %v21479_v37 = vld [vmem:[#allocation193_spill] sm:$0xff] }
 0x773   : > { %21468 = vst [vmem:[#allocation137_spill] sm:$0xff] %v17860_v8  ;;  %11499 = vmatmul.msk.f32.gmra.mxu2 %vm312_vm2, %v21472_v15  ;;  %v21480_v15 = vld [vmem:[#allocation299_spill] sm:$0xff]  ;;  %v21631_v8 = vld [vmem:[#allocation134_spill] sm:$0xff] }
 0x774   : > { %21466 = vst [vmem:[#allocation94_spill] sm:$0xff] %v17855_v53  ;;  %11504 = vmatmul.msk.f32.gmra.mxu3 %vm312_vm2, %v21473_v42  ;;  %v21478_v53 = vld [vmem:[#allocation192_spill] sm:$0xff]  ;;  %v21481_v42 = vld [vmem:[#allocation302_spill] sm:$0xff] }
 0x775   : > { %21467 = vst [vmem:[#allocation95_spill] sm:$0xff] %v17858_v63 }
 0x778   : > { %v17862_v56 = vpop.f32.mrf.mxu1 }
 0x779   : > { %21469 = vst [vmem:[#allocation140_spill] sm:$0xff] %v17862_v56  ;;  %v8228_v1 = vpop.f32.mrf.mxu2  ;;  %v8257_v48 = vpop.f32.mrf.mxu3 }
 0x77a   : > { %v17873_v2 = vadd.f32 %v8228_v1, %v17301_v25  ;;  %v17876_v16 = vadd.f32 %v8257_v48, %v17304_v61  ;;  %v17878_v63 = vpop.f32.mrf.mxu0  ;;  %11490 = vmatmul.msk.f32.gmra.mxu0 %vm312_vm2, %v21478_v53  ;;  %11495 = vmatmul.msk.f32.gmra.mxu1 %vm312_vm2, %v21479_v37  ;;  %v21487_v37 = vld [vmem:[#allocation180_spill] sm:$0xff] }
 0x77b   : > { %21476 = vst [vmem:[#allocation149_spill] sm:$0xff] %v17878_v63  ;;  %11500 = vmatmul.msk.f32.gmra.mxu2 %vm312_vm2, %v21480_v15  ;;  %v21488_v15 = vld [vmem:[#allocation290_spill] sm:$0xff] }
 0x77c   : > { %21474 = vst [vmem:[#allocation106_spill] sm:$0xff] %v17873_v2  ;;  %11505 = vmatmul.msk.f32.gmra.mxu3 %vm312_vm2, %v21481_v42  ;;  %v21486_v2 = vld [vmem:[#allocation176_spill] sm:$0xff] }
 0x77d   : > { %21475 = vst [vmem:[#allocation107_spill] sm:$0xff] %v17876_v16  ;;  %v21489_v42 = vld [vmem:[#allocation292_spill] sm:$0xff] }
 0x780   : > { %v17880_v10 = vpop.f32.mrf.mxu1 }
 0x781   : > { %21477 = vst [vmem:[#allocation152_spill] sm:$0xff] %v17880_v10  ;;  %v8231_v25 = vpop.f32.mrf.mxu2  ;;  %v8260_v1 = vpop.f32.mrf.mxu3  ;;  %v21627_v10 = vld [vmem:[#allocation417_spill] sm:$0xff] }
 0x782   : > { %v17891_v61 = vadd.f32 %v8231_v25, %v17319_v13  ;;  %v17894_v48 = vadd.f32 %v8260_v1, %v17322_v55  ;;  %v17896_v16 = vpop.f32.mrf.mxu0  ;;  %11491 = vmatmul.msk.f32.gmra.mxu0 %vm312_vm2, %v21486_v2  ;;  %11496 = vmatmul.msk.f32.gmra.mxu1 %vm312_vm2, %v21487_v37  ;;  %v21495_v37 = vld [vmem:[#allocation276_spill] sm:$0xff] }
 0x783   : > { %21484 = vst [vmem:[#allocation165_spill] sm:$0xff] %v17896_v16  ;;  %11501 = vmatmul.msk.f32.gmra.mxu2 %vm312_vm2, %v21488_v15  ;;  %v21496_v15 = vld [vmem:[#allocation319_spill] sm:$0xff] }
 0x784   : > { %21482 = vst [vmem:[#allocation121_spill] sm:$0xff] %v17891_v61  ;;  %11506 = vmatmul.msk.f32.gmra.mxu3 %vm312_vm2, %v21489_v42  ;;  %v21494_v61 = vld [vmem:[#allocation275_spill] sm:$0xff] }
 0x785   : > { %21483 = vst [vmem:[#allocation122_spill] sm:$0xff] %v17894_v48 }
 0x788   : > { %v17898_v53 = vpop.f32.mrf.mxu1 }
 0x789   : > { %21485 = vst [vmem:[#allocation168_spill] sm:$0xff] %v17898_v53  ;;  %v8234_v13 = vpop.f32.mrf.mxu2  ;;  %v8263_v25 = vpop.f32.mrf.mxu3 }
 0x78a   : > { %v17909_v55 = vadd.f32 %v8234_v13, %v17337_v38  ;;  %v17912_v1 = vadd.f32 %v8263_v25, %v17340_v6  ;;  %v17914_v48 = vpop.f32.mrf.mxu0  ;;  %11508 = vmatmul.msk.f32.vlgmr.msrb.gmra.mxu0 %vm312_vm2, %v21494_v61  ;;  %11513 = vmatmul.msk.f32.vlgmr.msrb.gmra.mxu1 %vm312_vm2, %v21495_v37  ;;  %v21497_v38 = vld [vmem:[#allocation322_spill] sm:$0xff] }
 0x78b   : > { %21492 = vst [vmem:[#allocation159_spill] sm:$0xff] %v17914_v48  ;;  %11547 = vmatpush.msk.msrb.mxu0 %vm321_vm0, %v17680_v49  ;;  %11518 = vmatmul.msk.f32.vlgmr.msrb.gmra.mxu2 %vm312_vm2, %v21496_v15  ;;  %v21502_v15 = vld [vmem:[#allocation287_spill] sm:$0xff] }
 0x78c   : > { %21490 = vst [vmem:[#allocation113_spill] sm:$0xff] %v17909_v55  ;;  %11523 = vmatmul.msk.f32.vlgmr.msrb.gmra.mxu3 %vm312_vm2, %v21497_v38  ;;  %11557 = vmatpush.msk.msrb.mxu2 %vm321_vm0, %v17680_v49  ;;  %v21503_v38 = vld [vmem:[#allocation288_spill] sm:$0xff]  ;;  %v21505_v55 = vld [vmem:[#allocation334_spill] sm:$0xff] }
 0x78d   : > { %21491 = vst [vmem:[#allocation114_spill] sm:$0xff] %v17912_v1  ;;  %11562 = vmatpush.msk.msrb.mxu3 %vm321_vm0, %v17680_v49  ;;  %11552 = vmatpush.msk.msrb.mxu1 %vm321_vm0, %v17680_v49  ;;  %v21504_v1 = vld [vmem:[#allocation331_spill] sm:$0xff] }
 0x790   : > { %v17916_v2 = vpop.f32.mrf.mxu1 }
 0x791   : > { %21493 = vst [vmem:[#allocation160_spill] sm:$0xff] %v17916_v2  ;;  %v8341_v6 = vpop.f32.mrf.mxu2  ;;  %v8370_v61 = vpop.f32.mrf.mxu3 }
 0x792   : > { %v17935_v42 = vadd.f32 %v8341_v6, %v17363_v4  ;;  %v17938_v13 = vadd.f32 %v8370_v61, %v17366_v35  ;;  %v17940_v25 = vpop.f32.mrf.mxu0  ;;  %11509 = vmatmul.msk.f32.gmra.mxu0 %vm312_vm2, %v21502_v15  ;;  %11514 = vmatmul.msk.f32.gmra.mxu1 %vm312_vm2, %v21503_v38  ;;  %v21511_v38 = vld [vmem:[#allocation304_spill] sm:$0xff] }
 0x793   : > { %21500 = vst [vmem:[#allocation184_spill] sm:$0xff] %v17940_v25  ;;  %11519 = vmatmul.msk.f32.gmra.mxu2 %vm312_vm2, %v21504_v1  ;;  %v21512_v1 = vld [vmem:[#allocation347_spill] sm:$0xff] }
 0x794   : > { %21498 = vst [vmem:[#allocation142_spill] sm:$0xff] %v17935_v42  ;;  %11524 = vmatmul.msk.f32.gmra.mxu3 %vm312_vm2, %v21505_v55  ;;  %v21510_v42 = vld [vmem:[#allocation303_spill] sm:$0xff]  ;;  %v21513_v55 = vld [vmem:[#allocation350_spill] sm:$0xff] }
 0x795   : > { %21499 = vst [vmem:[#allocation143_spill] sm:$0xff] %v17938_v13 }
 0x798   : > { %v17942_v37 = vpop.f32.mrf.mxu1 }
 0x799   : > { %21501 = vst [vmem:[#allocation187_spill] sm:$0xff] %v17942_v37  ;;  %v8344_v4 = vpop.f32.mrf.mxu2  ;;  %v8373_v6 = vpop.f32.mrf.mxu3 }
 0x79a   : > { %v17953_v35 = vadd.f32 %v8344_v4, %v17381_v31  ;;  %v17956_v61 = vadd.f32 %v8373_v6, %v17384_v24  ;;  %v17958_v13 = vpop.f32.mrf.mxu0  ;;  %11510 = vmatmul.msk.f32.gmra.mxu0 %vm312_vm2, %v21510_v42  ;;  %11515 = vmatmul.msk.f32.gmra.mxu1 %vm312_vm2, %v21511_v38  ;;  %v21519_v38 = vld [vmem:[#allocation296_spill] sm:$0xff] }
 0x79b   : > { %21508 = vst [vmem:[#allocation196_spill] sm:$0xff] %v17958_v13  ;;  %11520 = vmatmul.msk.f32.gmra.mxu2 %vm312_vm2, %v21512_v1  ;;  %v21520_v1 = vld [vmem:[#allocation338_spill] sm:$0xff] }
 0x79c   : > { %21506 = vst [vmem:[#allocation154_spill] sm:$0xff] %v17953_v35  ;;  %11525 = vmatmul.msk.f32.gmra.mxu3 %vm312_vm2, %v21513_v55  ;;  %v21518_v35 = vld [vmem:[#allocation294_spill] sm:$0xff]  ;;  %v21521_v55 = vld [vmem:[#allocation340_spill] sm:$0xff] }
 0x79d   : > { %21507 = vst [vmem:[#allocation155_spill] sm:$0xff] %v17956_v61 }
 0x7a0   : > { %v17960_v15 = vpop.f32.mrf.mxu1 }
 0x7a1   : > { %21509 = vst [vmem:[#allocation199_spill] sm:$0xff] %v17960_v15  ;;  %v8347_v31 = vpop.f32.mrf.mxu2  ;;  %v8376_v4 = vpop.f32.mrf.mxu3 }
 0x7a2   : > { %v17971_v24 = vadd.f32 %v8347_v31, %v17399_v36  ;;  %v17974_v6 = vadd.f32 %v8376_v4, %v17402_v30  ;;  %v17976_v61 = vpop.f32.mrf.mxu0  ;;  %11511 = vmatmul.msk.f32.gmra.mxu0 %vm312_vm2, %v21518_v35  ;;  %11516 = vmatmul.msk.f32.gmra.mxu1 %vm312_vm2, %v21519_v38  ;;  %v21527_v38 = vld [vmem:[#allocation324_spill] sm:$0xff] }
 0x7a3   : > { %21516 = vst [vmem:[#allocation169_spill] sm:$0xff] %v17976_v61  ;;  %11521 = vmatmul.msk.f32.gmra.mxu2 %vm312_vm2, %v21520_v1  ;;  %v21528_v1 = vld [vmem:[#allocation367_spill] sm:$0xff]  ;;  %v21603_v61 = vld [vmem:[#allocation105_spill] sm:$0xff] }
 0x7a4   : > { %21514 = vst [vmem:[#allocation573_spill] sm:$0xff] %v17971_v24  ;;  %11526 = vmatmul.msk.f32.gmra.mxu3 %vm312_vm2, %v21521_v55  ;;  %v21526_v24 = vld [vmem:[#allocation323_spill] sm:$0xff] }
 0x7a5   : > { %21515 = vst [vmem:[#allocation574_spill] sm:$0xff] %v17974_v6 }
 0x7a8   : > { %v17978_v42 = vpop.f32.mrf.mxu1 }
 0x7a9   : > { %21517 = vst [vmem:[#allocation170_spill] sm:$0xff] %v17978_v42  ;;  %v8350_v36 = vpop.f32.mrf.mxu2  ;;  %v8379_v31 = vpop.f32.mrf.mxu3  ;;  %v21601_v42 = vld [vmem:[#allocation98_spill] sm:$0xff] }
 0x7aa   : > { %v17989_v30 = vadd.f32 %v8350_v36, %v17417_v32  ;;  %v17992_v4 = vadd.f32 %v8379_v31, %v17420_v34  ;;  %v17994_v6 = vpop.f32.mrf.mxu0  ;;  %11528 = vmatmul.msk.f32.vlgmr.msra.gmra.mxu0 %vm312_vm2, %v21526_v24  ;;  %11533 = vmatmul.msk.f32.vlgmr.msra.gmra.mxu1 %vm312_vm2, %v21527_v38  ;;  %v21529_v32 = vld [vmem:[#allocation370_spill] sm:$0xff] }
 0x7ab   : > { %21524 = vst [vmem:[#allocation360_spill] sm:$0xff] %v17994_v6  ;;  %11567 = vmatpush.msk.msra.mxu0 %vm321_vm0, %v17680_v49  ;;  %11538 = vmatmul.msk.f32.vlgmr.msra.gmra.mxu2 %vm312_vm2, %v21528_v1  ;;  %v21534_v1 = vld [vmem:[#allocation335_spill] sm:$0xff] }
 0x7ac   : > { %21522 = vst [vmem:[#allocation209_spill] sm:$0xff] %v17989_v30  ;;  %11543 = vmatmul.msk.f32.vlgmr.msra.gmra.mxu3 %vm312_vm2, %v21529_v32  ;;  %11577 = vmatpush.msk.msra.mxu2 %vm321_vm0, %v17680_v49  ;;  %v21535_v32 = vld [vmem:[#allocation336_spill] sm:$0xff]  ;;  %v21537_v30 = vld [vmem:[#allocation382_spill] sm:$0xff] }
 0x7ad   : > { %21523 = vst [vmem:[#allocation212_spill] sm:$0xff] %v17992_v4  ;;  %11582 = vmatpush.msk.msra.mxu3 %vm321_vm0, %v17680_v49  ;;  %11572 = vmatpush.msk.msra.mxu1 %vm321_vm0, %v17680_v49  ;;  %v21536_v4 = vld [vmem:[#allocation379_spill] sm:$0xff] }
 0x7b0   : > { %v17996_v35 = vpop.f32.mrf.mxu1 }
 0x7b1   : > { %21525 = vst [vmem:[#allocation161_spill] sm:$0xff] %v17996_v35  ;;  %v8457_v34 = vpop.f32.mrf.mxu2  ;;  %v8486_v24 = vpop.f32.mrf.mxu3 }
 0x7b2   : > { %v18015_v55 = vadd.f32 %v8457_v34, %v17443_v18  ;;  %v18018_v36 = vadd.f32 %v8486_v24, %v17446_v0  ;;  %v18020_v31 = vpop.f32.mrf.mxu0  ;;  %11529 = vmatmul.msk.f32.gmra.mxu0 %vm312_vm2, %v21534_v1  ;;  %11534 = vmatmul.msk.f32.gmra.mxu1 %vm312_vm2, %v21535_v32  ;;  %v21543_v32 = vld [vmem:[#allocation352_spill] sm:$0xff] }
 0x7b3   : > { %21532 = vst [vmem:[#allocation205_spill] sm:$0xff] %v18020_v31  ;;  %11539 = vmatmul.msk.f32.gmra.mxu2 %vm312_vm2, %v21536_v4  ;;  %v21544_v4 = vld [vmem:[#allocation395_spill] sm:$0xff] }
 0x7b4   : > { %21530 = vst [vmem:[#allocation162_spill] sm:$0xff] %v18015_v55  ;;  %11544 = vmatmul.msk.f32.gmra.mxu3 %vm312_vm2, %v21537_v30  ;;  %v21542_v55 = vld [vmem:[#allocation351_spill] sm:$0xff]  ;;  %v21545_v30 = vld [vmem:[#allocation398_spill] sm:$0xff] }
 0x7b5   : > { %21531 = vst [vmem:[#allocation204_spill] sm:$0xff] %v18018_v36 }
 0x7b8   : > { %v18022_v38 = vpop.f32.mrf.mxu1 }
 0x7b9   : > { %21533 = vst [vmem:[#allocation189_spill] sm:$0xff] %v18022_v38  ;;  %v8460_v18 = vpop.f32.mrf.mxu2  ;;  %v8489_v34 = vpop.f32.mrf.mxu3  ;;  %v21581_v38 = vld [vmem:[#allocation87_spill] sm:$0xff] }
 0x7ba   : > { %v18033_v0 = vadd.f32 %v8460_v18, %v17461_v11  ;;  %v18036_v24 = vadd.f32 %v8489_v34, %v17464_v29  ;;  %v18038_v36 = vpop.f32.mrf.mxu0  ;;  %11530 = vmatmul.msk.f32.gmra.mxu0 %vm312_vm2, %v21542_v55  ;;  %11535 = vmatmul.msk.f32.gmra.mxu1 %vm312_vm2, %v21543_v32  ;;  %v21551_v32 = vld [vmem:[#allocation344_spill] sm:$0xff] }
 0x7bb   : > { %21540 = vst [vmem:[#allocation516_spill] sm:$0xff] %v18038_v36  ;;  %11540 = vmatmul.msk.f32.gmra.mxu2 %vm312_vm2, %v21544_v4  ;;  %v21552_v4 = vld [vmem:[#allocation386_spill] sm:$0xff]  ;;  %v21580_v36 = vld [vmem:[#allocation119_spill] sm:$0xff] }
 0x7bc   : > { %21538 = vst [vmem:[#allocation190_spill] sm:$0xff] %v18033_v0  ;;  %11545 = vmatmul.msk.f32.gmra.mxu3 %vm312_vm2, %v21545_v30  ;;  %v21550_v0 = vld [vmem:[#allocation342_spill] sm:$0xff]  ;;  %v21553_v30 = vld [vmem:[#allocation388_spill] sm:$0xff] }
 0x7bd   : > { %21539 = vst [vmem:[#allocation100_spill] sm:$0xff] %v18036_v24 }
 0x7c0   : > { %v18040_v1 = vpop.f32.mrf.mxu1 }
 0x7c1   : > { %21541 = vst [vmem:[#allocation200_spill] sm:$0xff] %v18040_v1  ;;  %v8463_v11 = vpop.f32.mrf.mxu2  ;;  %v8492_v18 = vpop.f32.mrf.mxu3 }
 0x7c2   : > { %v18051_v29 = vadd.f32 %v8463_v11, %v17479_v28  ;;  %v18054_v34 = vadd.f32 %v8492_v18, %v17482_v5  ;;  %v18056_v24 = vpop.f32.mrf.mxu0  ;;  %11531 = vmatmul.msk.f32.gmra.mxu0 %vm312_vm2, %v21550_v0  ;;  %11536 = vmatmul.msk.f32.gmra.mxu1 %vm312_vm2, %v21551_v32  ;;  %v21559_v32 = vld [vmem:[#allocation372_spill] sm:$0xff] }
 0x7c3   : > { %21548 = vst [vmem:[#allocation517_spill] sm:$0xff] %v18056_v24  ;;  %11541 = vmatmul.msk.f32.gmra.mxu2 %vm312_vm2, %v21552_v4  ;;  %v21560_v4 = vld [vmem:[#allocation415_spill] sm:$0xff]  ;;  %v21579_v24 = vld [vmem:[#allocation85_spill] sm:$0xff] }
 0x7c4   : > { %21546 = vst [vmem:[#allocation201_spill] sm:$0xff] %v18051_v29  ;;  %11546 = vmatmul.msk.f32.gmra.mxu3 %vm312_vm2, %v21553_v30  ;;  %v21558_v29 = vld [vmem:[#allocation371_spill] sm:$0xff] }
 0x7c5   : > { %21547 = vst [vmem:[#allocation412_spill] sm:$0xff] %v18054_v34 }
 0x7c8   : > { %v18058_v55 = vpop.f32.mrf.mxu1 }
 0x7c9   : > { %21549 = vst [vmem:[#allocation582_spill] sm:$0xff] %v18058_v55  ;;  %v8466_v28 = vpop.f32.mrf.mxu2  ;;  %v8495_v11 = vpop.f32.mrf.mxu3 }
 0x7ca   : > { %v18069_v5 = vadd.f32 %v8466_v28, %v17497_v33  ;;  %v18072_v18 = vadd.f32 %v8495_v11, %v17500_v50  ;;  %v18074_v34 = vpop.f32.mrf.mxu0  ;;  %11548 = vmatmul.msk.f32.vlgmr.msrb.gmra.mxu0 %vm312_vm2, %v21558_v29  ;;  %11553 = vmatmul.msk.f32.vlgmr.msrb.gmra.mxu1 %vm312_vm2, %v21559_v32  ;;  %v21561_v33 = vld [vmem:[#allocation418_spill] sm:$0xff] }
 0x7cb   : > { %21556 = vst [vmem:[#allocation123_spill] sm:$0xff] %v18074_v34  ;;  %11587 = vmatpush.msk.msrb.mxu0 %vm321_vm0, %v17680_v49  ;;  %11558 = vmatmul.msk.f32.vlgmr.msrb.gmra.mxu2 %vm312_vm2, %v21560_v4  ;;  %v21566_v4 = vld [vmem:[#allocation383_spill] sm:$0xff] }
 0x7cc   : > { %21554 = vst [vmem:[#allocation213_spill] sm:$0xff] %v18069_v5  ;;  %11563 = vmatmul.msk.f32.vlgmr.msrb.gmra.mxu3 %vm312_vm2, %v21561_v33  ;;  %11597 = vmatpush.msk.msrb.mxu2 %vm321_vm0, %v17680_v49  ;;  %v21567_v33 = vld [vmem:[#allocation384_spill] sm:$0xff]  ;;  %v21569_v5 = vld [vmem:[#allocation427_spill] sm:$0xff] }
 0x7cd   : > { %21555 = vst [vmem:[#allocation214_spill] sm:$0xff] %v18072_v18  ;;  %11602 = vmatpush.msk.msrb.mxu3 %vm321_vm0, %v17680_v49  ;;  %11592 = vmatpush.msk.msrb.mxu1 %vm321_vm0, %v17680_v49  ;;  %v21568_v18 = vld [vmem:[#allocation99_spill] sm:$0xff] }
 0x7ce   : > { %v21577_v34 = vld [vmem:[#allocation83_spill] sm:$0xff] }
 0x7d0   : > { %v18076_v0 = vpop.f32.mrf.mxu1 }
 0x7d1   : > { %21557 = vst [vmem:[#allocation206_spill] sm:$0xff] %v18076_v0  ;;  %v8573_v50 = vpop.f32.mrf.mxu2  ;;  %v8617_v29 = vpop.f32.mrf.mxu3 }
 0x7d2   : > { %v18095_v30 = vadd.f32 %v8573_v50, %v17523_v46  ;;  %v18098_v28 = vadd.f32 %v8617_v29, %v17526_v3  ;;  %v18100_v11 = vpop.f32.mrf.mxu0  ;;  %11549 = vmatmul.msk.f32.gmra.mxu0 %vm312_vm2, %v21566_v4  ;;  %11554 = vmatmul.msk.f32.gmra.mxu1 %vm312_vm2, %v21567_v33  ;;  %v21570_v46 = vld [vmem:[#allocation89_spill] sm:$0xff]  ;;  %v21571_v50 = vld [vmem:[#allocation71_spill] sm:$0xff]  ;;  %v21578_v33 = vld [vmem:[#allocation118_spill] sm:$0xff] }
 0x7d3   : > { %21564 = vst [vmem:[#allocation525_spill] sm:$0xff] %v18100_v11  ;;  %11559 = vmatmul.msk.f32.gmra.mxu2 %vm312_vm2, %v21568_v18  ;;  %v1679_v3 = vadd.f32 %v21571_v50, %v21570_v46  ;;  %v21572_v29 = vld [vmem:[#allocation91_spill] sm:$0xff]  ;;  %v21574_v11 = vld [vmem:[#allocation102_spill] sm:$0xff]  ;;  %v18126_v18 = vadd.f32 %v21579_v24, %v21578_v33  ;;  %v18130_v46 = vadd.f32 %v21581_v38, %v21580_v36  ;;  %v21582_v50 = vld [vmem:[#allocation125_spill] sm:$0xff] }
 0x7d4   : > { %21562 = vst [vmem:[#allocation207_spill] sm:$0xff] %v18095_v30  ;;  %11564 = vmatmul.msk.f32.gmra.mxu3 %vm312_vm2, %v21569_v5  ;;  %v21576_v4 = vld [vmem:[#allocation103_spill] sm:$0xff]  ;;  %v21589_v33 = vld [vmem:[#allocation84_spill] sm:$0xff]  ;;  %v21590_v36 = vld [vmem:[#allocation138_spill] sm:$0xff] }
 0x7d5   : > { %21563 = vst [vmem:[#allocation422_spill] sm:$0xff] %v18098_v28  ;;  %v21573_v28 = vld [vmem:[#allocation72_spill] sm:$0xff]  ;;  %v18122_v55 = vadd.f32 %v21577_v34, %v21576_v4  ;;  %v21588_v4 = vld [vmem:[#allocation126_spill] sm:$0xff] }
 0x7d6   : > { %v1716_v30 = vadd.f32 %v21573_v28, %v21572_v29  ;;  %v21583_v28 = vld [vmem:[#allocation82_spill] sm:$0xff]  ;;  %v18148_v31 = vadd.f32 %v21589_v33, %v21588_v4  ;;  %v21600_v33 = vld [vmem:[#allocation167_spill] sm:$0xff] }
 0x7d7   : > { %v18134_v29 = vadd.f32 %v21583_v28, %v21582_v50  ;;  %v21591_v38 = vld [vmem:[#allocation86_spill] sm:$0xff]  ;;  %v21592_v50 = vld [vmem:[#allocation139_spill] sm:$0xff]  ;;  %v21593_v28 = vld [vmem:[#allocation88_spill] sm:$0xff] }
 0x7d8   : > { %v18102_v32 = vpop.f32.mrf.mxu1  ;;  %v18152_v35 = vadd.f32 %v21591_v38, %v21590_v36  ;;  %v18156_v6 = vadd.f32 %v21593_v28, %v21592_v50  ;;  %v18172_v36 = vadd.f32 %v21601_v42, %v21600_v33  ;;  %v21602_v38 = vld [vmem:[#allocation173_spill] sm:$0xff]  ;;  %v21604_v28 = vld [vmem:[#allocation399_spill] sm:$0xff]  ;;  %v3929_v63 = vadd.f32 %v21627_v10, %v1716_v30  ;;  %v21641_v10 = vld [vmem:[#allocation222_spill] sm:$0xff] }
 0x7d9   : > { %21565 = vst [vmem:[#allocation144_spill] sm:$0xff] %v18102_v32  ;;  %v21575_v32 = vld [vmem:[#allocation81_spill] sm:$0xff]  ;;  %v8576_v1 = vpop.f32.mrf.mxu2  ;;  %v8620_v5 = vpop.f32.mrf.mxu3  ;;  %v18176_v50 = vadd.f32 %v21603_v61, %v21602_v38  ;;  %v21612_v33 = vld [vmem:[#allocation127_spill] sm:$0xff]  ;;  %v21613_v61 = vld [vmem:[#allocation400_spill] sm:$0xff] }
 0x7da   : > { %v18118_v0 = vadd.f32 %v21575_v32, %v21574_v11  ;;  %v18137_v11 = vadd.f32 %v8576_v1, %v17541_v45  ;;  %v18140_v34 = vadd.f32 %v8620_v5, %v17544_v58  ;;  %v18142_v32 = vpop.f32.mrf.mxu0  ;;  %v21594_v45 = vld [vmem:[#allocation150_spill] sm:$0xff]  ;;  %v21595_v1 = vld [vmem:[#allocation93_spill] sm:$0xff]  ;;  %v21596_v5 = vld [vmem:[#allocation151_spill] sm:$0xff]  ;;  %11550 = vmatmul.msk.f32.gmra.mxu0 %vm312_vm2, %v21604_v28  ;;  %11555 = vmatmul.msk.f32.gmra.mxu1 %vm312_vm2, %v21613_v61 }
 0x7db   : > { %21586 = vst [vmem:[#allocation274_spill] sm:$0xff] %v18142_v32  ;;  %v18160_v58 = vadd.f32 %v21595_v1, %v21594_v45  ;;  %v21599_v32 = vld [vmem:[#allocation97_spill] sm:$0xff]  ;;  %v21605_v45 = vld [vmem:[#allocation174_spill] sm:$0xff]  ;;  %v21606_v1 = vld [vmem:[#allocation108_spill] sm:$0xff] }
 0x7dc   : > { %21584 = vst [vmem:[#allocation145_spill] sm:$0xff] %v18137_v11  ;;  %v18182_v15 = vadd.f32 %v21606_v1, %v21605_v45  ;;  %v21611_v42 = vld [vmem:[#allocation197_spill] sm:$0xff]  ;;  %v21614_v38 = vld [vmem:[#allocation198_spill] sm:$0xff]  ;;  %v21617_v1 = vld [vmem:[#allocation131_spill] sm:$0xff] }
 0x7dd   : > { %21585 = vst [vmem:[#allocation271_spill] sm:$0xff] %v18140_v34  ;;  %v21597_v34 = vld [vmem:[#allocation96_spill] sm:$0xff]  ;;  %v18194_v25 = vadd.f32 %v21612_v33, %v21611_v42  ;;  %v21615_v28 = vld [vmem:[#allocation129_spill] sm:$0xff]  ;;  %v21616_v45 = vld [vmem:[#allocation210_spill] sm:$0xff] }
 0x7de   : > { %v18164_v11 = vadd.f32 %v21597_v34, %v21596_v5  ;;  %v21607_v34 = vld [vmem:[#allocation185_spill] sm:$0xff]  ;;  %v18200_v2 = vadd.f32 %v21615_v28, %v21614_v38  ;;  %v18204_v48 = vadd.f32 %v21617_v1, %v21616_v45  ;;  %v21622_v42 = vld [vmem:[#allocation215_spill] sm:$0xff]  ;;  %v21623_v33 = vld [vmem:[#allocation128_spill] sm:$0xff] }
 0x7df   : > { %v21608_v5 = vld [vmem:[#allocation109_spill] sm:$0xff]  ;;  %v18216_v61 = vadd.f32 %v21623_v33, %v21622_v42  ;;  %v21624_v38 = vld [vmem:[#allocation216_spill] sm:$0xff]  ;;  %v21625_v28 = vld [vmem:[#allocation130_spill] sm:$0xff] }
 0x7e0   : > { %v18144_v24 = vpop.f32.mrf.mxu1  ;;  %v18186_v13 = vadd.f32 %v21608_v5, %v21607_v34  ;;  %v21618_v34 = vld [vmem:[#allocation211_spill] sm:$0xff]  ;;  %v21619_v5 = vld [vmem:[#allocation133_spill] sm:$0xff]  ;;  %v18220_v16 = vadd.f32 %v21625_v28, %v21624_v38  ;;  %v21626_v45 = vld [vmem:[#allocation416_spill] sm:$0xff] }
 0x7e1   : > { %21587 = vst [vmem:[#allocation157_spill] sm:$0xff] %v18144_v24  ;;  %v21598_v24 = vld [vmem:[#allocation166_spill] sm:$0xff]  ;;  %v18208_v53 = vadd.f32 %v21619_v5, %v21618_v34  ;;  %v3925_v1 = vadd.f32 %v21626_v45, %v1679_v3  ;;  %v21628_v34 = vld [vmem:[#allocation217_spill] sm:$0xff]  ;;  %v21629_v5 = vld [vmem:[#allocation132_spill] sm:$0xff]  ;;  %v8623_v26 = vpop.f32.mrf.mxu3 }
 0x7e2   : > { %v18168_v4 = vadd.f32 %v21599_v32, %v21598_v24  ;;  %v21609_v32 = vld [vmem:[#allocation186_spill] sm:$0xff]  ;;  %v18226_v56 = vadd.f32 %v21629_v5, %v21628_v34  ;;  %v21636_v33 = vld [vmem:[#allocation220_spill] sm:$0xff]  ;;  %v21639_v28 = vld [vmem:[#allocation221_spill] sm:$0xff] }
 0x7e3   : > { %v21610_v24 = vld [vmem:[#allocation110_spill] sm:$0xff]  ;;  %v18238_v38 = vadd.f32 %v21637_v27, %v21636_v33  ;;  %v21640_v3 = vld [vmem:[#allocation181_spill] sm:$0xff]  ;;  %v21642_v30 = vld [vmem:[#allocation188_spill] sm:$0xff] }
 0x7e4   : > { %v18190_v37 = vadd.f32 %v21610_v24, %v21609_v32  ;;  %v21620_v32 = vld [vmem:[#allocation115_spill] sm:$0xff]  ;;  %v21621_v24 = vld [vmem:[#allocation438_spill] sm:$0xff]  ;;  %v18242_v45 = vadd.f32 %v21640_v3, %v21639_v28  ;;  %v18246_v34 = vadd.f32 %v21642_v30, %v21641_v10  ;;  %v18262_v3 = vadd.f32 %v8623_v26, %v17562_v44  ;;  %v18264_v10 = vpop.f32.mrf.mxu0  ;;  %v21656_v30 = vld [vmem:[#allocation272_spill] sm:$0xff] }
 0x7e5   : > { %11560 = vmatmul.msk.f32.gmra.mxu2 %vm312_vm2, %v21620_v32  ;;  %11565 = vmatmul.msk.f32.gmra.mxu3 %vm312_vm2, %v21621_v24  ;;  %v21630_v32 = vld [vmem:[#allocation218_spill] sm:$0xff]  ;;  %v21633_v24 = vld [vmem:[#allocation219_spill] sm:$0xff]  ;;  %21638 = vst [vmem:[#allocation286_spill] sm:$0xff] %v18238_v38 }
 0x7e6   : > { %v18230_v57 = vadd.f32 %v21631_v8, %v21630_v32  ;;  %v18234_v42 = vadd.f32 %v21634_v51, %v21633_v24  ;;  %v21643_v5 = vld [vmem:[#allocation279_spill] sm:$0xff]  ;;  %v21644_v8 = vld [vmem:[#allocation280_spill] sm:$0xff]  ;;  %v21645_v51 = vld [vmem:[#allocation225_spill] sm:$0xff]  ;;  %21652 = vst [vmem:[#allocation302_spill] sm:$0xff] %v18262_v3 }
 0x7e7   : > { %v4864_v17 = vadd.f32 %v21643_v5, %v3925_v1  ;;  %v4868_v32 = vadd.f32 %v21644_v8, %v3929_v63  ;;  %v21646_v24 = vld [vmem:[#allocation261_spill] sm:$0xff]  ;;  %v21648_v27 = vld [vmem:[#allocation226_spill] sm:$0xff]  ;;  %21653 = vst [vmem:[#allocation176_spill] sm:$0xff] %v18264_v10 }
 0x7e8   : > { %21632 = vst [vmem:[#allocation158_spill] sm:$0xff] %v18230_v57  ;;  %v8579_v57 = vpop.f32.mrf.mxu2  ;;  %v21649_v33 = vld [vmem:[#allocation262_spill] sm:$0xff]  ;;  %v18266_v1 = vpop.f32.mrf.mxu1  ;;  %v21655_v63 = vld [vmem:[#allocation229_spill] sm:$0xff] }
 0x7e9   : > { %21635 = vst [vmem:[#allocation283_spill] sm:$0xff] %v18234_v42  ;;  %v18252_v42 = vadd.f32 %v21646_v24, %v21645_v51  ;;  %v18256_v38 = vadd.f32 %v21649_v33, %v21648_v27  ;;  %v18259_v28 = vadd.f32 %v8579_v57, %v17559_v52  ;;  %v18270_v5 = vadd.f32 %v21656_v30, %v21655_v63  ;;  %v21658_v8 = vld [vmem:[#allocation230_spill] sm:$0xff]  ;;  %v21659_v51 = vld [vmem:[#allocation273_spill] sm:$0xff] }
 0x7ea   : > { %21654 = vst [vmem:[#allocation180_spill] sm:$0xff] %v18266_v1  ;;  %v18274_v24 = vadd.f32 %v21659_v51, %v21658_v8  ;;  %v21660_v27 = vld [vmem:[#allocation374_spill] sm:$0xff]  ;;  %v21662_v57 = vld [vmem:[#allocation233_spill] sm:$0xff] }
 0x7eb   : > { %21647 = vst [vmem:[#allocation192_spill] sm:$0xff] %v18252_v42  ;;  %v5806_v33 = vadd.f32 %v21660_v27, %v4864_v17  ;;  %v21665_v26 = vld [vmem:[#allocation234_spill] sm:$0xff]  ;;  %v21666_v3 = vld [vmem:[#allocation285_spill] sm:$0xff]  ;;  %v21669_v42 = vld [vmem:[#allocation300_spill] sm:$0xff] }
 0x7ec   : > { %21650 = vst [vmem:[#allocation193_spill] sm:$0xff] %v18256_v38  ;;  %v21661_v38 = vld [vmem:[#allocation375_spill] sm:$0xff]  ;;  %v18284_v10 = vadd.f32 %v21666_v3, %v21665_v26  ;;  %v21668_v1 = vld [vmem:[#allocation237_spill] sm:$0xff]  ;;  %v21671_v30 = vld [vmem:[#allocation238_spill] sm:$0xff] }
 0x7ed   : > { %21651 = vst [vmem:[#allocation299_spill] sm:$0xff] %v18259_v28  ;;  %v5810_v52 = vadd.f32 %v21661_v38, %v4868_v32  ;;  %v21663_v28 = vld [vmem:[#allocation284_spill] sm:$0xff]  ;;  %v18288_v63 = vadd.f32 %v21669_v42, %v21668_v1  ;;  %v21674_v51 = vld [vmem:[#allocation390_spill] sm:$0xff]  ;;  %v21675_v17 = vld [vmem:[#allocation241_spill] sm:$0xff] }
 0x7ee   : > { %21657 = vst [vmem:[#allocation290_spill] sm:$0xff] %v18270_v5  ;;  %v18280_v44 = vadd.f32 %v21663_v28, %v21662_v57  ;;  %v21672_v5 = vld [vmem:[#allocation301_spill] sm:$0xff]  ;;  %11551 = vmatmul.msk.f32.gmra.mxu0 %vm312_vm2, %v21674_v51  ;;  %v21676_v38 = vld [vmem:[#allocation307_spill] sm:$0xff]  ;;  %v21677_v28 = vld [vmem:[#allocation242_spill] sm:$0xff] }
 0x7ef   : > { %21667 = vst [vmem:[#allocation275_spill] sm:$0xff] %v18284_v10  ;;  %v18292_v8 = vadd.f32 %v21672_v5, %v21671_v30  ;;  %v18298_v32 = vadd.f32 %v21676_v38, %v21675_v17  ;;  %v21678_v27 = vld [vmem:[#allocation308_spill] sm:$0xff]  ;;  %v21680_v3 = vld [vmem:[#allocation9_spill] sm:$0xff]  ;;  %v21681_v10 = vld [vmem:[#allocation282_spill] sm:$0xff] }
 0x7f0   : > { %21664 = vst [vmem:[#allocation292_spill] sm:$0xff] %v18280_v44  ;;  %v18302_v57 = vadd.f32 %v21678_v27, %v21677_v28  ;;  %v6748_v26 = vadd.f32 %v21680_v3, %v5806_v33  ;;  %v6752_v42 = vadd.f32 %v21681_v10, %v5810_v52  ;;  %v21682_v1 = vld [vmem:[#allocation392_spill] sm:$0xff]  ;;  %v21683_v5 = vld [vmem:[#allocation245_spill] sm:$0xff]  ;;  %v21686_v51 = vld [vmem:[#allocation246_spill] sm:$0xff] }
 0x7f1   : > { %21670 = vst [vmem:[#allocation276_spill] sm:$0xff] %v18288_v63  ;;  %11556 = vmatmul.msk.f32.gmra.mxu1 %vm312_vm2, %v21682_v1  ;;  %v21684_v30 = vld [vmem:[#allocation320_spill] sm:$0xff]  ;;  %v21687_v63 = vld [vmem:[#allocation321_spill] sm:$0xff]  ;;  %v21690_v28 = vld [vmem:[#allocation430_spill] sm:$0xff] }
 0x7f2   : > { %21673 = vst [vmem:[#allocation319_spill] sm:$0xff] %v18292_v8  ;;  %v18310_v8 = vadd.f32 %v21684_v30, %v21683_v5  ;;  %v18314_v44 = vadd.f32 %v21687_v63, %v21686_v51  ;;  %v21689_v17 = vld [vmem:[#allocation425_spill] sm:$0xff]  ;;  %11561 = vmatmul.msk.f32.gmra.mxu2 %vm312_vm2, %v21690_v28  ;;  %v21691_v33 = vld [vmem:[#allocation432_spill] sm:$0xff]  ;;  %v21692_v10 = vld [vmem:[#allocation426_spill] sm:$0xff] }
 0x7f3   : > { %21679 = vst [vmem:[#allocation322_spill] sm:$0xff] %v18302_v57  ;;  %v3926_v38 = vadd.f32 %v21689_v17, %v18118_v0  ;;  %11566 = vmatmul.msk.f32.gmra.mxu3 %vm312_vm2, %v21691_v33  ;;  %v3930_v52 = vadd.f32 %v21692_v10, %v18122_v55  ;;  %v21693_v27 = vld [vmem:[#allocation116_spill] sm:$0xff]  ;;  %v21694_v1 = vld [vmem:[#allocation561_spill] sm:$0xff]  ;;  %v21695_v30 = vld [vmem:[#allocation562_spill] sm:$0xff] }
 0x7f4   : > { %21685 = vst [vmem:[#allocation287_spill] sm:$0xff] %v18310_v8  ;;  %v3927_v3 = vadd.f32 %v21693_v27, %v18126_v18  ;;  %v7687_v5 = vadd.f32 %v21694_v1, %v6748_v26  ;;  %v7691_v63 = vadd.f32 %v21695_v30, %v6752_v42  ;;  %v21696_v51 = vld [vmem:[#allocation437_spill] sm:$0xff]  ;;  %v21698_v28 = vld [vmem:[#allocation442_spill] sm:$0xff]  ;;  %v21701_v26 = vld [vmem:[#allocation239_spill] sm:$0xff]  ;;  %v8582_v1 = vpop.f32.mrf.mxu2  ;;  %v8626_v30 = vpop.f32.mrf.mxu3 }
 0x7f5   : > { %21688 = vst [vmem:[#allocation288_spill] sm:$0xff] %v18314_v44  ;;  %v3931_v44 = vadd.f32 %v21696_v51, %v18130_v46  ;;  %v21697_v0 = vld [vmem:[#allocation441_spill] sm:$0xff]  ;;  %v18336_v33 = vadd.f32 %v21698_v28, %v18148_v31  ;;  %v4869_v27 = vadd.f32 %v21701_v26, %v3930_v52  ;;  %v21702_v31 = vld [vmem:[#allocation450_spill] sm:$0xff]  ;;  %v18357_v51 = vadd.f32 %v8582_v1, %v17577_v14  ;;  %v21708_v14 = vld [vmem:[#allocation164_spill] sm:$0xff] }
 0x7f6   : > { %v18332_v17 = vadd.f32 %v21697_v0, %v18134_v29  ;;  %v21699_v8 = vld [vmem:[#allocation325_spill] sm:$0xff]  ;;  %v8629_v42 = vadd.f32 %v17582_v60, %v7687_v5  ;;  %v8633_v46 = vadd.f32 %v17584_v62, %v7691_v63  ;;  %v18349_v29 = vld [vmem:[%s19373_s2] ss:$0 sm:$0xff]  ;;  %v8761_v62 = vpop.f32.mrf.mxu0  ;;  %v8790_v5 = vpop.f32.mrf.mxu1  ;;  %v21705_v63 = vld [vmem:[#allocation458_spill] sm:$0xff] }
 0x7f7   : > { %v4865_v55 = vadd.f32 %v21699_v8, %v3926_v38  ;;  %v21700_v10 = vld [vmem:[#allocation449_spill] sm:$0xff]  ;;  %v18353_v8 = vadd.f32 %v21702_v31, %v18156_v6  ;;  %v21703_v38 = vld [vmem:[#allocation376_spill] sm:$0xff]  ;;  %v18364_v0 = vadd.f32 %v21705_v63, %v18160_v58  ;;  %v21707_v6 = vld [vmem:[#allocation459_spill] sm:$0xff] }
 0x7f8   : > { %v18341_v18 = vadd.f32 %v21700_v10, %v18152_v35  ;;  %v21704_v52 = vld [vmem:[#allocation41_spill] sm:$0xff]  ;;  %v9571_v26 = vadd.f32 %v8761_v62, %v8629_v42  ;;  %v9575_v57 = vadd.f32 %v8790_v5, %v8633_v46  ;;  %v18369_v31 = vadd.f32 %v21707_v6, %v18164_v11  ;;  %v21709_v1 = vld [vmem:[#allocation470_spill] sm:$0xff]  ;;  %v21711_v58 = vld [vmem:[#allocation419_spill] sm:$0xff] }
 0x7f9   : > { %v5807_v35 = vadd.f32 %v21703_v38, %v4865_v55  ;;  %v18360_v60 = vadd.f32 %v8626_v30, %v21704_v52  ;;  %v21706_v28 = vld [vmem:[#allocation421_spill] sm:$0xff]  ;;  %v18373_v55 = vadd.f32 %v21708_v14, %v18168_v4  ;;  %v18377_v30 = vadd.f32 %v21709_v1, %v18172_v36  ;;  %v21710_v38 = vld [vmem:[#allocation268_spill] sm:$0xff]  ;;  %11568 = vmatmul.msk.f32.vlgmr.msra.gmra.mxu0 %vm312_vm2, %v21711_v58  ;;  %v21714_v4 = vld [vmem:[#allocation474_spill] sm:$0xff] }
 0x7fa   : > { %v5811_v10 = vadd.f32 %v21706_v28, %v4869_v27  ;;  %v21712_v27 = vld [vmem:[#allocation310_spill] sm:$0xff]  ;;  %v9687_v46 = vadd.f32 %v18349_v29, %v9571_v26  ;;  %v9691_v11 = vadd.f32 %v18349_v29, %v9575_v57  ;;  %v21713_v62 = vld [vmem:[#allocation420_spill] sm:$0xff]  ;;  %11607 = vmatpush.msk.msra.mxu0 %vm321_vm0, %v17680_v49  ;;  %v18391_v36 = vadd.f32 %v21714_v4, %v18176_v50  ;;  %v21716_v63 = vld [vmem:[#allocation183_spill] sm:$0xff] }
 0x7fb   : > { %v6749_v52 = vadd.f32 %v21710_v38, %v5807_v35  ;;  %11573 = vmatmul.msk.f32.vlgmr.msra.gmra.mxu1 %vm312_vm2, %v21713_v62  ;;  %v21715_v35 = vld [vmem:[#allocation475_spill] sm:$0xff]  ;;  %v18399_v28 = vadd.f32 %v21716_v63, %v18186_v13  ;;  %v21720_v14 = vld [vmem:[#allocation564_spill] sm:$0xff]  ;;  %v21721_v13 = vld [vmem:[#allocation482_spill] sm:$0xff] }
 0x7fc   : > { %v6753_v42 = vadd.f32 %v21712_v27, %v5811_v10  ;;  %v18395_v5 = vadd.f32 %v21715_v35, %v18182_v15  ;;  %v21717_v57 = vld [vmem:[#allocation135_spill] sm:$0xff]  ;;  %v9799_v1 = vmax.f32 %v9687_v46, 0.0  ;;  %v9803_v38 = vmax.f32 %v9691_v11, 0.0  ;;  %v21722_v58 = vld [vmem:[#allocation489_spill] sm:$0xff]  ;;  %v21724_v4 = vld [vmem:[#allocation240_spill] sm:$0xff]  ;;  %11612 = vmatpush.msk.msra.mxu1 %vm321_vm0, %v17680_v49  ;;  %v8819_v63 = vpop.f32.mrf.mxu2 }
 0x7fd   : > { %11578 = vmatmul.msk.f32.vlgmr.msra.gmra.mxu2 %vm312_vm2, %v21717_v57  ;;  %v21718_v10 = vld [vmem:[#allocation451_spill] sm:$0xff]  ;;  %v18413_v15 = vadd.f32 %v21721_v13, %v18190_v37  ;;  %v18417_v27 = vadd.f32 %v21722_v58, %v18194_v25  ;;  %v21723_v62 = vld [vmem:[#allocation305_spill] sm:$0xff]  ;;  %v8848_v57 = vpop.f32.mrf.mxu3 }
 0x7fe   : > { %11583 = vmatmul.msk.f32.vlgmr.msra.gmra.mxu3 %vm312_vm2, %v21718_v10  ;;  %v21719_v26 = vld [vmem:[#allocation563_spill] sm:$0xff]  ;;  %v7692_v50 = vadd.f32 %v21720_v14, %v6753_v42  ;;  %11617 = vmatpush.msk.msra.mxu2 %vm321_vm0, %v17680_v49  ;;  %v4870_v42 = vadd.f32 %v21724_v4, %v3931_v44  ;;  %v9912_v35 = vsel %vm9911_vm4, %v9799_v1, -inf  ;;  %v9913_v37 = vsel %vm9911_vm4, %v9803_v38, -inf  ;;  %v21726_v14 = vld [vmem:[#allocation42_spill] sm:$0xff]  ;;  %v21727_v13 = vld [vmem:[#allocation33_spill] sm:$0xff]  ;;  %v8764_v58 = vpop.f32.mrf.mxu0 }
 0x7ff   : > { %v7688_v6 = vadd.f32 %v21719_v26, %v6749_v52  ;;  %11622 = vmatpush.msk.msra.mxu3 %vm321_vm0, %v17680_v49  ;;  %v4866_v52 = vadd.f32 %v21723_v62, %v3927_v3  ;;  %v21725_v10 = vld [vmem:[#allocation59_spill] sm:$0xff]  ;;  %v9914_v26 = vmax.f32 %v9912_v35, %v9913_v37  ;;  %v9579_v3 = vadd.f32 %v8819_v63, %v21726_v14  ;;  %v8793_v62 = vpop.f32.mrf.mxu1  ;;  %v21728_v49 = vld [vmem:[#allocation490_spill] sm:$0xff]  ;;  %v21730_v38 = vld [vmem:[#allocation236_spill] sm:$0xff] }
 0x800   : > { %v8634_v11 = vadd.f32 %v17610_v43, %v7692_v50  ;;  %v9583_v44 = vadd.f32 %v8848_v57, %v21727_v13  ;;  %v21729_v43 = vld [vmem:[#allocation401_spill] sm:$0xff]  ;;  %v21731_v37 = vld [vmem:[#allocation428_spill] sm:$0xff] }
 0x801   : > { %v8630_v46 = vadd.f32 %v17608_v12, %v7688_v6  ;;  %v5808_v25 = vadd.f32 %v21725_v10, %v4866_v52  ;;  %v18432_v12 = vadd.f32 %v21728_v49, %v18200_v2  ;;  %v5812_v6 = vadd.f32 %v21729_v43, %v4870_v42  ;;  %10081 = vst.msk [vmem:[#allocation2] sm:$0xff] %vm9911_vm4, %v9914_v26  ;;  %v21732_v63 = vld [vmem:[#allocation501_spill] sm:$0xff]  ;;  %v21740_v43 = vld [vmem:[#allocation566_spill] sm:$0xff] }
 0x802   : > { %v9576_v1 = vadd.f32 %v8793_v62, %v8634_v11  ;;  %v9695_v52 = vadd.f32 %v18349_v29, %v9579_v3  ;;  %v9699_v35 = vadd.f32 %v18349_v29, %v9583_v44  ;;  %11569 = vmatmul.msk.f32.gmra.mxu0 %vm312_vm2, %v21731_v37  ;;  %v18443_v57 = vadd.f32 %v21732_v63, %v18204_v48  ;;  %v21733_v2 = vld [vmem:[#allocation357_spill] sm:$0xff]  ;;  %v21738_v48 = vld [vmem:[#allocation460_spill] sm:$0xff]  ;;  %v21739_v62 = vld [vmem:[#allocation291_spill] sm:$0xff] }
 0x803   : > { %v9572_v50 = vadd.f32 %v8764_v58, %v8630_v46  ;;  %v6750_v4 = vadd.f32 %v21730_v38, %v5808_v25  ;;  %v6754_v10 = vadd.f32 %v21733_v2, %v5812_v6  ;;  %v21734_v11 = vld [vmem:[#allocation429_spill] sm:$0xff]  ;;  %v21735_v25 = vld [vmem:[#allocation306_spill] sm:$0xff]  ;;  %v21737_v58 = vld [vmem:[#allocation147_spill] sm:$0xff]  ;;  %v4871_v49 = vadd.f32 %v21739_v62, %v18336_v33 }
 0x804   : > { %v9692_v46 = vadd.f32 %v18349_v29, %v9576_v1  ;;  %11574 = vmatmul.msk.f32.gmra.mxu1 %vm312_vm2, %v21734_v11  ;;  %v4867_v26 = vadd.f32 %v21735_v25, %v18332_v17  ;;  %v21736_v14 = vld [vmem:[#allocation565_spill] sm:$0xff]  ;;  %v9807_v13 = vmax.f32 %v9695_v52, 0.0  ;;  %v9811_v44 = vmax.f32 %v9699_v35, 0.0  ;;  %v8822_v11 = vpop.f32.mrf.mxu2 }
 0x805   : > { %v9688_v42 = vadd.f32 %v18349_v29, %v9572_v50  ;;  %v7689_v3 = vadd.f32 %v21736_v14, %v6750_v4  ;;  %11579 = vmatmul.msk.f32.gmra.mxu2 %vm312_vm2, %v21737_v58  ;;  %v7693_v6 = vadd.f32 %v21740_v43, %v6754_v10  ;;  %v21741_v38 = vld [vmem:[#allocation293_spill] sm:$0xff]  ;;  %v8851_v10 = vpop.f32.mrf.mxu3  ;;  %v21743_v14 = vld [vmem:[#allocation34_spill] sm:$0xff] }
 0x806   : > { %11584 = vmatmul.msk.f32.gmra.mxu3 %vm312_vm2, %v21738_v48  ;;  %v9804_v1 = vmax.f32 %v9692_v46, 0.0  ;;  %v4880_v17 = vadd.f32 %v21741_v38, %v18341_v18  ;;  %v9925_v52 = vsel %vm9911_vm4, %v9807_v13, -inf  ;;  %v9926_v35 = vsel %vm9911_vm4, %v9811_v44, -inf  ;;  %v21744_v58 = vld [vmem:[#allocation57_spill] sm:$0xff]  ;;  %v21745_v44 = vld [vmem:[#allocation295_spill] sm:$0xff] }
 0x807   : > { %v9800_v50 = vmax.f32 %v9688_v42, 0.0  ;;  %v8631_v4 = vadd.f32 %v17626_v59, %v7689_v3  ;;  %v8635_v37 = vadd.f32 %v17628_v20, %v7693_v6  ;;  %v9927_v63 = vmax.f32 %v9925_v52, %v9926_v35  ;;  %v21742_v42 = vld [vmem:[#allocation62_spill] sm:$0xff]  ;;  %v8767_v3 = vpop.f32.mrf.mxu0  ;;  %v8796_v13 = vpop.f32.mrf.mxu1  ;;  %v21748_v52 = vld [vmem:[#allocation439_spill] sm:$0xff] }
 0x808   : > { %v9916_v33 = vsel %vm9911_vm4, %v9804_v1, -inf  ;;  %v5809_v46 = vadd.f32 %v21742_v42, %v4867_v26  ;;  %v9580_v18 = vadd.f32 %v8822_v11, %v21743_v14  ;;  %v9584_v59 = vadd.f32 %v8851_v10, %v21744_v58  ;;  %v21746_v20 = vld [vmem:[#allocation402_spill] sm:$0xff]  ;;  %v21753_v10 = vld [vmem:[#allocation567_spill] sm:$0xff] }
 0x809   : > { %v9915_v2 = vsel %vm9911_vm4, %v9800_v50, -inf  ;;  %v4884_v48 = vadd.f32 %v21745_v44, %v18353_v8  ;;  %v5813_v62 = vadd.f32 %v21746_v20, %v4871_v49  ;;  %10085 = vst.msk [vmem:[#allocation2 + $0x20] sm:$0xff] %vm9911_vm4, %v9927_v63  ;;  %v9573_v43 = vadd.f32 %v8767_v3, %v8631_v4  ;;  %v21747_v50 = vld [vmem:[#allocation248_spill] sm:$0xff]  ;;  %v21749_v8 = vld [vmem:[#allocation337_spill] sm:$0xff]  ;;  %v21750_v49 = vld [vmem:[#allocation358_spill] sm:$0xff] }
 0x80a   : > { %v9917_v25 = vmax.f32 %v9915_v2, %v9916_v33  ;;  %v9577_v6 = vadd.f32 %v8796_v13, %v8635_v37  ;;  %v6751_v1 = vadd.f32 %v21747_v50, %v5809_v46  ;;  %v9696_v26 = vadd.f32 %v18349_v29, %v9580_v18  ;;  %11570 = vmatmul.msk.f32.gmra.mxu0 %vm312_vm2, %v21748_v52  ;;  %v21751_v63 = vld [vmem:[#allocation440_spill] sm:$0xff]  ;;  %v21752_v33 = vld [vmem:[#allocation243_spill] sm:$0xff]  ;;  %v21756_v18 = vld [vmem:[#allocation317_spill] sm:$0xff] }
 0x80b   : > { %v9700_v38 = vadd.f32 %v18349_v29, %v9584_v59  ;;  %v4881_v35 = vadd.f32 %v21749_v8, %v18364_v0  ;;  %v6755_v2 = vadd.f32 %v21750_v49, %v5813_v62  ;;  %v9689_v4 = vadd.f32 %v18349_v29, %v9573_v43  ;;  %v21754_v14 = vld [vmem:[#allocation163_spill] sm:$0xff]  ;;  %v21757_v59 = vld [vmem:[#allocation568_spill] sm:$0xff] }
 0x80c   : > { %10082 = vst.msk [vmem:[#allocation2 + $0x8] sm:$0xff] %vm9911_vm4, %v9917_v25  ;;  %v9693_v37 = vadd.f32 %v18349_v29, %v9577_v6  ;;  %11575 = vmatmul.msk.f32.gmra.mxu1 %vm312_vm2, %v21751_v63  ;;  %v18490_v11 = vadd.f32 %v21752_v33, %v18369_v31  ;;  %v7690_v42 = vadd.f32 %v21753_v10, %v6751_v1  ;;  %v9808_v46 = vmax.f32 %v9696_v26, 0.0  ;;  %v21755_v0 = vld [vmem:[#allocation471_spill] sm:$0xff]  ;;  %v21759_v8 = vld [vmem:[#allocation244_spill] sm:$0xff]  ;;  %v21762_v10 = vld [vmem:[#allocation389_spill] sm:$0xff] }
 0x80d   : > { %v9812_v25 = vmax.f32 %v9700_v38, 0.0  ;;  %11580 = vmatmul.msk.f32.gmra.mxu2 %vm312_vm2, %v21754_v14  ;;  %v18499_v58 = vadd.f32 %v21756_v18, %v18373_v55  ;;  %v7694_v3 = vadd.f32 %v21757_v59, %v6755_v2  ;;  %v9801_v13 = vmax.f32 %v9689_v4, 0.0  ;;  %v21758_v44 = vld [vmem:[#allocation387_spill] sm:$0xff]  ;;  %v8825_v38 = vpop.f32.mrf.mxu2  ;;  %v8854_v52 = vpop.f32.mrf.mxu3  ;;  %v21760_v2 = vld [vmem:[#allocation58_spill] sm:$0xff]  ;;  %v21761_v4 = vld [vmem:[#allocation37_spill] sm:$0xff] }
 0x80e   : > { %11585 = vmatmul.msk.f32.gmra.mxu3 %vm312_vm2, %v21755_v0  ;;  %v9805_v31 = vmax.f32 %v9693_v37, 0.0  ;;  %v5822_v20 = vadd.f32 %v21758_v44, %v4880_v17  ;;  %v8632_v62 = vadd.f32 %v17644_v19, %v7690_v42  ;;  %v9928_v43 = vsel %vm9911_vm4, %v9808_v46, -inf  ;;  %v21763_v42 = vld [vmem:[#allocation141_spill] sm:$0xff]  ;;  %v21766_v44 = vld [vmem:[#allocation156_spill] sm:$0xff] }
 0x80f   : > { %v9929_v6 = vsel %vm9911_vm4, %v9812_v25, -inf  ;;  %v8636_v50 = vadd.f32 %v17646_v41, %v7694_v3  ;;  %v9918_v26 = vsel %vm9911_vm4, %v9801_v13, -inf  ;;  %v18512_v49 = vadd.f32 %v21759_v8, %v18377_v30  ;;  %v8770_v63 = vpop.f32.mrf.mxu0  ;;  %v8799_v33 = vpop.f32.mrf.mxu1  ;;  %v21764_v3 = vld [vmem:[#allocation434_spill] sm:$0xff] }
 0x810   : > { %v9930_v1 = vmax.f32 %v9928_v43, %v9929_v6  ;;  %v9919_v55 = vsel %vm9911_vm4, %v9805_v31, -inf  ;;  %v9581_v19 = vadd.f32 %v8825_v38, %v21760_v2  ;;  %v9585_v37 = vadd.f32 %v8854_v52, %v21761_v4  ;;  %v21765_v13 = vld [vmem:[#allocation318_spill] sm:$0xff]  ;;  %v21767_v6 = vld [vmem:[#allocation436_spill] sm:$0xff]  ;;  %v21769_v38 = vld [vmem:[#allocation463_spill] sm:$0xff] }
 0x811   : > { %v9920_v17 = vmax.f32 %v9918_v26, %v9919_v55  ;;  %v5826_v41 = vadd.f32 %v21762_v10, %v4884_v48  ;;  %v6764_v46 = vadd.f32 %v21763_v42, %v5822_v20  ;;  %v9574_v14 = vadd.f32 %v8770_v63, %v8632_v62  ;;  %v21771_v52 = vld [vmem:[#allocation391_spill] sm:$0xff] }
 0x812   : > { %10086 = vst.msk [vmem:[#allocation2 + $0x28] sm:$0xff] %vm9911_vm4, %v9930_v1  ;;  %v9578_v0 = vadd.f32 %v8799_v33, %v8636_v50  ;;  %v9697_v59 = vadd.f32 %v18349_v29, %v9581_v19  ;;  %v9701_v48 = vadd.f32 %v18349_v29, %v9585_v37  ;;  %11571 = vmatmul.msk.f32.gmra.mxu0 %vm312_vm2, %v21764_v3  ;;  %v21768_v50 = vld [vmem:[#allocation569_spill] sm:$0xff]  ;;  %v11863_v37 = vld [vmem:[%s11932_s19 + $0x3a0] sm:$0xff]  ;;  %v21773_v33 = vld [vmem:[#allocation66_spill] sm:$0xff] }
 0x813   : > { %v10137_v25 = vld [vmem:[#allocation2] ss:$2 sm:$0xff]  ;;  %v10193_v30 = vld [vmem:[#allocation2 + $0x1] ss:$2 sm:$0xff]  ;;  %10083 = vst.msk [vmem:[#allocation2 + $0x10] sm:$0xff] %vm9911_vm4, %v9920_v17  ;;  %v18531_v31 = vadd.f32 %v21765_v13, %v18391_v36  ;;  %v6768_v20 = vadd.f32 %v21766_v44, %v5826_v41  ;;  %v9690_v62 = vadd.f32 %v18349_v29, %v9574_v14  ;;  %v7703_v1 = vadd.f32 %v21768_v50, %v6764_v46  ;;  %v21770_v36 = vld [vmem:[#allocation465_spill] sm:$0xff] }
 0x814   : > { %v10248_v18 = vmax.f32 %v10137_v25, %v10193_v30  ;;  %v9694_v43 = vadd.f32 %v18349_v29, %v9578_v0  ;;  %11576 = vmatmul.msk.f32.gmra.mxu1 %vm312_vm2, %v21767_v6  ;;  %v9809_v26 = vmax.f32 %v9697_v59, 0.0  ;;  %v9813_v55 = vmax.f32 %v9701_v48, 0.0  ;;  %v21772_v17 = vld [vmem:[#allocation570_spill] sm:$0xff]  ;;  %v21774_v46 = vld [vmem:[#allocation47_spill] sm:$0xff]  ;;  %v18555_v59 = vld [vmem:[%s11932_s19 + $0x3a8] sm:$0xff] }
 0x815   : > { %11581 = vmatmul.msk.f32.gmra.mxu2 %vm312_vm2, %v21769_v38  ;;  %v5823_v8 = vadd.f32 %v21771_v52, %v4881_v35  ;;  %v7707_v2 = vadd.f32 %v21772_v17, %v6768_v20  ;;  %v9802_v19 = vmax.f32 %v9690_v62, 0.0  ;;  %v9527_v63 = vrot.slane %v11863_v37, 2  ;;  %v8828_v35 = vpop.f32.mrf.mxu2  ;;  %v21775_v20 = vld [vmem:[#allocation38_spill] sm:$0xff]  ;;  %v21778_v17 = vld [vmem:[#allocation191_spill] sm:$0xff]  ;;  %v21779_v37 = vld [vmem:[#allocation452_spill] sm:$0xff] }
 0x816   : > { %10276 = vst.msk [vmem:[%s18521_s15] sm:$0xff] %vm9911_vm4, %v10248_v18  ;;  %11586 = vmatmul.msk.f32.gmra.mxu3 %vm312_vm2, %v21770_v36  ;;  %v9806_v4 = vmax.f32 %v9694_v43, 0.0  ;;  %v8645_v10 = vadd.f32 %v21773_v33, %v7703_v1  ;;  %v9931_v41 = vsel %vm9911_vm4, %v9809_v26, -inf  ;;  %v9932_v42 = vsel %vm9911_vm4, %v9813_v55, -inf  ;;  %v8857_v18 = vpop.f32.mrf.mxu3  ;;  %v21776_v43 = vld [vmem:[#allocation65_spill] sm:$0xff]  ;;  %v21777_v26 = vld [vmem:[#allocation67_spill] sm:$0xff] }
 0x817   : > { %v8649_v25 = vadd.f32 %v21774_v46, %v7707_v2  ;;  %v9933_v30 = vmax.f32 %v9931_v41, %v9932_v42  ;;  %v9922_v14 = vsel %vm9921_vm5, %v9802_v19, -inf  ;;  %v9528_v48 = vrot.slane %v18555_v59, 2  ;;  %v8877_v50 = vpop.f32.mrf.mxu0  ;;  %v8906_v1 = vpop.f32.mrf.mxu1  ;;  %v21780_v33 = vld [vmem:[#allocation177_spill] sm:$0xff] }
 0x818   : > { %v9923_v0 = vsel %vm9921_vm5, %v9806_v4, -inf  ;;  %v9582_v62 = vadd.f32 %v8828_v35, %v21775_v20  ;;  %v9586_v6 = vadd.f32 %v8857_v18, %v21776_v43  ;;  %v5827_v55 = vadd.f32 %v21777_v26, %v18490_v11  ;;  %v21781_v42 = vld [vmem:[#allocation453_spill] sm:$0xff] }
 0x819   : > { %v10141_v3 = vld [vmem:[#allocation2 + $0x20] ss:$2 sm:$0xff]  ;;  %v10197_v13 = vld [vmem:[#allocation2 + $0x21] ss:$2 sm:$0xff]  ;;  %v9924_v44 = vmax.f32 %v9922_v14, %v9923_v0  ;;  %10087 = vst.msk [vmem:[#allocation2 + $0x30] sm:$0xff] %vm9911_vm4, %v9933_v30  ;;  %v9587_v36 = vadd.f32 %v8877_v50, %v8645_v10  ;;  %v9591_v52 = vadd.f32 %v8906_v1, %v8649_v25  ;;  %v6765_v2 = vadd.f32 %v21778_v17, %v5823_v8  ;;  %v21783_v14 = vld [vmem:[#allocation182_spill] sm:$0xff] }
 0x81a   : > { %v10250_v38 = vmax.f32 %v10141_v3, %v10197_v13  ;;  %v9698_v19 = vadd.f32 %v18349_v29, %v9582_v62  ;;  %v9702_v4 = vadd.f32 %v18349_v29, %v9586_v6  ;;  %11588 = vmatmul.msk.f32.vlgmr.msrb.gmra.mxu0 %vm312_vm2, %v21779_v37  ;;  %v6769_v41 = vadd.f32 %v21780_v33, %v5827_v55  ;;  %v21782_v8 = vld [vmem:[#allocation571_spill] sm:$0xff]  ;;  %v21785_v18 = vld [vmem:[#allocation413_spill] sm:$0xff]  ;;  %v21786_v13 = vld [vmem:[#allocation572_spill] sm:$0xff] }
 0x81b   : > { %10084 = vst.msk [vmem:[#allocation2 + $0x18] sm:$0xf] %vm9921_vm5, %v9924_v44  ;;  %v9703_v11 = vadd.f32 %v18349_v29, %v9587_v36  ;;  %v9707_v10 = vadd.f32 %v18349_v29, %v9591_v52  ;;  %v7704_v46 = vadd.f32 %v21782_v8, %v6765_v2  ;;  %v21784_v0 = vld [vmem:[#allocation483_spill] sm:$0xff]  ;;  %v18584_v35 = vsel %vm2689_vm3, %v9527_v63, %v9528_v48  ;;  %v18590_v43 = vld [vmem:[%s11932_s19 + $0x3b0] sm:$0xff]  ;;  %v21787_v50 = vld [vmem:[#allocation78_spill] sm:$0xff] }
 0x81c   : > { %10279 = vst.msk [vmem:[%s18521_s15 + $0x10] sm:$0xff] %vm9911_vm4, %v10250_v38  ;;  %11593 = vmatmul.msk.f32.vlgmr.msrb.gmra.mxu1 %vm312_vm2, %v21781_v42  ;;  %v9810_v25 = vmax.f32 %v9698_v19, 0.0  ;;  %v9814_v30 = vmax.f32 %v9702_v4, 0.0  ;;  %v5824_v3 = vadd.f32 %v21785_v18, %v18499_v58  ;;  %v7708_v44 = vadd.f32 %v21786_v13, %v6769_v41  ;;  %v21788_v38 = vld [vmem:[#allocation43_spill] sm:$0xff]  ;;  %v21789_v4 = vld [vmem:[#allocation48_spill] sm:$0xff]  ;;  %v21790_v33 = vld [vmem:[#allocation77_spill] sm:$0xff] }
 0x81d   : > { %11598 = vmatmul.msk.f32.vlgmr.msrb.gmra.mxu2 %vm312_vm2, %v21783_v14  ;;  %v9815_v20 = vmax.f32 %v9703_v11, 0.0  ;;  %v9819_v62 = vmax.f32 %v9707_v10, 0.0  ;;  %v9530_v6 = vrot.slane %v18590_v43, 2  ;;  %v8646_v1 = vadd.f32 %v21787_v50, %v7704_v46  ;;  %v8935_v17 = vpop.f32.mrf.mxu2  ;;  %v21791_v42 = vld [vmem:[#allocation70_spill] sm:$0xff]  ;;  %v21792_v46 = vld [vmem:[#allocation49_spill] sm:$0xff] }
 0x81e   : > { %11603 = vmatmul.msk.f32.vlgmr.msrb.gmra.mxu3 %vm312_vm2, %v21784_v0  ;;  %v9934_v26 = vsel %vm9921_vm5, %v9810_v25, -inf  ;;  %v9935_v55 = vsel %vm9921_vm5, %v9814_v30, -inf  ;;  %v8650_v63 = vadd.f32 %v21788_v38, %v7708_v44  ;;  %v8964_v2 = vpop.f32.mrf.mxu3  ;;  %v9595_v37 = vadd.f32 %v8935_v17, %v21789_v4  ;;  %v21794_v50 = vld [vmem:[#allocation378_spill] sm:$0xff]  ;;  %v21800_v4 = vld [vmem:[#allocation576_spill] sm:$0xff] }
 0x81f   : > { %v9936_v36 = vmax.f32 %v9934_v26, %v9935_v55  ;;  %v9937_v52 = vsel %vm9911_vm4, %v9815_v20, -inf  ;;  %v9938_v58 = vsel %vm9911_vm4, %v9819_v62, -inf  ;;  %v9599_v41 = vadd.f32 %v8964_v2, %v21790_v33  ;;  %v8880_v11 = vpop.f32.mrf.mxu0  ;;  %v8909_v10 = vpop.f32.mrf.mxu1  ;;  %v21793_v62 = vld [vmem:[#allocation461_spill] sm:$0xff]  ;;  %v21796_v55 = vld [vmem:[#allocation575_spill] sm:$0xff] }
 0x820   : > { %v9939_v19 = vmax.f32 %v9937_v52, %v9938_v58  ;;  %v5828_v8 = vadd.f32 %v21791_v42, %v18512_v49  ;;  %v6766_v25 = vadd.f32 %v21792_v46, %v5824_v3  ;;  %v9588_v0 = vadd.f32 %v8880_v11, %v8646_v1  ;;  %v21795_v1 = vld [vmem:[#allocation462_spill] sm:$0xff]  ;;  %v21798_v58 = vld [vmem:[#allocation491_spill] sm:$0xff] }
 0x821   : > { %v9592_v18 = vadd.f32 %v8909_v10, %v8650_v63  ;;  %10088 = vst.msk [vmem:[#allocation2 + $0x38] sm:$0xf] %vm9921_vm5, %v9936_v36  ;;  %v9711_v44 = vadd.f32 %v18349_v29, %v9595_v37  ;;  %v9715_v20 = vadd.f32 %v18349_v29, %v9599_v41  ;;  %v21797_v52 = vld [vmem:[#allocation194_spill] sm:$0xff]  ;;  %v18627_v17 = vsel %vm2689_vm3, %v9528_v48, %v9530_v6  ;;  %v21799_v2 = vld [vmem:[#allocation311_spill] sm:$0xff] }
 0x822   : > { %v10139_v30 = vld [vmem:[#allocation2 + $0x10] ss:$2 sm:$0x3f]  ;;  %v10195_v14 = vld [vmem:[#allocation2 + $0x11] ss:$2 sm:$0x3f]  ;;  %11589 = vmatmul.msk.f32.gmra.mxu0 %vm312_vm2, %v21793_v62  ;;  %v6770_v26 = vadd.f32 %v21794_v50, %v5828_v8  ;;  %v9704_v49 = vadd.f32 %v18349_v29, %v9588_v0  ;;  %v7705_v38 = vadd.f32 %v21796_v55, %v6766_v25 }
 0x823   : > { %v10249_v13 = vmax.f32 %v10139_v30, %v10195_v14  ;;  %10089 = vst.msk [vmem:[#allocation2 + $0x40] sm:$0xff] %vm9911_vm4, %v9939_v19  ;;  %v9708_v3 = vadd.f32 %v18349_v29, %v9592_v18  ;;  %v9823_v63 = vmax.f32 %v9711_v44, 0.0  ;;  %v9827_v36 = vmax.f32 %v9715_v20, 0.0  ;;  %v21801_v11 = vld [vmem:[#allocation414_spill] sm:$0xff]  ;;  %v21803_v44 = vld [vmem:[#allocation44_spill] sm:$0xff]  ;;  %v21804_v20 = vld [vmem:[#allocation73_spill] sm:$0xff] }
 0x824   : > { %11594 = vmatmul.msk.f32.gmra.mxu1 %vm312_vm2, %v21795_v1  ;;  %v4887_v19 = vadd.f32 %v21799_v2, %v18395_v5  ;;  %v7709_v37 = vadd.f32 %v21800_v4, %v6770_v26  ;;  %v9816_v33 = vmax.f32 %v9704_v49, 0.0  ;;  %v5825_v10 = vadd.f32 %v21801_v11, %v18531_v31  ;;  %v21802_v46 = vld [vmem:[#allocation74_spill] sm:$0xff]  ;;  %v21805_v49 = vld [vmem:[#allocation407_spill] sm:$0xff] }
 0x825   : > { %10278 = vst.msk [vmem:[%s18521_s15 + $0x8] sm:$0x3f] %vm10277_vm6, %v10249_v13  ;;  %11599 = vmatmul.msk.f32.gmra.mxu2 %vm312_vm2, %v21797_v52  ;;  %v9820_v41 = vmax.f32 %v9708_v3, 0.0  ;;  %v8647_v42 = vadd.f32 %v17717_v23, %v7705_v38  ;;  %v9949_v8 = vsel %vm9911_vm4, %v9823_v63, -inf  ;;  %v9950_v59 = vsel %vm9911_vm4, %v9827_v36, -inf  ;;  %v8938_v14 = vpop.f32.mrf.mxu2  ;;  %v21806_v1 = vld [vmem:[#allocation514_spill] sm:$0xff] }
 0x826   : > { %11604 = vmatmul.msk.f32.gmra.mxu3 %vm312_vm2, %v21798_v58  ;;  %v8651_v25 = vadd.f32 %v21802_v46, %v7709_v37  ;;  %v9951_v48 = vmax.f32 %v9949_v8, %v9950_v59  ;;  %v9940_v30 = vsel %vm9911_vm4, %v9816_v33, -inf  ;;  %v8967_v0 = vpop.f32.mrf.mxu3  ;;  %v18641_v18 = vld [vmem:[%s11932_s19 + $0x3b8] sm:$0x3f]  ;;  %v9596_v23 = vadd.f32 %v8938_v14, %v21803_v44  ;;  %v21807_v37 = vld [vmem:[#allocation472_spill] sm:$0xff]  ;;  %v21808_v33 = vld [vmem:[#allocation515_spill] sm:$0xff] }
 0x827   : > { %v9941_v5 = vsel %vm9911_vm4, %v9820_v41, -inf  ;;  %v9532_v13 = vrot.slane %v18641_v18, 2  ;;  %v9600_v62 = vadd.f32 %v8967_v0, %v21804_v20  ;;  %v8883_v50 = vpop.f32.mrf.mxu0  ;;  %v8912_v26 = vpop.f32.mrf.mxu1  ;;  %v5829_v3 = vadd.f32 %v21805_v49, %v4887_v19  ;;  %v21814_v0 = vld [vmem:[#allocation577_spill] sm:$0xff]  ;;  %v21815_v20 = vld [vmem:[#allocation315_spill] sm:$0xff] }
 0x828   : > { %v9942_v31 = vmax.f32 %v9940_v30, %v9941_v5  ;;  %v6767_v55 = vadd.f32 %v21806_v1, %v5825_v10  ;;  %v10143_v38 = vld [vmem:[#allocation2 + $0x30] ss:$2 sm:$0x3f]  ;;  %v10199_v63 = vld [vmem:[#allocation2 + $0x31] ss:$2 sm:$0x3f]  ;;  %v9589_v36 = vadd.f32 %v8883_v50, %v8647_v42  ;;  %v9593_v52 = vadd.f32 %v8912_v26, %v8651_v25 }
 0x829   : > { %v10251_v58 = vmax.f32 %v10143_v38, %v10199_v63  ;;  %10093 = vst.msk [vmem:[#allocation2 + $0x60] sm:$0xff] %vm9911_vm4, %v9951_v48  ;;  %v9712_v2 = vadd.f32 %v18349_v29, %v9596_v23  ;;  %v9716_v4 = vadd.f32 %v18349_v29, %v9600_v62  ;;  %v6771_v41 = vadd.f32 %v21808_v33, %v5829_v3  ;;  %v21809_v10 = vld [vmem:[#allocation473_spill] sm:$0xff]  ;;  %v21810_v42 = vld [vmem:[#allocation406_spill] sm:$0xff]  ;;  %v21811_v25 = vld [vmem:[#allocation208_spill] sm:$0xff] }
 0x82a   : > { %11590 = vmatmul.msk.f32.gmra.mxu0 %vm312_vm2, %v21807_v37  ;;  %10090 = vst.msk [vmem:[#allocation2 + $0x48] sm:$0xff] %vm9911_vm4, %v9942_v31  ;;  %v9705_v19 = vadd.f32 %v18349_v29, %v9589_v36  ;;  %v9709_v11 = vadd.f32 %v18349_v29, %v9593_v52  ;;  %v7706_v8 = vadd.f32 %v21810_v42, %v6767_v55  ;;  %v21812_v48 = vld [vmem:[#allocation503_spill] sm:$0xff]  ;;  %v21813_v5 = vld [vmem:[#allocation313_spill] sm:$0xff]  ;;  %v21817_v52 = vld [vmem:[#allocation60_spill] sm:$0xff] }
 0x82b   : > { %10280 = vst.msk [vmem:[%s18521_s15 + $0x18] sm:$0x3f] %vm10277_vm6, %v10251_v58  ;;  %v9824_v59 = vmax.f32 %v9712_v2, 0.0  ;;  %v9828_v46 = vmax.f32 %v9716_v4, 0.0  ;;  %v18671_v30 = vsel %vm2689_vm3, %v9530_v6, %v9532_v13  ;;  %v4896_v14 = vadd.f32 %v21813_v5, %v18399_v28  ;;  %v21816_v38 = vld [vmem:[#allocation409_spill] sm:$0xff]  ;;  %v21818_v4 = vld [vmem:[#allocation502_spill] sm:$0xff] }
 0x82c   : > { %11595 = vmatmul.msk.f32.gmra.mxu1 %vm312_vm2, %v21809_v10  ;;  %v7710_v31 = vadd.f32 %v21814_v0, %v6771_v41  ;;  %v9817_v44 = vmax.f32 %v9705_v19, 0.0  ;;  %v9821_v23 = vmax.f32 %v9709_v11, 0.0  ;;  %v4900_v62 = vadd.f32 %v21815_v20, %v18413_v15  ;;  %v21820_v11 = vld [vmem:[#allocation518_spill] sm:$0xff]  ;;  %v21823_v0 = vld [vmem:[#allocation469_spill] sm:$0xff] }
 0x82d   : > { %11600 = vmatmul.msk.f32.gmra.mxu2 %vm312_vm2, %v21811_v25  ;;  %v8648_v50 = vadd.f32 %v17738_v39, %v7706_v8  ;;  %v9952_v26 = vsel %vm9911_vm4, %v9824_v59, -inf  ;;  %v9953_v49 = vsel %vm9911_vm4, %v9828_v46, -inf  ;;  %v8941_v1 = vpop.f32.mrf.mxu2  ;;  %v5838_v63 = vadd.f32 %v21816_v38, %v4896_v14  ;;  %v21821_v46 = vld [vmem:[#allocation467_spill] sm:$0xff] }
 0x82e   : > { %11605 = vmatmul.msk.f32.gmra.mxu3 %vm312_vm2, %v21812_v48  ;;  %v8652_v43 = vadd.f32 %v17740_v40, %v7710_v31  ;;  %v9954_v6 = vmax.f32 %v9952_v26, %v9953_v49  ;;  %v9943_v3 = vsel %vm9911_vm4, %v9817_v44, -inf  ;;  %v9944_v28 = vsel %vm9911_vm4, %v9821_v23, -inf  ;;  %v8970_v55 = vpop.f32.mrf.mxu3  ;;  %v21819_v40 = vld [vmem:[#allocation411_spill] sm:$0xff]  ;;  %v21824_v31 = vld [vmem:[#allocation506_spill] sm:$0xff]  ;;  %v21827_v49 = vld [vmem:[#allocation496_spill] sm:$0xff] }
 0x82f   : > { %v9945_v36 = vmax.f32 %v9943_v3, %v9944_v28  ;;  %v9597_v15 = vadd.f32 %v8941_v1, %v17733_v7  ;;  %v9601_v39 = vadd.f32 %v8970_v55, %v21817_v52  ;;  %v8886_v58 = vpop.f32.mrf.mxu0  ;;  %v8915_v2 = vpop.f32.mrf.mxu1  ;;  %v18689_v37 = vadd.f32 %v21818_v4, %v18208_v53  ;;  %v21822_v53 = vld [vmem:[#allocation519_spill] sm:$0xff]  ;;  %v21825_v23 = vld [vmem:[#allocation578_spill] sm:$0xff]  ;;  %v21830_v55 = vld [vmem:[#allocation329_spill] sm:$0xff] }
 0x830   : > { %v5842_v33 = vadd.f32 %v21819_v40, %v4900_v62  ;;  %10094 = vst.msk [vmem:[#allocation2 + $0x68] sm:$0xff] %vm9911_vm4, %v9954_v6  ;;  %v9590_v41 = vadd.f32 %v8886_v58, %v8648_v50  ;;  %v9594_v19 = vadd.f32 %v8915_v2, %v8652_v43  ;;  %v6780_v10 = vadd.f32 %v21820_v11, %v5838_v63  ;;  %v21826_v26 = vld [vmem:[#allocation494_spill] sm:$0xff]  ;;  %v21828_v43 = vld [vmem:[#allocation247_spill] sm:$0xff]  ;;  %v21831_v40 = vld [vmem:[#allocation408_spill] sm:$0xff] }
 0x831   : > { %v10145_v42 = vld [vmem:[#allocation2 + $0x40] ss:$2 sm:$0xff]  ;;  %v10201_v8 = vld [vmem:[#allocation2 + $0x41] ss:$2 sm:$0xff]  ;;  %10091 = vst.msk [vmem:[#allocation2 + $0x50] sm:$0xff] %vm9911_vm4, %v9945_v36  ;;  %v9713_v7 = vadd.f32 %v18349_v29, %v9597_v15  ;;  %v9717_v59 = vadd.f32 %v18349_v29, %v9601_v39  ;;  %v18706_v44 = vadd.f32 %v21824_v31, %v18216_v61  ;;  %v4897_v6 = vadd.f32 %v21828_v43, %v18417_v27  ;;  %v21832_v11 = vld [vmem:[#allocation61_spill] sm:$0xff] }
 0x832   : > { %11591 = vmatmul.msk.f32.gmra.mxu0 %vm312_vm2, %v21821_v46  ;;  %v6784_v25 = vadd.f32 %v21822_v53, %v5842_v33  ;;  %v10252_v48 = vmax.f32 %v10145_v42, %v10201_v8  ;;  %v9706_v5 = vadd.f32 %v18349_v29, %v9590_v41  ;;  %v9710_v14 = vadd.f32 %v18349_v29, %v9594_v19  ;;  %v21829_v3 = vld [vmem:[#allocation579_spill] sm:$0xff] }
 0x833   : > { %v7719_v20 = vadd.f32 %v21825_v23, %v6780_v10  ;;  %v9825_v62 = vmax.f32 %v9713_v7, 0.0  ;;  %v9829_v50 = vmax.f32 %v9717_v59, 0.0  ;;  %v4901_v38 = vadd.f32 %v21830_v55, %v18432_v12  ;;  %v21842_v55 = vld [vmem:[#allocation581_spill] sm:$0xff] }
 0x834   : > { %11596 = vmatmul.msk.f32.gmra.mxu1 %vm312_vm2, %v21823_v0  ;;  %v7723_v28 = vadd.f32 %v21829_v3, %v6784_v25  ;;  %10281 = vst.msk [vmem:[%s18521_s15 + $0x20] sm:$0xff] %vm9911_vm4, %v10252_v48  ;;  %v9818_v1 = vmax.f32 %v9706_v5, 0.0  ;;  %v9822_v61 = vmax.f32 %v9710_v14, 0.0  ;;  %v5839_v33 = vadd.f32 %v21831_v40, %v4897_v6  ;;  %v21834_v25 = vld [vmem:[#allocation522_spill] sm:$0xff]  ;;  %v21836_v0 = vld [vmem:[#allocation523_spill] sm:$0xff] }
 0x835   : > { %11601 = vmatmul.msk.f32.gmra.mxu2 %vm312_vm2, %v21826_v26  ;;  %v8661_v63 = vadd.f32 %v17756_v9, %v7719_v20  ;;  %v9955_v36 = vsel %vm9911_vm4, %v9825_v62, -inf  ;;  %v9956_v15 = vsel %vm9911_vm4, %v9829_v50, -inf  ;;  %v8944_v2 = vpop.f32.mrf.mxu2  ;;  %v21837_v62 = vld [vmem:[#allocation485_spill] sm:$0xff]  ;;  %v21838_v50 = vld [vmem:[#allocation330_spill] sm:$0xff] }
 0x836   : > { %11606 = vmatmul.msk.f32.gmra.mxu3 %vm312_vm2, %v21827_v49  ;;  %v8665_v52 = vadd.f32 %v17758_v47, %v7723_v28  ;;  %v9957_v39 = vmax.f32 %v9955_v36, %v9956_v15  ;;  %v9946_v27 = vsel %vm9921_vm5, %v9818_v1, -inf  ;;  %v9947_v58 = vsel %vm9921_vm5, %v9822_v61, -inf  ;;  %v8973_v4 = vpop.f32.mrf.mxu3  ;;  %v21833_v47 = vld [vmem:[#allocation410_spill] sm:$0xff]  ;;  %v21839_v49 = vld [vmem:[#allocation580_spill] sm:$0xff]  ;;  %v21843_v15 = vld [vmem:[#allocation423_spill] sm:$0xff] }
 0x837   : > { %v10149_v41 = vld [vmem:[#allocation2 + $0x60] ss:$2 sm:$0xff]  ;;  %v10205_v19 = vld [vmem:[#allocation2 + $0x61] ss:$2 sm:$0xff]  ;;  %v9948_v12 = vmax.f32 %v9946_v27, %v9947_v58  ;;  %v9598_v9 = vadd.f32 %v8944_v2, %v17751_v22  ;;  %v9602_v10 = vadd.f32 %v8973_v4, %v21832_v11  ;;  %v8993_v42 = vpop.f32.mrf.mxu0  ;;  %v9022_v8 = vpop.f32.mrf.mxu1  ;;  %v5843_v7 = vadd.f32 %v21833_v47, %v4901_v38  ;;  %v21845_v2 = vld [vmem:[#allocation69_spill] sm:$0xff] }
 0x838   : > { %v10254_v59 = vmax.f32 %v10149_v41, %v10205_v19  ;;  %10095 = vst.msk [vmem:[#allocation2 + $0x70] sm:$0xff] %vm9911_vm4, %v9957_v39  ;;  %v9603_v46 = vadd.f32 %v8993_v42, %v8661_v63  ;;  %v9607_v53 = vadd.f32 %v9022_v8, %v8665_v52  ;;  %v6781_v48 = vadd.f32 %v21834_v25, %v5839_v33  ;;  %v21835_v22 = vld [vmem:[#allocation484_spill] sm:$0xff]  ;;  %v21846_v19 = vld [vmem:[#allocation507_spill] sm:$0xff]  ;;  %v21847_v11 = vld [vmem:[#allocation90_spill] sm:$0xff] }
 0x839   : > { %10092 = vst.msk [vmem:[#allocation2 + $0x58] sm:$0xf] %vm9921_vm5, %v9948_v12  ;;  %v9714_v5 = vadd.f32 %v18349_v29, %v9598_v9  ;;  %v9718_v14 = vadd.f32 %v18349_v29, %v9602_v10  ;;  %v6785_v31 = vadd.f32 %v21836_v0, %v5843_v7  ;;  %v4898_v26 = vadd.f32 %v21838_v50, %v18443_v57  ;;  %v21840_v28 = vld [vmem:[#allocation520_spill] sm:$0xff] }
 0x83a   : > { %11608 = vmatmul.msk.f32.vlgmr.msra.gmra.mxu0 %vm312_vm2, %v21835_v22  ;;  %10283 = vst.msk [vmem:[%s18521_s15 + $0x30] sm:$0xff] %vm9911_vm4, %v10254_v59  ;;  %v9719_v23 = vadd.f32 %v18349_v29, %v9603_v46  ;;  %v9723_v20 = vadd.f32 %v18349_v29, %v9607_v53  ;;  %v7720_v43 = vadd.f32 %v21839_v49, %v6781_v48  ;;  %v21841_v1 = vld [vmem:[#allocation312_spill] sm:$0xff]  ;;  %v21850_v53 = vld [vmem:[#allocation527_spill] sm:$0xff]  ;;  %v21853_v49 = vld [vmem:[#allocation493_spill] sm:$0xff] }
 0x83b   : > { %v9826_v6 = vmax.f32 %v9714_v5, 0.0  ;;  %v9830_v3 = vmax.f32 %v9718_v14, 0.0  ;;  %v4902_v61 = vadd.f32 %v21841_v1, %v18689_v37  ;;  %v7724_v38 = vadd.f32 %v21842_v55, %v6785_v31  ;;  %v21844_v57 = vld [vmem:[#allocation68_spill] sm:$0xff] }
 0x83c   : > { %11613 = vmatmul.msk.f32.vlgmr.msra.gmra.mxu1 %vm312_vm2, %v21837_v62  ;;  %v9831_v63 = vmax.f32 %v9719_v23, 0.0  ;;  %v9835_v36 = vmax.f32 %v9723_v20, 0.0  ;;  %v5840_v52 = vadd.f32 %v21843_v15, %v4898_v26  ;;  %v8662_v39 = vadd.f32 %v21844_v57, %v7720_v43  ;;  %v21848_v42 = vld [vmem:[#allocation92_spill] sm:$0xff]  ;;  %v21854_v43 = vld [vmem:[#allocation314_spill] sm:$0xff] }
 0x83d   : > { %11618 = vmatmul.msk.f32.vlgmr.msra.gmra.mxu2 %vm312_vm2, %v21840_v28  ;;  %v9958_v27 = vsel %vm9921_vm5, %v9826_v6, -inf  ;;  %v9959_v58 = vsel %vm9921_vm5, %v9830_v3, -inf  ;;  %v8666_v4 = vadd.f32 %v21845_v2, %v7724_v38  ;;  %v9051_v37 = vpop.f32.mrf.mxu2  ;;  %v3964_v12 = vadd.f32 %v21846_v19, %v18220_v16  ;;  %v21849_v59 = vld [vmem:[#allocation424_spill] sm:$0xff]  ;;  %v21855_v3 = vld [vmem:[#allocation583_spill] sm:$0xff] }
 0x83e   : > { %11623 = vmatmul.msk.f32.vlgmr.msra.gmra.mxu3 %vm312_vm2, %v18584_v35  ;;  %v9960_v40 = vmax.f32 %v9958_v27, %v9959_v58  ;;  %v9961_v35 = vsel %vm9911_vm4, %v9831_v63, -inf  ;;  %v9962_v33 = vsel %vm9911_vm4, %v9835_v36, -inf  ;;  %v9080_v41 = vpop.f32.mrf.mxu3  ;;  %v9611_v10 = vadd.f32 %v9051_v37, %v21847_v11  ;;  %v21851_v23 = vld [vmem:[#allocation492_spill] sm:$0xff] }
 0x83f   : > { %v9963_v9 = vmax.f32 %v9961_v35, %v9962_v33  ;;  %v9615_v8 = vadd.f32 %v9080_v41, %v21848_v42  ;;  %v8996_v47 = vpop.f32.mrf.mxu0  ;;  %v9025_v7 = vpop.f32.mrf.mxu1  ;;  %v5844_v46 = vadd.f32 %v21849_v59, %v4902_v61  ;;  %v6782_v25 = vadd.f32 %v21850_v53, %v5840_v52  ;;  %v21852_v20 = vld [vmem:[#allocation528_spill] sm:$0xff] }
 0x840   : > { %v10147_v48 = vld [vmem:[#allocation2 + $0x50] ss:$2 sm:$0x3f]  ;;  %v10203_v5 = vld [vmem:[#allocation2 + $0x51] ss:$2 sm:$0x3f]  ;;  %v9604_v14 = vadd.f32 %v8996_v47, %v8662_v39  ;;  %v9608_v22 = vadd.f32 %v9025_v7, %v8666_v4  ;;  %v9727_v16 = vadd.f32 %v18349_v29, %v9611_v10  ;;  %v4899_v6 = vadd.f32 %v21854_v43, %v18706_v44 }
 0x841   : > { %v10253_v0 = vmax.f32 %v10147_v48, %v10203_v5  ;;  %10096 = vst.msk [vmem:[#allocation2 + $0x78] sm:$0xf] %vm9921_vm5, %v9960_v40  ;;  %v9731_v31 = vadd.f32 %v18349_v29, %v9615_v8  ;;  %v6786_v62 = vadd.f32 %v21852_v20, %v5844_v46  ;;  %v7721_v28 = vadd.f32 %v21855_v3, %v6782_v25  ;;  %v21856_v55 = vld [vmem:[#allocation524_spill] sm:$0xff]  ;;  %v21863_v47 = vld [vmem:[#allocation431_spill] sm:$0xff]  ;;  %v21867_v20 = vld [vmem:[#allocation505_spill] sm:$0xff] }
 0x842   : > { %11609 = vmatmul.msk.f32.gmra.mxu0 %vm312_vm2, %v21851_v23  ;;  %10097 = vst.msk [vmem:[#allocation2 + $0x80] sm:$0xff] %vm9911_vm4, %v9963_v9  ;;  %v9720_v50 = vadd.f32 %v18349_v29, %v9604_v14  ;;  %v9724_v26 = vadd.f32 %v18349_v29, %v9608_v22  ;;  %v9839_v1 = vmax.f32 %v9727_v16, 0.0  ;;  %v21857_v38 = vld [vmem:[#allocation316_spill] sm:$0xff]  ;;  %v21861_v9 = vld [vmem:[#allocation101_spill] sm:$0xff] }
 0x843   : > { %10282 = vst.msk [vmem:[%s18521_s15 + $0x28] sm:$0x3f] %vm10277_vm6, %v10253_v0  ;;  %v9843_v61 = vmax.f32 %v9731_v31, 0.0  ;;  %v4903_v63 = vadd.f32 %v21857_v38, %v3964_v12  ;;  %v21858_v36 = vld [vmem:[#allocation584_spill] sm:$0xff]  ;;  %v8663_v27 = vadd.f32 %v17798_v21, %v7721_v28  ;;  %v21866_v0 = vld [vmem:[#allocation531_spill] sm:$0xff]  ;;  %v21871_v28 = vld [vmem:[#allocation529_spill] sm:$0xff] }
 0x844   : > { %11614 = vmatmul.msk.f32.gmra.mxu1 %vm312_vm2, %v21853_v49  ;;  %v7725_v15 = vadd.f32 %v21858_v36, %v6786_v62  ;;  %v9832_v52 = vmax.f32 %v9720_v50, 0.0  ;;  %v9836_v57 = vmax.f32 %v9724_v26, 0.0  ;;  %v21859_v39 = vld [vmem:[#allocation124_spill] sm:$0xff]  ;;  %v9973_v58 = vsel %vm9911_vm4, %v9839_v1, -inf  ;;  %v21868_v62 = vld [vmem:[#allocation158_spill] sm:$0xff]  ;;  %v21869_v50 = vld [vmem:[#allocation509_spill] sm:$0xff] }
 0x845   : > { %11619 = vmatmul.msk.f32.gmra.mxu2 %vm312_vm2, %v21856_v55  ;;  %v5841_v44 = vadd.f32 %v21859_v39, %v4899_v6  ;;  %v9974_v2 = vsel %vm9911_vm4, %v9843_v61, -inf  ;;  %v9054_v33 = vpop.f32.mrf.mxu2  ;;  %v21860_v41 = vld [vmem:[#allocation508_spill] sm:$0xff]  ;;  %v5845_v7 = vadd.f32 %v21863_v47, %v4903_v63  ;;  %v3977_v26 = vadd.f32 %v21869_v50, %v21868_v62  ;;  %v21870_v49 = vld [vmem:[#allocation521_spill] sm:$0xff]  ;;  %v21872_v1 = vld [vmem:[#allocation251_spill] sm:$0xff] }
 0x846   : > { %11624 = vmatmul.msk.f32.gmra.mxu3 %vm312_vm2, %v18627_v17  ;;  %v8667_v4 = vadd.f32 %v17800_v54, %v7725_v15  ;;  %v9975_v40 = vmax.f32 %v9973_v58, %v9974_v2  ;;  %v9964_v35 = vsel %vm9911_vm4, %v9832_v52, -inf  ;;  %v9965_v17 = vsel %vm9911_vm4, %v9836_v57, -inf  ;;  %v9083_v37 = vpop.f32.mrf.mxu3  ;;  %v21862_v21 = vld [vmem:[#allocation104_spill] sm:$0xff]  ;;  %v21864_v54 = vld [vmem:[#allocation530_spill] sm:$0xff]  ;;  %v21873_v55 = vld [vmem:[#allocation585_spill] sm:$0xff] }
 0x847   : > { %v3973_v19 = vadd.f32 %v21860_v41, %v18226_v56  ;;  %v9966_v12 = vmax.f32 %v9964_v35, %v9965_v17  ;;  %v9612_v11 = vadd.f32 %v9054_v33, %v21861_v9  ;;  %v9616_v10 = vadd.f32 %v9083_v37, %v21862_v21  ;;  %v8999_v42 = vpop.f32.mrf.mxu0  ;;  %v9028_v8 = vpop.f32.mrf.mxu1  ;;  %v21865_v22 = vld [vmem:[#allocation504_spill] sm:$0xff]  ;;  %v21874_v15 = vld [vmem:[#allocation345_spill] sm:$0xff]  ;;  %v21887_v50 = vld [vmem:[#allocation286_spill] sm:$0xff] }
 0x848   : > { %v6783_v59 = vadd.f32 %v21864_v54, %v5841_v44  ;;  %v10151_v46 = vld [vmem:[#allocation2 + $0x70] ss:$2 sm:$0x3f]  ;;  %v10207_v53 = vld [vmem:[#allocation2 + $0x71] ss:$2 sm:$0x3f]  ;;  %v9605_v25 = vadd.f32 %v8999_v42, %v8663_v27  ;;  %v9609_v48 = vadd.f32 %v9028_v8, %v8667_v4  ;;  %v6787_v16 = vadd.f32 %v21866_v0, %v5845_v7 }
 0x849   : > { %v10255_v5 = vmax.f32 %v10151_v46, %v10207_v53  ;;  %10101 = vst.msk [vmem:[#allocation2 + $0xa0] sm:$0xff] %vm9911_vm4, %v9975_v40  ;;  %v9728_v56 = vadd.f32 %v18349_v29, %v9612_v11  ;;  %v9732_v14 = vadd.f32 %v18349_v29, %v9616_v10  ;;  %v4912_v61 = vadd.f32 %v21872_v1, %v3973_v19  ;;  %v21875_v57 = vld [vmem:[#allocation117_spill] sm:$0xff]  ;;  %v21876_v58 = vld [vmem:[#allocation120_spill] sm:$0xff]  ;;  %v21878_v19 = vld [vmem:[#allocation79_spill] sm:$0xff] }
 0x84a   : > { %11610 = vmatmul.msk.f32.gmra.mxu0 %vm312_vm2, %v21865_v22  ;;  %10098 = vst.msk [vmem:[#allocation2 + $0x88] sm:$0xff] %vm9911_vm4, %v9966_v12  ;;  %v9721_v31 = vadd.f32 %v18349_v29, %v9605_v25  ;;  %v9725_v23 = vadd.f32 %v18349_v29, %v9609_v48  ;;  %v7722_v43 = vadd.f32 %v21870_v49, %v6783_v59  ;;  %v21877_v33 = vld [vmem:[#allocation433_spill] sm:$0xff]  ;;  %v21879_v9 = vld [vmem:[#allocation80_spill] sm:$0xff]  ;;  %v21880_v42 = vld [vmem:[#allocation283_spill] sm:$0xff] }
 0x84b   : > { %10284 = vst.msk [vmem:[%s18521_s15 + $0x38] sm:$0x3f] %vm10277_vm6, %v10255_v5  ;;  %v9840_v6 = vmax.f32 %v9728_v56, 0.0  ;;  %v9844_v3 = vmax.f32 %v9732_v14, 0.0  ;;  %v7726_v38 = vadd.f32 %v21873_v55, %v6787_v16  ;;  %v4916_v52 = vadd.f32 %v21874_v15, %v3977_v26  ;;  %v21881_v8 = vld [vmem:[#allocation510_spill] sm:$0xff]  ;;  %v21882_v7 = vld [vmem:[#allocation435_spill] sm:$0xff] }
 0x84c   : > { %11615 = vmatmul.msk.f32.gmra.mxu1 %vm312_vm2, %v21867_v20  ;;  %v9833_v63 = vmax.f32 %v9721_v31, 0.0  ;;  %v9837_v36 = vmax.f32 %v9725_v23, 0.0  ;;  %v8664_v39 = vadd.f32 %v21875_v57, %v7722_v43  ;;  %v5854_v37 = vadd.f32 %v21877_v33, %v4912_v61  ;;  %v21883_v53 = vld [vmem:[#allocation532_spill] sm:$0xff]  ;;  %v21884_v22 = vld [vmem:[#allocation498_spill] sm:$0xff]  ;;  %v21885_v0 = vld [vmem:[#allocation533_spill] sm:$0xff] }
 0x84d   : > { %11620 = vmatmul.msk.f32.gmra.mxu2 %vm312_vm2, %v21871_v28  ;;  %v9976_v44 = vsel %vm9911_vm4, %v9840_v6, -inf  ;;  %v9977_v27 = vsel %vm9911_vm4, %v9844_v3, -inf  ;;  %v8668_v2 = vadd.f32 %v21876_v58, %v7726_v38  ;;  %v9057_v35 = vpop.f32.mrf.mxu2  ;;  %v3974_v47 = vadd.f32 %v21881_v8, %v21880_v42  ;;  %v21886_v62 = vld [vmem:[#allocation500_spill] sm:$0xff]  ;;  %v21888_v26 = vld [vmem:[#allocation511_spill] sm:$0xff]  ;;  %v21889_v43 = vld [vmem:[#allocation586_spill] sm:$0xff] }
 0x84e   : > { %11625 = vmatmul.msk.f32.gmra.mxu3 %vm312_vm2, %v18671_v30  ;;  %v9978_v4 = vmax.f32 %v9976_v44, %v9977_v27  ;;  %v9967_v40 = vsel %vm9911_vm4, %v9833_v63, -inf  ;;  %v9968_v30 = vsel %vm9911_vm4, %v9837_v36, -inf  ;;  %v9086_v17 = vpop.f32.mrf.mxu3  ;;  %v9613_v12 = vadd.f32 %v9057_v35, %v21878_v19  ;;  %v21890_v1 = vld [vmem:[#allocation526_spill] sm:$0xff]  ;;  %v21891_v61 = vld [vmem:[#allocation252_spill] sm:$0xff]  ;;  %v21894_v57 = vld [vmem:[#allocation111_spill] sm:$0xff] }
 0x84f   : > { %v9969_v41 = vmax.f32 %v9967_v40, %v9968_v30  ;;  %v9617_v11 = vadd.f32 %v9086_v17, %v21879_v9  ;;  %v9002_v21 = vpop.f32.mrf.mxu0  ;;  %v9031_v10 = vpop.f32.mrf.mxu1  ;;  %v5858_v54 = vadd.f32 %v21882_v7, %v4916_v52  ;;  %v6796_v25 = vadd.f32 %v21883_v53, %v5854_v37  ;;  %v21893_v15 = vld [vmem:[#allocation346_spill] sm:$0xff]  ;;  %v21895_v58 = vld [vmem:[#allocation112_spill] sm:$0xff]  ;;  %v21897_v19 = vld [vmem:[#allocation75_spill] sm:$0xff] }
 0x850   : > { %10102 = vst.msk [vmem:[#allocation2 + $0xa8] sm:$0xff] %vm9911_vm4, %v9978_v4  ;;  %v9606_v59 = vadd.f32 %v9002_v21, %v8664_v39  ;;  %v9610_v46 = vadd.f32 %v9031_v10, %v8668_v2  ;;  %v9729_v56 = vadd.f32 %v18349_v29, %v9613_v12  ;;  %v3978_v49 = vadd.f32 %v21888_v26, %v21887_v50  ;;  %v21896_v35 = vld [vmem:[#allocation136_spill] sm:$0xff]  ;;  %v21899_v42 = vld [vmem:[#allocation443_spill] sm:$0xff] }
 0x851   : > { %v10153_v48 = vld [vmem:[#allocation2 + $0x80] ss:$2 sm:$0xff]  ;;  %v10209_v5 = vld [vmem:[#allocation2 + $0x81] ss:$2 sm:$0xff]  ;;  %10099 = vst.msk [vmem:[#allocation2 + $0x90] sm:$0xff] %vm9911_vm4, %v9969_v41  ;;  %v9733_v14 = vadd.f32 %v18349_v29, %v9617_v11  ;;  %v6800_v16 = vadd.f32 %v21885_v0, %v5858_v54  ;;  %v7735_v6 = vadd.f32 %v21889_v43, %v6796_v25  ;;  %v4913_v55 = vadd.f32 %v21891_v61, %v3974_v47  ;;  %v21902_v25 = vld [vmem:[#allocation534_spill] sm:$0xff] }
 0x852   : > { %11611 = vmatmul.msk.f32.gmra.mxu0 %vm312_vm2, %v21884_v22  ;;  %v10256_v31 = vmax.f32 %v10153_v48, %v10209_v5  ;;  %v9722_v23 = vadd.f32 %v18349_v29, %v9606_v59  ;;  %v9726_v20 = vadd.f32 %v18349_v29, %v9610_v46  ;;  %v9841_v3 = vmax.f32 %v9729_v56, 0.0  ;;  %v21892_v29 = vld [vmem:[#allocation587_spill] sm:$0xff]  ;;  %v21898_v9 = vld [vmem:[#allocation76_spill] sm:$0xff]  ;;  %v21900_v59 = vld [vmem:[#allocation249_spill] sm:$0xff] }
 0x853   : > { %v9845_v28 = vmax.f32 %v9733_v14, 0.0  ;;  %v7739_v38 = vadd.f32 %v21892_v29, %v6800_v16  ;;  %v4917_v52 = vadd.f32 %v21893_v15, %v3978_v49  ;;  %v8677_v39 = vadd.f32 %v21894_v57, %v7735_v6  ;;  %v21901_v46 = vld [vmem:[#allocation332_spill] sm:$0xff]  ;;  %v18882_v5 = vld [vmem:[%s19373_s2] ss:$0 sm:$0xff] }
 0x854   : > { %11616 = vmatmul.msk.f32.gmra.mxu1 %vm312_vm2, %v21886_v62  ;;  %10285 = vst.msk [vmem:[%s18521_s15 + $0x40] sm:$0xff] %vm9911_vm4, %v10256_v31  ;;  %v9834_v63 = vmax.f32 %v9722_v23, 0.0  ;;  %v9838_v36 = vmax.f32 %v9726_v20, 0.0  ;;  %v9979_v44 = vsel %vm9911_vm4, %v9841_v3, -inf  ;;  %v5855_v17 = vadd.f32 %v21896_v35, %v4913_v55  ;;  %v21903_v22 = vld [vmem:[#allocation512_spill] sm:$0xff]  ;;  %v21904_v16 = vld [vmem:[#allocation535_spill] sm:$0xff] }
 0x855   : > { %11621 = vmatmul.msk.f32.gmra.mxu2 %vm312_vm2, %v21890_v1  ;;  %v9980_v27 = vsel %vm9911_vm4, %v9845_v28, -inf  ;;  %v8681_v18 = vadd.f32 %v21895_v58, %v7739_v38  ;;  %v9060_v40 = vpop.f32.mrf.mxu2  ;;  %v5859_v8 = vadd.f32 %v21899_v42, %v4917_v52  ;;  %v18875_v53 = vadd.f32 %v21901_v46, %v21900_v59  ;;  %v21905_v62 = vld [vmem:[#allocation513_spill] sm:$0xff]  ;;  %v21906_v26 = vld [vmem:[#allocation4_spill] sm:$0xff]  ;;  %v21907_v3 = vld [vmem:[#allocation326_spill] sm:$0xff] }
 0x856   : > { %11626 = vmatmul.msk.f32.gmra.mxu3 %vm312_vm2, %v9532_v13  ;;  %v9981_v2 = vmax.f32 %v9979_v44, %v9980_v27  ;;  %v9970_v13 = vsel %vm9921_vm5, %v9834_v63, -inf  ;;  %v9971_v4 = vsel %vm9921_vm5, %v9838_v36, -inf  ;;  %v9089_v30 = vpop.f32.mrf.mxu3  ;;  %v9614_v12 = vadd.f32 %v9060_v40, %v21897_v19  ;;  %v21908_v1 = vld [vmem:[#allocation5_spill] sm:$0xff]  ;;  %v21909_v29 = vld [vmem:[#allocation327_spill] sm:$0xff]  ;;  %v21911_v57 = vld [vmem:[#allocation140_spill] sm:$0xff] }
 0x857   : > { %v10157_v33 = vld [vmem:[#allocation2 + $0xa0] ss:$2 sm:$0xff]  ;;  %v10213_v37 = vld [vmem:[#allocation2 + $0xa1] ss:$2 sm:$0xff]  ;;  %v9972_v41 = vmax.f32 %v9970_v13, %v9971_v4  ;;  %v9618_v11 = vadd.f32 %v9089_v30, %v21898_v9  ;;  %v9109_v21 = vpop.f32.mrf.mxu0  ;;  %v9138_v10 = vpop.f32.mrf.mxu1  ;;  %v6797_v48 = vadd.f32 %v21902_v25, %v5855_v17  ;;  %v3975_v0 = vadd.f32 %v21903_v22, %v18242_v45  ;;  %v21910_v63 = vld [vmem:[#allocation137_spill] sm:$0xff] }
 0x858   : > { %v10258_v47 = vmax.f32 %v10157_v33, %v10213_v37  ;;  %10103 = vst.msk [vmem:[#allocation2 + $0xb0] sm:$0xff] %vm9911_vm4, %v9981_v2  ;;  %v9619_v7 = vadd.f32 %v9109_v21, %v8677_v39  ;;  %v9623_v54 = vadd.f32 %v9138_v10, %v8681_v18  ;;  %v9730_v56 = vadd.f32 %v18882_v5, %v9614_v12  ;;  %v21912_v2 = vld [vmem:[#allocation445_spill] sm:$0xff]  ;;  %v21913_v40 = vld [vmem:[#allocation94_spill] sm:$0xff]  ;;  %v21914_v35 = vld [vmem:[#allocation95_spill] sm:$0xff] }
 0x859   : > { %10100 = vst.msk [vmem:[#allocation2 + $0x98] sm:$0xf] %vm9921_vm5, %v9972_v41  ;;  %v9734_v14 = vadd.f32 %v18882_v5, %v9618_v11  ;;  %v6801_v31 = vadd.f32 %v21904_v16, %v5859_v8  ;;  %v3979_v50 = vadd.f32 %v21905_v62, %v18246_v34  ;;  %v7736_v49 = vadd.f32 %v21906_v26, %v6797_v48  ;;  %v21915_v41 = vld [vmem:[#allocation250_spill] sm:$0xff]  ;;  %v21916_v19 = vld [vmem:[#allocation333_spill] sm:$0xff]  ;;  %v21917_v9 = vld [vmem:[#allocation447_spill] sm:$0xff] }
 0x85a   : > { %10287 = vst.msk [vmem:[%s18521_s15 + $0x50] sm:$0xff] %vm9911_vm4, %v10258_v47  ;;  %v9735_v23 = vadd.f32 %v18882_v5, %v9619_v7  ;;  %v9739_v20 = vadd.f32 %v18882_v5, %v9623_v54  ;;  %v9842_v43 = vmax.f32 %v9730_v56, 0.0  ;;  %v4914_v28 = vadd.f32 %v21907_v3, %v3975_v0  ;;  %v21918_v47 = vld [vmem:[#allocation536_spill] sm:$0xff]  ;;  %v21920_v48 = vld [vmem:[#allocation277_spill] sm:$0xff]  ;;  %v21924_v62 = vld [vmem:[#allocation15_spill] sm:$0xff] }
 0x85b   : > { %v9846_v6 = vmax.f32 %v9734_v14, 0.0  ;;  %v7740_v61 = vadd.f32 %v21908_v1, %v6801_v31  ;;  %v4918_v38 = vadd.f32 %v21909_v29, %v3979_v50  ;;  %v8678_v36 = vadd.f32 %v21910_v63, %v7736_v49  ;;  %v21919_v25 = vld [vmem:[#allocation192_spill] sm:$0xff]  ;;  %v21921_v14 = vld [vmem:[#allocation537_spill] sm:$0xff] }
 0x85c   : > { %v9847_v45 = vmax.f32 %v9735_v23, 0.0  ;;  %v9851_v55 = vmax.f32 %v9739_v20, 0.0  ;;  %v9982_v15 = vsel %vm9921_vm5, %v9842_v43, -inf  ;;  %v5856_v13 = vadd.f32 %v21912_v2, %v4914_v28  ;;  %v21922_v31 = vld [vmem:[#allocation193_spill] sm:$0xff]  ;;  %v21923_v23 = vld [vmem:[#allocation223_spill] sm:$0xff]  ;;  %v21925_v43 = vld [vmem:[#allocation328_spill] sm:$0xff] }
 0x85d   : > { %v9983_v52 = vsel %vm9921_vm5, %v9846_v6, -inf  ;;  %v8682_v34 = vadd.f32 %v21911_v57, %v7740_v61  ;;  %v9167_v58 = vpop.f32.mrf.mxu2  ;;  %v18910_v12 = vadd.f32 %v21916_v19, %v21915_v41  ;;  %v5860_v11 = vadd.f32 %v21917_v9, %v4918_v38  ;;  %v21926_v3 = vld [vmem:[#allocation16_spill] sm:$0xff]  ;;  %v21928_v29 = vld [vmem:[#allocation149_spill] sm:$0xff] }
 0x85e   : > { %v9984_v39 = vmax.f32 %v9982_v15, %v9983_v52  ;;  %v9985_v44 = vsel %vm9911_vm4, %v9847_v45, -inf  ;;  %v9986_v27 = vsel %vm9911_vm4, %v9851_v55, -inf  ;;  %v9196_v18 = vpop.f32.mrf.mxu3  ;;  %v9627_v30 = vadd.f32 %v9167_v58, %v21913_v40  ;;  %v21927_v45 = vld [vmem:[#allocation373_spill] sm:$0xff]  ;;  %v21929_v15 = vld [vmem:[#allocation152_spill] sm:$0xff]  ;;  %v21932_v40 = vld [vmem:[#allocation107_spill] sm:$0xff] }
 0x85f   : > { %v9987_v4 = vmax.f32 %v9985_v44, %v9986_v27  ;;  %v9631_v17 = vadd.f32 %v9196_v18, %v21914_v35  ;;  %v9112_v33 = vpop.f32.mrf.mxu0  ;;  %v9141_v37 = vpop.f32.mrf.mxu1  ;;  %v6798_v7 = vadd.f32 %v21918_v47, %v5856_v13  ;;  %v3976_v56 = vadd.f32 %v21920_v48, %v21919_v25  ;;  %v21930_v58 = vld [vmem:[#allocation148_spill] sm:$0xff]  ;;  %v21931_v13 = vld [vmem:[#allocation106_spill] sm:$0xff]  ;;  %v21935_v19 = vld [vmem:[#allocation457_spill] sm:$0xff] }
 0x860   : > { %v10155_v21 = vld [vmem:[#allocation2 + $0x90] ss:$2 sm:$0x3f]  ;;  %v10211_v10 = vld [vmem:[#allocation2 + $0x91] ss:$2 sm:$0x3f]  ;;  %v9620_v42 = vadd.f32 %v9112_v33, %v8678_v36  ;;  %v9624_v8 = vadd.f32 %v9141_v37, %v8682_v34  ;;  %v9743_v59 = vadd.f32 %v18882_v5, %v9627_v30  ;;  %v6802_v22 = vadd.f32 %v21921_v14, %v5860_v11 }
 0x861   : > { %v10257_v54 = vmax.f32 %v10155_v21, %v10211_v10  ;;  %10104 = vst.msk [vmem:[#allocation2 + $0xb8] sm:$0xf] %vm9921_vm5, %v9984_v39  ;;  %v9747_v46 = vadd.f32 %v18882_v5, %v9631_v17  ;;  %v3980_v20 = vadd.f32 %v21923_v23, %v21922_v31  ;;  %v7737_v50 = vadd.f32 %v21924_v62, %v6798_v7  ;;  %v21933_v33 = vld [vmem:[#allocation253_spill] sm:$0xff]  ;;  %v21934_v37 = vld [vmem:[#allocation348_spill] sm:$0xff]  ;;  %v21938_v25 = vld [vmem:[#allocation202_spill] sm:$0xff] }
 0x862   : > { %10105 = vst.msk [vmem:[#allocation2 + $0xc0] sm:$0xff] %vm9911_vm4, %v9987_v4  ;;  %v9736_v0 = vadd.f32 %v18882_v5, %v9620_v42  ;;  %v9740_v16 = vadd.f32 %v18882_v5, %v9624_v8  ;;  %v9855_v26 = vmax.f32 %v9743_v59, 0.0  ;;  %v4915_v6 = vadd.f32 %v21925_v43, %v3976_v56  ;;  %v21936_v8 = vld [vmem:[#allocation538_spill] sm:$0xff]  ;;  %v21939_v56 = vld [vmem:[#allocation539_spill] sm:$0xff]  ;;  %v21943_v43 = vld [vmem:[#allocation8_spill] sm:$0xff] }
 0x863   : > { %10286 = vst.msk [vmem:[%s18521_s15 + $0x48] sm:$0x3f] %vm10277_vm6, %v10257_v54  ;;  %v9859_v49 = vmax.f32 %v9747_v46, 0.0  ;;  %v7741_v28 = vadd.f32 %v21926_v3, %v6802_v22  ;;  %v4919_v55 = vadd.f32 %v21927_v45, %v3980_v20  ;;  %v8679_v38 = vadd.f32 %v21928_v29, %v7737_v50  ;;  %v21937_v46 = vld [vmem:[#allocation290_spill] sm:$0xff]  ;;  %v21941_v23 = vld [vmem:[#allocation7_spill] sm:$0xff]  ;;  %v21945_v45 = vld [vmem:[#allocation165_spill] sm:$0xff] }
 0x864   : > { %v9848_v1 = vmax.f32 %v9736_v0, 0.0  ;;  %v9852_v61 = vmax.f32 %v9740_v16, 0.0  ;;  %v9997_v63 = vsel %vm9911_vm4, %v9855_v26, -inf  ;;  %v5857_v18 = vadd.f32 %v21930_v58, %v4915_v6  ;;  %v21940_v16 = vld [vmem:[#allocation224_spill] sm:$0xff]  ;;  %v21942_v26 = vld [vmem:[#allocation255_spill] sm:$0xff]  ;;  %v21948_v58 = vld [vmem:[#allocation121_spill] sm:$0xff] }
 0x865   : > { %v9998_v36 = vsel %vm9911_vm4, %v9859_v49, -inf  ;;  %v8683_v52 = vadd.f32 %v21929_v15, %v7741_v28  ;;  %v9170_v44 = vpop.f32.mrf.mxu2  ;;  %v18942_v41 = vadd.f32 %v21934_v37, %v21933_v33  ;;  %v5861_v9 = vadd.f32 %v21935_v19, %v4919_v55  ;;  %v21952_v33 = vld [vmem:[#allocation446_spill] sm:$0xff] }
 0x866   : > { %v9999_v57 = vmax.f32 %v9997_v63, %v9998_v36  ;;  %v9988_v34 = vsel %vm9911_vm4, %v9848_v1, -inf  ;;  %v9989_v39 = vsel %vm9911_vm4, %v9852_v61, -inf  ;;  %v9199_v27 = vpop.f32.mrf.mxu3  ;;  %v9628_v4 = vadd.f32 %v9170_v44, %v21931_v13  ;;  %v21944_v1 = vld [vmem:[#allocation353_spill] sm:$0xff] }
 0x867   : > { %v9990_v2 = vmax.f32 %v9988_v34, %v9989_v39  ;;  %v9632_v30 = vadd.f32 %v9199_v27, %v21932_v40  ;;  %v9115_v35 = vpop.f32.mrf.mxu0  ;;  %v9144_v17 = vpop.f32.mrf.mxu1  ;;  %v6799_v47 = vadd.f32 %v21936_v8, %v5857_v18  ;;  %v3989_v48 = vadd.f32 %v21938_v25, %v21937_v46  ;;  %v21947_v39 = vld [vmem:[#allocation444_spill] sm:$0xff]  ;;  %v21956_v46 = vld [vmem:[#allocation541_spill] sm:$0xff] }
 0x868   : > { %v10159_v11 = vld [vmem:[#allocation2 + $0xb0] ss:$2 sm:$0x3f]  ;;  %v10215_v21 = vld [vmem:[#allocation2 + $0xb1] ss:$2 sm:$0x3f]  ;;  %v9621_v10 = vadd.f32 %v9115_v35, %v8679_v38  ;;  %v9625_v42 = vadd.f32 %v9144_v17, %v8683_v52  ;;  %v9744_v54 = vadd.f32 %v18882_v5, %v9628_v4  ;;  %v6803_v14 = vadd.f32 %v21939_v56, %v5861_v9 }
 0x869   : > { %v10259_v7 = vmax.f32 %v10159_v11, %v10215_v21  ;;  %10109 = vst.msk [vmem:[#allocation2 + $0xe0] sm:$0xff] %vm9911_vm4, %v9999_v57  ;;  %v9748_v59 = vadd.f32 %v18882_v5, %v9632_v30  ;;  %v3993_v31 = vadd.f32 %v21940_v16, %v18274_v24  ;;  %v7738_v20 = vadd.f32 %v21941_v23, %v6799_v47  ;;  %v21946_v38 = vld [vmem:[#allocation168_spill] sm:$0xff]  ;;  %v21950_v30 = vld [vmem:[#allocation254_spill] sm:$0xff]  ;;  %v21951_v35 = vld [vmem:[#allocation349_spill] sm:$0xff] }
 0x86a   : > { %10106 = vst.msk [vmem:[#allocation2 + $0xc8] sm:$0xff] %vm9911_vm4, %v9990_v2  ;;  %v9737_v22 = vadd.f32 %v18882_v5, %v9621_v10  ;;  %v9741_v0 = vadd.f32 %v18882_v5, %v9625_v42  ;;  %v9856_v62 = vmax.f32 %v9744_v54, 0.0  ;;  %v4928_v49 = vadd.f32 %v21942_v26, %v3989_v48  ;;  %v21949_v2 = vld [vmem:[#allocation122_spill] sm:$0xff]  ;;  %v21953_v11 = vld [vmem:[#allocation292_spill] sm:$0xff]  ;;  %v21954_v21 = vld [vmem:[#allocation203_spill] sm:$0xff] }
 0x86b   : > { %10288 = vst.msk [vmem:[%s18521_s15 + $0x58] sm:$0x3f] %vm10277_vm6, %v10259_v7  ;;  %v9860_v50 = vmax.f32 %v9748_v59, 0.0  ;;  %v7742_v6 = vadd.f32 %v21943_v43, %v6803_v14  ;;  %v4932_v61 = vadd.f32 %v21944_v1, %v3993_v31  ;;  %v8680_v55 = vadd.f32 %v21945_v45, %v7738_v20  ;;  %v21955_v42 = vld [vmem:[#allocation540_spill] sm:$0xff]  ;;  %v21959_v31 = vld [vmem:[#allocation19_spill] sm:$0xff] }
 0x86c   : > { %v9849_v3 = vmax.f32 %v9737_v22, 0.0  ;;  %v9853_v28 = vmax.f32 %v9741_v0, 0.0  ;;  %v10000_v29 = vsel %vm9911_vm4, %v9856_v62, -inf  ;;  %v5870_v44 = vadd.f32 %v21947_v39, %v4928_v49  ;;  %v21957_v22 = vld [vmem:[#allocation275_spill] sm:$0xff]  ;;  %v21961_v49 = vld [vmem:[#allocation20_spill] sm:$0xff] }
 0x86d   : > { %v10001_v24 = vsel %vm9911_vm4, %v9860_v50, -inf  ;;  %v8684_v63 = vadd.f32 %v21946_v38, %v7742_v6  ;;  %v9173_v57 = vpop.f32.mrf.mxu2  ;;  %v18974_v17 = vadd.f32 %v21951_v35, %v21950_v30  ;;  %v5874_v37 = vadd.f32 %v21952_v33, %v4932_v61  ;;  %v21958_v0 = vld [vmem:[#allocation175_spill] sm:$0xff]  ;;  %v21960_v50 = vld [vmem:[#allocation256_spill] sm:$0xff]  ;;  %v21968_v35 = vld [vmem:[#allocation454_spill] sm:$0xff] }
 0x86e   : > { %v10002_v36 = vmax.f32 %v10000_v29, %v10001_v24  ;;  %v9991_v15 = vsel %vm9911_vm4, %v9849_v3, -inf  ;;  %v9992_v52 = vsel %vm9911_vm4, %v9853_v28, -inf  ;;  %v9202_v34 = vpop.f32.mrf.mxu3  ;;  %v9629_v18 = vadd.f32 %v9173_v57, %v21948_v58  ;;  %v21962_v28 = vld [vmem:[#allocation354_spill] sm:$0xff]  ;;  %v21963_v61 = vld [vmem:[#allocation159_spill] sm:$0xff]  ;;  %v21964_v24 = vld [vmem:[#allocation160_spill] sm:$0xff] }
 0x86f   : > { %v9993_v27 = vmax.f32 %v9991_v15, %v9992_v52  ;;  %v9633_v13 = vadd.f32 %v9202_v34, %v21949_v2  ;;  %v9118_v4 = vpop.f32.mrf.mxu0  ;;  %v9147_v40 = vpop.f32.mrf.mxu1  ;;  %v3990_v10 = vadd.f32 %v21954_v21, %v21953_v11  ;;  %v6812_v8 = vadd.f32 %v21955_v42, %v5870_v44  ;;  %v21965_v34 = vld [vmem:[#allocation448_spill] sm:$0xff]  ;;  %v21969_v11 = vld [vmem:[#allocation257_spill] sm:$0xff]  ;;  %v21970_v21 = vld [vmem:[#allocation355_spill] sm:$0xff] }
 0x870   : > { %10110 = vst.msk [vmem:[#allocation2 + $0xe8] sm:$0xff] %vm9911_vm4, %v10002_v36  ;;  %v9622_v19 = vadd.f32 %v9118_v4, %v8680_v55  ;;  %v9626_v9 = vadd.f32 %v9147_v40, %v8684_v63  ;;  %v9745_v54 = vadd.f32 %v18882_v5, %v9629_v18  ;;  %v6816_v25 = vadd.f32 %v21956_v46, %v5874_v37  ;;  %v21966_v18 = vld [vmem:[#allocation113_spill] sm:$0xff]  ;;  %v21971_v42 = vld [vmem:[#allocation542_spill] sm:$0xff] }
 0x871   : > { %v10161_v47 = vld [vmem:[#allocation2 + $0xc0] ss:$2 sm:$0xff]  ;;  %v10217_v7 = vld [vmem:[#allocation2 + $0xc1] ss:$2 sm:$0xff]  ;;  %10107 = vst.msk [vmem:[#allocation2 + $0xd0] sm:$0xff] %vm9911_vm4, %v9993_v27  ;;  %v9749_v59 = vadd.f32 %v18882_v5, %v9633_v13  ;;  %v3994_v16 = vadd.f32 %v21958_v0, %v21957_v22  ;;  %v7751_v23 = vadd.f32 %v21959_v31, %v6812_v8  ;;  %v4929_v26 = vadd.f32 %v21960_v50, %v3990_v10  ;;  %v21967_v13 = vld [vmem:[#allocation114_spill] sm:$0xff] }
 0x872   : > { %v10260_v48 = vmax.f32 %v10161_v47, %v10217_v7  ;;  %v9738_v56 = vadd.f32 %v18882_v5, %v9622_v19  ;;  %v9742_v14 = vadd.f32 %v18882_v5, %v9626_v9  ;;  %v9857_v20 = vmax.f32 %v9745_v54, 0.0  ;;  %v21972_v54 = vld [vmem:[#allocation276_spill] sm:$0xff]  ;;  %v21975_v22 = vld [vmem:[#allocation319_spill] sm:$0xff]  ;;  %v21976_v0 = vld [vmem:[#allocation178_spill] sm:$0xff] }
 0x873   : > { %v9861_v62 = vmax.f32 %v9749_v59, 0.0  ;;  %v7755_v43 = vadd.f32 %v21961_v49, %v6816_v25  ;;  %v4933_v1 = vadd.f32 %v21962_v28, %v3994_v16  ;;  %v8693_v45 = vadd.f32 %v21963_v61, %v7751_v23  ;;  %v21973_v59 = vld [vmem:[#allocation179_spill] sm:$0xff]  ;;  %v21977_v31 = vld [vmem:[#allocation13_spill] sm:$0xff]  ;;  %v21979_v49 = vld [vmem:[#allocation14_spill] sm:$0xff] }
 0x874   : > { %10289 = vst.msk [vmem:[%s18521_s15 + $0x60] sm:$0xff] %vm9911_vm4, %v10260_v48  ;;  %v9850_v6 = vmax.f32 %v9738_v56, 0.0  ;;  %v9854_v3 = vmax.f32 %v9742_v14, 0.0  ;;  %v10003_v55 = vsel %vm9911_vm4, %v9857_v20, -inf  ;;  %v5871_v39 = vadd.f32 %v21965_v34, %v4929_v26  ;;  %v21974_v25 = vld [vmem:[#allocation543_spill] sm:$0xff]  ;;  %v21980_v28 = vld [vmem:[#allocation341_spill] sm:$0xff] }
 0x875   : > { %v10004_v29 = vsel %vm9911_vm4, %v9861_v62, -inf  ;;  %v8697_v38 = vadd.f32 %v21964_v24, %v7755_v43  ;;  %v9176_v52 = vpop.f32.mrf.mxu2  ;;  %v5875_v33 = vadd.f32 %v21968_v35, %v4933_v1  ;;  %v19008_v10 = vadd.f32 %v21970_v21, %v21969_v11  ;;  %v21978_v50 = vld [vmem:[#allocation339_spill] sm:$0xff]  ;;  %v21981_v61 = vld [vmem:[#allocation184_spill] sm:$0xff] }
 0x876   : > { %v10005_v63 = vmax.f32 %v10003_v55, %v10004_v29  ;;  %v9994_v36 = vsel %vm9921_vm5, %v9850_v6, -inf  ;;  %v9995_v15 = vsel %vm9921_vm5, %v9854_v3, -inf  ;;  %v9205_v57 = vpop.f32.mrf.mxu3  ;;  %v9630_v2 = vadd.f32 %v9176_v52, %v21966_v18  ;;  %v21982_v24 = vld [vmem:[#allocation187_spill] sm:$0xff] }
 0x877   : > { %v10165_v44 = vld [vmem:[#allocation2 + $0xe0] ss:$2 sm:$0xff]  ;;  %v10221_v27 = vld [vmem:[#allocation2 + $0xe1] ss:$2 sm:$0xff]  ;;  %v9996_v58 = vmax.f32 %v9994_v36, %v9995_v15  ;;  %v9634_v4 = vadd.f32 %v9205_v57, %v21967_v13  ;;  %v9225_v40 = vpop.f32.mrf.mxu0  ;;  %v6813_v8 = vadd.f32 %v21971_v42, %v5871_v39  ;;  %v3991_v46 = vadd.f32 %v21973_v59, %v21972_v54  ;;  %v21990_v59 = vld [vmem:[#allocation289_spill] sm:$0xff] }
 0x878   : > { %v9254_v30 = vpop.f32.mrf.mxu1  ;;  %v10262_v37 = vmax.f32 %v10165_v44, %v10221_v27  ;;  %10111 = vst.msk [vmem:[#allocation2 + $0xf0] sm:$0xff] %vm9911_vm4, %v10005_v63  ;;  %v9635_v19 = vadd.f32 %v9225_v40, %v8693_v45  ;;  %v9746_v47 = vadd.f32 %v18882_v5, %v9630_v2  ;;  %v6817_v48 = vadd.f32 %v21974_v25, %v5875_v33  ;;  %v21983_v34 = vld [vmem:[#allocation455_spill] sm:$0xff]  ;;  %v21984_v27 = vld [vmem:[#allocation142_spill] sm:$0xff]  ;;  %v21988_v33 = vld [vmem:[#allocation456_spill] sm:$0xff] }
 0x879   : > { %v9639_v9 = vadd.f32 %v9254_v30, %v8697_v38  ;;  %10108 = vst.msk [vmem:[#allocation2 + $0xd8] sm:$0xf] %vm9921_vm5, %v9996_v58  ;;  %v9750_v7 = vadd.f32 %v18882_v5, %v9634_v4  ;;  %v3995_v16 = vadd.f32 %v21976_v0, %v21975_v22  ;;  %v7752_v23 = vadd.f32 %v21977_v31, %v6813_v8  ;;  %v21985_v18 = vld [vmem:[#allocation143_spill] sm:$0xff]  ;;  %v21986_v40 = vld [vmem:[#allocation258_spill] sm:$0xff]  ;;  %v21987_v30 = vld [vmem:[#allocation356_spill] sm:$0xff] }
 0x87a   : > { %10291 = vst.msk [vmem:[%s18521_s15 + $0x70] sm:$0xff] %vm9911_vm4, %v10262_v37  ;;  %v9751_v56 = vadd.f32 %v18882_v5, %v9635_v19  ;;  %v9858_v20 = vmax.f32 %v9746_v47, 0.0  ;;  %v4930_v26 = vadd.f32 %v21978_v50, %v3991_v46  ;;  %v7756_v43 = vadd.f32 %v21979_v49, %v6817_v48  ;;  %v21989_v42 = vld [vmem:[#allocation544_spill] sm:$0xff]  ;;  %v21991_v25 = vld [vmem:[#allocation545_spill] sm:$0xff]  ;;  %v21992_v22 = vld [vmem:[#allocation322_spill] sm:$0xff] }
 0x87b   : > { %v9755_v14 = vadd.f32 %v18882_v5, %v9639_v9  ;;  %v9862_v62 = vmax.f32 %v9750_v7, 0.0  ;;  %v4934_v1 = vadd.f32 %v21980_v28, %v3995_v16  ;;  %v8694_v45 = vadd.f32 %v21981_v61, %v7752_v23  ;;  %v21993_v0 = vld [vmem:[#allocation227_spill] sm:$0xff] }
 0x87c   : > { %v9863_v6 = vmax.f32 %v9751_v56, 0.0  ;;  %v10006_v55 = vsel %vm9921_vm5, %v9858_v20, -inf  ;;  %v8698_v38 = vadd.f32 %v21982_v24, %v7756_v43  ;;  %v5872_v39 = vadd.f32 %v21983_v34, %v4930_v26  ;;  %v21994_v31 = vld [vmem:[#allocation27_spill] sm:$0xff] }
 0x87d   : > { %v9867_v3 = vmax.f32 %v9755_v14, 0.0  ;;  %v10007_v29 = vsel %vm9921_vm5, %v9862_v62, -inf  ;;  %v19038_v35 = vadd.f32 %v21987_v30, %v21986_v40  ;;  %v5876_v37 = vadd.f32 %v21988_v33, %v4934_v1  ;;  %v21995_v50 = vld [vmem:[#allocation343_spill] sm:$0xff]  ;;  %v21998_v1 = vld [vmem:[#allocation196_spill] sm:$0xff] }
 0x87e   : > { %v10008_v63 = vmax.f32 %v10006_v55, %v10007_v29  ;;  %v10009_v36 = vsel %vm9911_vm4, %v9863_v6, -inf  ;;  %v6814_v8 = vadd.f32 %v21989_v42, %v5872_v39  ;;  %v3992_v46 = vadd.f32 %v21990_v59, %v18298_v32  ;;  %v21996_v32 = vld [vmem:[#allocation28_spill] sm:$0xff]  ;;  %v21999_v29 = vld [vmem:[#allocation199_spill] sm:$0xff]  ;;  %v22006_v42 = vld [vmem:[#allocation546_spill] sm:$0xff] }
 0x87f   : > { %v10010_v15 = vsel %vm9911_vm4, %v9867_v3, -inf  ;;  %v9228_v13 = vpop.f32.mrf.mxu0  ;;  %v6818_v48 = vadd.f32 %v21991_v25, %v5876_v37  ;;  %v3996_v16 = vadd.f32 %v21993_v0, %v21992_v22  ;;  %v21997_v3 = vld [vmem:[#allocation385_spill] sm:$0xff]  ;;  %v22004_v40 = vld [vmem:[#allocation368_spill] sm:$0xff]  ;;  %v22007_v59 = vld [vmem:[#allocation287_spill] sm:$0xff] }
 0x880   : > { %v9283_v52 = vpop.f32.mrf.mxu2  ;;  %v10011_v44 = vmax.f32 %v10009_v36, %v10010_v15  ;;  %v10163_v19 = vld [vmem:[#allocation2 + $0xd0] ss:$2 sm:$0x3f]  ;;  %v10219_v9 = vld [vmem:[#allocation2 + $0xd1] ss:$2 sm:$0x3f]  ;;  %v9636_v11 = vadd.f32 %v9228_v13, %v8694_v45  ;;  %v7753_v23 = vadd.f32 %v21994_v31, %v6814_v8  ;;  %v4931_v26 = vadd.f32 %v21995_v50, %v3992_v46 }
 0x881   : > { %v9312_v57 = vpop.f32.mrf.mxu3  ;;  %v9643_v58 = vadd.f32 %v9283_v52, %v21984_v27  ;;  %v9257_v4 = vpop.f32.mrf.mxu1  ;;  %v10261_v47 = vmax.f32 %v10163_v19, %v10219_v9  ;;  %10112 = vst.msk [vmem:[#allocation2 + $0xf8] sm:$0xf] %vm9921_vm5, %v10008_v63  ;;  %v7757_v49 = vadd.f32 %v21996_v32, %v6818_v48  ;;  %v4935_v28 = vadd.f32 %v21997_v3, %v3996_v16  ;;  %v22005_v33 = vld [vmem:[#allocation172_spill] sm:$0xff]  ;;  %v22008_v46 = vld [vmem:[#allocation269_spill] sm:$0xff]  ;;  %v22009_v48 = vld [vmem:[#allocation547_spill] sm:$0xff] }
 0x882   : > { %v9647_v2 = vadd.f32 %v9312_v57, %v21985_v18  ;;  %v9640_v21 = vadd.f32 %v9257_v4, %v8698_v38  ;;  %10113 = vst.msk [vmem:[#allocation2 + $0x100] sm:$0xff] %vm9911_vm4, %v10011_v44  ;;  %v9752_v56 = vadd.f32 %v18882_v5, %v9636_v11  ;;  %v8695_v61 = vadd.f32 %v21998_v1, %v7753_v23  ;;  %v22000_v57 = vld [vmem:[#allocation171_spill] sm:$0xff]  ;;  %v22001_v44 = vld [vmem:[#allocation154_spill] sm:$0xff]  ;;  %v22010_v0 = vld [vmem:[#allocation288_spill] sm:$0xff] }
 0x883   : > { %v9759_v7 = vadd.f32 %v18882_v5, %v9643_v58  ;;  %10290 = vst.msk [vmem:[%s18521_s15 + $0x68] sm:$0x3f] %vm10277_vm6, %v10261_v47  ;;  %v8699_v24 = vadd.f32 %v21999_v29, %v7757_v49  ;;  %v5873_v34 = vadd.f32 %v22000_v57, %v4931_v26  ;;  %v22002_v58 = vld [vmem:[#allocation155_spill] sm:$0xff]  ;;  %v5877_v37 = vadd.f32 %v22005_v33, %v4935_v28  ;;  %v22011_v16 = vld [vmem:[#allocation228_spill] sm:$0xff]  ;;  %v22012_v23 = vld [vmem:[#allocation10_spill] sm:$0xff] }
 0x884   : > { %v9763_v54 = vadd.f32 %v18882_v5, %v9647_v2  ;;  %v9756_v14 = vadd.f32 %v18882_v5, %v9640_v21  ;;  %v9864_v43 = vmax.f32 %v9752_v56, 0.0  ;;  %v22003_v4 = vld [vmem:[#allocation259_spill] sm:$0xff]  ;;  %v4005_v25 = vadd.f32 %v22008_v46, %v22007_v59  ;;  %v22015_v28 = vld [vmem:[#allocation365_spill] sm:$0xff] }
 0x885   : > { %v9871_v20 = vmax.f32 %v9759_v7, 0.0  ;;  %v19070_v30 = vadd.f32 %v22004_v40, %v22003_v4  ;;  %v6815_v8 = vadd.f32 %v22006_v42, %v5873_v34  ;;  %v6819_v56 = vadd.f32 %v22009_v48, %v5877_v37  ;;  %v22013_v26 = vld [vmem:[#allocation39_spill] sm:$0xff]  ;;  %v22018_v34 = vld [vmem:[#allocation464_spill] sm:$0xff]  ;;  %v22022_v33 = vld [vmem:[#allocation369_spill] sm:$0xff] }
 0x886   : > { %v9875_v62 = vmax.f32 %v9763_v54, 0.0  ;;  %v9868_v6 = vmax.f32 %v9756_v14, 0.0  ;;  %v10012_v63 = vsel %vm9911_vm4, %v9864_v43, -inf  ;;  %v4009_v31 = vadd.f32 %v22011_v16, %v22010_v0  ;;  %v22014_v49 = vld [vmem:[#allocation11_spill] sm:$0xff]  ;;  %v22021_v40 = vld [vmem:[#allocation260_spill] sm:$0xff]  ;;  %v22024_v42 = vld [vmem:[#allocation270_spill] sm:$0xff] }
 0x887   : > { %v10021_v45 = vsel %vm9911_vm4, %v9871_v20, -inf  ;;  %v9231_v2 = vpop.f32.mrf.mxu0  ;;  %v7754_v20 = vadd.f32 %v22012_v23, %v6815_v8  ;;  %v4944_v32 = vadd.f32 %v22013_v26, %v4005_v25  ;;  %v7758_v43 = vadd.f32 %v22014_v49, %v6819_v56  ;;  %v22026_v48 = vld [vmem:[#allocation549_spill] sm:$0xff] }
 0x888   : > { %v10022_v55 = vsel %vm9911_vm4, %v9875_v62, -inf  ;;  %v10013_v36 = vsel %vm9911_vm4, %v9868_v6, -inf  ;;  %v9286_v15 = vpop.f32.mrf.mxu2  ;;  %v10167_v19 = vld [vmem:[#allocation2 + $0xf0] ss:$2 sm:$0x3f]  ;;  %v9637_v11 = vadd.f32 %v9231_v2, %v8695_v61  ;;  %v4948_v1 = vadd.f32 %v22015_v28, %v4009_v31  ;;  %v22028_v31 = vld [vmem:[#allocation23_spill] sm:$0xff] }
 0x889   : > { %v10023_v38 = vmax.f32 %v10021_v45, %v10022_v55  ;;  %v9315_v52 = vpop.f32.mrf.mxu3  ;;  %v10014_v39 = vmax.f32 %v10012_v63, %v10013_v36  ;;  %v9644_v27 = vadd.f32 %v9286_v15, %v22001_v44  ;;  %v9260_v13 = vpop.f32.mrf.mxu1  ;;  %v10223_v9 = vld [vmem:[#allocation2 + $0xf1] ss:$2 sm:$0x3f]  ;;  %v19102_v37 = vadd.f32 %v22022_v33, %v22021_v40  ;;  %v22037_v40 = vld [vmem:[#allocation476_spill] sm:$0xff] }
 0x88a   : > { %v9648_v18 = vadd.f32 %v9315_v52, %v22002_v58  ;;  %v9641_v21 = vadd.f32 %v9260_v13, %v8699_v24  ;;  %v10263_v47 = vmax.f32 %v10167_v19, %v10223_v9  ;;  %v9753_v14 = vadd.f32 %v18882_v5, %v9637_v11  ;;  %v22016_v61 = vld [vmem:[#allocation169_spill] sm:$0xff]  ;;  %v22017_v24 = vld [vmem:[#allocation170_spill] sm:$0xff] }
 0x88b   : > { %10117 = vst.msk [vmem:[#allocation2 + $0x120] sm:$0xff] %vm9911_vm4, %v10023_v38  ;;  %v9760_v7 = vadd.f32 %v18882_v5, %v9644_v27  ;;  %v8696_v45 = vadd.f32 %v22016_v61, %v7754_v20  ;;  %v8700_v38 = vadd.f32 %v22017_v24, %v7758_v43  ;;  %v22019_v27 = vld [vmem:[#allocation573_spill] sm:$0xff]  ;;  %v22023_v19 = vld [vmem:[#allocation466_spill] sm:$0xff]  ;;  %v4006_v8 = vadd.f32 %v22024_v42, %v18875_v53  ;;  %v22027_v53 = vld [vmem:[#allocation263_spill] sm:$0xff] }
 0x88c   : > { %v9764_v54 = vadd.f32 %v18882_v5, %v9648_v18  ;;  %10114 = vst.msk [vmem:[#allocation2 + $0x108] sm:$0xff] %vm9911_vm4, %v10014_v39  ;;  %v9757_v22 = vadd.f32 %v18882_v5, %v9641_v21  ;;  %v9865_v6 = vmax.f32 %v9753_v14, 0.0  ;;  %v5886_v39 = vadd.f32 %v22018_v34, %v4944_v32  ;;  %v22020_v18 = vld [vmem:[#allocation574_spill] sm:$0xff]  ;;  %v22030_v32 = vld [vmem:[#allocation24_spill] sm:$0xff] }
 0x88d   : > { %10292 = vst.msk [vmem:[%s18521_s15 + $0x78] sm:$0x3f] %vm10277_vm6, %v10263_v47  ;;  %v9872_v62 = vmax.f32 %v9760_v7, 0.0  ;;  %v5890_v9 = vadd.f32 %v22023_v19, %v4948_v1  ;;  %v22025_v47 = vld [vmem:[#allocation548_spill] sm:$0xff]  ;;  %v4010_v16 = vadd.f32 %v22027_v53, %v18910_v12 }
 0x88e   : > { %v9876_v50 = vmax.f32 %v9764_v54, 0.0  ;;  %v9869_v3 = vmax.f32 %v9757_v22, 0.0  ;;  %v10015_v36 = vsel %vm9911_vm4, %v9865_v6, -inf  ;;  %v6828_v7 = vadd.f32 %v22025_v47, %v5886_v39  ;;  %v22032_v1 = vld [vmem:[#allocation360_spill] sm:$0xff]  ;;  %v22040_v47 = vld [vmem:[#allocation550_spill] sm:$0xff] }
 0x88f   : > { %v10024_v55 = vsel %vm9911_vm4, %v9872_v62, -inf  ;;  %v9234_v13 = vpop.f32.mrf.mxu0  ;;  %v6832_v56 = vadd.f32 %v22026_v48, %v5890_v9  ;;  %v22039_v42 = vld [vmem:[#allocation380_spill] sm:$0xff]  ;;  %v22042_v48 = vld [vmem:[#allocation551_spill] sm:$0xff] }
 0x890   : > { %v10025_v29 = vsel %vm9911_vm4, %v9876_v50, -inf  ;;  %v10016_v15 = vsel %vm9911_vm4, %v9869_v3, -inf  ;;  %v9289_v52 = vpop.f32.mrf.mxu2  ;;  %v9638_v11 = vadd.f32 %v9234_v13, %v8696_v45  ;;  %v7767_v23 = vadd.f32 %v22028_v31, %v6828_v7  ;;  %v22029_v50 = vld [vmem:[#allocation40_spill] sm:$0xff]  ;;  %v22031_v3 = vld [vmem:[#allocation366_spill] sm:$0xff] }
 0x891   : > { %v10026_v63 = vmax.f32 %v10024_v55, %v10025_v29  ;;  %v9318_v57 = vpop.f32.mrf.mxu3  ;;  %v10017_v44 = vmax.f32 %v10015_v36, %v10016_v15  ;;  %v9645_v58 = vadd.f32 %v9289_v52, %v22019_v27  ;;  %v9263_v4 = vpop.f32.mrf.mxu1  ;;  %v4945_v26 = vadd.f32 %v22029_v50, %v4006_v8  ;;  %v22033_v55 = vld [vmem:[#allocation161_spill] sm:$0xff]  ;;  %v22034_v52 = vld [vmem:[#allocation468_spill] sm:$0xff] }
 0x892   : > { %v9649_v2 = vadd.f32 %v9318_v57, %v22020_v18  ;;  %v9642_v21 = vadd.f32 %v9263_v4, %v8700_v38  ;;  %v9754_v22 = vadd.f32 %v18882_v5, %v9638_v11  ;;  %v7771_v49 = vadd.f32 %v22030_v32, %v6832_v56  ;;  %v22035_v27 = vld [vmem:[#allocation209_spill] sm:$0xff]  ;;  %v22036_v18 = vld [vmem:[#allocation212_spill] sm:$0xff] }
 0x893   : > { %10118 = vst.msk [vmem:[#allocation2 + $0x128] sm:$0xff] %vm9911_vm4, %v10026_v63  ;;  %v10169_v54 = vld [vmem:[#allocation2 + $0x100] ss:$2 sm:$0xff]  ;;  %v10225_v59 = vld [vmem:[#allocation2 + $0x101] ss:$2 sm:$0xff]  ;;  %v9761_v46 = vadd.f32 %v18882_v5, %v9645_v58  ;;  %v4949_v28 = vadd.f32 %v22031_v3, %v4010_v16  ;;  %v8709_v61 = vadd.f32 %v22032_v1, %v7767_v23  ;;  %v5887_v57 = vadd.f32 %v22034_v52, %v4945_v26  ;;  %v22044_v16 = vld [vmem:[#allocation17_spill] sm:$0xff] }
 0x894   : > { %10115 = vst.msk [vmem:[#allocation2 + $0x110] sm:$0xff] %vm9911_vm4, %v10017_v44  ;;  %v9765_v25 = vadd.f32 %v18882_v5, %v9649_v2  ;;  %v10264_v14 = vmax.f32 %v10169_v54, %v10225_v59  ;;  %v9758_v0 = vadd.f32 %v18882_v5, %v9642_v21  ;;  %v9866_v43 = vmax.f32 %v9754_v22, 0.0  ;;  %v22038_v21 = vld [vmem:[#allocation53_spill] sm:$0xff]  ;;  %v22046_v26 = vld [vmem:[#allocation18_spill] sm:$0xff] }
 0x895   : > { %v9873_v20 = vmax.f32 %v9761_v46, 0.0  ;;  %v8713_v29 = vadd.f32 %v22033_v55, %v7771_v49  ;;  %v5891_v33 = vadd.f32 %v22037_v40, %v4949_v28  ;;  %v19136_v8 = vadd.f32 %v22039_v42, %v22038_v21  ;;  %v22041_v46 = vld [vmem:[#allocation265_spill] sm:$0xff]  ;;  %v22051_v52 = vld [vmem:[#allocation162_spill] sm:$0xff] }
 0x896   : > { %v9877_v62 = vmax.f32 %v9765_v25, 0.0  ;;  %10293 = vst.msk [vmem:[%s18521_s15 + $0x80] sm:$0xff] %vm9911_vm4, %v10264_v14  ;;  %v9870_v6 = vmax.f32 %v9758_v0, 0.0  ;;  %v10018_v38 = vsel %vm9921_vm5, %v9866_v43, -inf  ;;  %v6829_v7 = vadd.f32 %v22040_v47, %v5887_v57  ;;  %v22043_v0 = vld [vmem:[#allocation267_spill] sm:$0xff]  ;;  %v22047_v43 = vld [vmem:[#allocation361_spill] sm:$0xff] }
 0x897   : > { %v10027_v45 = vsel %vm9911_vm4, %v9873_v20, -inf  ;;  %v9341_v13 = vpop.f32.mrf.mxu0  ;;  %v4007_v25 = vadd.f32 %v22041_v46, %v18942_v41  ;;  %v6833_v56 = vadd.f32 %v22042_v48, %v5891_v33  ;;  %v4011_v53 = vadd.f32 %v22043_v0, %v18974_v17  ;;  %v22048_v3 = vld [vmem:[#allocation205_spill] sm:$0xff]  ;;  %v22060_v0 = vld [vmem:[#allocation31_spill] sm:$0xff] }
 0x898   : > { %v10028_v12 = vsel %vm9911_vm4, %v9877_v62, -inf  ;;  %v10019_v63 = vsel %vm9921_vm5, %v9870_v6, -inf  ;;  %v9292_v36 = vpop.f32.mrf.mxu2  ;;  %v9651_v9 = vadd.f32 %v9341_v13, %v8709_v61  ;;  %v7768_v31 = vadd.f32 %v22044_v16, %v6829_v7  ;;  %v22045_v62 = vld [vmem:[#allocation359_spill] sm:$0xff]  ;;  %v22055_v13 = vld [vmem:[#allocation480_spill] sm:$0xff]  ;;  %v22058_v46 = vld [vmem:[#allocation553_spill] sm:$0xff] }
 0x899   : > { %v10029_v24 = vmax.f32 %v10027_v45, %v10028_v12  ;;  %v9321_v15 = vpop.f32.mrf.mxu3  ;;  %v10020_v44 = vmax.f32 %v10018_v38, %v10019_v63  ;;  %v9646_v58 = vadd.f32 %v9292_v36, %v22035_v27  ;;  %v9370_v4 = vpop.f32.mrf.mxu1  ;;  %v4946_v50 = vadd.f32 %v22045_v62, %v4007_v25  ;;  %v22049_v45 = vld [vmem:[#allocation189_spill] sm:$0xff]  ;;  %v22050_v63 = vld [vmem:[#allocation478_spill] sm:$0xff] }
 0x89a   : > { %v10173_v34 = vld [vmem:[#allocation2 + $0x120] ss:$2 sm:$0xff]  ;;  %v10229_v39 = vld [vmem:[#allocation2 + $0x121] ss:$2 sm:$0xff]  ;;  %v9650_v2 = vadd.f32 %v9321_v15, %v22036_v18  ;;  %v9655_v11 = vadd.f32 %v9370_v4, %v8713_v29  ;;  %v9767_v14 = vadd.f32 %v18882_v5, %v9651_v9  ;;  %v7772_v32 = vadd.f32 %v22046_v26, %v6833_v56  ;;  %v22054_v18 = vld [vmem:[#allocation381_spill] sm:$0xff] }
 0x89b   : > { %v10266_v19 = vmax.f32 %v10173_v34, %v10229_v39  ;;  %10119 = vst.msk [vmem:[#allocation2 + $0x130] sm:$0xff] %vm9911_vm4, %v10029_v24  ;;  %v9762_v54 = vadd.f32 %v18882_v5, %v9646_v58  ;;  %v4950_v6 = vadd.f32 %v22047_v43, %v4011_v53  ;;  %v8710_v28 = vadd.f32 %v22048_v3, %v7768_v31  ;;  %v22052_v34 = vld [vmem:[#allocation204_spill] sm:$0xff]  ;;  %v22053_v58 = vld [vmem:[#allocation55_spill] sm:$0xff] }
 0x89c   : > { %10116 = vst.msk [vmem:[#allocation2 + $0x118] sm:$0xf] %vm9921_vm5, %v10020_v44  ;;  %v9766_v59 = vadd.f32 %v18882_v5, %v9650_v2  ;;  %v9771_v22 = vadd.f32 %v18882_v5, %v9655_v11  ;;  %v9879_v41 = vmax.f32 %v9767_v14, 0.0  ;;  %v8714_v17 = vadd.f32 %v22049_v45, %v7772_v32  ;;  %v22056_v11 = vld [vmem:[#allocation552_spill] sm:$0xff]  ;;  %v22059_v14 = vld [vmem:[#allocation231_spill] sm:$0xff]  ;;  %v22063_v32 = vld [vmem:[#allocation405_spill] sm:$0xff] }
 0x89d   : > { %10295 = vst.msk [vmem:[%s18521_s15 + $0x90] sm:$0xff] %vm9911_vm4, %v10266_v19  ;;  %v9874_v23 = vmax.f32 %v9762_v54, 0.0  ;;  %v5888_v36 = vadd.f32 %v22050_v63, %v4946_v50  ;;  %v19166_v2 = vadd.f32 %v22054_v18, %v22053_v58  ;;  %v5892_v4 = vadd.f32 %v22055_v13, %v4950_v6  ;;  %v22057_v54 = vld [vmem:[#allocation309_spill] sm:$0xff]  ;;  %v22065_v3 = vld [vmem:[#allocation200_spill] sm:$0xff] }
 0x89e   : > { %v9878_v20 = vmax.f32 %v9766_v59, 0.0  ;;  %v9883_v49 = vmax.f32 %v9771_v22, 0.0  ;;  %v10033_v55 = vsel %vm9911_vm4, %v9879_v41, -inf  ;;  %v4008_v59 = vadd.f32 %v22057_v54, %v19008_v10  ;;  %v22062_v10 = vld [vmem:[#allocation32_spill] sm:$0xff] }
 0x89f   : > { %v10030_v1 = vsel %vm9921_vm5, %v9874_v23, -inf  ;;  %v9344_v44 = vpop.f32.mrf.mxu0  ;;  %v6830_v21 = vadd.f32 %v22056_v11, %v5888_v36  ;;  %v6834_v25 = vadd.f32 %v22058_v46, %v5892_v4  ;;  %v4012_v22 = vadd.f32 %v22059_v14, %v19038_v35  ;;  %v22061_v23 = vld [vmem:[#allocation363_spill] sm:$0xff]  ;;  %v22068_v36 = vld [vmem:[#allocation100_spill] sm:$0xff] }
 0x8a0   : > { %v10031_v61 = vsel %vm9921_vm5, %v9878_v20, -inf  ;;  %v10034_v29 = vsel %vm9911_vm4, %v9883_v49, -inf  ;;  %v9399_v24 = vpop.f32.mrf.mxu2  ;;  %v9652_v19 = vadd.f32 %v9344_v44, %v8710_v28  ;;  %v4947_v20 = vadd.f32 %v22061_v23, %v4008_v59  ;;  %v22064_v49 = vld [vmem:[#allocation516_spill] sm:$0xff] }
 0x8a1   : > { %v10032_v12 = vmax.f32 %v10030_v1, %v10031_v61  ;;  %v9428_v38 = vpop.f32.mrf.mxu3  ;;  %v10035_v15 = vmax.f32 %v10033_v55, %v10034_v29  ;;  %v9659_v57 = vadd.f32 %v9399_v24, %v22051_v52  ;;  %v9373_v27 = vpop.f32.mrf.mxu1  ;;  %v7769_v53 = vadd.f32 %v22060_v0, %v6830_v21  ;;  %v22066_v55 = vld [vmem:[#allocation195_spill] sm:$0xff] }
 0x8a2   : > { %v9663_v39 = vadd.f32 %v9428_v38, %v22052_v34  ;;  %v9656_v9 = vadd.f32 %v9373_v27, %v8714_v17  ;;  %v9768_v48 = vadd.f32 %v18882_v5, %v9652_v19  ;;  %v7773_v62 = vadd.f32 %v22062_v10, %v6834_v25  ;;  %v22067_v38 = vld [vmem:[#allocation190_spill] sm:$0xff]  ;;  %v22071_v27 = vld [vmem:[#allocation477_spill] sm:$0xff]  ;;  %v22075_v25 = vld [vmem:[#allocation232_spill] sm:$0xff] }
 0x8a3   : > { %v10171_v40 = vld [vmem:[#allocation2 + $0x110] ss:$2 sm:$0x3f]  ;;  %v10227_v33 = vld [vmem:[#allocation2 + $0x111] ss:$2 sm:$0x3f]  ;;  %v9775_v47 = vadd.f32 %v18882_v5, %v9659_v57  ;;  %v4951_v41 = vadd.f32 %v22063_v32, %v4012_v22  ;;  %v8711_v43 = vadd.f32 %v22064_v49, %v7769_v53  ;;  %v5889_v29 = vadd.f32 %v22066_v55, %v4947_v20 }
 0x8a4   : > { %v10265_v42 = vmax.f32 %v10171_v40, %v10227_v33  ;;  %10120 = vst.msk [vmem:[#allocation2 + $0x138] sm:$0xf] %vm9921_vm5, %v10032_v12  ;;  %v9779_v7 = vadd.f32 %v18882_v5, %v9663_v39  ;;  %v9772_v56 = vadd.f32 %v18882_v5, %v9656_v9  ;;  %v9880_v50 = vmax.f32 %v9768_v48, 0.0  ;;  %v22069_v34 = vld [vmem:[#allocation54_spill] sm:$0xff]  ;;  %v22070_v39 = vld [vmem:[#allocation396_spill] sm:$0xff]  ;;  %v22077_v53 = vld [vmem:[#allocation377_spill] sm:$0xff] }
 0x8a5   : > { %10121 = vst.msk [vmem:[#allocation2 + $0x140] sm:$0xff] %vm9911_vm4, %v10035_v15  ;;  %v9887_v16 = vmax.f32 %v9775_v47, 0.0  ;;  %v8715_v28 = vadd.f32 %v22065_v3, %v7773_v62  ;;  %v19198_v44 = vadd.f32 %v22070_v39, %v22069_v34  ;;  %v5893_v58 = vadd.f32 %v22071_v27, %v4951_v41  ;;  %v22072_v33 = vld [vmem:[#allocation554_spill] sm:$0xff]  ;;  %v22079_v10 = vld [vmem:[#allocation51_spill] sm:$0xff]  ;;  %v22084_v55 = vld [vmem:[#allocation412_spill] sm:$0xff] }
 0x8a6   : > { %10294 = vst.msk [vmem:[%s18521_s15 + $0x88] sm:$0x3f] %vm10277_vm6, %v10265_v42  ;;  %v9891_v31 = vmax.f32 %v9779_v7, 0.0  ;;  %v9884_v26 = vmax.f32 %v9772_v56, 0.0  ;;  %v10036_v61 = vsel %vm9911_vm4, %v9880_v50, -inf  ;;  %v6831_v19 = vadd.f32 %v22072_v33, %v5889_v29  ;;  %v22073_v42 = vld [vmem:[#allocation281_spill] sm:$0xff] }
 0x8a7   : > { %v10045_v6 = vsel %vm9911_vm4, %v9887_v16, -inf  ;;  %v9347_v52 = vpop.f32.mrf.mxu0  ;;  %v4021_v47 = vadd.f32 %v22073_v42, %v19070_v30  ;;  %v22074_v7 = vld [vmem:[#allocation555_spill] sm:$0xff]  ;;  %v4025_v48 = vadd.f32 %v22075_v25, %v19102_v37  ;;  %v22076_v56 = vld [vmem:[#allocation21_spill] sm:$0xff]  ;;  %v22078_v30 = vld [vmem:[#allocation22_spill] sm:$0xff] }
 0x8a8   : > { %v10046_v35 = vsel %vm9911_vm4, %v9891_v31, -inf  ;;  %v10037_v45 = vsel %vm9911_vm4, %v9884_v26, -inf  ;;  %v9402_v17 = vpop.f32.mrf.mxu2  ;;  %v9653_v4 = vadd.f32 %v9347_v52, %v8711_v43  ;;  %v6835_v54 = vadd.f32 %v22074_v7, %v5893_v58  ;;  %v22080_v50 = vld [vmem:[#allocation517_spill] sm:$0xff]  ;;  %v22081_v41 = vld [vmem:[#allocation582_spill] sm:$0xff]  ;;  %v22087_v52 = vld [vmem:[#allocation487_spill] sm:$0xff] }
 0x8a9   : > { %v10047_v1 = vmax.f32 %v10045_v6, %v10046_v35  ;;  %v9431_v12 = vpop.f32.mrf.mxu3  ;;  %v10038_v24 = vmax.f32 %v10036_v61, %v10037_v45  ;;  %v9660_v63 = vadd.f32 %v9402_v17, %v22067_v38  ;;  %v9376_v57 = vpop.f32.mrf.mxu1  ;;  %v7770_v14 = vadd.f32 %v22076_v56, %v6831_v19  ;;  %v22083_v17 = vld [vmem:[#allocation201_spill] sm:$0xff]  ;;  %v22088_v27 = vld [vmem:[#allocation264_spill] sm:$0xff] }
 0x8aa   : > { %v9664_v15 = vadd.f32 %v9431_v12, %v22068_v36  ;;  %v9657_v40 = vadd.f32 %v9376_v57, %v8715_v28  ;;  %v9769_v59 = vadd.f32 %v18882_v5, %v9653_v4  ;;  %v4960_v16 = vadd.f32 %v22077_v53, %v4021_v47  ;;  %v22086_v36 = vld [vmem:[#allocation397_spill] sm:$0xff] }
 0x8ab   : > { %v10175_v18 = vld [vmem:[#allocation2 + $0x130] ss:$2 sm:$0x3f]  ;;  %v10231_v13 = vld [vmem:[#allocation2 + $0x131] ss:$2 sm:$0x3f]  ;;  %v9776_v11 = vadd.f32 %v18882_v5, %v9660_v63  ;;  %v7774_v31 = vadd.f32 %v22078_v30, %v6835_v54  ;;  %v4964_v62 = vadd.f32 %v22079_v10, %v4025_v48  ;;  %v8712_v26 = vadd.f32 %v22080_v50, %v7770_v14 }
 0x8ac   : > { %v10267_v9 = vmax.f32 %v10175_v18, %v10231_v13  ;;  %10125 = vst.msk [vmem:[#allocation2 + $0x160] sm:$0xff] %vm9911_vm4, %v10047_v1  ;;  %v9780_v21 = vadd.f32 %v18882_v5, %v9664_v15  ;;  %v9773_v46 = vadd.f32 %v18882_v5, %v9657_v40  ;;  %v9881_v23 = vmax.f32 %v9769_v59, 0.0  ;;  %v22082_v1 = vld [vmem:[#allocation486_spill] sm:$0xff]  ;;  %v22085_v63 = vld [vmem:[#allocation56_spill] sm:$0xff]  ;;  %v22089_v18 = vld [vmem:[#allocation479_spill] sm:$0xff] }
 0x8ad   : > { %10122 = vst.msk [vmem:[#allocation2 + $0x148] sm:$0xff] %vm9911_vm4, %v10038_v24  ;;  %v9888_v22 = vmax.f32 %v9776_v11, 0.0  ;;  %v8716_v49 = vadd.f32 %v22081_v41, %v7774_v31  ;;  %v5902_v61 = vadd.f32 %v22082_v1, %v4960_v16  ;;  %v2610_v15 = vadd.f32 %v22086_v36, %v22085_v63  ;;  %v22092_v54 = vld [vmem:[#allocation35_spill] sm:$0xff]  ;;  %v22093_v48 = vld [vmem:[#allocation362_spill] sm:$0xff]  ;;  %v22094_v14 = vld [vmem:[#allocation36_spill] sm:$0xff] }
 0x8ae   : > { %10296 = vst.msk [vmem:[%s18521_s15 + $0x98] sm:$0x3f] %vm10277_vm6, %v10267_v9  ;;  %v9892_v0 = vmax.f32 %v9780_v21, 0.0  ;;  %v9885_v20 = vmax.f32 %v9773_v46, 0.0  ;;  %v10039_v6 = vsel %vm9911_vm4, %v9881_v23, -inf  ;;  %v5906_v57 = vadd.f32 %v22087_v52, %v4964_v62  ;;  %v22090_v9 = vld [vmem:[#allocation481_spill] sm:$0xff] }
 0x8af   : > { %v10048_v32 = vsel %vm9911_vm4, %v9888_v22, -inf  ;;  %v9350_v24 = vpop.f32.mrf.mxu0  ;;  %v4022_v58 = vadd.f32 %v22088_v27, %v19136_v8  ;;  %v6844_v13 = vadd.f32 %v22089_v18, %v5902_v61  ;;  %v22091_v8 = vld [vmem:[#allocation266_spill] sm:$0xff]  ;;  %v22095_v16 = vld [vmem:[#allocation364_spill] sm:$0xff]  ;;  %v22096_v31 = vld [vmem:[#allocation123_spill] sm:$0xff] }
 0x8b0   : > { %v10049_v37 = vsel %vm9911_vm4, %v9892_v0, -inf  ;;  %v10040_v35 = vsel %vm9911_vm4, %v9885_v20, -inf  ;;  %v9405_v3 = vpop.f32.mrf.mxu2  ;;  %v9654_v34 = vadd.f32 %v9350_v24, %v8712_v26  ;;  %v6848_v11 = vadd.f32 %v22090_v9, %v5906_v57  ;;  %v22097_v10 = vld [vmem:[#allocation206_spill] sm:$0xff]  ;;  %v22102_v36 = vld [vmem:[#allocation63_spill] sm:$0xff]  ;;  %v22107_v9 = vld [vmem:[#allocation297_spill] sm:$0xff] }
 0x8b1   : > { %v10050_v43 = vmax.f32 %v10048_v32, %v10049_v37  ;;  %v9434_v28 = vpop.f32.mrf.mxu3  ;;  %v10041_v45 = vmax.f32 %v10039_v6, %v10040_v35  ;;  %v9661_v12 = vadd.f32 %v9405_v3, %v22083_v17  ;;  %v9379_v38 = vpop.f32.mrf.mxu1  ;;  %v4026_v7 = vadd.f32 %v22091_v8, %v19166_v2  ;;  %v22100_v61 = vld [vmem:[#allocation214_spill] sm:$0xff]  ;;  %v22103_v52 = vld [vmem:[#allocation403_spill] sm:$0xff] }
 0x8b2   : > { %v9665_v29 = vadd.f32 %v9434_v28, %v22084_v55  ;;  %v9658_v39 = vadd.f32 %v9379_v38, %v8716_v49  ;;  %v9770_v42 = vadd.f32 %v18882_v5, %v9654_v34  ;;  %v7783_v59 = vadd.f32 %v22092_v54, %v6844_v13  ;;  %v22098_v49 = vld [vmem:[#allocation495_spill] sm:$0xff]  ;;  %v22099_v28 = vld [vmem:[#allocation213_spill] sm:$0xff]  ;;  %v22104_v34 = vld [vmem:[#allocation488_spill] sm:$0xff] }
 0x8b3   : > { %10126 = vst.msk [vmem:[#allocation2 + $0x168] sm:$0xff] %vm9911_vm4, %v10050_v43  ;;  %v9777_v33 = vadd.f32 %v18882_v5, %v9661_v12  ;;  %v4961_v56 = vadd.f32 %v22093_v48, %v4022_v58  ;;  %v7787_v22 = vadd.f32 %v22094_v14, %v6848_v11  ;;  %v4965_v30 = vadd.f32 %v22095_v16, %v4026_v7  ;;  %v22101_v55 = vld [vmem:[#allocation497_spill] sm:$0xff]  ;;  %v22105_v18 = vld [vmem:[#allocation235_spill] sm:$0xff]  ;;  %v22109_v7 = vld [vmem:[#allocation50_spill] sm:$0xff] }
 0x8b4   : > { %v10177_v4 = vld [vmem:[#allocation2 + $0x140] ss:$2 sm:$0xff]  ;;  %v10233_v40 = vld [vmem:[#allocation2 + $0x141] ss:$2 sm:$0xff]  ;;  %10123 = vst.msk [vmem:[#allocation2 + $0x150] sm:$0xff] %vm9911_vm4, %v10041_v45  ;;  %v9781_v19 = vadd.f32 %v18882_v5, %v9665_v29  ;;  %v9774_v47 = vadd.f32 %v18882_v5, %v9658_v39  ;;  %v9882_v0 = vmax.f32 %v9770_v42, 0.0  ;;  %v8725_v23 = vadd.f32 %v22096_v31, %v7783_v59 }
 0x8b5   : > { %v10268_v21 = vmax.f32 %v10177_v4, %v10233_v40  ;;  %v9889_v46 = vmax.f32 %v9777_v33, 0.0  ;;  %v8729_v62 = vadd.f32 %v22097_v10, %v7787_v22  ;;  %v5903_v43 = vadd.f32 %v22098_v49, %v4961_v56  ;;  %v22106_v4 = vld [vmem:[#allocation556_spill] sm:$0xff]  ;;  %v22110_v59 = vld [vmem:[#allocation30_spill] sm:$0xff]  ;;  %v22111_v48 = vld [vmem:[#allocation393_spill] sm:$0xff] }
 0x8b6   : > { %v9893_v25 = vmax.f32 %v9781_v19, 0.0  ;;  %v9886_v53 = vmax.f32 %v9774_v47, 0.0  ;;  %v10042_v26 = vsel %vm9921_vm5, %v9882_v0, -inf  ;;  %v5907_v29 = vadd.f32 %v22101_v55, %v4965_v30  ;;  %v22112_v14 = vld [vmem:[#allocation525_spill] sm:$0xff] }
 0x8b7   : > { %10297 = vst.msk [vmem:[%s18521_s15 + $0xa0] sm:$0xff] %vm9911_vm4, %v10268_v21  ;;  %v10051_v20 = vsel %vm9911_vm4, %v9889_v46, -inf  ;;  %v9457_v17 = vpop.f32.mrf.mxu0  ;;  %v2576_v57 = vadd.f32 %v22103_v52, %v22102_v36  ;;  %v6845_v39 = vadd.f32 %v22104_v34, %v5903_v43  ;;  %v4023_v13 = vadd.f32 %v22105_v18, %v19198_v44  ;;  %v22108_v21 = vld [vmem:[#allocation29_spill] sm:$0xff]  ;;  %v22117_v43 = vld [vmem:[#allocation64_spill] sm:$0xff]  ;;  %v22121_v36 = vld [vmem:[#allocation298_spill] sm:$0xff] }
 0x8b8   : > { %v10052_v2 = vsel %vm9911_vm4, %v9893_v25, -inf  ;;  %v10043_v32 = vsel %vm9921_vm5, %v9886_v53, -inf  ;;  %v9408_v37 = vpop.f32.mrf.mxu2  ;;  %v9667_v38 = vadd.f32 %v9457_v17, %v8725_v23  ;;  %v6849_v40 = vadd.f32 %v22106_v4, %v5907_v29  ;;  %v22113_v53 = vld [vmem:[#allocation144_spill] sm:$0xff]  ;;  %v22122_v34 = vld [vmem:[#allocation558_spill] sm:$0xff]  ;;  %v22124_v4 = vld [vmem:[#allocation45_spill] sm:$0xff] }
 0x8b9   : > { %v10053_v50 = vmax.f32 %v10051_v20, %v10052_v2  ;;  %v9437_v41 = vpop.f32.mrf.mxu3  ;;  %v10044_v3 = vmax.f32 %v10042_v26, %v10043_v32  ;;  %v9662_v1 = vadd.f32 %v9408_v37, %v22099_v28  ;;  %v9486_v12 = vpop.f32.mrf.mxu1  ;;  %v4027_v11 = vadd.f32 %v22107_v9, %v2610_v15  ;;  %v22114_v2 = vld [vmem:[#allocation499_spill] sm:$0xff]  ;;  %v22116_v32 = vld [vmem:[#allocation422_spill] sm:$0xff]  ;;  %v22125_v9 = vld [vmem:[#allocation52_spill] sm:$0xff] }
 0x8ba   : > { %v10181_v6 = vld [vmem:[#allocation2 + $0x160] ss:$2 sm:$0xff]  ;;  %v10237_v35 = vld [vmem:[#allocation2 + $0x161] ss:$2 sm:$0xff]  ;;  %v9666_v45 = vadd.f32 %v9437_v41, %v22100_v61  ;;  %v9671_v63 = vadd.f32 %v9486_v12, %v8729_v62  ;;  %v9783_v33 = vadd.f32 %v18882_v5, %v9667_v38  ;;  %v7784_v42 = vadd.f32 %v22108_v21, %v6845_v39  ;;  %v22120_v12 = vld [vmem:[#allocation557_spill] sm:$0xff] }
 0x8bb   : > { %v10270_v24 = vmax.f32 %v10181_v6, %v10237_v35  ;;  %10127 = vst.msk [vmem:[#allocation2 + $0x170] sm:$0xff] %vm9911_vm4, %v10053_v50  ;;  %v9778_v27 = vadd.f32 %v18882_v5, %v9662_v1  ;;  %v4962_v54 = vadd.f32 %v22109_v7, %v4023_v13  ;;  %v7788_v46 = vadd.f32 %v22110_v59, %v6849_v40  ;;  %v22115_v50 = vld [vmem:[#allocation207_spill] sm:$0xff]  ;;  %v22118_v6 = vld [vmem:[#allocation404_spill] sm:$0xff]  ;;  %v22123_v18 = vld [vmem:[#allocation278_spill] sm:$0xff] }
 0x8bc   : > { %10124 = vst.msk [vmem:[#allocation2 + $0x158] sm:$0xf] %vm9921_vm5, %v10044_v3  ;;  %v9782_v58 = vadd.f32 %v18882_v5, %v9666_v45  ;;  %v9787_v19 = vadd.f32 %v18882_v5, %v9671_v63  ;;  %v9895_v25 = vmax.f32 %v9783_v33, 0.0  ;;  %v4966_v56 = vadd.f32 %v22111_v48, %v4027_v11  ;;  %v22119_v3 = vld [vmem:[#allocation3_spill] sm:$0xff]  ;;  %v22126_v21 = vld [vmem:[#allocation46_spill] sm:$0xff] }
 0x8bd   : > { %10299 = vst.msk [vmem:[%s18521_s15 + $0xb0] sm:$0xff] %vm9911_vm4, %v10270_v24  ;;  %v9890_v47 = vmax.f32 %v9778_v27, 0.0  ;;  %v8726_v22 = vadd.f32 %v22112_v14, %v7784_v42  ;;  %v8730_v15 = vadd.f32 %v22113_v53, %v7788_v46  ;;  %v5904_v10 = vadd.f32 %v22114_v2, %v4962_v54  ;;  %v19295_v24 = vld [vmem:[%s19373_s2] ss:$0 sm:$0xff]  ;;  %v22128_v54 = vld [vmem:[#allocation274_spill] sm:$0xff] }
 0x8be   : > { %v9894_v8 = vmax.f32 %v9782_v58, 0.0  ;;  %v9899_v44 = vmax.f32 %v9787_v19, 0.0  ;;  %v10057_v30 = vsel %vm9911_vm4, %v9895_v25, -inf  ;;  %v2613_v35 = vadd.f32 %v22118_v6, %v22117_v43  ;;  %v22130_v53 = vld [vmem:[#allocation6_spill] sm:$0xff] }
 0x8bf   : > { %v10054_v0 = vsel %vm9921_vm5, %v9890_v47, -inf  ;;  %v9460_v41 = vpop.f32.mrf.mxu0  ;;  %v5908_v28 = vadd.f32 %v22119_v3, %v4966_v56  ;;  %v6846_v55 = vadd.f32 %v22120_v12, %v5904_v10  ;;  %v4024_v52 = vadd.f32 %v22121_v36, %v2576_v57 }
 0x8c0   : > { %v10055_v5 = vsel %vm9921_vm5, %v9894_v8, -inf  ;;  %v10058_v31 = vsel %vm9911_vm4, %v9899_v44, -inf  ;;  %v9515_v23 = vpop.f32.mrf.mxu2  ;;  %v9668_v45 = vadd.f32 %v9460_v41, %v8726_v22  ;;  %v4028_v13 = vadd.f32 %v22123_v18, %v2613_v35  ;;  %v22127_v8 = vld [vmem:[#allocation394_spill] sm:$0xff]  ;;  %v22129_v44 = vld [vmem:[#allocation157_spill] sm:$0xff]  ;;  %v22139_v18 = vld [vmem:[#allocation180_spill] sm:$0xff] }
 0x8c1   : > { %v10056_v16 = vmax.f32 %v10054_v0, %v10055_v5  ;;  %v9559_v20 = vpop.f32.mrf.mxu3  ;;  %v10059_v62 = vmax.f32 %v10057_v30, %v10058_v31  ;;  %v9675_v26 = vadd.f32 %v9515_v23, %v22115_v50  ;;  %v9489_v49 = vpop.f32.mrf.mxu1  ;;  %v6850_v39 = vadd.f32 %v22122_v34, %v5908_v28  ;;  %v22131_v30 = vld [vmem:[#allocation145_spill] sm:$0xff]  ;;  %v22132_v23 = vld [vmem:[#allocation271_spill] sm:$0xff]  ;;  %v22135_v28 = vld [vmem:[#allocation560_spill] sm:$0xff] }
 0x8c2   : > { %v9679_v37 = vadd.f32 %v9559_v20, %v22116_v32  ;;  %v9672_v17 = vadd.f32 %v9489_v49, %v8730_v15  ;;  %v9784_v27 = vadd.f32 %v19295_v24, %v9668_v45  ;;  %v7785_v40 = vadd.f32 %v22124_v4, %v6846_v55  ;;  %v22134_v49 = vld [vmem:[#allocation559_spill] sm:$0xff]  ;;  %v22138_v34 = vld [vmem:[#allocation176_spill] sm:$0xff] }
 0x8c3   : > { %v10179_v1 = vld [vmem:[#allocation2 + $0x150] ss:$2 sm:$0x3f]  ;;  %v10235_v61 = vld [vmem:[#allocation2 + $0x151] ss:$2 sm:$0x3f]  ;;  %v9791_v38 = vadd.f32 %v19295_v24, %v9675_v26  ;;  %v4963_v11 = vadd.f32 %v22125_v9, %v4024_v52  ;;  %v7789_v57 = vadd.f32 %v22126_v21, %v6850_v39  ;;  %v4967_v7 = vadd.f32 %v22127_v8, %v4028_v13 }
 0x8c4   : > { %v10269_v29 = vmax.f32 %v10179_v1, %v10235_v61  ;;  %10128 = vst.msk [vmem:[#allocation2 + $0x178] sm:$0xf] %vm9921_vm5, %v10056_v16  ;;  %v9795_v63 = vadd.f32 %v19295_v24, %v9679_v37  ;;  %v9788_v58 = vadd.f32 %v19295_v24, %v9672_v17  ;;  %v9896_v42 = vmax.f32 %v9784_v27, 0.0  ;;  %v22136_v17 = vld [vmem:[#allocation25_spill] sm:$0xff]  ;;  %v22140_v21 = vld [vmem:[#allocation299_spill] sm:$0xff] }
 0x8c5   : > { %10129 = vst.msk [vmem:[#allocation2 + $0x180] sm:$0xff] %vm9911_vm4, %v10059_v62  ;;  %v9903_v33 = vmax.f32 %v9791_v38, 0.0  ;;  %v8727_v59 = vadd.f32 %v22128_v54, %v7785_v40  ;;  %v8731_v48 = vadd.f32 %v22129_v44, %v7789_v57  ;;  %v5905_v15 = vadd.f32 %v22130_v53, %v4963_v11  ;;  %v22133_v62 = vld [vmem:[#allocation12_spill] sm:$0xff]  ;;  %v22137_v38 = vld [vmem:[#allocation26_spill] sm:$0xff] }
 0x8c6   : > { %10298 = vst.msk [vmem:[%s18521_s15 + $0xa8] sm:$0x3f] %vm10277_vm6, %v10269_v29  ;;  %v9907_v19 = vmax.f32 %v9795_v63, 0.0  ;;  %v9900_v47 = vmax.f32 %v9788_v58, 0.0  ;;  %v10060_v14 = vsel %vm9911_vm4, %v9896_v42, -inf  ;;  %v5909_v50 = vadd.f32 %v22133_v62, %v4967_v7  ;;  %v22141_v42 = vld [vmem:[#allocation302_spill] sm:$0xff] }
 0x8c7   : > { %v10069_v46 = vsel %vm9911_vm4, %v9903_v33, -inf  ;;  %v9463_v2 = vpop.f32.mrf.mxu0  ;;  %v6847_v43 = vadd.f32 %v22134_v49, %v5905_v15 }
 0x8c8   : > { %v10070_v25 = vsel %vm9911_vm4, %v9907_v19, -inf  ;;  %v10061_v22 = vsel %vm9911_vm4, %v9900_v47, -inf  ;;  %v9518_v0 = vpop.f32.mrf.mxu2  ;;  %v9669_v37 = vadd.f32 %v9463_v2, %v8727_v59  ;;  %v6851_v1 = vadd.f32 %v22135_v28, %v5909_v50 }
 0x8c9   : > { %v10071_v56 = vmax.f32 %v10069_v46, %v10070_v25  ;;  %v9562_v5 = vpop.f32.mrf.mxu3  ;;  %v10062_v16 = vmax.f32 %v10060_v14, %v10061_v22  ;;  %v9676_v31 = vadd.f32 %v9518_v0, %v22131_v30  ;;  %v9492_v10 = vpop.f32.mrf.mxu1  ;;  %v7786_v12 = vadd.f32 %v22136_v17, %v6847_v43 }
 0x8ca   : > { %v9680_v20 = vadd.f32 %v9562_v5, %v22132_v23  ;;  %v9673_v41 = vadd.f32 %v9492_v10, %v8731_v48  ;;  %v9785_v61 = vadd.f32 %v19295_v24, %v9669_v37  ;;  %v7790_v63 = vadd.f32 %v22137_v38, %v6851_v1 }
 0x8cb   : > { %v10183_v26 = vld [vmem:[#allocation2 + $0x170] ss:$2 sm:$0x3f]  ;;  %v10239_v32 = vld [vmem:[#allocation2 + $0x171] ss:$2 sm:$0x3f]  ;;  %v9792_v35 = vadd.f32 %v19295_v24, %v9676_v31  ;;  %v8728_v39 = vadd.f32 %v22138_v34, %v7786_v12 }
 0x8cc   : > { %v10271_v6 = vmax.f32 %v10183_v26, %v10239_v32  ;;  %10133 = vst.msk [vmem:[#allocation2 + $0x1a0] sm:$0xff] %vm9911_vm4, %v10071_v56  ;;  %v9796_v3 = vadd.f32 %v19295_v24, %v9680_v20  ;;  %v9789_v45 = vadd.f32 %v19295_v24, %v9673_v41  ;;  %v9897_v36 = vmax.f32 %v9785_v61, 0.0 }
 0x8cd   : > { %10130 = vst.msk [vmem:[#allocation2 + $0x188] sm:$0xff] %vm9911_vm4, %v10062_v16  ;;  %v9904_v55 = vmax.f32 %v9792_v35, 0.0  ;;  %v8732_v13 = vadd.f32 %v22139_v18, %v7790_v63 }
 0x8ce   : > { %10300 = vst.msk [vmem:[%s18521_s15 + $0xb8] sm:$0x3f] %vm10277_vm6, %v10271_v6  ;;  %v9908_v29 = vmax.f32 %v9796_v3, 0.0  ;;  %v9901_v52 = vmax.f32 %v9789_v45, 0.0  ;;  %v10063_v40 = vsel %vm9911_vm4, %v9897_v36, -inf }
 0x8cf   : > { %v10072_v27 = vsel %vm9911_vm4, %v9904_v55, -inf  ;;  %v9466_v8 = vpop.f32.mrf.mxu0 }
 0x8d0   : > { %v10073_v58 = vsel %vm9911_vm4, %v9908_v29, -inf  ;;  %v10064_v33 = vsel %vm9911_vm4, %v9901_v52, -inf  ;;  %v9521_v19 = vpop.f32.mrf.mxu2  ;;  %v9670_v54 = vadd.f32 %v9466_v8, %v8728_v39 }
 0x8d1   : > { %v10074_v4 = vmax.f32 %v10072_v27, %v10073_v58  ;;  %v9565_v9 = vpop.f32.mrf.mxu3  ;;  %v10065_v11 = vmax.f32 %v10063_v40, %v10064_v33  ;;  %v9677_v57 = vadd.f32 %v9521_v19, %v22140_v21  ;;  %v9495_v7 = vpop.f32.mrf.mxu1 }
 0x8d2   : > { %v9681_v47 = vadd.f32 %v9565_v9, %v22141_v42  ;;  %v9674_v59 = vadd.f32 %v9495_v7, %v8732_v13  ;;  %v9786_v14 = vadd.f32 %v19295_v24, %v9670_v54 }
 0x8d3   : > { %10134 = vst.msk [vmem:[#allocation2 + $0x1a8] sm:$0xff] %vm9911_vm4, %v10074_v4  ;;  %v9793_v44 = vadd.f32 %v19295_v24, %v9677_v57 }
 0x8d4   : > { %v10185_v46 = vld [vmem:[#allocation2 + $0x180] ss:$2 sm:$0xff]  ;;  %v10241_v25 = vld [vmem:[#allocation2 + $0x181] ss:$2 sm:$0xff]  ;;  %10131 = vst.msk [vmem:[#allocation2 + $0x190] sm:$0xff] %vm9911_vm4, %v10065_v11  ;;  %v9797_v48 = vadd.f32 %v19295_v24, %v9681_v47  ;;  %v9790_v22 = vadd.f32 %v19295_v24, %v9674_v59  ;;  %v9898_v53 = vmax.f32 %v9786_v14, 0.0 }
 0x8d5   : > { %v10272_v56 = vmax.f32 %v10185_v46, %v10241_v25  ;;  %v9905_v0 = vmax.f32 %v9793_v44, 0.0 }
 0x8d6   : > { %v9909_v5 = vmax.f32 %v9797_v48, 0.0  ;;  %v9902_v15 = vmax.f32 %v9790_v22, 0.0  ;;  %v10066_v23 = vsel %vm9921_vm5, %v9898_v53, -inf }
 0x8d7   : > { %10301 = vst.msk [vmem:[%s18521_s15 + $0xc0] sm:$0xff] %vm9911_vm4, %v10272_v56  ;;  %v10075_v16 = vsel %vm9911_vm4, %v9905_v0, -inf }
 0x8d8   : > { %v10076_v30 = vsel %vm9911_vm4, %v9909_v5, -inf  ;;  %v10067_v20 = vsel %vm9921_vm5, %v9902_v15, -inf  ;;  %v9524_v2 = vpop.f32.mrf.mxu2 }
 0x8d9   : > { %v10077_v31 = vmax.f32 %v10075_v16, %v10076_v30  ;;  %v9568_v10 = vpop.f32.mrf.mxu3  ;;  %v10068_v26 = vmax.f32 %v10066_v23, %v10067_v20  ;;  %v9678_v32 = vadd.f32 %v9524_v2, %v18357_v51 }
 0x8da   : > { %v10189_v62 = vld [vmem:[#allocation2 + $0x1a0] ss:$2 sm:$0xff]  ;;  %v10245_v50 = vld [vmem:[#allocation2 + $0x1a1] ss:$2 sm:$0xff]  ;;  %v9682_v37 = vadd.f32 %v9568_v10, %v18360_v60 }
 0x8db   : > { %v10274_v41 = vmax.f32 %v10189_v62, %v10245_v50  ;;  %10135 = vst.msk [vmem:[#allocation2 + $0x1b0] sm:$0xff] %vm9911_vm4, %v10077_v31  ;;  %v9794_v49 = vadd.f32 %v19295_v24, %v9678_v32 }
 0x8dc   : > { %10132 = vst.msk [vmem:[#allocation2 + $0x198] sm:$0xf] %vm9921_vm5, %v10068_v26  ;;  %v9798_v43 = vadd.f32 %v19295_v24, %v9682_v37 }
 0x8dd   : > { %10303 = vst.msk [vmem:[%s18521_s15 + $0xd0] sm:$0xff] %vm9911_vm4, %v10274_v41  ;;  %v9906_v6 = vmax.f32 %v9794_v49, 0.0 }
 0x8de   : > { %v9910_v35 = vmax.f32 %v9798_v43, 0.0 }
 0x8df   : > { %v10078_v3 = vsel %vm9921_vm5, %v9906_v6, -inf }
 0x8e0   : > { %v10079_v51 = vsel %vm9921_vm5, %v9910_v35, -inf }
 0x8e1   : > { %v10080_v60 = vmax.f32 %v10078_v3, %v10079_v51 }
 0x8e3   : > { %v10187_v28 = vld [vmem:[#allocation2 + $0x190] ss:$2 sm:$0x3f]  ;;  %v10243_v1 = vld [vmem:[#allocation2 + $0x191] ss:$2 sm:$0x3f] }
 0x8e4   : > { %v10273_v61 = vmax.f32 %v10187_v28, %v10243_v1  ;;  %10136 = vst.msk [vmem:[#allocation2 + $0x1b8] sm:$0xf] %vm9921_vm5, %v10080_v60 }
 0x8e6   : > { %10302 = vst.msk [vmem:[%s18521_s15 + $0xc8] sm:$0x3f] %vm10277_vm6, %v10273_v61 }
 0x8eb   : > { %v10191_v45 = vld [vmem:[#allocation2 + $0x1b0] ss:$2 sm:$0x3f]  ;;  %v10247_v17 = vld [vmem:[#allocation2 + $0x1b1] ss:$2 sm:$0x3f] }
 0x8ec   : > { %v10275_v12 = vmax.f32 %v10191_v45, %v10247_v17 }
 0x8ee   : > { %10304 = vst.msk [vmem:[%s18521_s15 + $0xd8] sm:$0x3f] %vm10277_vm6, %v10275_v12 }
 0x8ef PF: > { %s13_s12 = sadd.s32 1, %s11875_s12  }
 0x8f0   : > { %p10_p4 = scmp.ge.s32.totalorder %s13_s12, 4  }
 0x8f2   :  { %12 = sbr.rel (!%p10_p4) target bundleno = 1 (0x1), region = 117 }

</bundles_post_ra>
